<compile_context>
chip_gen: v6e
topology: v6e:2x2x1
jax: 0.10.0
libtpu: 0.0.40
codegen_flags: <defaults>
</compile_context>

<pallas_src>
import math

import jax
import jax.numpy as jnp
from jax.experimental import pallas as pl
from jax.experimental.pallas import tpu as pltpu

# ----------------------------- config -----------------------------
BATCH = 2
IN_CH = 3
IMG = 32                      # input image is IMG x IMG
PATCH = 8                     # patch size -> embedding grid EMB x EMB
EMB = IMG // PATCH            # 4
D = 32                        # transformer / embedding dim
HEADS = 2
DH = D // HEADS               # 16
MLP_H = 64
PE_FEATS = D // 2             # 16 gaussian positional features
NUM_MASK_TOKENS = 4           # num_multimask_outputs(3) + 1
NUM_TOKENS = 1 + NUM_MASK_TOKENS + 2   # iou token + mask tokens + 2 box corners = 7
C1 = D // 4                   # 8  upscaling intermediate channels
C2 = D // 8                   # 4  upscaled embedding channels
N_PATCH = EMB * EMB           # 16 image tokens
PATCH_K = IN_CH * PATCH * PATCH        # 192
HW_UP = 4 * EMB               # 16 low-res mask side


# ----------------------------- in-kernel helpers (operate on values) -----------------------------
def _gelu(x):
    # tanh-approx GELU (PyTorch nn.GELU uses exact erf; approx is fine for synthetic weights)
    return 0.5 * x * (1.0 + jnp.tanh(0.7978845608028654 * (x + 0.044715 * x * x * x)))


def _layernorm(x, w, b, eps):
    mu = jnp.mean(x, axis=-1, keepdims=True)
    xc = x - mu
    var = jnp.mean(xc * xc, axis=-1, keepdims=True)
    return xc * jax.lax.rsqrt(var + eps) * w + b


def _attention_block(xq, xk, xv, qkv_w, qkv_b, o_w, o_b):
    """Multi-head attention on 2-D (seq, D) values with a fused (D, 3D) QKV weight.

    The head concat + output projection is done as a sum of per-head projections
    (equivalent to concat(heads) @ o_w) to avoid in-kernel concatenation.
    """
    q = jnp.dot(xq, qkv_w[:, 0:D], preferred_element_type=jnp.float32) + qkv_b[:, 0:D]
    k = jnp.dot(xk, qkv_w[:, D:2 * D], preferred_element_type=jnp.float32) + qkv_b[:, D:2 * D]
    v = jnp.dot(xv, qkv_w[:, 2 * D:3 * D], preferred_element_type=jnp.float32) + qkv_b[:, 2 * D:3 * D]
    scale = 1.0 / math.sqrt(DH)
    out = None
    for h in range(HEADS):
        sl = slice(h * DH, (h + 1) * DH)
        qh, kh, vh = q[:, sl], k[:, sl], v[:, sl]
        s = jnp.dot(qh, kh.T, preferred_element_type=jnp.float32) * scale
        s = s - jnp.max(s, axis=-1, keepdims=True)
        p = jnp.exp(s)
        p = p * pl.reciprocal(jnp.sum(p, axis=-1, keepdims=True), approx=True)
        oh = jnp.dot(p, vh, preferred_element_type=jnp.float32)
        contrib = jnp.dot(oh, o_w[sl, :], preferred_element_type=jnp.float32)
        out = contrib if out is None else out + contrib
    return out + o_b


def _full(shape):
    """Full-array BlockSpec with a constant index map -> weight stays resident in VMEM."""
    return pl.BlockSpec(shape, lambda b: (0,) * len(shape))


# ----------------------------- kernel 1: fused image encoder -----------------------------
def _image_encoder_kernel(patch_ref, pw_ref, pb_ref, ln_w_ref, ln_b_ref,
                          qkv_w_ref, qkv_b_ref, ow_ref, ob_ref,
                          m1w_ref, m1b_ref, m2w_ref, m2b_ref, neck_w_ref,
                          feat_ref):
    # patch embed (non-overlapping conv == matmul over flattened patches)
    x = jnp.dot(patch_ref[0], pw_ref[...], preferred_element_type=jnp.float32) + pb_ref[...]
    # ViT block
    h = _layernorm(x, ln_w_ref[0], ln_b_ref[0], 1e-5)
    h = _attention_block(h, h, h, qkv_w_ref[...], qkv_b_ref[...], ow_ref[...], ob_ref[...])
    x = x + h
    h = _layernorm(x, ln_w_ref[1], ln_b_ref[1], 1e-5)
    h = _gelu(jnp.dot(h, m1w_ref[...], preferred_element_type=jnp.float32) + m1b_ref[...])
    h = jnp.dot(h, m2w_ref[...], preferred_element_type=jnp.float32) + m2b_ref[...]
    x = x + h
    # neck: 1x1 conv (no bias) + LayerNorm2d (channels-last sequence form)
    y = jnp.dot(x, neck_w_ref[...], preferred_element_type=jnp.float32)
    feat_ref[0] = _layernorm(y, ln_w_ref[2], ln_b_ref[2], 1e-6)


def image_encoder_call(p, patches):
    B = patches.shape[0]
    return pl.pallas_call(
        _image_encoder_kernel,
        out_shape=jax.ShapeDtypeStruct((B, N_PATCH, D), jnp.float32),
        grid=(B,),
        in_specs=[
            pl.BlockSpec((1, N_PATCH, PATCH_K), lambda b: (b, 0, 0)),
            _full((PATCH_K, D)), _full((1, D)),
            _full((3, 1, D)), _full((3, 1, D)),
            _full((D, 3 * D)), _full((1, 3 * D)),
            _full((D, D)), _full((1, D)),
            _full((D, MLP_H)), _full((1, MLP_H)),
            _full((MLP_H, D)), _full((1, D)),
            _full((D, D)),
        ],
        out_specs=pl.BlockSpec((1, N_PATCH, D), lambda b: (b, 0, 0)),
        compiler_params=pltpu.CompilerParams(dimension_semantics=("parallel",)),
    )(patches, p["patch_w"], p["patch_b"], p["ln_w"], p["ln_b"],
      p["qkv_w"], p["qkv_b"], p["o_w"], p["o_b"],
      p["mlp1_w"], p["mlp1_b"], p["mlp2_w"], p["mlp2_b"], p["neck_w"])


# ----------------------------- kernel 2: fused two-way transformer -----------------------------
def _two_way_transformer_kernel(feat_ref, tok_ref, pos_ref, nomask_ref,
                                aqkvw_ref, aqkvb_ref, aow_ref, aob_ref,
                                lnw_ref, lnb_ref,
                                m1w_ref, m1b_ref, m2w_ref, m2b_ref,
                                q_out_ref, k_out_ref):
    tokens = tok_ref[0]                                   # (7, D)  prompt / output tokens (= query PE)
    pos = pos_ref[...]                                    # (16, D) dense image positional encoding
    src = feat_ref[0] + nomask_ref[...]                   # image embedding + "no mask" dense embedding

    def attn(i, xq, xk, xv):
        return _attention_block(xq, xk, xv, aqkvw_ref[i], aqkvb_ref[i], aow_ref[i], aob_ref[i])

    def ln(i, x):
        return _layernorm(x, lnw_ref[i], lnb_ref[i], 1e-5)

    queries, keys = tokens, src

    # depth-1 TwoWayAttentionBlock, skip_first_layer_pe=True
    queries = ln(0, attn(0, queries, queries, queries))               # self attention on tokens

    q = queries + tokens
    k = keys + pos
    queries = ln(1, queries + attn(1, q, k, keys))                    # token -> image cross attention

    m = jnp.maximum(
        jnp.dot(queries, m1w_ref[...], preferred_element_type=jnp.float32) + m1b_ref[...], 0.0)
    m = jnp.dot(m, m2w_ref[...], preferred_element_type=jnp.float32) + m2b_ref[...]
    queries = ln(2, queries + m)                                      # MLP

    q = queries + tokens
    k = keys + pos
    keys = ln(3, keys + attn(2, k, q, queries))                       # image -> token cross attention

    # final token -> image attention
    q = queries + tokens
    k = keys + pos
    queries = ln(4, queries + attn(3, q, k, keys))

    q_out_ref[0] = queries
    k_out_ref[0] = keys


def two_way_transformer_call(pe_p, md_p, features, tokens, pos):
    B = features.shape[0]
    tr = md_p["transformer"]
    return pl.pallas_call(
        _two_way_transformer_kernel,
        out_shape=(jax.ShapeDtypeStruct((B, NUM_TOKENS, D), jnp.float32),
                   jax.ShapeDtypeStruct((B, N_PATCH, D), jnp.float32)),
        grid=(B,),
        in_specs=[
            pl.BlockSpec((1, N_PATCH, D), lambda b: (b, 0, 0)),
            pl.BlockSpec((1, NUM_TOKENS, D), lambda b: (b, 0, 0)),
            _full((N_PATCH, D)),
            _full((1, D)),
            _full((4, D, 3 * D)), _full((4, 1, 3 * D)),
            _full((4, D, D)), _full((4, 1, D)),
            _full((5, 1, D)), _full((5, 1, D)),
            _full((D, MLP_H)), _full((1, MLP_H)),
            _full((MLP_H, D)), _full((1, D)),
        ],
        out_specs=[pl.BlockSpec((1, NUM_TOKENS, D), lambda b: (b, 0, 0)),
                   pl.BlockSpec((1, N_PATCH, D), lambda b: (b, 0, 0))],
        compiler_params=pltpu.CompilerParams(dimension_semantics=("parallel",)),
    )(features, tokens, pos, pe_p["no_mask_embed"],
      tr["attn_qkv_w"], tr["attn_qkv_b"], tr["attn_o_w"], tr["attn_o_b"],
      tr["ln_w"], tr["ln_b"],
      tr["mlp1_w"], tr["mlp1_b"], tr["mlp2_w"], tr["mlp2_b"])


# ----------------------------- kernel 3: fused upscale + hypernet + mask + IoU head -----------------------------
def _mask_head_kernel(q_ref, k_ref,
                      up1w_ref, up1b_ref, uplnw_ref, uplnb_ref, up2w_ref, up2b_ref,
                      hw1_ref, hb1_ref, hw2_ref, hb2_ref, hw3_ref, hb3_ref,
                      iw1_ref, ib1_ref, iw2_ref, ib2_ref, iw3_ref, ib3_ref,
                      masks_ref, iou_ref):
    queries = q_ref[0]                                     # (7, D)   token outputs of the transformer
    keys = k_ref[0]                                        # (16, D)  image outputs of the transformer

    # hypernetwork MLPs (one per mask token), batched inside a single kernel
    hyp = []
    for t in range(NUM_MASK_TOKENS):
        xt = queries[1 + t:2 + t, :]                                                   # (1, D)
        h = jnp.maximum(
            jnp.dot(xt, hw1_ref[t], preferred_element_type=jnp.float32) + hb1_ref[t], 0.0)
        h = jnp.maximum(
            jnp.dot(h, hw2_ref[t], preferred_element_type=jnp.float32) + hb2_ref[t], 0.0)
        hyp.append(jnp.dot(h, hw3_ref[t], preferred_element_type=jnp.float32) + hb3_ref[t])  # (1, C2)

    # ConvTranspose2d(k=2, s=2) #1 as a single matmul with quadrant-major columns:
    #   y1[token, q1*C1 + c1] = upscaled value at sub-pixel quadrant q1 = 2*di + dj
    y1 = jnp.dot(keys, up1w_ref[...], preferred_element_type=jnp.float32) + up1b_ref[...]    # (16, 4*C1)
    up2w = up2w_ref[...]
    up2b = up2b_ref[...]
    upln_w = uplnw_ref[...]
    upln_b = uplnb_ref[...]

    for q1 in range(4):                                    # first-conv quadrant (di, dj)
        # LayerNorm2d (over C1 channels per spatial position) + GELU
        zq = _gelu(_layernorm(y1[:, q1 * C1:(q1 + 1) * C1], upln_w, upln_b, 1e-6))           # (16, C1)
        # ConvTranspose2d #2, channel-major columns: col = c2*4 + q2 (q2 = 2*dr + ds), + GELU
        uq = _gelu(jnp.dot(zq, up2w, preferred_element_type=jnp.float32) + up2b)             # (16, 4*C2)
        # masks = hyper_in @ upscaled_embedding : K=C2=4 -> VPU FMA chain on the resident tile
        for t in range(NUM_MASK_TOKENS):
            acc = uq[:, 0:4] * hyp[t][:, 0:1]
            for c in range(1, C2):
                acc = acc + uq[:, c * 4:(c + 1) * 4] * hyp[t][:, c:c + 1]
            # output row = t*64 + q1*16 + token, col = q2; un-factored to (m, 16, 16) on the host
            masks_ref[0, t * 4 * N_PATCH + q1 * N_PATCH:
                         t * 4 * N_PATCH + (q1 + 1) * N_PATCH, :] = acc

    # IoU prediction head (kept for parity with mask_decoder; discarded by SAM_with_bbox.forward)
    x = queries[0:1, :]
    x = jnp.maximum(jnp.dot(x, iw1_ref[...], preferred_element_type=jnp.float32) + ib1_ref[...], 0.0)
    x = jnp.maximum(jnp.dot(x, iw2_ref[...], preferred_element_type=jnp.float32) + ib2_ref[...], 0.0)
    iou_ref[0] = jnp.dot(x, iw3_ref[...], preferred_element_type=jnp.float32) + ib3_ref[...]


def mask_head_call(md_p, queries, keys):
    B = queries.shape[0]
    return pl.pallas_call(
        _mask_head_kernel,
        out_shape=(jax.ShapeDtypeStruct((B, NUM_MASK_TOKENS * 4 * N_PATCH, 4), jnp.float32),
                   jax.ShapeDtypeStruct((B, 1, NUM_MASK_TOKENS), jnp.float32)),
        grid=(B,),
        in_specs=[
            pl.BlockSpec((1, NUM_TOKENS, D), lambda b: (b, 0, 0)),
            pl.BlockSpec((1, N_PATCH, D), lambda b: (b, 0, 0)),
            _full((D, 4 * C1)), _full((1, 4 * C1)),
            _full((1, C1)), _full((1, C1)),
            _full((C1, 4 * C2)), _full((1, 4 * C2)),
            _full((NUM_MASK_TOKENS, D, D)), _full((NUM_MASK_TOKENS, 1, D)),
            _full((NUM_MASK_TOKENS, D, D)), _full((NUM_MASK_TOKENS, 1, D)),
            _full((NUM_MASK_TOKENS, D, C2)), _full((NUM_MASK_TOKENS, 1, C2)),
            _full((D, MLP_H)), _full((1, MLP_H)),
            _full((MLP_H, MLP_H)), _full((1, MLP_H)),
            _full((MLP_H, NUM_MASK_TOKENS)), _full((1, NUM_MASK_TOKENS)),
        ],
        out_specs=[pl.BlockSpec((1, NUM_MASK_TOKENS * 4 * N_PATCH, 4), lambda b: (b, 0, 0)),
                   pl.BlockSpec((1, 1, NUM_MASK_TOKENS), lambda b: (b, 0, 0))],
        compiler_params=pltpu.CompilerParams(dimension_semantics=("parallel",)),
    )(queries, keys,
      md_p["up1_w"], md_p["up1_b"], md_p["up_ln_w"], md_p["up_ln_b"],
      md_p["up2_w"], md_p["up2_b"],
      md_p["hyp_w1"], md_p["hyp_b1"], md_p["hyp_w2"], md_p["hyp_b2"],
      md_p["hyp_w3"], md_p["hyp_b3"],
      md_p["iou_w1"], md_p["iou_b1"], md_p["iou_w2"], md_p["iou_b2"],
      md_p["iou_w3"], md_p["iou_b3"])


# ----------------------------- prompt encoder (tiny, off the image critical path) -----------------------------
def prompt_encoder_host(pe_p, md_p, bbox):
    """Random-fourier positional encodings for box corners + dense grid.

    This is a handful of 2x16-sized ops independent of the image-encoder output, so it is left
    to XLA (it overlaps with kernel 1 and adds nothing to the critical path / launch count).
    """
    B = bbox.shape[0]
    gauss = pe_p["pe_gauss"]                                           # (2, PE_FEATS)

    def pe_encode(c01):                                                # (M, 2) in [0, 1] -> (M, D)
        proj = (2.0 * c01 - 1.0) @ gauss * (2.0 * math.pi)
        return jnp.concatenate([jnp.sin(proj), jnp.cos(proj)], axis=-1)

    corners = (bbox.reshape(B, 2, 2) + 0.5) / float(IMG)
    sparse = pe_encode(corners.reshape(B * 2, 2)).reshape(B, 2, D) + pe_p["point_emb"][2:4][None]
    out_tok = jnp.broadcast_to(md_p["output_tokens"][None], (B, 1 + NUM_MASK_TOKENS, D))
    tokens = jnp.concatenate([out_tok, sparse], axis=1)                # (B, 7, D)

    g = (jnp.arange(EMB, dtype=jnp.float32) + 0.5) / EMB
    yy, xx = jnp.meshgrid(g, g, indexing="ij")
    grid = jnp.stack([xx, yy], axis=-1).reshape(N_PATCH, 2)
    pos = pe_encode(grid)                                              # (16, D) dense image PE
    return tokens, pos


# ----------------------------- SAM_with_bbox forward -----------------------------
def sam_with_bbox_forward(params, image, bbox):
    B = image.shape[0]

    # layout plumbing: NCHW image -> (B, tokens, C*P*P) patch rows for the patch-embed matmul
    patches = image.reshape(B, IN_CH, EMB, PATCH, EMB, PATCH)
    patches = patches.transpose(0, 2, 4, 1, 3, 5).reshape(B, N_PATCH, PATCH_K)

    features = image_encoder_call(params["image_encoder"], patches)             # (B, 16, D)

    tokens, pos = prompt_encoder_host(params["prompt_encoder"], params["mask_decoder"], bbox)

    queries, keys = two_way_transformer_call(
        params["prompt_encoder"], params["mask_decoder"], features, tokens, pos)

    masks_k, _iou_pred = mask_head_call(params["mask_decoder"], queries, keys)  # (B, 256, 4)

    # un-factor the transposed-conv layout:
    #   masks_k[b, m*64 + (2di+dj)*16 + i*4 + j, 2dr+ds] -> masks[b, m, 4i+2di+dr, 4j+2dj+ds]
    masks = masks_k.reshape(B, NUM_MASK_TOKENS, 2, 2, EMB, EMB, 2, 2)
    masks = masks.transpose(0, 1, 4, 2, 6, 5, 3, 7).reshape(B, NUM_MASK_TOKENS, HW_UP, HW_UP)
    return masks[:, 0:1]                                                        # multimask_output=False


# ----------------------------- parameter init -----------------------------
def init_params(key):
    ks = iter(jax.random.split(key, 64))

    def nrm(shape, scale=0.02):
        return scale * jax.random.normal(next(ks), shape, dtype=jnp.float32)

    ones = lambda *s: jnp.ones(s, jnp.float32)
    zeros = lambda *s: jnp.zeros(s, jnp.float32)

    image_enc = {
        "patch_w": nrm((PATCH_K, D)), "patch_b": zeros(1, D),
        "ln_w": ones(3, 1, D), "ln_b": zeros(3, 1, D),              # [ln1, ln2, neck_ln]
        "qkv_w": nrm((D, 3 * D)), "qkv_b": zeros(1, 3 * D),         # fused Q|K|V projection
        "o_w": nrm((D, D)), "o_b": zeros(1, D),
        "mlp1_w": nrm((D, MLP_H)), "mlp1_b": zeros(1, MLP_H),
        "mlp2_w": nrm((MLP_H, D)), "mlp2_b": zeros(1, D),
        "neck_w": nrm((D, D)),
    }

    prompt_enc = {
        "pe_gauss": jax.random.normal(next(ks), (2, PE_FEATS), jnp.float32),
        "point_emb": nrm((4, D)),
        "no_mask_embed": nrm((1, D)),
    }

    transformer = {
        # stacked attention modules: [self_attn, cross_token2image, cross_image2token, final_attn]
        "attn_qkv_w": nrm((4, D, 3 * D)), "attn_qkv_b": zeros(4, 1, 3 * D),
        "attn_o_w": nrm((4, D, D)), "attn_o_b": zeros(4, 1, D),
        "ln_w": ones(5, 1, D), "ln_b": zeros(5, 1, D),              # [norm1..norm4, norm_final]
        "mlp1_w": nrm((D, MLP_H)), "mlp1_b": zeros(1, MLP_H),
        "mlp2_w": nrm((MLP_H, D)), "mlp2_b": zeros(1, D),
    }

    iou_token = nrm((1, D))
    mask_tokens = nrm((NUM_MASK_TOKENS, D))
    # ConvTranspose2d(k=2, s=2) weights in PyTorch layout, repacked to matmul layouts.
    up1_pt = nrm((D, C1, 2, 2))                                      # (Cin, Cout, kh, kw)
    up1_b = zeros(C1)
    up2_pt = nrm((C1, C2, 2, 2))
    up2_b = zeros(C2)

    mask_dec = {
        "output_tokens": jnp.concatenate([iou_token, mask_tokens], axis=0),       # (5, D)
        "transformer": transformer,
        # quadrant-major columns: col = (2*di+dj)*C1 + c1
        "up1_w": up1_pt.transpose(0, 2, 3, 1).reshape(D, 4 * C1),
        "up1_b": jnp.tile(up1_b, 4).reshape(1, 4 * C1),
        "up_ln_w": ones(1, C1), "up_ln_b": zeros(1, C1),
        # channel-major columns: col = c2*4 + (2*dr+ds)
        "up2_w": up2_pt.reshape(C1, 4 * C2),
        "up2_b": jnp.repeat(up2_b, 4).reshape(1, 4 * C2),
        # stacked per-mask-token hypernetwork MLPs
        "hyp_w1": nrm((NUM_MASK_TOKENS, D, D)), "hyp_b1": zeros(NUM_MASK_TOKENS, 1, D),
        "hyp_w2": nrm((NUM_MASK_TOKENS, D, D)), "hyp_b2": zeros(NUM_MASK_TOKENS, 1, D),
        "hyp_w3": nrm((NUM_MASK_TOKENS, D, C2)), "hyp_b3": zeros(NUM_MASK_TOKENS, 1, C2),
        "iou_w1": nrm((D, MLP_H)), "iou_b1": zeros(1, MLP_H),
        "iou_w2": nrm((MLP_H, MLP_H)), "iou_b2": zeros(1, MLP_H),
        "iou_w3": nrm((MLP_H, NUM_MASK_TOKENS)), "iou_b3": zeros(1, NUM_MASK_TOKENS),
    }

    return {"image_encoder": image_enc, "prompt_encoder": prompt_enc, "mask_decoder": mask_dec}


# ----------------------------- main -----------------------------
if __name__ == "__main__":
    key = jax.random.PRNGKey(0)
    kp, ki = jax.random.split(key, 2)
    params = init_params(kp)

    image = jax.random.normal(ki, (BATCH, IN_CH, IMG, IMG), jnp.float32)   # NCHW like PyTorch
    bbox = jnp.array([[2.0, 3.0, 20.0, 25.0],
                      [5.0, 6.0, 30.0, 28.0]], jnp.float32)                # (B, 4) x1,y1,x2,y2

    fwd = jax.jit(sam_with_bbox_forward)
    low_res_masks = jax.block_until_ready(fwd(params, image, bbox))

    assert low_res_masks.shape == (BATCH, 1, HW_UP, HW_UP), low_res_masks.shape
    assert low_res_masks.dtype == jnp.float32
    assert bool(jnp.all(jnp.isfinite(low_res_masks)))
    print("KERNEL_OK")
</pallas_src>

<mosaic_0001>
module attributes {stable_mosaic.version = 11 : i64} {
  func.func @_image_encoder_kernel(%arg0: i32, %arg1: memref<1x16x192xf32, #tpu.memory_space<vmem>>, %arg2: memref<192x32xf32, #tpu.memory_space<vmem>>, %arg3: memref<1x32xf32, #tpu.memory_space<vmem>>, %arg4: memref<3x1x32xf32, #tpu.memory_space<vmem>>, %arg5: memref<3x1x32xf32, #tpu.memory_space<vmem>>, %arg6: memref<32x96xf32, #tpu.memory_space<vmem>>, %arg7: memref<1x96xf32, #tpu.memory_space<vmem>>, %arg8: memref<32x32xf32, #tpu.memory_space<vmem>>, %arg9: memref<1x32xf32, #tpu.memory_space<vmem>>, %arg10: memref<32x64xf32, #tpu.memory_space<vmem>>, %arg11: memref<1x64xf32, #tpu.memory_space<vmem>>, %arg12: memref<64x32xf32, #tpu.memory_space<vmem>>, %arg13: memref<1x32xf32, #tpu.memory_space<vmem>>, %arg14: memref<32x32xf32, #tpu.memory_space<vmem>>, %arg15: memref<1x16x32xf32, #tpu.memory_space<vmem>>) attributes {dimension_semantics = [#tpu.dimension_semantics<parallel>], iteration_bounds = array<i64: 2>, scalar_prefetch = 0 : i64, scratch_operands = 0 : i64, tpu.core_type = #tpu.core_type<tc>, window_params = [{transform_indices = @transform_0, window_bounds = array<i64: 1, 16, 192>}, {pipeline_mode = #tpu.pipeline_mode<synchronous>, transform_indices = @transform_1, window_bounds = array<i64: 192, 32>}, {pipeline_mode = #tpu.pipeline_mode<synchronous>, transform_indices = @transform_2, window_bounds = array<i64: 1, 32>}, {pipeline_mode = #tpu.pipeline_mode<synchronous>, transform_indices = @transform_3, window_bounds = array<i64: 3, 1, 32>}, {pipeline_mode = #tpu.pipeline_mode<synchronous>, transform_indices = @transform_4, window_bounds = array<i64: 3, 1, 32>}, {pipeline_mode = #tpu.pipeline_mode<synchronous>, transform_indices = @transform_5, window_bounds = array<i64: 32, 96>}, {pipeline_mode = #tpu.pipeline_mode<synchronous>, transform_indices = @transform_6, window_bounds = array<i64: 1, 96>}, {pipeline_mode = #tpu.pipeline_mode<synchronous>, transform_indices = @transform_7, window_bounds = array<i64: 32, 32>}, {pipeline_mode = #tpu.pipeline_mode<synchronous>, transform_indices = @transform_8, window_bounds = array<i64: 1, 32>}, {pipeline_mode = #tpu.pipeline_mode<synchronous>, transform_indices = @transform_9, window_bounds = array<i64: 32, 64>}, {pipeline_mode = #tpu.pipeline_mode<synchronous>, transform_indices = @transform_10, window_bounds = array<i64: 1, 64>}, {pipeline_mode = #tpu.pipeline_mode<synchronous>, transform_indices = @transform_11, window_bounds = array<i64: 64, 32>}, {pipeline_mode = #tpu.pipeline_mode<synchronous>, transform_indices = @transform_12, window_bounds = array<i64: 1, 32>}, {pipeline_mode = #tpu.pipeline_mode<synchronous>, transform_indices = @transform_13, window_bounds = array<i64: 32, 32>}, {transform_indices = @transform_14, window_bounds = array<i64: 1, 16, 32>}]} {
    %c0 = arith.constant 0 : index
    %c0_0 = arith.constant 0 : index
    %c0_1 = arith.constant 0 : index
    %0 = vector.load %arg1[%c0, %c0_0, %c0_1] : memref<1x16x192xf32, #tpu.memory_space<vmem>>, vector<1x16x192xf32>
    %1 = vector.shape_cast %0 : vector<1x16x192xf32> to vector<16x192xf32>
    %c0_2 = arith.constant 0 : index
    %c0_3 = arith.constant 0 : index
    %2 = vector.load %arg2[%c0_2, %c0_3] : memref<192x32xf32, #tpu.memory_space<vmem>>, vector<192x32xf32>
    %cst = arith.constant dense<0.000000e+00> : vector<16x32xf32>
    %3 = tpu.matmul %1, %2, %cst {dimension_numbers = #tpu.dot_dimension_numbers<[1], [0], [0], [1], [0, 0, 1, 1], [], []>} : vector<16x192xf32>, vector<192x32xf32>, vector<16x32xf32> -> vector<16x32xf32>
    %c0_4 = arith.constant 0 : index
    %c0_5 = arith.constant 0 : index
    %4 = vector.load %arg3[%c0_4, %c0_5] : memref<1x32xf32, #tpu.memory_space<vmem>>, vector<1x32xf32>
    %5 = vector.broadcast %4 : vector<1x32xf32> to vector<16x32xf32>
    %6 = arith.addf %3, %5 : vector<16x32xf32>
    %c0_6 = arith.constant 0 : index
    %c0_7 = arith.constant 0 : index
    %c0_8 = arith.constant 0 : index
    %7 = vector.load %arg4[%c0_6, %c0_7, %c0_8] : memref<3x1x32xf32, #tpu.memory_space<vmem>>, vector<1x1x32xf32>
    %8 = vector.shape_cast %7 : vector<1x1x32xf32> to vector<1x32xf32>
    %c0_9 = arith.constant 0 : index
    %c0_10 = arith.constant 0 : index
    %c0_11 = arith.constant 0 : index
    %9 = vector.load %arg5[%c0_9, %c0_10, %c0_11] : memref<3x1x32xf32, #tpu.memory_space<vmem>>, vector<1x1x32xf32>
    %10 = vector.shape_cast %9 : vector<1x1x32xf32> to vector<1x32xf32>
    %cst_12 = arith.constant dense<0.000000e+00> : vector<16xf32>
    %11 = vector.multi_reduction <add>, %6, %cst_12 [1] : vector<16x32xf32> to vector<16xf32>
    %12 = vector.shape_cast %11 : vector<16xf32> to vector<16x1xf32>
    %cst_13 = arith.constant 3.200000e+01 : f32
    %13 = vector.broadcast %cst_13 : f32 to vector<16x1xf32>
    %14 = arith.divf %12, %13 : vector<16x1xf32>
    %15 = vector.broadcast %14 : vector<16x1xf32> to vector<16x32xf32>
    %16 = arith.subf %6, %15 : vector<16x32xf32>
    %17 = arith.mulf %16, %16 : vector<16x32xf32>
    %cst_14 = arith.constant dense<0.000000e+00> : vector<16xf32>
    %18 = vector.multi_reduction <add>, %17, %cst_14 [1] : vector<16x32xf32> to vector<16xf32>
    %19 = vector.shape_cast %18 : vector<16xf32> to vector<16x1xf32>
    %cst_15 = arith.constant 3.200000e+01 : f32
    %20 = vector.broadcast %cst_15 : f32 to vector<16x1xf32>
    %21 = arith.divf %19, %20 : vector<16x1xf32>
    %cst_16 = arith.constant 9.99999974E-6 : f32
    %22 = vector.broadcast %cst_16 : f32 to vector<16x1xf32>
    %23 = arith.addf %21, %22 : vector<16x1xf32>
    %24 = math.rsqrt %23 : vector<16x1xf32>
    %25 = vector.broadcast %24 : vector<16x1xf32> to vector<16x32xf32>
    %26 = arith.mulf %16, %25 : vector<16x32xf32>
    %27 = vector.broadcast %8 : vector<1x32xf32> to vector<16x32xf32>
    %28 = arith.mulf %26, %27 : vector<16x32xf32>
    %29 = vector.broadcast %10 : vector<1x32xf32> to vector<16x32xf32>
    %30 = arith.addf %28, %29 : vector<16x32xf32>
    %c0_17 = arith.constant 0 : index
    %c0_18 = arith.constant 0 : index
    %31 = vector.load %arg6[%c0_17, %c0_18] : memref<32x96xf32, #tpu.memory_space<vmem>>, vector<32x96xf32>
    %c0_19 = arith.constant 0 : index
    %c0_20 = arith.constant 0 : index
    %32 = vector.load %arg7[%c0_19, %c0_20] : memref<1x96xf32, #tpu.memory_space<vmem>>, vector<1x96xf32>
    %c0_21 = arith.constant 0 : index
    %c0_22 = arith.constant 0 : index
    %33 = vector.load %arg8[%c0_21, %c0_22] : memref<32x32xf32, #tpu.memory_space<vmem>>, vector<32x32xf32>
    %c0_23 = arith.constant 0 : index
    %c0_24 = arith.constant 0 : index
    %34 = vector.load %arg9[%c0_23, %c0_24] : memref<1x32xf32, #tpu.memory_space<vmem>>, vector<1x32xf32>
    %35 = vector.extract_strided_slice %31 {offsets = [0, 0], sizes = [32, 32], strides = [1, 1]} : vector<32x96xf32> to vector<32x32xf32>
    %cst_25 = arith.constant dense<0.000000e+00> : vector<16x32xf32>
    %36 = tpu.matmul %30, %35, %cst_25 {dimension_numbers = #tpu.dot_dimension_numbers<[1], [0], [0], [1], [0, 0, 1, 1], [], []>} : vector<16x32xf32>, vector<32x32xf32>, vector<16x32xf32> -> vector<16x32xf32>
    %37 = vector.extract_strided_slice %32 {offsets = [0, 0], sizes = [1, 32], strides = [1, 1]} : vector<1x96xf32> to vector<1x32xf32>
    %38 = vector.broadcast %37 : vector<1x32xf32> to vector<16x32xf32>
    %39 = arith.addf %36, %38 : vector<16x32xf32>
    %40 = vector.extract_strided_slice %31 {offsets = [0, 32], sizes = [32, 32], strides = [1, 1]} : vector<32x96xf32> to vector<32x32xf32>
    %cst_26 = arith.constant dense<0.000000e+00> : vector<16x32xf32>
    %41 = tpu.matmul %30, %40, %cst_26 {dimension_numbers = #tpu.dot_dimension_numbers<[1], [0], [0], [1], [0, 0, 1, 1], [], []>} : vector<16x32xf32>, vector<32x32xf32>, vector<16x32xf32> -> vector<16x32xf32>
    %42 = vector.extract_strided_slice %32 {offsets = [0, 32], sizes = [1, 32], strides = [1, 1]} : vector<1x96xf32> to vector<1x32xf32>
    %43 = vector.broadcast %42 : vector<1x32xf32> to vector<16x32xf32>
    %44 = arith.addf %41, %43 : vector<16x32xf32>
    %45 = vector.extract_strided_slice %31 {offsets = [0, 64], sizes = [32, 32], strides = [1, 1]} : vector<32x96xf32> to vector<32x32xf32>
    %cst_27 = arith.constant dense<0.000000e+00> : vector<16x32xf32>
    %46 = tpu.matmul %30, %45, %cst_27 {dimension_numbers = #tpu.dot_dimension_numbers<[1], [0], [0], [1], [0, 0, 1, 1], [], []>} : vector<16x32xf32>, vector<32x32xf32>, vector<16x32xf32> -> vector<16x32xf32>
    %47 = vector.extract_strided_slice %32 {offsets = [0, 64], sizes = [1, 32], strides = [1, 1]} : vector<1x96xf32> to vector<1x32xf32>
    %48 = vector.broadcast %47 : vector<1x32xf32> to vector<16x32xf32>
    %49 = arith.addf %46, %48 : vector<16x32xf32>
    %50 = vector.extract_strided_slice %39 {offsets = [0, 0], sizes = [16, 16], strides = [1, 1]} : vector<16x32xf32> to vector<16x16xf32>
    %51 = vector.extract_strided_slice %44 {offsets = [0, 0], sizes = [16, 16], strides = [1, 1]} : vector<16x32xf32> to vector<16x16xf32>
    %52 = vector.extract_strided_slice %49 {offsets = [0, 0], sizes = [16, 16], strides = [1, 1]} : vector<16x32xf32> to vector<16x16xf32>
    %53 = tpu.transpose %51, [1, 0] : vector<16x16xf32> -> vector<16x16xf32>
    %cst_28 = arith.constant dense<0.000000e+00> : vector<16x16xf32>
    %54 = tpu.matmul %50, %53, %cst_28 {dimension_numbers = #tpu.dot_dimension_numbers<[1], [0], [0], [1], [0, 0, 1, 1], [], []>} : vector<16x16xf32>, vector<16x16xf32>, vector<16x16xf32> -> vector<16x16xf32>
    %cst_29 = arith.constant 2.500000e-01 : f32
    %55 = vector.broadcast %cst_29 : f32 to vector<16x16xf32>
    %56 = arith.mulf %54, %55 : vector<16x16xf32>
    %cst_30 = arith.constant dense<0xFF800000> : vector<16xf32>
    %57 = vector.multi_reduction <maximumf>, %56, %cst_30 [1] : vector<16x16xf32> to vector<16xf32>
    %58 = vector.shape_cast %57 : vector<16xf32> to vector<16x1xf32>
    %59 = vector.broadcast %58 : vector<16x1xf32> to vector<16x16xf32>
    %60 = arith.subf %56, %59 : vector<16x16xf32>
    %61 = math.exp %60 : vector<16x16xf32>
    %cst_31 = arith.constant dense<0.000000e+00> : vector<16xf32>
    %62 = vector.multi_reduction <add>, %61, %cst_31 [1] : vector<16x16xf32> to vector<16xf32>
    %63 = vector.shape_cast %62 : vector<16xf32> to vector<16x1xf32>
    %64 = tpu.reciprocal %63 {approx = true} : vector<16x1xf32> -> vector<16x1xf32>
    %65 = vector.broadcast %64 : vector<16x1xf32> to vector<16x16xf32>
    %66 = arith.mulf %61, %65 : vector<16x16xf32>
    %cst_32 = arith.constant dense<0.000000e+00> : vector<16x16xf32>
    %67 = tpu.matmul %66, %52, %cst_32 {dimension_numbers = #tpu.dot_dimension_numbers<[1], [0], [0], [1], [0, 0, 1, 1], [], []>} : vector<16x16xf32>, vector<16x16xf32>, vector<16x16xf32> -> vector<16x16xf32>
    %68 = vector.extract_strided_slice %33 {offsets = [0, 0], sizes = [16, 32], strides = [1, 1]} : vector<32x32xf32> to vector<16x32xf32>
    %cst_33 = arith.constant dense<0.000000e+00> : vector<16x32xf32>
    %69 = tpu.matmul %67, %68, %cst_33 {dimension_numbers = #tpu.dot_dimension_numbers<[1], [0], [0], [1], [0, 0, 1, 1], [], []>} : vector<16x16xf32>, vector<16x32xf32>, vector<16x32xf32> -> vector<16x32xf32>
    %70 = vector.extract_strided_slice %39 {offsets = [0, 16], sizes = [16, 16], strides = [1, 1]} : vector<16x32xf32> to vector<16x16xf32>
    %71 = vector.extract_strided_slice %44 {offsets = [0, 16], sizes = [16, 16], strides = [1, 1]} : vector<16x32xf32> to vector<16x16xf32>
    %72 = vector.extract_strided_slice %49 {offsets = [0, 16], sizes = [16, 16], strides = [1, 1]} : vector<16x32xf32> to vector<16x16xf32>
    %73 = tpu.transpose %71, [1, 0] : vector<16x16xf32> -> vector<16x16xf32>
    %cst_34 = arith.constant dense<0.000000e+00> : vector<16x16xf32>
    %74 = tpu.matmul %70, %73, %cst_34 {dimension_numbers = #tpu.dot_dimension_numbers<[1], [0], [0], [1], [0, 0, 1, 1], [], []>} : vector<16x16xf32>, vector<16x16xf32>, vector<16x16xf32> -> vector<16x16xf32>
    %cst_35 = arith.constant 2.500000e-01 : f32
    %75 = vector.broadcast %cst_35 : f32 to vector<16x16xf32>
    %76 = arith.mulf %74, %75 : vector<16x16xf32>
    %cst_36 = arith.constant dense<0xFF800000> : vector<16xf32>
    %77 = vector.multi_reduction <maximumf>, %76, %cst_36 [1] : vector<16x16xf32> to vector<16xf32>
    %78 = vector.shape_cast %77 : vector<16xf32> to vector<16x1xf32>
    %79 = vector.broadcast %78 : vector<16x1xf32> to vector<16x16xf32>
    %80 = arith.subf %76, %79 : vector<16x16xf32>
    %81 = math.exp %80 : vector<16x16xf32>
    %cst_37 = arith.constant dense<0.000000e+00> : vector<16xf32>
    %82 = vector.multi_reduction <add>, %81, %cst_37 [1] : vector<16x16xf32> to vector<16xf32>
    %83 = vector.shape_cast %82 : vector<16xf32> to vector<16x1xf32>
    %84 = tpu.reciprocal %83 {approx = true} : vector<16x1xf32> -> vector<16x1xf32>
    %85 = vector.broadcast %84 : vector<16x1xf32> to vector<16x16xf32>
    %86 = arith.mulf %81, %85 : vector<16x16xf32>
    %cst_38 = arith.constant dense<0.000000e+00> : vector<16x16xf32>
    %87 = tpu.matmul %86, %72, %cst_38 {dimension_numbers = #tpu.dot_dimension_numbers<[1], [0], [0], [1], [0, 0, 1, 1], [], []>} : vector<16x16xf32>, vector<16x16xf32>, vector<16x16xf32> -> vector<16x16xf32>
    %88 = vector.extract_strided_slice %33 {offsets = [16, 0], sizes = [16, 32], strides = [1, 1]} : vector<32x32xf32> to vector<16x32xf32>
    %cst_39 = arith.constant dense<0.000000e+00> : vector<16x32xf32>
    %89 = tpu.matmul %87, %88, %cst_39 {dimension_numbers = #tpu.dot_dimension_numbers<[1], [0], [0], [1], [0, 0, 1, 1], [], []>} : vector<16x16xf32>, vector<16x32xf32>, vector<16x32xf32> -> vector<16x32xf32>
    %90 = arith.addf %69, %89 : vector<16x32xf32>
    %91 = vector.broadcast %34 : vector<1x32xf32> to vector<16x32xf32>
    %92 = arith.addf %90, %91 : vector<16x32xf32>
    %93 = arith.addf %6, %92 : vector<16x32xf32>
    %c1 = arith.constant 1 : index
    %c0_40 = arith.constant 0 : index
    %c0_41 = arith.constant 0 : index
    %94 = vector.load %arg4[%c1, %c0_40, %c0_41] : memref<3x1x32xf32, #tpu.memory_space<vmem>>, vector<1x1x32xf32>
    %95 = vector.shape_cast %94 : vector<1x1x32xf32> to vector<1x32xf32>
    %c1_42 = arith.constant 1 : index
    %c0_43 = arith.constant 0 : index
    %c0_44 = arith.constant 0 : index
    %96 = vector.load %arg5[%c1_42, %c0_43, %c0_44] : memref<3x1x32xf32, #tpu.memory_space<vmem>>, vector<1x1x32xf32>
    %97 = vector.shape_cast %96 : vector<1x1x32xf32> to vector<1x32xf32>
    %cst_45 = arith.constant dense<0.000000e+00> : vector<16xf32>
    %98 = vector.multi_reduction <add>, %93, %cst_45 [1] : vector<16x32xf32> to vector<16xf32>
    %99 = vector.shape_cast %98 : vector<16xf32> to vector<16x1xf32>
    %cst_46 = arith.constant 3.200000e+01 : f32
    %100 = vector.broadcast %cst_46 : f32 to vector<16x1xf32>
    %101 = arith.divf %99, %100 : vector<16x1xf32>
    %102 = vector.broadcast %101 : vector<16x1xf32> to vector<16x32xf32>
    %103 = arith.subf %93, %102 : vector<16x32xf32>
    %104 = arith.mulf %103, %103 : vector<16x32xf32>
    %cst_47 = arith.constant dense<0.000000e+00> : vector<16xf32>
    %105 = vector.multi_reduction <add>, %104, %cst_47 [1] : vector<16x32xf32> to vector<16xf32>
    %106 = vector.shape_cast %105 : vector<16xf32> to vector<16x1xf32>
    %cst_48 = arith.constant 3.200000e+01 : f32
    %107 = vector.broadcast %cst_48 : f32 to vector<16x1xf32>
    %108 = arith.divf %106, %107 : vector<16x1xf32>
    %cst_49 = arith.constant 9.99999974E-6 : f32
    %109 = vector.broadcast %cst_49 : f32 to vector<16x1xf32>
    %110 = arith.addf %108, %109 : vector<16x1xf32>
    %111 = math.rsqrt %110 : vector<16x1xf32>
    %112 = vector.broadcast %111 : vector<16x1xf32> to vector<16x32xf32>
    %113 = arith.mulf %103, %112 : vector<16x32xf32>
    %114 = vector.broadcast %95 : vector<1x32xf32> to vector<16x32xf32>
    %115 = arith.mulf %113, %114 : vector<16x32xf32>
    %116 = vector.broadcast %97 : vector<1x32xf32> to vector<16x32xf32>
    %117 = arith.addf %115, %116 : vector<16x32xf32>
    %c0_50 = arith.constant 0 : index
    %c0_51 = arith.constant 0 : index
    %118 = vector.load %arg10[%c0_50, %c0_51] : memref<32x64xf32, #tpu.memory_space<vmem>>, vector<32x64xf32>
    %cst_52 = arith.constant dense<0.000000e+00> : vector<16x64xf32>
    %119 = tpu.matmul %117, %118, %cst_52 {dimension_numbers = #tpu.dot_dimension_numbers<[1], [0], [0], [1], [0, 0, 1, 1], [], []>} : vector<16x32xf32>, vector<32x64xf32>, vector<16x64xf32> -> vector<16x64xf32>
    %c0_53 = arith.constant 0 : index
    %c0_54 = arith.constant 0 : index
    %120 = vector.load %arg11[%c0_53, %c0_54] : memref<1x64xf32, #tpu.memory_space<vmem>>, vector<1x64xf32>
    %121 = vector.broadcast %120 : vector<1x64xf32> to vector<16x64xf32>
    %122 = arith.addf %119, %121 : vector<16x64xf32>
    %cst_55 = arith.constant 5.000000e-01 : f32
    %123 = vector.broadcast %cst_55 : f32 to vector<16x64xf32>
    %124 = arith.mulf %123, %122 : vector<16x64xf32>
    %cst_56 = arith.constant 4.471500e-02 : f32
    %125 = vector.broadcast %cst_56 : f32 to vector<16x64xf32>
    %126 = arith.mulf %125, %122 : vector<16x64xf32>
    %127 = arith.mulf %126, %122 : vector<16x64xf32>
    %128 = arith.mulf %127, %122 : vector<16x64xf32>
    %129 = arith.addf %122, %128 : vector<16x64xf32>
    %cst_57 = arith.constant 0.797884583 : f32
    %130 = vector.broadcast %cst_57 : f32 to vector<16x64xf32>
    %131 = arith.mulf %130, %129 : vector<16x64xf32>
    %132 = math.tanh %131 : vector<16x64xf32>
    %cst_58 = arith.constant 1.000000e+00 : f32
    %133 = vector.broadcast %cst_58 : f32 to vector<16x64xf32>
    %134 = arith.addf %133, %132 : vector<16x64xf32>
    %135 = arith.mulf %124, %134 : vector<16x64xf32>
    %c0_59 = arith.constant 0 : index
    %c0_60 = arith.constant 0 : index
    %136 = vector.load %arg12[%c0_59, %c0_60] : memref<64x32xf32, #tpu.memory_space<vmem>>, vector<64x32xf32>
    %cst_61 = arith.constant dense<0.000000e+00> : vector<16x32xf32>
    %137 = tpu.matmul %135, %136, %cst_61 {dimension_numbers = #tpu.dot_dimension_numbers<[1], [0], [0], [1], [0, 0, 1, 1], [], []>} : vector<16x64xf32>, vector<64x32xf32>, vector<16x32xf32> -> vector<16x32xf32>
    %c0_62 = arith.constant 0 : index
    %c0_63 = arith.constant 0 : index
    %138 = vector.load %arg13[%c0_62, %c0_63] : memref<1x32xf32, #tpu.memory_space<vmem>>, vector<1x32xf32>
    %139 = vector.broadcast %138 : vector<1x32xf32> to vector<16x32xf32>
    %140 = arith.addf %137, %139 : vector<16x32xf32>
    %141 = arith.addf %93, %140 : vector<16x32xf32>
    %c0_64 = arith.constant 0 : index
    %c0_65 = arith.constant 0 : index
    %142 = vector.load %arg14[%c0_64, %c0_65] : memref<32x32xf32, #tpu.memory_space<vmem>>, vector<32x32xf32>
    %cst_66 = arith.constant dense<0.000000e+00> : vector<16x32xf32>
    %143 = tpu.matmul %141, %142, %cst_66 {dimension_numbers = #tpu.dot_dimension_numbers<[1], [0], [0], [1], [0, 0, 1, 1], [], []>} : vector<16x32xf32>, vector<32x32xf32>, vector<16x32xf32> -> vector<16x32xf32>
    %c2 = arith.constant 2 : index
    %c0_67 = arith.constant 0 : index
    %c0_68 = arith.constant 0 : index
    %144 = vector.load %arg4[%c2, %c0_67, %c0_68] : memref<3x1x32xf32, #tpu.memory_space<vmem>>, vector<1x1x32xf32>
    %145 = vector.shape_cast %144 : vector<1x1x32xf32> to vector<1x32xf32>
    %c2_69 = arith.constant 2 : index
    %c0_70 = arith.constant 0 : index
    %c0_71 = arith.constant 0 : index
    %146 = vector.load %arg5[%c2_69, %c0_70, %c0_71] : memref<3x1x32xf32, #tpu.memory_space<vmem>>, vector<1x1x32xf32>
    %147 = vector.shape_cast %146 : vector<1x1x32xf32> to vector<1x32xf32>
    %cst_72 = arith.constant dense<0.000000e+00> : vector<16xf32>
    %148 = vector.multi_reduction <add>, %143, %cst_72 [1] : vector<16x32xf32> to vector<16xf32>
    %149 = vector.shape_cast %148 : vector<16xf32> to vector<16x1xf32>
    %cst_73 = arith.constant 3.200000e+01 : f32
    %150 = vector.broadcast %cst_73 : f32 to vector<16x1xf32>
    %151 = arith.divf %149, %150 : vector<16x1xf32>
    %152 = vector.broadcast %151 : vector<16x1xf32> to vector<16x32xf32>
    %153 = arith.subf %143, %152 : vector<16x32xf32>
    %154 = arith.mulf %153, %153 : vector<16x32xf32>
    %cst_74 = arith.constant dense<0.000000e+00> : vector<16xf32>
    %155 = vector.multi_reduction <add>, %154, %cst_74 [1] : vector<16x32xf32> to vector<16xf32>
    %156 = vector.shape_cast %155 : vector<16xf32> to vector<16x1xf32>
    %cst_75 = arith.constant 3.200000e+01 : f32
    %157 = vector.broadcast %cst_75 : f32 to vector<16x1xf32>
    %158 = arith.divf %156, %157 : vector<16x1xf32>
    %cst_76 = arith.constant 9.99999997E-7 : f32
    %159 = vector.broadcast %cst_76 : f32 to vector<16x1xf32>
    %160 = arith.addf %158, %159 : vector<16x1xf32>
    %161 = math.rsqrt %160 : vector<16x1xf32>
    %162 = vector.broadcast %161 : vector<16x1xf32> to vector<16x32xf32>
    %163 = arith.mulf %153, %162 : vector<16x32xf32>
    %164 = vector.broadcast %145 : vector<1x32xf32> to vector<16x32xf32>
    %165 = arith.mulf %163, %164 : vector<16x32xf32>
    %166 = vector.broadcast %147 : vector<1x32xf32> to vector<16x32xf32>
    %167 = arith.addf %165, %166 : vector<16x32xf32>
    %c0_77 = arith.constant 0 : index
    %c0_78 = arith.constant 0 : index
    %c0_79 = arith.constant 0 : index
    %168 = vector.load %arg15[%c0_77, %c0_78, %c0_79] : memref<1x16x32xf32, #tpu.memory_space<vmem>>, vector<1x16x32xf32>
    %169 = vector.shape_cast %168 : vector<1x16x32xf32> to vector<16x32xf32>
    %170 = vector.shape_cast %167 : vector<16x32xf32> to vector<1x16x32xf32>
    tpu.vector_store %arg15[%c0_77, %c0_78, %c0_79], %170 {strides = array<i32>} : memref<1x16x32xf32, #tpu.memory_space<vmem>>, vector<1x16x32xf32>,
    return
  }
  func.func @transform_0(%arg0: i32) -> (i32, i32, i32) {
    %c0_i32 = arith.constant 0 : i32
    %c0_i32_0 = arith.constant 0 : i32
    %c0_i32_1 = arith.constant 0 : i32
    return %arg0, %c0_i32, %c0_i32_0 : i32, i32, i32
  }
  func.func @transform_1(%arg0: i32) -> (i32, i32) {
    %c0_i32 = arith.constant 0 : i32
    %c0_i32_0 = arith.constant 0 : i32
    %c0_i32_1 = arith.constant 0 : i32
    return %c0_i32, %c0_i32_0 : i32, i32
  }
  func.func @transform_2(%arg0: i32) -> (i32, i32) {
    %c0_i32 = arith.constant 0 : i32
    %c0_i32_0 = arith.constant 0 : i32
    %c0_i32_1 = arith.constant 0 : i32
    return %c0_i32, %c0_i32_0 : i32, i32
  }
  func.func @transform_3(%arg0: i32) -> (i32, i32, i32) {
    %c0_i32 = arith.constant 0 : i32
    %c0_i32_0 = arith.constant 0 : i32
    %c0_i32_1 = arith.constant 0 : i32
    %c0_i32_2 = arith.constant 0 : i32
    return %c0_i32, %c0_i32_0, %c0_i32_1 : i32, i32, i32
  }
  func.func @transform_4(%arg0: i32) -> (i32, i32, i32) {
    %c0_i32 = arith.constant 0 : i32
    %c0_i32_0 = arith.constant 0 : i32
    %c0_i32_1 = arith.constant 0 : i32
    %c0_i32_2 = arith.constant 0 : i32
    return %c0_i32, %c0_i32_0, %c0_i32_1 : i32, i32, i32
  }
  func.func @transform_5(%arg0: i32) -> (i32, i32) {
    %c0_i32 = arith.constant 0 : i32
    %c0_i32_0 = arith.constant 0 : i32
    %c0_i32_1 = arith.constant 0 : i32
    return %c0_i32, %c0_i32_0 : i32, i32
  }
  func.func @transform_6(%arg0: i32) -> (i32, i32) {
    %c0_i32 = arith.constant 0 : i32
    %c0_i32_0 = arith.constant 0 : i32
    %c0_i32_1 = arith.constant 0 : i32
    return %c0_i32, %c0_i32_0 : i32, i32
  }
  func.func @transform_7(%arg0: i32) -> (i32, i32) {
    %c0_i32 = arith.constant 0 : i32
    %c0_i32_0 = arith.constant 0 : i32
    %c0_i32_1 = arith.constant 0 : i32
    return %c0_i32, %c0_i32_0 : i32, i32
  }
  func.func @transform_8(%arg0: i32) -> (i32, i32) {
    %c0_i32 = arith.constant 0 : i32
    %c0_i32_0 = arith.constant 0 : i32
    %c0_i32_1 = arith.constant 0 : i32
    return %c0_i32, %c0_i32_0 : i32, i32
  }
  func.func @transform_9(%arg0: i32) -> (i32, i32) {
    %c0_i32 = arith.constant 0 : i32
    %c0_i32_0 = arith.constant 0 : i32
    %c0_i32_1 = arith.constant 0 : i32
    return %c0_i32, %c0_i32_0 : i32, i32
  }
  func.func @transform_10(%arg0: i32) -> (i32, i32) {
    %c0_i32 = arith.constant 0 : i32
    %c0_i32_0 = arith.constant 0 : i32
    %c0_i32_1 = arith.constant 0 : i32
    return %c0_i32, %c0_i32_0 : i32, i32
  }
  func.func @transform_11(%arg0: i32) -> (i32, i32) {
    %c0_i32 = arith.constant 0 : i32
    %c0_i32_0 = arith.constant 0 : i32
    %c0_i32_1 = arith.constant 0 : i32
    return %c0_i32, %c0_i32_0 : i32, i32
  }
  func.func @transform_12(%arg0: i32) -> (i32, i32) {
    %c0_i32 = arith.constant 0 : i32
    %c0_i32_0 = arith.constant 0 : i32
    %c0_i32_1 = arith.constant 0 : i32
    return %c0_i32, %c0_i32_0 : i32, i32
  }
  func.func @transform_13(%arg0: i32) -> (i32, i32) {
    %c0_i32 = arith.constant 0 : i32
    %c0_i32_0 = arith.constant 0 : i32
    %c0_i32_1 = arith.constant 0 : i32
    return %c0_i32, %c0_i32_0 : i32, i32
  }
  func.func @transform_14(%arg0: i32) -> (i32, i32, i32) {
    %c0_i32 = arith.constant 0 : i32
    %c0_i32_0 = arith.constant 0 : i32
    %c0_i32_1 = arith.constant 0 : i32
    return %arg0, %c0_i32, %c0_i32_0 : i32, i32, i32
  }
}

module attributes {stable_mosaic.version = 11 : i64} {
  func.func @_two_way_transformer_kernel(%arg0: i32, %arg1: memref<1x16x32xf32, #tpu.memory_space<vmem>>, %arg2: memref<1x7x32xf32, #tpu.memory_space<vmem>>, %arg3: memref<16x32xf32, #tpu.memory_space<vmem>>, %arg4: memref<1x32xf32, #tpu.memory_space<vmem>>, %arg5: memref<4x32x96xf32, #tpu.memory_space<vmem>>, %arg6: memref<4x1x96xf32, #tpu.memory_space<vmem>>, %arg7: memref<4x32x32xf32, #tpu.memory_space<vmem>>, %arg8: memref<4x1x32xf32, #tpu.memory_space<vmem>>, %arg9: memref<5x1x32xf32, #tpu.memory_space<vmem>>, %arg10: memref<5x1x32xf32, #tpu.memory_space<vmem>>, %arg11: memref<32x64xf32, #tpu.memory_space<vmem>>, %arg12: memref<1x64xf32, #tpu.memory_space<vmem>>, %arg13: memref<64x32xf32, #tpu.memory_space<vmem>>, %arg14: memref<1x32xf32, #tpu.memory_space<vmem>>, %arg15: memref<1x7x32xf32, #tpu.memory_space<vmem>>, %arg16: memref<1x16x32xf32, #tpu.memory_space<vmem>>) attributes {dimension_semantics = [#tpu.dimension_semantics<parallel>], iteration_bounds = array<i64: 2>, scalar_prefetch = 0 : i64, scratch_operands = 0 : i64, tpu.core_type = #tpu.core_type<tc>, window_params = [{transform_indices = @transform_0, window_bounds = array<i64: 1, 16, 32>}, {transform_indices = @transform_1, window_bounds = array<i64: 1, 7, 32>}, {pipeline_mode = #tpu.pipeline_mode<synchronous>, transform_indices = @transform_2, window_bounds = array<i64: 16, 32>}, {pipeline_mode = #tpu.pipeline_mode<synchronous>, transform_indices = @transform_3, window_bounds = array<i64: 1, 32>}, {pipeline_mode = #tpu.pipeline_mode<synchronous>, transform_indices = @transform_4, window_bounds = array<i64: 4, 32, 96>}, {pipeline_mode = #tpu.pipeline_mode<synchronous>, transform_indices = @transform_5, window_bounds = array<i64: 4, 1, 96>}, {pipeline_mode = #tpu.pipeline_mode<synchronous>, transform_indices = @transform_6, window_bounds = array<i64: 4, 32, 32>}, {pipeline_mode = #tpu.pipeline_mode<synchronous>, transform_indices = @transform_7, window_bounds = array<i64: 4, 1, 32>}, {pipeline_mode = #tpu.pipeline_mode<synchronous>, transform_indices = @transform_8, window_bounds = array<i64: 5, 1, 32>}, {pipeline_mode = #tpu.pipeline_mode<synchronous>, transform_indices = @transform_9, window_bounds = array<i64: 5, 1, 32>}, {pipeline_mode = #tpu.pipeline_mode<synchronous>, transform_indices = @transform_10, window_bounds = array<i64: 32, 64>}, {pipeline_mode = #tpu.pipeline_mode<synchronous>, transform_indices = @transform_11, window_bounds = array<i64: 1, 64>}, {pipeline_mode = #tpu.pipeline_mode<synchronous>, transform_indices = @transform_12, window_bounds = array<i64: 64, 32>}, {pipeline_mode = #tpu.pipeline_mode<synchronous>, transform_indices = @transform_13, window_bounds = array<i64: 1, 32>}, {transform_indices = @transform_14, window_bounds = array<i64: 1, 7, 32>}, {transform_indices = @transform_15, window_bounds = array<i64: 1, 16, 32>}]} {
    %c0 = arith.constant 0 : index
    %c0_0 = arith.constant 0 : index
    %c0_1 = arith.constant 0 : index
    %0 = vector.load %arg2[%c0, %c0_0, %c0_1] : memref<1x7x32xf32, #tpu.memory_space<vmem>>, vector<1x7x32xf32>
    %1 = vector.shape_cast %0 : vector<1x7x32xf32> to vector<7x32xf32>
    %c0_2 = arith.constant 0 : index
    %c0_3 = arith.constant 0 : index
    %2 = vector.load %arg3[%c0_2, %c0_3] : memref<16x32xf32, #tpu.memory_space<vmem>>, vector<16x32xf32>
    %c0_4 = arith.constant 0 : index
    %c0_5 = arith.constant 0 : index
    %c0_6 = arith.constant 0 : index
    %3 = vector.load %arg1[%c0_4, %c0_5, %c0_6] : memref<1x16x32xf32, #tpu.memory_space<vmem>>, vector<1x16x32xf32>
    %4 = vector.shape_cast %3 : vector<1x16x32xf32> to vector<16x32xf32>
    %c0_7 = arith.constant 0 : index
    %c0_8 = arith.constant 0 : index
    %5 = vector.load %arg4[%c0_7, %c0_8] : memref<1x32xf32, #tpu.memory_space<vmem>>, vector<1x32xf32>
    %6 = vector.broadcast %5 : vector<1x32xf32> to vector<16x32xf32>
    %7 = arith.addf %4, %6 : vector<16x32xf32>
    %c0_9 = arith.constant 0 : index
    %c0_10 = arith.constant 0 : index
    %c0_11 = arith.constant 0 : index
    %8 = vector.load %arg5[%c0_9, %c0_10, %c0_11] : memref<4x32x96xf32, #tpu.memory_space<vmem>>, vector<1x32x96xf32>
    %9 = vector.shape_cast %8 : vector<1x32x96xf32> to vector<32x96xf32>
    %c0_12 = arith.constant 0 : index
    %c0_13 = arith.constant 0 : index
    %c0_14 = arith.constant 0 : index
    %10 = vector.load %arg6[%c0_12, %c0_13, %c0_14] : memref<4x1x96xf32, #tpu.memory_space<vmem>>, vector<1x1x96xf32>
    %11 = vector.shape_cast %10 : vector<1x1x96xf32> to vector<1x96xf32>
    %c0_15 = arith.constant 0 : index
    %c0_16 = arith.constant 0 : index
    %c0_17 = arith.constant 0 : index
    %12 = vector.load %arg7[%c0_15, %c0_16, %c0_17] : memref<4x32x32xf32, #tpu.memory_space<vmem>>, vector<1x32x32xf32>
    %13 = vector.shape_cast %12 : vector<1x32x32xf32> to vector<32x32xf32>
    %c0_18 = arith.constant 0 : index
    %c0_19 = arith.constant 0 : index
    %c0_20 = arith.constant 0 : index
    %14 = vector.load %arg8[%c0_18, %c0_19, %c0_20] : memref<4x1x32xf32, #tpu.memory_space<vmem>>, vector<1x1x32xf32>
    %15 = vector.shape_cast %14 : vector<1x1x32xf32> to vector<1x32xf32>
    %16 = vector.extract_strided_slice %9 {offsets = [0, 0], sizes = [32, 32], strides = [1, 1]} : vector<32x96xf32> to vector<32x32xf32>
    %cst = arith.constant dense<0.000000e+00> : vector<7x32xf32>
    %17 = tpu.matmul %1, %16, %cst {dimension_numbers = #tpu.dot_dimension_numbers<[1], [0], [0], [1], [0, 0, 1, 1], [], []>} : vector<7x32xf32>, vector<32x32xf32>, vector<7x32xf32> -> vector<7x32xf32>
    %18 = vector.extract_strided_slice %11 {offsets = [0, 0], sizes = [1, 32], strides = [1, 1]} : vector<1x96xf32> to vector<1x32xf32>
    %19 = vector.broadcast %18 : vector<1x32xf32> to vector<7x32xf32>
    %20 = arith.addf %17, %19 : vector<7x32xf32>
    %21 = vector.extract_strided_slice %9 {offsets = [0, 32], sizes = [32, 32], strides = [1, 1]} : vector<32x96xf32> to vector<32x32xf32>
    %cst_21 = arith.constant dense<0.000000e+00> : vector<7x32xf32>
    %22 = tpu.matmul %1, %21, %cst_21 {dimension_numbers = #tpu.dot_dimension_numbers<[1], [0], [0], [1], [0, 0, 1, 1], [], []>} : vector<7x32xf32>, vector<32x32xf32>, vector<7x32xf32> -> vector<7x32xf32>
    %23 = vector.extract_strided_slice %11 {offsets = [0, 32], sizes = [1, 32], strides = [1, 1]} : vector<1x96xf32> to vector<1x32xf32>
    %24 = vector.broadcast %23 : vector<1x32xf32> to vector<7x32xf32>
    %25 = arith.addf %22, %24 : vector<7x32xf32>
    %26 = vector.extract_strided_slice %9 {offsets = [0, 64], sizes = [32, 32], strides = [1, 1]} : vector<32x96xf32> to vector<32x32xf32>
    %cst_22 = arith.constant dense<0.000000e+00> : vector<7x32xf32>
    %27 = tpu.matmul %1, %26, %cst_22 {dimension_numbers = #tpu.dot_dimension_numbers<[1], [0], [0], [1], [0, 0, 1, 1], [], []>} : vector<7x32xf32>, vector<32x32xf32>, vector<7x32xf32> -> vector<7x32xf32>
    %28 = vector.extract_strided_slice %11 {offsets = [0, 64], sizes = [1, 32], strides = [1, 1]} : vector<1x96xf32> to vector<1x32xf32>
    %29 = vector.broadcast %28 : vector<1x32xf32> to vector<7x32xf32>
    %30 = arith.addf %27, %29 : vector<7x32xf32>
    %31 = vector.extract_strided_slice %20 {offsets = [0, 0], sizes = [7, 16], strides = [1, 1]} : vector<7x32xf32> to vector<7x16xf32>
    %32 = vector.extract_strided_slice %25 {offsets = [0, 0], sizes = [7, 16], strides = [1, 1]} : vector<7x32xf32> to vector<7x16xf32>
    %33 = vector.extract_strided_slice %30 {offsets = [0, 0], sizes = [7, 16], strides = [1, 1]} : vector<7x32xf32> to vector<7x16xf32>
    %34 = tpu.transpose %32, [1, 0] : vector<7x16xf32> -> vector<16x7xf32>
    %cst_23 = arith.constant dense<0.000000e+00> : vector<7x7xf32>
    %35 = tpu.matmul %31, %34, %cst_23 {dimension_numbers = #tpu.dot_dimension_numbers<[1], [0], [0], [1], [0, 0, 1, 1], [], []>} : vector<7x16xf32>, vector<16x7xf32>, vector<7x7xf32> -> vector<7x7xf32>
    %cst_24 = arith.constant 2.500000e-01 : f32
    %36 = vector.broadcast %cst_24 : f32 to vector<7x7xf32>
    %37 = arith.mulf %35, %36 : vector<7x7xf32>
    %cst_25 = arith.constant dense<0xFF800000> : vector<7xf32>
    %38 = vector.multi_reduction <maximumf>, %37, %cst_25 [1] : vector<7x7xf32> to vector<7xf32>
    %39 = vector.shape_cast %38 : vector<7xf32> to vector<7x1xf32>
    %40 = vector.broadcast %39 : vector<7x1xf32> to vector<7x7xf32>
    %41 = arith.subf %37, %40 : vector<7x7xf32>
    %42 = math.exp %41 : vector<7x7xf32>
    %cst_26 = arith.constant dense<0.000000e+00> : vector<7xf32>
    %43 = vector.multi_reduction <add>, %42, %cst_26 [1] : vector<7x7xf32> to vector<7xf32>
    %44 = vector.shape_cast %43 : vector<7xf32> to vector<7x1xf32>
    %45 = tpu.reciprocal %44 {approx = true} : vector<7x1xf32> -> vector<7x1xf32>
    %46 = vector.broadcast %45 : vector<7x1xf32> to vector<7x7xf32>
    %47 = arith.mulf %42, %46 : vector<7x7xf32>
    %cst_27 = arith.constant dense<0.000000e+00> : vector<7x16xf32>
    %48 = tpu.matmul %47, %33, %cst_27 {dimension_numbers = #tpu.dot_dimension_numbers<[1], [0], [0], [1], [0, 0, 1, 1], [], []>} : vector<7x7xf32>, vector<7x16xf32>, vector<7x16xf32> -> vector<7x16xf32>
    %49 = vector.extract_strided_slice %13 {offsets = [0, 0], sizes = [16, 32], strides = [1, 1]} : vector<32x32xf32> to vector<16x32xf32>
    %cst_28 = arith.constant dense<0.000000e+00> : vector<7x32xf32>
    %50 = tpu.matmul %48, %49, %cst_28 {dimension_numbers = #tpu.dot_dimension_numbers<[1], [0], [0], [1], [0, 0, 1, 1], [], []>} : vector<7x16xf32>, vector<16x32xf32>, vector<7x32xf32> -> vector<7x32xf32>
    %51 = vector.extract_strided_slice %20 {offsets = [0, 16], sizes = [7, 16], strides = [1, 1]} : vector<7x32xf32> to vector<7x16xf32>
    %52 = vector.extract_strided_slice %25 {offsets = [0, 16], sizes = [7, 16], strides = [1, 1]} : vector<7x32xf32> to vector<7x16xf32>
    %53 = vector.extract_strided_slice %30 {offsets = [0, 16], sizes = [7, 16], strides = [1, 1]} : vector<7x32xf32> to vector<7x16xf32>
    %54 = tpu.transpose %52, [1, 0] : vector<7x16xf32> -> vector<16x7xf32>
    %cst_29 = arith.constant dense<0.000000e+00> : vector<7x7xf32>
    %55 = tpu.matmul %51, %54, %cst_29 {dimension_numbers = #tpu.dot_dimension_numbers<[1], [0], [0], [1], [0, 0, 1, 1], [], []>} : vector<7x16xf32>, vector<16x7xf32>, vector<7x7xf32> -> vector<7x7xf32>
    %cst_30 = arith.constant 2.500000e-01 : f32
    %56 = vector.broadcast %cst_30 : f32 to vector<7x7xf32>
    %57 = arith.mulf %55, %56 : vector<7x7xf32>
    %cst_31 = arith.constant dense<0xFF800000> : vector<7xf32>
    %58 = vector.multi_reduction <maximumf>, %57, %cst_31 [1] : vector<7x7xf32> to vector<7xf32>
    %59 = vector.shape_cast %58 : vector<7xf32> to vector<7x1xf32>
    %60 = vector.broadcast %59 : vector<7x1xf32> to vector<7x7xf32>
    %61 = arith.subf %57, %60 : vector<7x7xf32>
    %62 = math.exp %61 : vector<7x7xf32>
    %cst_32 = arith.constant dense<0.000000e+00> : vector<7xf32>
    %63 = vector.multi_reduction <add>, %62, %cst_32 [1] : vector<7x7xf32> to vector<7xf32>
    %64 = vector.shape_cast %63 : vector<7xf32> to vector<7x1xf32>
    %65 = tpu.reciprocal %64 {approx = true} : vector<7x1xf32> -> vector<7x1xf32>
    %66 = vector.broadcast %65 : vector<7x1xf32> to vector<7x7xf32>
    %67 = arith.mulf %62, %66 : vector<7x7xf32>
    %cst_33 = arith.constant dense<0.000000e+00> : vector<7x16xf32>
    %68 = tpu.matmul %67, %53, %cst_33 {dimension_numbers = #tpu.dot_dimension_numbers<[1], [0], [0], [1], [0, 0, 1, 1], [], []>} : vector<7x7xf32>, vector<7x16xf32>, vector<7x16xf32> -> vector<7x16xf32>
    %69 = vector.extract_strided_slice %13 {offsets = [16, 0], sizes = [16, 32], strides = [1, 1]} : vector<32x32xf32> to vector<16x32xf32>
    %cst_34 = arith.constant dense<0.000000e+00> : vector<7x32xf32>
    %70 = tpu.matmul %68, %69, %cst_34 {dimension_numbers = #tpu.dot_dimension_numbers<[1], [0], [0], [1], [0, 0, 1, 1], [], []>} : vector<7x16xf32>, vector<16x32xf32>, vector<7x32xf32> -> vector<7x32xf32>
    %71 = arith.addf %50, %70 : vector<7x32xf32>
    %72 = vector.broadcast %15 : vector<1x32xf32> to vector<7x32xf32>
    %73 = arith.addf %71, %72 : vector<7x32xf32>
    %c0_35 = arith.constant 0 : index
    %c0_36 = arith.constant 0 : index
    %c0_37 = arith.constant 0 : index
    %74 = vector.load %arg9[%c0_35, %c0_36, %c0_37] : memref<5x1x32xf32, #tpu.memory_space<vmem>>, vector<1x1x32xf32>
    %75 = vector.shape_cast %74 : vector<1x1x32xf32> to vector<1x32xf32>
    %c0_38 = arith.constant 0 : index
    %c0_39 = arith.constant 0 : index
    %c0_40 = arith.constant 0 : index
    %76 = vector.load %arg10[%c0_38, %c0_39, %c0_40] : memref<5x1x32xf32, #tpu.memory_space<vmem>>, vector<1x1x32xf32>
    %77 = vector.shape_cast %76 : vector<1x1x32xf32> to vector<1x32xf32>
    %cst_41 = arith.constant dense<0.000000e+00> : vector<7xf32>
    %78 = vector.multi_reduction <add>, %73, %cst_41 [1] : vector<7x32xf32> to vector<7xf32>
    %79 = vector.shape_cast %78 : vector<7xf32> to vector<7x1xf32>
    %cst_42 = arith.constant 3.200000e+01 : f32
    %80 = vector.broadcast %cst_42 : f32 to vector<7x1xf32>
    %81 = arith.divf %79, %80 : vector<7x1xf32>
    %82 = vector.broadcast %81 : vector<7x1xf32> to vector<7x32xf32>
    %83 = arith.subf %73, %82 : vector<7x32xf32>
    %84 = arith.mulf %83, %83 : vector<7x32xf32>
    %cst_43 = arith.constant dense<0.000000e+00> : vector<7xf32>
    %85 = vector.multi_reduction <add>, %84, %cst_43 [1] : vector<7x32xf32> to vector<7xf32>
    %86 = vector.shape_cast %85 : vector<7xf32> to vector<7x1xf32>
    %cst_44 = arith.constant 3.200000e+01 : f32
    %87 = vector.broadcast %cst_44 : f32 to vector<7x1xf32>
    %88 = arith.divf %86, %87 : vector<7x1xf32>
    %cst_45 = arith.constant 9.99999974E-6 : f32
    %89 = vector.broadcast %cst_45 : f32 to vector<7x1xf32>
    %90 = arith.addf %88, %89 : vector<7x1xf32>
    %91 = math.rsqrt %90 : vector<7x1xf32>
    %92 = vector.broadcast %91 : vector<7x1xf32> to vector<7x32xf32>
    %93 = arith.mulf %83, %92 : vector<7x32xf32>
    %94 = vector.broadcast %75 : vector<1x32xf32> to vector<7x32xf32>
    %95 = arith.mulf %93, %94 : vector<7x32xf32>
    %96 = vector.broadcast %77 : vector<1x32xf32> to vector<7x32xf32>
    %97 = arith.addf %95, %96 : vector<7x32xf32>
    %98 = arith.addf %97, %1 : vector<7x32xf32>
    %99 = arith.addf %7, %2 : vector<16x32xf32>
    %c1 = arith.constant 1 : index
    %c0_46 = arith.constant 0 : index
    %c0_47 = arith.constant 0 : index
    %100 = vector.load %arg5[%c1, %c0_46, %c0_47] : memref<4x32x96xf32, #tpu.memory_space<vmem>>, vector<1x32x96xf32>
    %101 = vector.shape_cast %100 : vector<1x32x96xf32> to vector<32x96xf32>
    %c1_48 = arith.constant 1 : index
    %c0_49 = arith.constant 0 : index
    %c0_50 = arith.constant 0 : index
    %102 = vector.load %arg6[%c1_48, %c0_49, %c0_50] : memref<4x1x96xf32, #tpu.memory_space<vmem>>, vector<1x1x96xf32>
    %103 = vector.shape_cast %102 : vector<1x1x96xf32> to vector<1x96xf32>
    %c1_51 = arith.constant 1 : index
    %c0_52 = arith.constant 0 : index
    %c0_53 = arith.constant 0 : index
    %104 = vector.load %arg7[%c1_51, %c0_52, %c0_53] : memref<4x32x32xf32, #tpu.memory_space<vmem>>, vector<1x32x32xf32>
    %105 = vector.shape_cast %104 : vector<1x32x32xf32> to vector<32x32xf32>
    %c1_54 = arith.constant 1 : index
    %c0_55 = arith.constant 0 : index
    %c0_56 = arith.constant 0 : index
    %106 = vector.load %arg8[%c1_54, %c0_55, %c0_56] : memref<4x1x32xf32, #tpu.memory_space<vmem>>, vector<1x1x32xf32>
    %107 = vector.shape_cast %106 : vector<1x1x32xf32> to vector<1x32xf32>
    %108 = vector.extract_strided_slice %101 {offsets = [0, 0], sizes = [32, 32], strides = [1, 1]} : vector<32x96xf32> to vector<32x32xf32>
    %cst_57 = arith.constant dense<0.000000e+00> : vector<7x32xf32>
    %109 = tpu.matmul %98, %108, %cst_57 {dimension_numbers = #tpu.dot_dimension_numbers<[1], [0], [0], [1], [0, 0, 1, 1], [], []>} : vector<7x32xf32>, vector<32x32xf32>, vector<7x32xf32> -> vector<7x32xf32>
    %110 = vector.extract_strided_slice %103 {offsets = [0, 0], sizes = [1, 32], strides = [1, 1]} : vector<1x96xf32> to vector<1x32xf32>
    %111 = vector.broadcast %110 : vector<1x32xf32> to vector<7x32xf32>
    %112 = arith.addf %109, %111 : vector<7x32xf32>
    %113 = vector.extract_strided_slice %101 {offsets = [0, 32], sizes = [32, 32], strides = [1, 1]} : vector<32x96xf32> to vector<32x32xf32>
    %cst_58 = arith.constant dense<0.000000e+00> : vector<16x32xf32>
    %114 = tpu.matmul %99, %113, %cst_58 {dimension_numbers = #tpu.dot_dimension_numbers<[1], [0], [0], [1], [0, 0, 1, 1], [], []>} : vector<16x32xf32>, vector<32x32xf32>, vector<16x32xf32> -> vector<16x32xf32>
    %115 = vector.extract_strided_slice %103 {offsets = [0, 32], sizes = [1, 32], strides = [1, 1]} : vector<1x96xf32> to vector<1x32xf32>
    %116 = vector.broadcast %115 : vector<1x32xf32> to vector<16x32xf32>
    %117 = arith.addf %114, %116 : vector<16x32xf32>
    %118 = vector.extract_strided_slice %101 {offsets = [0, 64], sizes = [32, 32], strides = [1, 1]} : vector<32x96xf32> to vector<32x32xf32>
    %cst_59 = arith.constant dense<0.000000e+00> : vector<16x32xf32>
    %119 = tpu.matmul %7, %118, %cst_59 {dimension_numbers = #tpu.dot_dimension_numbers<[1], [0], [0], [1], [0, 0, 1, 1], [], []>} : vector<16x32xf32>, vector<32x32xf32>, vector<16x32xf32> -> vector<16x32xf32>
    %120 = vector.extract_strided_slice %103 {offsets = [0, 64], sizes = [1, 32], strides = [1, 1]} : vector<1x96xf32> to vector<1x32xf32>
    %121 = vector.broadcast %120 : vector<1x32xf32> to vector<16x32xf32>
    %122 = arith.addf %119, %121 : vector<16x32xf32>
    %123 = vector.extract_strided_slice %112 {offsets = [0, 0], sizes = [7, 16], strides = [1, 1]} : vector<7x32xf32> to vector<7x16xf32>
    %124 = vector.extract_strided_slice %117 {offsets = [0, 0], sizes = [16, 16], strides = [1, 1]} : vector<16x32xf32> to vector<16x16xf32>
    %125 = vector.extract_strided_slice %122 {offsets = [0, 0], sizes = [16, 16], strides = [1, 1]} : vector<16x32xf32> to vector<16x16xf32>
    %126 = tpu.transpose %124, [1, 0] : vector<16x16xf32> -> vector<16x16xf32>
    %cst_60 = arith.constant dense<0.000000e+00> : vector<7x16xf32>
    %127 = tpu.matmul %123, %126, %cst_60 {dimension_numbers = #tpu.dot_dimension_numbers<[1], [0], [0], [1], [0, 0, 1, 1], [], []>} : vector<7x16xf32>, vector<16x16xf32>, vector<7x16xf32> -> vector<7x16xf32>
    %cst_61 = arith.constant 2.500000e-01 : f32
    %128 = vector.broadcast %cst_61 : f32 to vector<7x16xf32>
    %129 = arith.mulf %127, %128 : vector<7x16xf32>
    %cst_62 = arith.constant dense<0xFF800000> : vector<7xf32>
    %130 = vector.multi_reduction <maximumf>, %129, %cst_62 [1] : vector<7x16xf32> to vector<7xf32>
    %131 = vector.shape_cast %130 : vector<7xf32> to vector<7x1xf32>
    %132 = vector.broadcast %131 : vector<7x1xf32> to vector<7x16xf32>
    %133 = arith.subf %129, %132 : vector<7x16xf32>
    %134 = math.exp %133 : vector<7x16xf32>
    %cst_63 = arith.constant dense<0.000000e+00> : vector<7xf32>
    %135 = vector.multi_reduction <add>, %134, %cst_63 [1] : vector<7x16xf32> to vector<7xf32>
    %136 = vector.shape_cast %135 : vector<7xf32> to vector<7x1xf32>
    %137 = tpu.reciprocal %136 {approx = true} : vector<7x1xf32> -> vector<7x1xf32>
    %138 = vector.broadcast %137 : vector<7x1xf32> to vector<7x16xf32>
    %139 = arith.mulf %134, %138 : vector<7x16xf32>
    %cst_64 = arith.constant dense<0.000000e+00> : vector<7x16xf32>
    %140 = tpu.matmul %139, %125, %cst_64 {dimension_numbers = #tpu.dot_dimension_numbers<[1], [0], [0], [1], [0, 0, 1, 1], [], []>} : vector<7x16xf32>, vector<16x16xf32>, vector<7x16xf32> -> vector<7x16xf32>
    %141 = vector.extract_strided_slice %105 {offsets = [0, 0], sizes = [16, 32], strides = [1, 1]} : vector<32x32xf32> to vector<16x32xf32>
    %cst_65 = arith.constant dense<0.000000e+00> : vector<7x32xf32>
    %142 = tpu.matmul %140, %141, %cst_65 {dimension_numbers = #tpu.dot_dimension_numbers<[1], [0], [0], [1], [0, 0, 1, 1], [], []>} : vector<7x16xf32>, vector<16x32xf32>, vector<7x32xf32> -> vector<7x32xf32>
    %143 = vector.extract_strided_slice %112 {offsets = [0, 16], sizes = [7, 16], strides = [1, 1]} : vector<7x32xf32> to vector<7x16xf32>
    %144 = vector.extract_strided_slice %117 {offsets = [0, 16], sizes = [16, 16], strides = [1, 1]} : vector<16x32xf32> to vector<16x16xf32>
    %145 = vector.extract_strided_slice %122 {offsets = [0, 16], sizes = [16, 16], strides = [1, 1]} : vector<16x32xf32> to vector<16x16xf32>
    %146 = tpu.transpose %144, [1, 0] : vector<16x16xf32> -> vector<16x16xf32>
    %cst_66 = arith.constant dense<0.000000e+00> : vector<7x16xf32>
    %147 = tpu.matmul %143, %146, %cst_66 {dimension_numbers = #tpu.dot_dimension_numbers<[1], [0], [0], [1], [0, 0, 1, 1], [], []>} : vector<7x16xf32>, vector<16x16xf32>, vector<7x16xf32> -> vector<7x16xf32>
    %cst_67 = arith.constant 2.500000e-01 : f32
    %148 = vector.broadcast %cst_67 : f32 to vector<7x16xf32>
    %149 = arith.mulf %147, %148 : vector<7x16xf32>
    %cst_68 = arith.constant dense<0xFF800000> : vector<7xf32>
    %150 = vector.multi_reduction <maximumf>, %149, %cst_68 [1] : vector<7x16xf32> to vector<7xf32>
    %151 = vector.shape_cast %150 : vector<7xf32> to vector<7x1xf32>
    %152 = vector.broadcast %151 : vector<7x1xf32> to vector<7x16xf32>
    %153 = arith.subf %149, %152 : vector<7x16xf32>
    %154 = math.exp %153 : vector<7x16xf32>
    %cst_69 = arith.constant dense<0.000000e+00> : vector<7xf32>
    %155 = vector.multi_reduction <add>, %154, %cst_69 [1] : vector<7x16xf32> to vector<7xf32>
    %156 = vector.shape_cast %155 : vector<7xf32> to vector<7x1xf32>
    %157 = tpu.reciprocal %156 {approx = true} : vector<7x1xf32> -> vector<7x1xf32>
    %158 = vector.broadcast %157 : vector<7x1xf32> to vector<7x16xf32>
    %159 = arith.mulf %154, %158 : vector<7x16xf32>
    %cst_70 = arith.constant dense<0.000000e+00> : vector<7x16xf32>
    %160 = tpu.matmul %159, %145, %cst_70 {dimension_numbers = #tpu.dot_dimension_numbers<[1], [0], [0], [1], [0, 0, 1, 1], [], []>} : vector<7x16xf32>, vector<16x16xf32>, vector<7x16xf32> -> vector<7x16xf32>
    %161 = vector.extract_strided_slice %105 {offsets = [16, 0], sizes = [16, 32], strides = [1, 1]} : vector<32x32xf32> to vector<16x32xf32>
    %cst_71 = arith.constant dense<0.000000e+00> : vector<7x32xf32>
    %162 = tpu.matmul %160, %161, %cst_71 {dimension_numbers = #tpu.dot_dimension_numbers<[1], [0], [0], [1], [0, 0, 1, 1], [], []>} : vector<7x16xf32>, vector<16x32xf32>, vector<7x32xf32> -> vector<7x32xf32>
    %163 = arith.addf %142, %162 : vector<7x32xf32>
    %164 = vector.broadcast %107 : vector<1x32xf32> to vector<7x32xf32>
    %165 = arith.addf %163, %164 : vector<7x32xf32>
    %166 = arith.addf %97, %165 : vector<7x32xf32>
    %c1_72 = arith.constant 1 : index
    %c0_73 = arith.constant 0 : index
    %c0_74 = arith.constant 0 : index
    %167 = vector.load %arg9[%c1_72, %c0_73, %c0_74] : memref<5x1x32xf32, #tpu.memory_space<vmem>>, vector<1x1x32xf32>
    %168 = vector.shape_cast %167 : vector<1x1x32xf32> to vector<1x32xf32>
    %c1_75 = arith.constant 1 : index
    %c0_76 = arith.constant 0 : index
    %c0_77 = arith.constant 0 : index
    %169 = vector.load %arg10[%c1_75, %c0_76, %c0_77] : memref<5x1x32xf32, #tpu.memory_space<vmem>>, vector<1x1x32xf32>
    %170 = vector.shape_cast %169 : vector<1x1x32xf32> to vector<1x32xf32>
    %cst_78 = arith.constant dense<0.000000e+00> : vector<7xf32>
    %171 = vector.multi_reduction <add>, %166, %cst_78 [1] : vector<7x32xf32> to vector<7xf32>
    %172 = vector.shape_cast %171 : vector<7xf32> to vector<7x1xf32>
    %cst_79 = arith.constant 3.200000e+01 : f32
    %173 = vector.broadcast %cst_79 : f32 to vector<7x1xf32>
    %174 = arith.divf %172, %173 : vector<7x1xf32>
    %175 = vector.broadcast %174 : vector<7x1xf32> to vector<7x32xf32>
    %176 = arith.subf %166, %175 : vector<7x32xf32>
    %177 = arith.mulf %176, %176 : vector<7x32xf32>
    %cst_80 = arith.constant dense<0.000000e+00> : vector<7xf32>
    %178 = vector.multi_reduction <add>, %177, %cst_80 [1] : vector<7x32xf32> to vector<7xf32>
    %179 = vector.shape_cast %178 : vector<7xf32> to vector<7x1xf32>
    %cst_81 = arith.constant 3.200000e+01 : f32
    %180 = vector.broadcast %cst_81 : f32 to vector<7x1xf32>
    %181 = arith.divf %179, %180 : vector<7x1xf32>
    %cst_82 = arith.constant 9.99999974E-6 : f32
    %182 = vector.broadcast %cst_82 : f32 to vector<7x1xf32>
    %183 = arith.addf %181, %182 : vector<7x1xf32>
    %184 = math.rsqrt %183 : vector<7x1xf32>
    %185 = vector.broadcast %184 : vector<7x1xf32> to vector<7x32xf32>
    %186 = arith.mulf %176, %185 : vector<7x32xf32>
    %187 = vector.broadcast %168 : vector<1x32xf32> to vector<7x32xf32>
    %188 = arith.mulf %186, %187 : vector<7x32xf32>
    %189 = vector.broadcast %170 : vector<1x32xf32> to vector<7x32xf32>
    %190 = arith.addf %188, %189 : vector<7x32xf32>
    %c0_83 = arith.constant 0 : index
    %c0_84 = arith.constant 0 : index
    %191 = vector.load %arg11[%c0_83, %c0_84] : memref<32x64xf32, #tpu.memory_space<vmem>>, vector<32x64xf32>
    %cst_85 = arith.constant dense<0.000000e+00> : vector<7x64xf32>
    %192 = tpu.matmul %190, %191, %cst_85 {dimension_numbers = #tpu.dot_dimension_numbers<[1], [0], [0], [1], [0, 0, 1, 1], [], []>} : vector<7x32xf32>, vector<32x64xf32>, vector<7x64xf32> -> vector<7x64xf32>
    %c0_86 = arith.constant 0 : index
    %c0_87 = arith.constant 0 : index
    %193 = vector.load %arg12[%c0_86, %c0_87] : memref<1x64xf32, #tpu.memory_space<vmem>>, vector<1x64xf32>
    %194 = vector.broadcast %193 : vector<1x64xf32> to vector<7x64xf32>
    %195 = arith.addf %192, %194 : vector<7x64xf32>
    %cst_88 = arith.constant 0.000000e+00 : f32
    %196 = vector.broadcast %cst_88 : f32 to vector<7x64xf32>
    %197 = arith.maximumf %195, %196 : vector<7x64xf32>
    %c0_89 = arith.constant 0 : index
    %c0_90 = arith.constant 0 : index
    %198 = vector.load %arg13[%c0_89, %c0_90] : memref<64x32xf32, #tpu.memory_space<vmem>>, vector<64x32xf32>
    %cst_91 = arith.constant dense<0.000000e+00> : vector<7x32xf32>
    %199 = tpu.matmul %197, %198, %cst_91 {dimension_numbers = #tpu.dot_dimension_numbers<[1], [0], [0], [1], [0, 0, 1, 1], [], []>} : vector<7x64xf32>, vector<64x32xf32>, vector<7x32xf32> -> vector<7x32xf32>
    %c0_92 = arith.constant 0 : index
    %c0_93 = arith.constant 0 : index
    %200 = vector.load %arg14[%c0_92, %c0_93] : memref<1x32xf32, #tpu.memory_space<vmem>>, vector<1x32xf32>
    %201 = vector.broadcast %200 : vector<1x32xf32> to vector<7x32xf32>
    %202 = arith.addf %199, %201 : vector<7x32xf32>
    %203 = arith.addf %190, %202 : vector<7x32xf32>
    %c2 = arith.constant 2 : index
    %c0_94 = arith.constant 0 : index
    %c0_95 = arith.constant 0 : index
    %204 = vector.load %arg9[%c2, %c0_94, %c0_95] : memref<5x1x32xf32, #tpu.memory_space<vmem>>, vector<1x1x32xf32>
    %205 = vector.shape_cast %204 : vector<1x1x32xf32> to vector<1x32xf32>
    %c2_96 = arith.constant 2 : index
    %c0_97 = arith.constant 0 : index
    %c0_98 = arith.constant 0 : index
    %206 = vector.load %arg10[%c2_96, %c0_97, %c0_98] : memref<5x1x32xf32, #tpu.memory_space<vmem>>, vector<1x1x32xf32>
    %207 = vector.shape_cast %206 : vector<1x1x32xf32> to vector<1x32xf32>
    %cst_99 = arith.constant dense<0.000000e+00> : vector<7xf32>
    %208 = vector.multi_reduction <add>, %203, %cst_99 [1] : vector<7x32xf32> to vector<7xf32>
    %209 = vector.shape_cast %208 : vector<7xf32> to vector<7x1xf32>
    %cst_100 = arith.constant 3.200000e+01 : f32
    %210 = vector.broadcast %cst_100 : f32 to vector<7x1xf32>
    %211 = arith.divf %209, %210 : vector<7x1xf32>
    %212 = vector.broadcast %211 : vector<7x1xf32> to vector<7x32xf32>
    %213 = arith.subf %203, %212 : vector<7x32xf32>
    %214 = arith.mulf %213, %213 : vector<7x32xf32>
    %cst_101 = arith.constant dense<0.000000e+00> : vector<7xf32>
    %215 = vector.multi_reduction <add>, %214, %cst_101 [1] : vector<7x32xf32> to vector<7xf32>
    %216 = vector.shape_cast %215 : vector<7xf32> to vector<7x1xf32>
    %cst_102 = arith.constant 3.200000e+01 : f32
    %217 = vector.broadcast %cst_102 : f32 to vector<7x1xf32>
    %218 = arith.divf %216, %217 : vector<7x1xf32>
    %cst_103 = arith.constant 9.99999974E-6 : f32
    %219 = vector.broadcast %cst_103 : f32 to vector<7x1xf32>
    %220 = arith.addf %218, %219 : vector<7x1xf32>
    %221 = math.rsqrt %220 : vector<7x1xf32>
    %222 = vector.broadcast %221 : vector<7x1xf32> to vector<7x32xf32>
    %223 = arith.mulf %213, %222 : vector<7x32xf32>
    %224 = vector.broadcast %205 : vector<1x32xf32> to vector<7x32xf32>
    %225 = arith.mulf %223, %224 : vector<7x32xf32>
    %226 = vector.broadcast %207 : vector<1x32xf32> to vector<7x32xf32>
    %227 = arith.addf %225, %226 : vector<7x32xf32>
    %228 = arith.addf %227, %1 : vector<7x32xf32>
    %229 = arith.addf %7, %2 : vector<16x32xf32>
    %c2_104 = arith.constant 2 : index
    %c0_105 = arith.constant 0 : index
    %c0_106 = arith.constant 0 : index
    %230 = vector.load %arg5[%c2_104, %c0_105, %c0_106] : memref<4x32x96xf32, #tpu.memory_space<vmem>>, vector<1x32x96xf32>
    %231 = vector.shape_cast %230 : vector<1x32x96xf32> to vector<32x96xf32>
    %c2_107 = arith.constant 2 : index
    %c0_108 = arith.constant 0 : index
    %c0_109 = arith.constant 0 : index
    %232 = vector.load %arg6[%c2_107, %c0_108, %c0_109] : memref<4x1x96xf32, #tpu.memory_space<vmem>>, vector<1x1x96xf32>
    %233 = vector.shape_cast %232 : vector<1x1x96xf32> to vector<1x96xf32>
    %c2_110 = arith.constant 2 : index
    %c0_111 = arith.constant 0 : index
    %c0_112 = arith.constant 0 : index
    %234 = vector.load %arg7[%c2_110, %c0_111, %c0_112] : memref<4x32x32xf32, #tpu.memory_space<vmem>>, vector<1x32x32xf32>
    %235 = vector.shape_cast %234 : vector<1x32x32xf32> to vector<32x32xf32>
    %c2_113 = arith.constant 2 : index
    %c0_114 = arith.constant 0 : index
    %c0_115 = arith.constant 0 : index
    %236 = vector.load %arg8[%c2_113, %c0_114, %c0_115] : memref<4x1x32xf32, #tpu.memory_space<vmem>>, vector<1x1x32xf32>
    %237 = vector.shape_cast %236 : vector<1x1x32xf32> to vector<1x32xf32>
    %238 = vector.extract_strided_slice %231 {offsets = [0, 0], sizes = [32, 32], strides = [1, 1]} : vector<32x96xf32> to vector<32x32xf32>
    %cst_116 = arith.constant dense<0.000000e+00> : vector<16x32xf32>
    %239 = tpu.matmul %229, %238, %cst_116 {dimension_numbers = #tpu.dot_dimension_numbers<[1], [0], [0], [1], [0, 0, 1, 1], [], []>} : vector<16x32xf32>, vector<32x32xf32>, vector<16x32xf32> -> vector<16x32xf32>
    %240 = vector.extract_strided_slice %233 {offsets = [0, 0], sizes = [1, 32], strides = [1, 1]} : vector<1x96xf32> to vector<1x32xf32>
    %241 = vector.broadcast %240 : vector<1x32xf32> to vector<16x32xf32>
    %242 = arith.addf %239, %241 : vector<16x32xf32>
    %243 = vector.extract_strided_slice %231 {offsets = [0, 32], sizes = [32, 32], strides = [1, 1]} : vector<32x96xf32> to vector<32x32xf32>
    %cst_117 = arith.constant dense<0.000000e+00> : vector<7x32xf32>
    %244 = tpu.matmul %228, %243, %cst_117 {dimension_numbers = #tpu.dot_dimension_numbers<[1], [0], [0], [1], [0, 0, 1, 1], [], []>} : vector<7x32xf32>, vector<32x32xf32>, vector<7x32xf32> -> vector<7x32xf32>
    %245 = vector.extract_strided_slice %233 {offsets = [0, 32], sizes = [1, 32], strides = [1, 1]} : vector<1x96xf32> to vector<1x32xf32>
    %246 = vector.broadcast %245 : vector<1x32xf32> to vector<7x32xf32>
    %247 = arith.addf %244, %246 : vector<7x32xf32>
    %248 = vector.extract_strided_slice %231 {offsets = [0, 64], sizes = [32, 32], strides = [1, 1]} : vector<32x96xf32> to vector<32x32xf32>
    %cst_118 = arith.constant dense<0.000000e+00> : vector<7x32xf32>
    %249 = tpu.matmul %227, %248, %cst_118 {dimension_numbers = #tpu.dot_dimension_numbers<[1], [0], [0], [1], [0, 0, 1, 1], [], []>} : vector<7x32xf32>, vector<32x32xf32>, vector<7x32xf32> -> vector<7x32xf32>
    %250 = vector.extract_strided_slice %233 {offsets = [0, 64], sizes = [1, 32], strides = [1, 1]} : vector<1x96xf32> to vector<1x32xf32>
    %251 = vector.broadcast %250 : vector<1x32xf32> to vector<7x32xf32>
    %252 = arith.addf %249, %251 : vector<7x32xf32>
    %253 = vector.extract_strided_slice %242 {offsets = [0, 0], sizes = [16, 16], strides = [1, 1]} : vector<16x32xf32> to vector<16x16xf32>
    %254 = vector.extract_strided_slice %247 {offsets = [0, 0], sizes = [7, 16], strides = [1, 1]} : vector<7x32xf32> to vector<7x16xf32>
    %255 = vector.extract_strided_slice %252 {offsets = [0, 0], sizes = [7, 16], strides = [1, 1]} : vector<7x32xf32> to vector<7x16xf32>
    %256 = tpu.transpose %254, [1, 0] : vector<7x16xf32> -> vector<16x7xf32>
    %cst_119 = arith.constant dense<0.000000e+00> : vector<16x7xf32>
    %257 = tpu.matmul %253, %256, %cst_119 {dimension_numbers = #tpu.dot_dimension_numbers<[1], [0], [0], [1], [0, 0, 1, 1], [], []>} : vector<16x16xf32>, vector<16x7xf32>, vector<16x7xf32> -> vector<16x7xf32>
    %cst_120 = arith.constant 2.500000e-01 : f32
    %258 = vector.broadcast %cst_120 : f32 to vector<16x7xf32>
    %259 = arith.mulf %257, %258 : vector<16x7xf32>
    %cst_121 = arith.constant dense<0xFF800000> : vector<16xf32>
    %260 = vector.multi_reduction <maximumf>, %259, %cst_121 [1] : vector<16x7xf32> to vector<16xf32>
    %261 = vector.shape_cast %260 : vector<16xf32> to vector<16x1xf32>
    %262 = vector.broadcast %261 : vector<16x1xf32> to vector<16x7xf32>
    %263 = arith.subf %259, %262 : vector<16x7xf32>
    %264 = math.exp %263 : vector<16x7xf32>
    %cst_122 = arith.constant dense<0.000000e+00> : vector<16xf32>
    %265 = vector.multi_reduction <add>, %264, %cst_122 [1] : vector<16x7xf32> to vector<16xf32>
    %266 = vector.shape_cast %265 : vector<16xf32> to vector<16x1xf32>
    %267 = tpu.reciprocal %266 {approx = true} : vector<16x1xf32> -> vector<16x1xf32>
    %268 = vector.broadcast %267 : vector<16x1xf32> to vector<16x7xf32>
    %269 = arith.mulf %264, %268 : vector<16x7xf32>
    %cst_123 = arith.constant dense<0.000000e+00> : vector<16x16xf32>
    %270 = tpu.matmul %269, %255, %cst_123 {dimension_numbers = #tpu.dot_dimension_numbers<[1], [0], [0], [1], [0, 0, 1, 1], [], []>} : vector<16x7xf32>, vector<7x16xf32>, vector<16x16xf32> -> vector<16x16xf32>
    %271 = vector.extract_strided_slice %235 {offsets = [0, 0], sizes = [16, 32], strides = [1, 1]} : vector<32x32xf32> to vector<16x32xf32>
    %cst_124 = arith.constant dense<0.000000e+00> : vector<16x32xf32>
    %272 = tpu.matmul %270, %271, %cst_124 {dimension_numbers = #tpu.dot_dimension_numbers<[1], [0], [0], [1], [0, 0, 1, 1], [], []>} : vector<16x16xf32>, vector<16x32xf32>, vector<16x32xf32> -> vector<16x32xf32>
    %273 = vector.extract_strided_slice %242 {offsets = [0, 16], sizes = [16, 16], strides = [1, 1]} : vector<16x32xf32> to vector<16x16xf32>
    %274 = vector.extract_strided_slice %247 {offsets = [0, 16], sizes = [7, 16], strides = [1, 1]} : vector<7x32xf32> to vector<7x16xf32>
    %275 = vector.extract_strided_slice %252 {offsets = [0, 16], sizes = [7, 16], strides = [1, 1]} : vector<7x32xf32> to vector<7x16xf32>
    %276 = tpu.transpose %274, [1, 0] : vector<7x16xf32> -> vector<16x7xf32>
    %cst_125 = arith.constant dense<0.000000e+00> : vector<16x7xf32>
    %277 = tpu.matmul %273, %276, %cst_125 {dimension_numbers = #tpu.dot_dimension_numbers<[1], [0], [0], [1], [0, 0, 1, 1], [], []>} : vector<16x16xf32>, vector<16x7xf32>, vector<16x7xf32> -> vector<16x7xf32>
    %cst_126 = arith.constant 2.500000e-01 : f32
    %278 = vector.broadcast %cst_126 : f32 to vector<16x7xf32>
    %279 = arith.mulf %277, %278 : vector<16x7xf32>
    %cst_127 = arith.constant dense<0xFF800000> : vector<16xf32>
    %280 = vector.multi_reduction <maximumf>, %279, %cst_127 [1] : vector<16x7xf32> to vector<16xf32>
    %281 = vector.shape_cast %280 : vector<16xf32> to vector<16x1xf32>
    %282 = vector.broadcast %281 : vector<16x1xf32> to vector<16x7xf32>
    %283 = arith.subf %279, %282 : vector<16x7xf32>
    %284 = math.exp %283 : vector<16x7xf32>
    %cst_128 = arith.constant dense<0.000000e+00> : vector<16xf32>
    %285 = vector.multi_reduction <add>, %284, %cst_128 [1] : vector<16x7xf32> to vector<16xf32>
    %286 = vector.shape_cast %285 : vector<16xf32> to vector<16x1xf32>
    %287 = tpu.reciprocal %286 {approx = true} : vector<16x1xf32> -> vector<16x1xf32>
    %288 = vector.broadcast %287 : vector<16x1xf32> to vector<16x7xf32>
    %289 = arith.mulf %284, %288 : vector<16x7xf32>
    %cst_129 = arith.constant dense<0.000000e+00> : vector<16x16xf32>
    %290 = tpu.matmul %289, %275, %cst_129 {dimension_numbers = #tpu.dot_dimension_numbers<[1], [0], [0], [1], [0, 0, 1, 1], [], []>} : vector<16x7xf32>, vector<7x16xf32>, vector<16x16xf32> -> vector<16x16xf32>
    %291 = vector.extract_strided_slice %235 {offsets = [16, 0], sizes = [16, 32], strides = [1, 1]} : vector<32x32xf32> to vector<16x32xf32>
    %cst_130 = arith.constant dense<0.000000e+00> : vector<16x32xf32>
    %292 = tpu.matmul %290, %291, %cst_130 {dimension_numbers = #tpu.dot_dimension_numbers<[1], [0], [0], [1], [0, 0, 1, 1], [], []>} : vector<16x16xf32>, vector<16x32xf32>, vector<16x32xf32> -> vector<16x32xf32>
    %293 = arith.addf %272, %292 : vector<16x32xf32>
    %294 = vector.broadcast %237 : vector<1x32xf32> to vector<16x32xf32>
    %295 = arith.addf %293, %294 : vector<16x32xf32>
    %296 = arith.addf %7, %295 : vector<16x32xf32>
    %c3 = arith.constant 3 : index
    %c0_131 = arith.constant 0 : index
    %c0_132 = arith.constant 0 : index
    %297 = vector.load %arg9[%c3, %c0_131, %c0_132] : memref<5x1x32xf32, #tpu.memory_space<vmem>>, vector<1x1x32xf32>
    %298 = vector.shape_cast %297 : vector<1x1x32xf32> to vector<1x32xf32>
    %c3_133 = arith.constant 3 : index
    %c0_134 = arith.constant 0 : index
    %c0_135 = arith.constant 0 : index
    %299 = vector.load %arg10[%c3_133, %c0_134, %c0_135] : memref<5x1x32xf32, #tpu.memory_space<vmem>>, vector<1x1x32xf32>
    %300 = vector.shape_cast %299 : vector<1x1x32xf32> to vector<1x32xf32>
    %cst_136 = arith.constant dense<0.000000e+00> : vector<16xf32>
    %301 = vector.multi_reduction <add>, %296, %cst_136 [1] : vector<16x32xf32> to vector<16xf32>
    %302 = vector.shape_cast %301 : vector<16xf32> to vector<16x1xf32>
    %cst_137 = arith.constant 3.200000e+01 : f32
    %303 = vector.broadcast %cst_137 : f32 to vector<16x1xf32>
    %304 = arith.divf %302, %303 : vector<16x1xf32>
    %305 = vector.broadcast %304 : vector<16x1xf32> to vector<16x32xf32>
    %306 = arith.subf %296, %305 : vector<16x32xf32>
    %307 = arith.mulf %306, %306 : vector<16x32xf32>
    %cst_138 = arith.constant dense<0.000000e+00> : vector<16xf32>
    %308 = vector.multi_reduction <add>, %307, %cst_138 [1] : vector<16x32xf32> to vector<16xf32>
    %309 = vector.shape_cast %308 : vector<16xf32> to vector<16x1xf32>
    %cst_139 = arith.constant 3.200000e+01 : f32
    %310 = vector.broadcast %cst_139 : f32 to vector<16x1xf32>
    %311 = arith.divf %309, %310 : vector<16x1xf32>
    %cst_140 = arith.constant 9.99999974E-6 : f32
    %312 = vector.broadcast %cst_140 : f32 to vector<16x1xf32>
    %313 = arith.addf %311, %312 : vector<16x1xf32>
    %314 = math.rsqrt %313 : vector<16x1xf32>
    %315 = vector.broadcast %314 : vector<16x1xf32> to vector<16x32xf32>
    %316 = arith.mulf %306, %315 : vector<16x32xf32>
    %317 = vector.broadcast %298 : vector<1x32xf32> to vector<16x32xf32>
    %318 = arith.mulf %316, %317 : vector<16x32xf32>
    %319 = vector.broadcast %300 : vector<1x32xf32> to vector<16x32xf32>
    %320 = arith.addf %318, %319 : vector<16x32xf32>
    %321 = arith.addf %227, %1 : vector<7x32xf32>
    %322 = arith.addf %320, %2 : vector<16x32xf32>
    %c3_141 = arith.constant 3 : index
    %c0_142 = arith.constant 0 : index
    %c0_143 = arith.constant 0 : index
    %323 = vector.load %arg5[%c3_141, %c0_142, %c0_143] : memref<4x32x96xf32, #tpu.memory_space<vmem>>, vector<1x32x96xf32>
    %324 = vector.shape_cast %323 : vector<1x32x96xf32> to vector<32x96xf32>
    %c3_144 = arith.constant 3 : index
    %c0_145 = arith.constant 0 : index
    %c0_146 = arith.constant 0 : index
    %325 = vector.load %arg6[%c3_144, %c0_145, %c0_146] : memref<4x1x96xf32, #tpu.memory_space<vmem>>, vector<1x1x96xf32>
    %326 = vector.shape_cast %325 : vector<1x1x96xf32> to vector<1x96xf32>
    %c3_147 = arith.constant 3 : index
    %c0_148 = arith.constant 0 : index
    %c0_149 = arith.constant 0 : index
    %327 = vector.load %arg7[%c3_147, %c0_148, %c0_149] : memref<4x32x32xf32, #tpu.memory_space<vmem>>, vector<1x32x32xf32>
    %328 = vector.shape_cast %327 : vector<1x32x32xf32> to vector<32x32xf32>
    %c3_150 = arith.constant 3 : index
    %c0_151 = arith.constant 0 : index
    %c0_152 = arith.constant 0 : index
    %329 = vector.load %arg8[%c3_150, %c0_151, %c0_152] : memref<4x1x32xf32, #tpu.memory_space<vmem>>, vector<1x1x32xf32>
    %330 = vector.shape_cast %329 : vector<1x1x32xf32> to vector<1x32xf32>
    %331 = vector.extract_strided_slice %324 {offsets = [0, 0], sizes = [32, 32], strides = [1, 1]} : vector<32x96xf32> to vector<32x32xf32>
    %cst_153 = arith.constant dense<0.000000e+00> : vector<7x32xf32>
    %332 = tpu.matmul %321, %331, %cst_153 {dimension_numbers = #tpu.dot_dimension_numbers<[1], [0], [0], [1], [0, 0, 1, 1], [], []>} : vector<7x32xf32>, vector<32x32xf32>, vector<7x32xf32> -> vector<7x32xf32>
    %333 = vector.extract_strided_slice %326 {offsets = [0, 0], sizes = [1, 32], strides = [1, 1]} : vector<1x96xf32> to vector<1x32xf32>
    %334 = vector.broadcast %333 : vector<1x32xf32> to vector<7x32xf32>
    %335 = arith.addf %332, %334 : vector<7x32xf32>
    %336 = vector.extract_strided_slice %324 {offsets = [0, 32], sizes = [32, 32], strides = [1, 1]} : vector<32x96xf32> to vector<32x32xf32>
    %cst_154 = arith.constant dense<0.000000e+00> : vector<16x32xf32>
    %337 = tpu.matmul %322, %336, %cst_154 {dimension_numbers = #tpu.dot_dimension_numbers<[1], [0], [0], [1], [0, 0, 1, 1], [], []>} : vector<16x32xf32>, vector<32x32xf32>, vector<16x32xf32> -> vector<16x32xf32>
    %338 = vector.extract_strided_slice %326 {offsets = [0, 32], sizes = [1, 32], strides = [1, 1]} : vector<1x96xf32> to vector<1x32xf32>
    %339 = vector.broadcast %338 : vector<1x32xf32> to vector<16x32xf32>
    %340 = arith.addf %337, %339 : vector<16x32xf32>
    %341 = vector.extract_strided_slice %324 {offsets = [0, 64], sizes = [32, 32], strides = [1, 1]} : vector<32x96xf32> to vector<32x32xf32>
    %cst_155 = arith.constant dense<0.000000e+00> : vector<16x32xf32>
    %342 = tpu.matmul %320, %341, %cst_155 {dimension_numbers = #tpu.dot_dimension_numbers<[1], [0], [0], [1], [0, 0, 1, 1], [], []>} : vector<16x32xf32>, vector<32x32xf32>, vector<16x32xf32> -> vector<16x32xf32>
    %343 = vector.extract_strided_slice %326 {offsets = [0, 64], sizes = [1, 32], strides = [1, 1]} : vector<1x96xf32> to vector<1x32xf32>
    %344 = vector.broadcast %343 : vector<1x32xf32> to vector<16x32xf32>
    %345 = arith.addf %342, %344 : vector<16x32xf32>
    %346 = vector.extract_strided_slice %335 {offsets = [0, 0], sizes = [7, 16], strides = [1, 1]} : vector<7x32xf32> to vector<7x16xf32>
    %347 = vector.extract_strided_slice %340 {offsets = [0, 0], sizes = [16, 16], strides = [1, 1]} : vector<16x32xf32> to vector<16x16xf32>
    %348 = vector.extract_strided_slice %345 {offsets = [0, 0], sizes = [16, 16], strides = [1, 1]} : vector<16x32xf32> to vector<16x16xf32>
    %349 = tpu.transpose %347, [1, 0] : vector<16x16xf32> -> vector<16x16xf32>
    %cst_156 = arith.constant dense<0.000000e+00> : vector<7x16xf32>
    %350 = tpu.matmul %346, %349, %cst_156 {dimension_numbers = #tpu.dot_dimension_numbers<[1], [0], [0], [1], [0, 0, 1, 1], [], []>} : vector<7x16xf32>, vector<16x16xf32>, vector<7x16xf32> -> vector<7x16xf32>
    %cst_157 = arith.constant 2.500000e-01 : f32
    %351 = vector.broadcast %cst_157 : f32 to vector<7x16xf32>
    %352 = arith.mulf %350, %351 : vector<7x16xf32>
    %cst_158 = arith.constant dense<0xFF800000> : vector<7xf32>
    %353 = vector.multi_reduction <maximumf>, %352, %cst_158 [1] : vector<7x16xf32> to vector<7xf32>
    %354 = vector.shape_cast %353 : vector<7xf32> to vector<7x1xf32>
    %355 = vector.broadcast %354 : vector<7x1xf32> to vector<7x16xf32>
    %356 = arith.subf %352, %355 : vector<7x16xf32>
    %357 = math.exp %356 : vector<7x16xf32>
    %cst_159 = arith.constant dense<0.000000e+00> : vector<7xf32>
    %358 = vector.multi_reduction <add>, %357, %cst_159 [1] : vector<7x16xf32> to vector<7xf32>
    %359 = vector.shape_cast %358 : vector<7xf32> to vector<7x1xf32>
    %360 = tpu.reciprocal %359 {approx = true} : vector<7x1xf32> -> vector<7x1xf32>
    %361 = vector.broadcast %360 : vector<7x1xf32> to vector<7x16xf32>
    %362 = arith.mulf %357, %361 : vector<7x16xf32>
    %cst_160 = arith.constant dense<0.000000e+00> : vector<7x16xf32>
    %363 = tpu.matmul %362, %348, %cst_160 {dimension_numbers = #tpu.dot_dimension_numbers<[1], [0], [0], [1], [0, 0, 1, 1], [], []>} : vector<7x16xf32>, vector<16x16xf32>, vector<7x16xf32> -> vector<7x16xf32>
    %364 = vector.extract_strided_slice %328 {offsets = [0, 0], sizes = [16, 32], strides = [1, 1]} : vector<32x32xf32> to vector<16x32xf32>
    %cst_161 = arith.constant dense<0.000000e+00> : vector<7x32xf32>
    %365 = tpu.matmul %363, %364, %cst_161 {dimension_numbers = #tpu.dot_dimension_numbers<[1], [0], [0], [1], [0, 0, 1, 1], [], []>} : vector<7x16xf32>, vector<16x32xf32>, vector<7x32xf32> -> vector<7x32xf32>
    %366 = vector.extract_strided_slice %335 {offsets = [0, 16], sizes = [7, 16], strides = [1, 1]} : vector<7x32xf32> to vector<7x16xf32>
    %367 = vector.extract_strided_slice %340 {offsets = [0, 16], sizes = [16, 16], strides = [1, 1]} : vector<16x32xf32> to vector<16x16xf32>
    %368 = vector.extract_strided_slice %345 {offsets = [0, 16], sizes = [16, 16], strides = [1, 1]} : vector<16x32xf32> to vector<16x16xf32>
    %369 = tpu.transpose %367, [1, 0] : vector<16x16xf32> -> vector<16x16xf32>
    %cst_162 = arith.constant dense<0.000000e+00> : vector<7x16xf32>
    %370 = tpu.matmul %366, %369, %cst_162 {dimension_numbers = #tpu.dot_dimension_numbers<[1], [0], [0], [1], [0, 0, 1, 1], [], []>} : vector<7x16xf32>, vector<16x16xf32>, vector<7x16xf32> -> vector<7x16xf32>
    %cst_163 = arith.constant 2.500000e-01 : f32
    %371 = vector.broadcast %cst_163 : f32 to vector<7x16xf32>
    %372 = arith.mulf %370, %371 : vector<7x16xf32>
    %cst_164 = arith.constant dense<0xFF800000> : vector<7xf32>
    %373 = vector.multi_reduction <maximumf>, %372, %cst_164 [1] : vector<7x16xf32> to vector<7xf32>
    %374 = vector.shape_cast %373 : vector<7xf32> to vector<7x1xf32>
    %375 = vector.broadcast %374 : vector<7x1xf32> to vector<7x16xf32>
    %376 = arith.subf %372, %375 : vector<7x16xf32>
    %377 = math.exp %376 : vector<7x16xf32>
    %cst_165 = arith.constant dense<0.000000e+00> : vector<7xf32>
    %378 = vector.multi_reduction <add>, %377, %cst_165 [1] : vector<7x16xf32> to vector<7xf32>
    %379 = vector.shape_cast %378 : vector<7xf32> to vector<7x1xf32>
    %380 = tpu.reciprocal %379 {approx = true} : vector<7x1xf32> -> vector<7x1xf32>
    %381 = vector.broadcast %380 : vector<7x1xf32> to vector<7x16xf32>
    %382 = arith.mulf %377, %381 : vector<7x16xf32>
    %cst_166 = arith.constant dense<0.000000e+00> : vector<7x16xf32>
    %383 = tpu.matmul %382, %368, %cst_166 {dimension_numbers = #tpu.dot_dimension_numbers<[1], [0], [0], [1], [0, 0, 1, 1], [], []>} : vector<7x16xf32>, vector<16x16xf32>, vector<7x16xf32> -> vector<7x16xf32>
    %384 = vector.extract_strided_slice %328 {offsets = [16, 0], sizes = [16, 32], strides = [1, 1]} : vector<32x32xf32> to vector<16x32xf32>
    %cst_167 = arith.constant dense<0.000000e+00> : vector<7x32xf32>
    %385 = tpu.matmul %383, %384, %cst_167 {dimension_numbers = #tpu.dot_dimension_numbers<[1], [0], [0], [1], [0, 0, 1, 1], [], []>} : vector<7x16xf32>, vector<16x32xf32>, vector<7x32xf32> -> vector<7x32xf32>
    %386 = arith.addf %365, %385 : vector<7x32xf32>
    %387 = vector.broadcast %330 : vector<1x32xf32> to vector<7x32xf32>
    %388 = arith.addf %386, %387 : vector<7x32xf32>
    %389 = arith.addf %227, %388 : vector<7x32xf32>
    %c4 = arith.constant 4 : index
    %c0_168 = arith.constant 0 : index
    %c0_169 = arith.constant 0 : index
    %390 = vector.load %arg9[%c4, %c0_168, %c0_169] : memref<5x1x32xf32, #tpu.memory_space<vmem>>, vector<1x1x32xf32>
    %391 = vector.shape_cast %390 : vector<1x1x32xf32> to vector<1x32xf32>
    %c4_170 = arith.constant 4 : index
    %c0_171 = arith.constant 0 : index
    %c0_172 = arith.constant 0 : index
    %392 = vector.load %arg10[%c4_170, %c0_171, %c0_172] : memref<5x1x32xf32, #tpu.memory_space<vmem>>, vector<1x1x32xf32>
    %393 = vector.shape_cast %392 : vector<1x1x32xf32> to vector<1x32xf32>
    %cst_173 = arith.constant dense<0.000000e+00> : vector<7xf32>
    %394 = vector.multi_reduction <add>, %389, %cst_173 [1] : vector<7x32xf32> to vector<7xf32>
    %395 = vector.shape_cast %394 : vector<7xf32> to vector<7x1xf32>
    %cst_174 = arith.constant 3.200000e+01 : f32
    %396 = vector.broadcast %cst_174 : f32 to vector<7x1xf32>
    %397 = arith.divf %395, %396 : vector<7x1xf32>
    %398 = vector.broadcast %397 : vector<7x1xf32> to vector<7x32xf32>
    %399 = arith.subf %389, %398 : vector<7x32xf32>
    %400 = arith.mulf %399, %399 : vector<7x32xf32>
    %cst_175 = arith.constant dense<0.000000e+00> : vector<7xf32>
    %401 = vector.multi_reduction <add>, %400, %cst_175 [1] : vector<7x32xf32> to vector<7xf32>
    %402 = vector.shape_cast %401 : vector<7xf32> to vector<7x1xf32>
    %cst_176 = arith.constant 3.200000e+01 : f32
    %403 = vector.broadcast %cst_176 : f32 to vector<7x1xf32>
    %404 = arith.divf %402, %403 : vector<7x1xf32>
    %cst_177 = arith.constant 9.99999974E-6 : f32
    %405 = vector.broadcast %cst_177 : f32 to vector<7x1xf32>
    %406 = arith.addf %404, %405 : vector<7x1xf32>
    %407 = math.rsqrt %406 : vector<7x1xf32>
    %408 = vector.broadcast %407 : vector<7x1xf32> to vector<7x32xf32>
    %409 = arith.mulf %399, %408 : vector<7x32xf32>
    %410 = vector.broadcast %391 : vector<1x32xf32> to vector<7x32xf32>
    %411 = arith.mulf %409, %410 : vector<7x32xf32>
    %412 = vector.broadcast %393 : vector<1x32xf32> to vector<7x32xf32>
    %413 = arith.addf %411, %412 : vector<7x32xf32>
    %c0_178 = arith.constant 0 : index
    %c0_179 = arith.constant 0 : index
    %c0_180 = arith.constant 0 : index
    %414 = vector.load %arg15[%c0_178, %c0_179, %c0_180] : memref<1x7x32xf32, #tpu.memory_space<vmem>>, vector<1x7x32xf32>
    %415 = vector.shape_cast %414 : vector<1x7x32xf32> to vector<7x32xf32>
    %416 = vector.shape_cast %413 : vector<7x32xf32> to vector<1x7x32xf32>
    tpu.vector_store %arg15[%c0_178, %c0_179, %c0_180], %416 {strides = array<i32>} : memref<1x7x32xf32, #tpu.memory_space<vmem>>, vector<1x7x32xf32>,
    %c0_181 = arith.constant 0 : index
    %c0_182 = arith.constant 0 : index
    %c0_183 = arith.constant 0 : index
    %417 = vector.load %arg16[%c0_181, %c0_182, %c0_183] : memref<1x16x32xf32, #tpu.memory_space<vmem>>, vector<1x16x32xf32>
    %418 = vector.shape_cast %417 : vector<1x16x32xf32> to vector<16x32xf32>
    %419 = vector.shape_cast %320 : vector<16x32xf32> to vector<1x16x32xf32>
    tpu.vector_store %arg16[%c0_181, %c0_182, %c0_183], %419 {strides = array<i32>} : memref<1x16x32xf32, #tpu.memory_space<vmem>>, vector<1x16x32xf32>,
    return
  }
  func.func @transform_0(%arg0: i32) -> (i32, i32, i32) {
    %c0_i32 = arith.constant 0 : i32
    %c0_i32_0 = arith.constant 0 : i32
    %c0_i32_1 = arith.constant 0 : i32
    return %arg0, %c0_i32, %c0_i32_0 : i32, i32, i32
  }
  func.func @transform_1(%arg0: i32) -> (i32, i32, i32) {
    %c0_i32 = arith.constant 0 : i32
    %c0_i32_0 = arith.constant 0 : i32
    %c0_i32_1 = arith.constant 0 : i32
    return %arg0, %c0_i32, %c0_i32_0 : i32, i32, i32
  }
  func.func @transform_2(%arg0: i32) -> (i32, i32) {
    %c0_i32 = arith.constant 0 : i32
    %c0_i32_0 = arith.constant 0 : i32
    %c0_i32_1 = arith.constant 0 : i32
    return %c0_i32, %c0_i32_0 : i32, i32
  }
  func.func @transform_3(%arg0: i32) -> (i32, i32) {
    %c0_i32 = arith.constant 0 : i32
    %c0_i32_0 = arith.constant 0 : i32
    %c0_i32_1 = arith.constant 0 : i32
    return %c0_i32, %c0_i32_0 : i32, i32
  }
  func.func @transform_4(%arg0: i32) -> (i32, i32, i32) {
    %c0_i32 = arith.constant 0 : i32
    %c0_i32_0 = arith.constant 0 : i32
    %c0_i32_1 = arith.constant 0 : i32
    %c0_i32_2 = arith.constant 0 : i32
    return %c0_i32, %c0_i32_0, %c0_i32_1 : i32, i32, i32
  }
  func.func @transform_5(%arg0: i32) -> (i32, i32, i32) {
    %c0_i32 = arith.constant 0 : i32
    %c0_i32_0 = arith.constant 0 : i32
    %c0_i32_1 = arith.constant 0 : i32
    %c0_i32_2 = arith.constant 0 : i32
    return %c0_i32, %c0_i32_0, %c0_i32_1 : i32, i32, i32
  }
  func.func @transform_6(%arg0: i32) -> (i32, i32, i32) {
    %c0_i32 = arith.constant 0 : i32
    %c0_i32_0 = arith.constant 0 : i32
    %c0_i32_1 = arith.constant 0 : i32
    %c0_i32_2 = arith.constant 0 : i32
    return %c0_i32, %c0_i32_0, %c0_i32_1 : i32, i32, i32
  }
  func.func @transform_7(%arg0: i32) -> (i32, i32, i32) {
    %c0_i32 = arith.constant 0 : i32
    %c0_i32_0 = arith.constant 0 : i32
    %c0_i32_1 = arith.constant 0 : i32
    %c0_i32_2 = arith.constant 0 : i32
    return %c0_i32, %c0_i32_0, %c0_i32_1 : i32, i32, i32
  }
  func.func @transform_8(%arg0: i32) -> (i32, i32, i32) {
    %c0_i32 = arith.constant 0 : i32
    %c0_i32_0 = arith.constant 0 : i32
    %c0_i32_1 = arith.constant 0 : i32
    %c0_i32_2 = arith.constant 0 : i32
    return %c0_i32, %c0_i32_0, %c0_i32_1 : i32, i32, i32
  }
  func.func @transform_9(%arg0: i32) -> (i32, i32, i32) {
    %c0_i32 = arith.constant 0 : i32
    %c0_i32_0 = arith.constant 0 : i32
    %c0_i32_1 = arith.constant 0 : i32
    %c0_i32_2 = arith.constant 0 : i32
    return %c0_i32, %c0_i32_0, %c0_i32_1 : i32, i32, i32
  }
  func.func @transform_10(%arg0: i32) -> (i32, i32) {
    %c0_i32 = arith.constant 0 : i32
    %c0_i32_0 = arith.constant 0 : i32
    %c0_i32_1 = arith.constant 0 : i32
    return %c0_i32, %c0_i32_0 : i32, i32
  }
  func.func @transform_11(%arg0: i32) -> (i32, i32) {
    %c0_i32 = arith.constant 0 : i32
    %c0_i32_0 = arith.constant 0 : i32
    %c0_i32_1 = arith.constant 0 : i32
    return %c0_i32, %c0_i32_0 : i32, i32
  }
  func.func @transform_12(%arg0: i32) -> (i32, i32) {
    %c0_i32 = arith.constant 0 : i32
    %c0_i32_0 = arith.constant 0 : i32
    %c0_i32_1 = arith.constant 0 : i32
    return %c0_i32, %c0_i32_0 : i32, i32
  }
  func.func @transform_13(%arg0: i32) -> (i32, i32) {
    %c0_i32 = arith.constant 0 : i32
    %c0_i32_0 = arith.constant 0 : i32
    %c0_i32_1 = arith.constant 0 : i32
    return %c0_i32, %c0_i32_0 : i32, i32
  }
  func.func @transform_14(%arg0: i32) -> (i32, i32, i32) {
    %c0_i32 = arith.constant 0 : i32
    %c0_i32_0 = arith.constant 0 : i32
    %c0_i32_1 = arith.constant 0 : i32
    return %arg0, %c0_i32, %c0_i32_0 : i32, i32, i32
  }
  func.func @transform_15(%arg0: i32) -> (i32, i32, i32) {
    %c0_i32 = arith.constant 0 : i32
    %c0_i32_0 = arith.constant 0 : i32
    %c0_i32_1 = arith.constant 0 : i32
    return %arg0, %c0_i32, %c0_i32_0 : i32, i32, i32
  }
}

module attributes {stable_mosaic.version = 11 : i64} {
  func.func @_mask_head_kernel(%arg0: i32, %arg1: memref<1x7x32xf32, #tpu.memory_space<vmem>>, %arg2: memref<1x16x32xf32, #tpu.memory_space<vmem>>, %arg3: memref<32x32xf32, #tpu.memory_space<vmem>>, %arg4: memref<1x32xf32, #tpu.memory_space<vmem>>, %arg5: memref<1x8xf32, #tpu.memory_space<vmem>>, %arg6: memref<1x8xf32, #tpu.memory_space<vmem>>, %arg7: memref<8x16xf32, #tpu.memory_space<vmem>>, %arg8: memref<1x16xf32, #tpu.memory_space<vmem>>, %arg9: memref<4x32x32xf32, #tpu.memory_space<vmem>>, %arg10: memref<4x1x32xf32, #tpu.memory_space<vmem>>, %arg11: memref<4x32x32xf32, #tpu.memory_space<vmem>>, %arg12: memref<4x1x32xf32, #tpu.memory_space<vmem>>, %arg13: memref<4x32x4xf32, #tpu.memory_space<vmem>>, %arg14: memref<4x1x4xf32, #tpu.memory_space<vmem>>, %arg15: memref<32x64xf32, #tpu.memory_space<vmem>>, %arg16: memref<1x64xf32, #tpu.memory_space<vmem>>, %arg17: memref<64x64xf32, #tpu.memory_space<vmem>>, %arg18: memref<1x64xf32, #tpu.memory_space<vmem>>, %arg19: memref<64x4xf32, #tpu.memory_space<vmem>>, %arg20: memref<1x4xf32, #tpu.memory_space<vmem>>, %arg21: memref<1x256x4xf32, #tpu.memory_space<vmem>>, %arg22: memref<1x1x4xf32, #tpu.memory_space<vmem>>) attributes {dimension_semantics = [#tpu.dimension_semantics<parallel>], iteration_bounds = array<i64: 2>, scalar_prefetch = 0 : i64, scratch_operands = 0 : i64, tpu.core_type = #tpu.core_type<tc>, window_params = [{transform_indices = @transform_0, window_bounds = array<i64: 1, 7, 32>}, {transform_indices = @transform_1, window_bounds = array<i64: 1, 16, 32>}, {pipeline_mode = #tpu.pipeline_mode<synchronous>, transform_indices = @transform_2, window_bounds = array<i64: 32, 32>}, {pipeline_mode = #tpu.pipeline_mode<synchronous>, transform_indices = @transform_3, window_bounds = array<i64: 1, 32>}, {pipeline_mode = #tpu.pipeline_mode<synchronous>, transform_indices = @transform_4, window_bounds = array<i64: 1, 8>}, {pipeline_mode = #tpu.pipeline_mode<synchronous>, transform_indices = @transform_5, window_bounds = array<i64: 1, 8>}, {pipeline_mode = #tpu.pipeline_mode<synchronous>, transform_indices = @transform_6, window_bounds = array<i64: 8, 16>}, {pipeline_mode = #tpu.pipeline_mode<synchronous>, transform_indices = @transform_7, window_bounds = array<i64: 1, 16>}, {pipeline_mode = #tpu.pipeline_mode<synchronous>, transform_indices = @transform_8, window_bounds = array<i64: 4, 32, 32>}, {pipeline_mode = #tpu.pipeline_mode<synchronous>, transform_indices = @transform_9, window_bounds = array<i64: 4, 1, 32>}, {pipeline_mode = #tpu.pipeline_mode<synchronous>, transform_indices = @transform_10, window_bounds = array<i64: 4, 32, 32>}, {pipeline_mode = #tpu.pipeline_mode<synchronous>, transform_indices = @transform_11, window_bounds = array<i64: 4, 1, 32>}, {pipeline_mode = #tpu.pipeline_mode<synchronous>, transform_indices = @transform_12, window_bounds = array<i64: 4, 32, 4>}, {pipeline_mode = #tpu.pipeline_mode<synchronous>, transform_indices = @transform_13, window_bounds = array<i64: 4, 1, 4>}, {pipeline_mode = #tpu.pipeline_mode<synchronous>, transform_indices = @transform_14, window_bounds = array<i64: 32, 64>}, {pipeline_mode = #tpu.pipeline_mode<synchronous>, transform_indices = @transform_15, window_bounds = array<i64: 1, 64>}, {pipeline_mode = #tpu.pipeline_mode<synchronous>, transform_indices = @transform_16, window_bounds = array<i64: 64, 64>}, {pipeline_mode = #tpu.pipeline_mode<synchronous>, transform_indices = @transform_17, window_bounds = array<i64: 1, 64>}, {pipeline_mode = #tpu.pipeline_mode<synchronous>, transform_indices = @transform_18, window_bounds = array<i64: 64, 4>}, {pipeline_mode = #tpu.pipeline_mode<synchronous>, transform_indices = @transform_19, window_bounds = array<i64: 1, 4>}, {transform_indices = @transform_20, window_bounds = array<i64: 1, 256, 4>}, {transform_indices = @transform_21, window_bounds = array<i64: 1, 1, 4>}]} {
    %c0 = arith.constant 0 : index
    %c0_0 = arith.constant 0 : index
    %c0_1 = arith.constant 0 : index
    %0 = vector.load %arg1[%c0, %c0_0, %c0_1] : memref<1x7x32xf32, #tpu.memory_space<vmem>>, vector<1x7x32xf32>
    %1 = vector.shape_cast %0 : vector<1x7x32xf32> to vector<7x32xf32>
    %c0_2 = arith.constant 0 : index
    %c0_3 = arith.constant 0 : index
    %c0_4 = arith.constant 0 : index
    %2 = vector.load %arg2[%c0_2, %c0_3, %c0_4] : memref<1x16x32xf32, #tpu.memory_space<vmem>>, vector<1x16x32xf32>
    %3 = vector.shape_cast %2 : vector<1x16x32xf32> to vector<16x32xf32>
    %4 = vector.extract_strided_slice %1 {offsets = [1, 0], sizes = [1, 32], strides = [1, 1]} : vector<7x32xf32> to vector<1x32xf32>
    %c0_5 = arith.constant 0 : index
    %c0_6 = arith.constant 0 : index
    %c0_7 = arith.constant 0 : index
    %5 = vector.load %arg9[%c0_5, %c0_6, %c0_7] : memref<4x32x32xf32, #tpu.memory_space<vmem>>, vector<1x32x32xf32>
    %6 = vector.shape_cast %5 : vector<1x32x32xf32> to vector<32x32xf32>
    %cst = arith.constant dense<0.000000e+00> : vector<1x32xf32>
    %7 = tpu.matmul %4, %6, %cst {dimension_numbers = #tpu.dot_dimension_numbers<[1], [0], [0], [1], [0, 0, 1, 1], [], []>} : vector<1x32xf32>, vector<32x32xf32>, vector<1x32xf32> -> vector<1x32xf32>
    %c0_8 = arith.constant 0 : index
    %c0_9 = arith.constant 0 : index
    %c0_10 = arith.constant 0 : index
    %8 = vector.load %arg10[%c0_8, %c0_9, %c0_10] : memref<4x1x32xf32, #tpu.memory_space<vmem>>, vector<1x1x32xf32>
    %9 = vector.shape_cast %8 : vector<1x1x32xf32> to vector<1x32xf32>
    %10 = arith.addf %7, %9 : vector<1x32xf32>
    %cst_11 = arith.constant 0.000000e+00 : f32
    %11 = vector.broadcast %cst_11 : f32 to vector<1x32xf32>
    %12 = arith.maximumf %10, %11 : vector<1x32xf32>
    %c0_12 = arith.constant 0 : index
    %c0_13 = arith.constant 0 : index
    %c0_14 = arith.constant 0 : index
    %13 = vector.load %arg11[%c0_12, %c0_13, %c0_14] : memref<4x32x32xf32, #tpu.memory_space<vmem>>, vector<1x32x32xf32>
    %14 = vector.shape_cast %13 : vector<1x32x32xf32> to vector<32x32xf32>
    %cst_15 = arith.constant dense<0.000000e+00> : vector<1x32xf32>
    %15 = tpu.matmul %12, %14, %cst_15 {dimension_numbers = #tpu.dot_dimension_numbers<[1], [0], [0], [1], [0, 0, 1, 1], [], []>} : vector<1x32xf32>, vector<32x32xf32>, vector<1x32xf32> -> vector<1x32xf32>
    %c0_16 = arith.constant 0 : index
    %c0_17 = arith.constant 0 : index
    %c0_18 = arith.constant 0 : index
    %16 = vector.load %arg12[%c0_16, %c0_17, %c0_18] : memref<4x1x32xf32, #tpu.memory_space<vmem>>, vector<1x1x32xf32>
    %17 = vector.shape_cast %16 : vector<1x1x32xf32> to vector<1x32xf32>
    %18 = arith.addf %15, %17 : vector<1x32xf32>
    %cst_19 = arith.constant 0.000000e+00 : f32
    %19 = vector.broadcast %cst_19 : f32 to vector<1x32xf32>
    %20 = arith.maximumf %18, %19 : vector<1x32xf32>
    %c0_20 = arith.constant 0 : index
    %c0_21 = arith.constant 0 : index
    %c0_22 = arith.constant 0 : index
    %21 = vector.load %arg13[%c0_20, %c0_21, %c0_22] : memref<4x32x4xf32, #tpu.memory_space<vmem>>, vector<1x32x4xf32>
    %22 = vector.shape_cast %21 : vector<1x32x4xf32> to vector<32x4xf32>
    %cst_23 = arith.constant dense<0.000000e+00> : vector<1x4xf32>
    %23 = tpu.matmul %20, %22, %cst_23 {dimension_numbers = #tpu.dot_dimension_numbers<[1], [0], [0], [1], [0, 0, 1, 1], [], []>} : vector<1x32xf32>, vector<32x4xf32>, vector<1x4xf32> -> vector<1x4xf32>
    %c0_24 = arith.constant 0 : index
    %c0_25 = arith.constant 0 : index
    %c0_26 = arith.constant 0 : index
    %24 = vector.load %arg14[%c0_24, %c0_25, %c0_26] : memref<4x1x4xf32, #tpu.memory_space<vmem>>, vector<1x1x4xf32>
    %25 = vector.shape_cast %24 : vector<1x1x4xf32> to vector<1x4xf32>
    %26 = arith.addf %23, %25 : vector<1x4xf32>
    %27 = vector.extract_strided_slice %1 {offsets = [2, 0], sizes = [1, 32], strides = [1, 1]} : vector<7x32xf32> to vector<1x32xf32>
    %c1 = arith.constant 1 : index
    %c0_27 = arith.constant 0 : index
    %c0_28 = arith.constant 0 : index
    %28 = vector.load %arg9[%c1, %c0_27, %c0_28] : memref<4x32x32xf32, #tpu.memory_space<vmem>>, vector<1x32x32xf32>
    %29 = vector.shape_cast %28 : vector<1x32x32xf32> to vector<32x32xf32>
    %cst_29 = arith.constant dense<0.000000e+00> : vector<1x32xf32>
    %30 = tpu.matmul %27, %29, %cst_29 {dimension_numbers = #tpu.dot_dimension_numbers<[1], [0], [0], [1], [0, 0, 1, 1], [], []>} : vector<1x32xf32>, vector<32x32xf32>, vector<1x32xf32> -> vector<1x32xf32>
    %c1_30 = arith.constant 1 : index
    %c0_31 = arith.constant 0 : index
    %c0_32 = arith.constant 0 : index
    %31 = vector.load %arg10[%c1_30, %c0_31, %c0_32] : memref<4x1x32xf32, #tpu.memory_space<vmem>>, vector<1x1x32xf32>
    %32 = vector.shape_cast %31 : vector<1x1x32xf32> to vector<1x32xf32>
    %33 = arith.addf %30, %32 : vector<1x32xf32>
    %cst_33 = arith.constant 0.000000e+00 : f32
    %34 = vector.broadcast %cst_33 : f32 to vector<1x32xf32>
    %35 = arith.maximumf %33, %34 : vector<1x32xf32>
    %c1_34 = arith.constant 1 : index
    %c0_35 = arith.constant 0 : index
    %c0_36 = arith.constant 0 : index
    %36 = vector.load %arg11[%c1_34, %c0_35, %c0_36] : memref<4x32x32xf32, #tpu.memory_space<vmem>>, vector<1x32x32xf32>
    %37 = vector.shape_cast %36 : vector<1x32x32xf32> to vector<32x32xf32>
    %cst_37 = arith.constant dense<0.000000e+00> : vector<1x32xf32>
    %38 = tpu.matmul %35, %37, %cst_37 {dimension_numbers = #tpu.dot_dimension_numbers<[1], [0], [0], [1], [0, 0, 1, 1], [], []>} : vector<1x32xf32>, vector<32x32xf32>, vector<1x32xf32> -> vector<1x32xf32>
    %c1_38 = arith.constant 1 : index
    %c0_39 = arith.constant 0 : index
    %c0_40 = arith.constant 0 : index
    %39 = vector.load %arg12[%c1_38, %c0_39, %c0_40] : memref<4x1x32xf32, #tpu.memory_space<vmem>>, vector<1x1x32xf32>
    %40 = vector.shape_cast %39 : vector<1x1x32xf32> to vector<1x32xf32>
    %41 = arith.addf %38, %40 : vector<1x32xf32>
    %cst_41 = arith.constant 0.000000e+00 : f32
    %42 = vector.broadcast %cst_41 : f32 to vector<1x32xf32>
    %43 = arith.maximumf %41, %42 : vector<1x32xf32>
    %c1_42 = arith.constant 1 : index
    %c0_43 = arith.constant 0 : index
    %c0_44 = arith.constant 0 : index
    %44 = vector.load %arg13[%c1_42, %c0_43, %c0_44] : memref<4x32x4xf32, #tpu.memory_space<vmem>>, vector<1x32x4xf32>
    %45 = vector.shape_cast %44 : vector<1x32x4xf32> to vector<32x4xf32>
    %cst_45 = arith.constant dense<0.000000e+00> : vector<1x4xf32>
    %46 = tpu.matmul %43, %45, %cst_45 {dimension_numbers = #tpu.dot_dimension_numbers<[1], [0], [0], [1], [0, 0, 1, 1], [], []>} : vector<1x32xf32>, vector<32x4xf32>, vector<1x4xf32> -> vector<1x4xf32>
    %c1_46 = arith.constant 1 : index
    %c0_47 = arith.constant 0 : index
    %c0_48 = arith.constant 0 : index
    %47 = vector.load %arg14[%c1_46, %c0_47, %c0_48] : memref<4x1x4xf32, #tpu.memory_space<vmem>>, vector<1x1x4xf32>
    %48 = vector.shape_cast %47 : vector<1x1x4xf32> to vector<1x4xf32>
    %49 = arith.addf %46, %48 : vector<1x4xf32>
    %50 = vector.extract_strided_slice %1 {offsets = [3, 0], sizes = [1, 32], strides = [1, 1]} : vector<7x32xf32> to vector<1x32xf32>
    %c2 = arith.constant 2 : index
    %c0_49 = arith.constant 0 : index
    %c0_50 = arith.constant 0 : index
    %51 = vector.load %arg9[%c2, %c0_49, %c0_50] : memref<4x32x32xf32, #tpu.memory_space<vmem>>, vector<1x32x32xf32>
    %52 = vector.shape_cast %51 : vector<1x32x32xf32> to vector<32x32xf32>
    %cst_51 = arith.constant dense<0.000000e+00> : vector<1x32xf32>
    %53 = tpu.matmul %50, %52, %cst_51 {dimension_numbers = #tpu.dot_dimension_numbers<[1], [0], [0], [1], [0, 0, 1, 1], [], []>} : vector<1x32xf32>, vector<32x32xf32>, vector<1x32xf32> -> vector<1x32xf32>
    %c2_52 = arith.constant 2 : index
    %c0_53 = arith.constant 0 : index
    %c0_54 = arith.constant 0 : index
    %54 = vector.load %arg10[%c2_52, %c0_53, %c0_54] : memref<4x1x32xf32, #tpu.memory_space<vmem>>, vector<1x1x32xf32>
    %55 = vector.shape_cast %54 : vector<1x1x32xf32> to vector<1x32xf32>
    %56 = arith.addf %53, %55 : vector<1x32xf32>
    %cst_55 = arith.constant 0.000000e+00 : f32
    %57 = vector.broadcast %cst_55 : f32 to vector<1x32xf32>
    %58 = arith.maximumf %56, %57 : vector<1x32xf32>
    %c2_56 = arith.constant 2 : index
    %c0_57 = arith.constant 0 : index
    %c0_58 = arith.constant 0 : index
    %59 = vector.load %arg11[%c2_56, %c0_57, %c0_58] : memref<4x32x32xf32, #tpu.memory_space<vmem>>, vector<1x32x32xf32>
    %60 = vector.shape_cast %59 : vector<1x32x32xf32> to vector<32x32xf32>
    %cst_59 = arith.constant dense<0.000000e+00> : vector<1x32xf32>
    %61 = tpu.matmul %58, %60, %cst_59 {dimension_numbers = #tpu.dot_dimension_numbers<[1], [0], [0], [1], [0, 0, 1, 1], [], []>} : vector<1x32xf32>, vector<32x32xf32>, vector<1x32xf32> -> vector<1x32xf32>
    %c2_60 = arith.constant 2 : index
    %c0_61 = arith.constant 0 : index
    %c0_62 = arith.constant 0 : index
    %62 = vector.load %arg12[%c2_60, %c0_61, %c0_62] : memref<4x1x32xf32, #tpu.memory_space<vmem>>, vector<1x1x32xf32>
    %63 = vector.shape_cast %62 : vector<1x1x32xf32> to vector<1x32xf32>
    %64 = arith.addf %61, %63 : vector<1x32xf32>
    %cst_63 = arith.constant 0.000000e+00 : f32
    %65 = vector.broadcast %cst_63 : f32 to vector<1x32xf32>
    %66 = arith.maximumf %64, %65 : vector<1x32xf32>
    %c2_64 = arith.constant 2 : index
    %c0_65 = arith.constant 0 : index
    %c0_66 = arith.constant 0 : index
    %67 = vector.load %arg13[%c2_64, %c0_65, %c0_66] : memref<4x32x4xf32, #tpu.memory_space<vmem>>, vector<1x32x4xf32>
    %68 = vector.shape_cast %67 : vector<1x32x4xf32> to vector<32x4xf32>
    %cst_67 = arith.constant dense<0.000000e+00> : vector<1x4xf32>
    %69 = tpu.matmul %66, %68, %cst_67 {dimension_numbers = #tpu.dot_dimension_numbers<[1], [0], [0], [1], [0, 0, 1, 1], [], []>} : vector<1x32xf32>, vector<32x4xf32>, vector<1x4xf32> -> vector<1x4xf32>
    %c2_68 = arith.constant 2 : index
    %c0_69 = arith.constant 0 : index
    %c0_70 = arith.constant 0 : index
    %70 = vector.load %arg14[%c2_68, %c0_69, %c0_70] : memref<4x1x4xf32, #tpu.memory_space<vmem>>, vector<1x1x4xf32>
    %71 = vector.shape_cast %70 : vector<1x1x4xf32> to vector<1x4xf32>
    %72 = arith.addf %69, %71 : vector<1x4xf32>
    %73 = vector.extract_strided_slice %1 {offsets = [4, 0], sizes = [1, 32], strides = [1, 1]} : vector<7x32xf32> to vector<1x32xf32>
    %c3 = arith.constant 3 : index
    %c0_71 = arith.constant 0 : index
    %c0_72 = arith.constant 0 : index
    %74 = vector.load %arg9[%c3, %c0_71, %c0_72] : memref<4x32x32xf32, #tpu.memory_space<vmem>>, vector<1x32x32xf32>
    %75 = vector.shape_cast %74 : vector<1x32x32xf32> to vector<32x32xf32>
    %cst_73 = arith.constant dense<0.000000e+00> : vector<1x32xf32>
    %76 = tpu.matmul %73, %75, %cst_73 {dimension_numbers = #tpu.dot_dimension_numbers<[1], [0], [0], [1], [0, 0, 1, 1], [], []>} : vector<1x32xf32>, vector<32x32xf32>, vector<1x32xf32> -> vector<1x32xf32>
    %c3_74 = arith.constant 3 : index
    %c0_75 = arith.constant 0 : index
    %c0_76 = arith.constant 0 : index
    %77 = vector.load %arg10[%c3_74, %c0_75, %c0_76] : memref<4x1x32xf32, #tpu.memory_space<vmem>>, vector<1x1x32xf32>
    %78 = vector.shape_cast %77 : vector<1x1x32xf32> to vector<1x32xf32>
    %79 = arith.addf %76, %78 : vector<1x32xf32>
    %cst_77 = arith.constant 0.000000e+00 : f32
    %80 = vector.broadcast %cst_77 : f32 to vector<1x32xf32>
    %81 = arith.maximumf %79, %80 : vector<1x32xf32>
    %c3_78 = arith.constant 3 : index
    %c0_79 = arith.constant 0 : index
    %c0_80 = arith.constant 0 : index
    %82 = vector.load %arg11[%c3_78, %c0_79, %c0_80] : memref<4x32x32xf32, #tpu.memory_space<vmem>>, vector<1x32x32xf32>
    %83 = vector.shape_cast %82 : vector<1x32x32xf32> to vector<32x32xf32>
    %cst_81 = arith.constant dense<0.000000e+00> : vector<1x32xf32>
    %84 = tpu.matmul %81, %83, %cst_81 {dimension_numbers = #tpu.dot_dimension_numbers<[1], [0], [0], [1], [0, 0, 1, 1], [], []>} : vector<1x32xf32>, vector<32x32xf32>, vector<1x32xf32> -> vector<1x32xf32>
    %c3_82 = arith.constant 3 : index
    %c0_83 = arith.constant 0 : index
    %c0_84 = arith.constant 0 : index
    %85 = vector.load %arg12[%c3_82, %c0_83, %c0_84] : memref<4x1x32xf32, #tpu.memory_space<vmem>>, vector<1x1x32xf32>
    %86 = vector.shape_cast %85 : vector<1x1x32xf32> to vector<1x32xf32>
    %87 = arith.addf %84, %86 : vector<1x32xf32>
    %cst_85 = arith.constant 0.000000e+00 : f32
    %88 = vector.broadcast %cst_85 : f32 to vector<1x32xf32>
    %89 = arith.maximumf %87, %88 : vector<1x32xf32>
    %c3_86 = arith.constant 3 : index
    %c0_87 = arith.constant 0 : index
    %c0_88 = arith.constant 0 : index
    %90 = vector.load %arg13[%c3_86, %c0_87, %c0_88] : memref<4x32x4xf32, #tpu.memory_space<vmem>>, vector<1x32x4xf32>
    %91 = vector.shape_cast %90 : vector<1x32x4xf32> to vector<32x4xf32>
    %cst_89 = arith.constant dense<0.000000e+00> : vector<1x4xf32>
    %92 = tpu.matmul %89, %91, %cst_89 {dimension_numbers = #tpu.dot_dimension_numbers<[1], [0], [0], [1], [0, 0, 1, 1], [], []>} : vector<1x32xf32>, vector<32x4xf32>, vector<1x4xf32> -> vector<1x4xf32>
    %c3_90 = arith.constant 3 : index
    %c0_91 = arith.constant 0 : index
    %c0_92 = arith.constant 0 : index
    %93 = vector.load %arg14[%c3_90, %c0_91, %c0_92] : memref<4x1x4xf32, #tpu.memory_space<vmem>>, vector<1x1x4xf32>
    %94 = vector.shape_cast %93 : vector<1x1x4xf32> to vector<1x4xf32>
    %95 = arith.addf %92, %94 : vector<1x4xf32>
    %c0_93 = arith.constant 0 : index
    %c0_94 = arith.constant 0 : index
    %96 = vector.load %arg3[%c0_93, %c0_94] : memref<32x32xf32, #tpu.memory_space<vmem>>, vector<32x32xf32>
    %cst_95 = arith.constant dense<0.000000e+00> : vector<16x32xf32>
    %97 = tpu.matmul %3, %96, %cst_95 {dimension_numbers = #tpu.dot_dimension_numbers<[1], [0], [0], [1], [0, 0, 1, 1], [], []>} : vector<16x32xf32>, vector<32x32xf32>, vector<16x32xf32> -> vector<16x32xf32>
    %c0_96 = arith.constant 0 : index
    %c0_97 = arith.constant 0 : index
    %98 = vector.load %arg4[%c0_96, %c0_97] : memref<1x32xf32, #tpu.memory_space<vmem>>, vector<1x32xf32>
    %99 = vector.broadcast %98 : vector<1x32xf32> to vector<16x32xf32>
    %100 = arith.addf %97, %99 : vector<16x32xf32>
    %c0_98 = arith.constant 0 : index
    %c0_99 = arith.constant 0 : index
    %101 = vector.load %arg7[%c0_98, %c0_99] : memref<8x16xf32, #tpu.memory_space<vmem>>, vector<8x16xf32>
    %c0_100 = arith.constant 0 : index
    %c0_101 = arith.constant 0 : index
    %102 = vector.load %arg8[%c0_100, %c0_101] : memref<1x16xf32, #tpu.memory_space<vmem>>, vector<1x16xf32>
    %c0_102 = arith.constant 0 : index
    %c0_103 = arith.constant 0 : index
    %103 = vector.load %arg5[%c0_102, %c0_103] : memref<1x8xf32, #tpu.memory_space<vmem>>, vector<1x8xf32>
    %c0_104 = arith.constant 0 : index
    %c0_105 = arith.constant 0 : index
    %104 = vector.load %arg6[%c0_104, %c0_105] : memref<1x8xf32, #tpu.memory_space<vmem>>, vector<1x8xf32>
    %105 = vector.extract_strided_slice %100 {offsets = [0, 0], sizes = [16, 8], strides = [1, 1]} : vector<16x32xf32> to vector<16x8xf32>
    %cst_106 = arith.constant dense<0.000000e+00> : vector<16xf32>
    %106 = vector.multi_reduction <add>, %105, %cst_106 [1] : vector<16x8xf32> to vector<16xf32>
    %107 = vector.shape_cast %106 : vector<16xf32> to vector<16x1xf32>
    %cst_107 = arith.constant 8.000000e+00 : f32
    %108 = vector.broadcast %cst_107 : f32 to vector<16x1xf32>
    %109 = arith.divf %107, %108 : vector<16x1xf32>
    %110 = vector.broadcast %109 : vector<16x1xf32> to vector<16x8xf32>
    %111 = arith.subf %105, %110 : vector<16x8xf32>
    %112 = arith.mulf %111, %111 : vector<16x8xf32>
    %cst_108 = arith.constant dense<0.000000e+00> : vector<16xf32>
    %113 = vector.multi_reduction <add>, %112, %cst_108 [1] : vector<16x8xf32> to vector<16xf32>
    %114 = vector.shape_cast %113 : vector<16xf32> to vector<16x1xf32>
    %cst_109 = arith.constant 8.000000e+00 : f32
    %115 = vector.broadcast %cst_109 : f32 to vector<16x1xf32>
    %116 = arith.divf %114, %115 : vector<16x1xf32>
    %cst_110 = arith.constant 9.99999997E-7 : f32
    %117 = vector.broadcast %cst_110 : f32 to vector<16x1xf32>
    %118 = arith.addf %116, %117 : vector<16x1xf32>
    %119 = math.rsqrt %118 : vector<16x1xf32>
    %120 = vector.broadcast %119 : vector<16x1xf32> to vector<16x8xf32>
    %121 = arith.mulf %111, %120 : vector<16x8xf32>
    %122 = vector.broadcast %103 : vector<1x8xf32> to vector<16x8xf32>
    %123 = arith.mulf %121, %122 : vector<16x8xf32>
    %124 = vector.broadcast %104 : vector<1x8xf32> to vector<16x8xf32>
    %125 = arith.addf %123, %124 : vector<16x8xf32>
    %cst_111 = arith.constant 5.000000e-01 : f32
    %126 = vector.broadcast %cst_111 : f32 to vector<16x8xf32>
    %127 = arith.mulf %126, %125 : vector<16x8xf32>
    %cst_112 = arith.constant 4.471500e-02 : f32
    %128 = vector.broadcast %cst_112 : f32 to vector<16x8xf32>
    %129 = arith.mulf %128, %125 : vector<16x8xf32>
    %130 = arith.mulf %129, %125 : vector<16x8xf32>
    %131 = arith.mulf %130, %125 : vector<16x8xf32>
    %132 = arith.addf %125, %131 : vector<16x8xf32>
    %cst_113 = arith.constant 0.797884583 : f32
    %133 = vector.broadcast %cst_113 : f32 to vector<16x8xf32>
    %134 = arith.mulf %133, %132 : vector<16x8xf32>
    %135 = math.tanh %134 : vector<16x8xf32>
    %cst_114 = arith.constant 1.000000e+00 : f32
    %136 = vector.broadcast %cst_114 : f32 to vector<16x8xf32>
    %137 = arith.addf %136, %135 : vector<16x8xf32>
    %138 = arith.mulf %127, %137 : vector<16x8xf32>
    %cst_115 = arith.constant dense<0.000000e+00> : vector<16x16xf32>
    %139 = tpu.matmul %138, %101, %cst_115 {dimension_numbers = #tpu.dot_dimension_numbers<[1], [0], [0], [1], [0, 0, 1, 1], [], []>} : vector<16x8xf32>, vector<8x16xf32>, vector<16x16xf32> -> vector<16x16xf32>
    %140 = vector.broadcast %102 : vector<1x16xf32> to vector<16x16xf32>
    %141 = arith.addf %139, %140 : vector<16x16xf32>
    %cst_116 = arith.constant 5.000000e-01 : f32
    %142 = vector.broadcast %cst_116 : f32 to vector<16x16xf32>
    %143 = arith.mulf %142, %141 : vector<16x16xf32>
    %cst_117 = arith.constant 4.471500e-02 : f32
    %144 = vector.broadcast %cst_117 : f32 to vector<16x16xf32>
    %145 = arith.mulf %144, %141 : vector<16x16xf32>
    %146 = arith.mulf %145, %141 : vector<16x16xf32>
    %147 = arith.mulf %146, %141 : vector<16x16xf32>
    %148 = arith.addf %141, %147 : vector<16x16xf32>
    %cst_118 = arith.constant 0.797884583 : f32
    %149 = vector.broadcast %cst_118 : f32 to vector<16x16xf32>
    %150 = arith.mulf %149, %148 : vector<16x16xf32>
    %151 = math.tanh %150 : vector<16x16xf32>
    %cst_119 = arith.constant 1.000000e+00 : f32
    %152 = vector.broadcast %cst_119 : f32 to vector<16x16xf32>
    %153 = arith.addf %152, %151 : vector<16x16xf32>
    %154 = arith.mulf %143, %153 : vector<16x16xf32>
    %155 = vector.extract_strided_slice %154 {offsets = [0, 0], sizes = [16, 4], strides = [1, 1]} : vector<16x16xf32> to vector<16x4xf32>
    %156 = vector.extract_strided_slice %26 {offsets = [0, 0], sizes = [1, 1], strides = [1, 1]} : vector<1x4xf32> to vector<1x1xf32>
    %157 = vector.broadcast %156 : vector<1x1xf32> to vector<16x4xf32>
    %158 = arith.mulf %155, %157 : vector<16x4xf32>
    %159 = vector.extract_strided_slice %154 {offsets = [0, 4], sizes = [16, 4], strides = [1, 1]} : vector<16x16xf32> to vector<16x4xf32>
    %160 = vector.extract_strided_slice %26 {offsets = [0, 1], sizes = [1, 1], strides = [1, 1]} : vector<1x4xf32> to vector<1x1xf32>
    %161 = vector.broadcast %160 : vector<1x1xf32> to vector<16x4xf32>
    %162 = arith.mulf %159, %161 : vector<16x4xf32>
    %163 = arith.addf %158, %162 : vector<16x4xf32>
    %164 = vector.extract_strided_slice %154 {offsets = [0, 8], sizes = [16, 4], strides = [1, 1]} : vector<16x16xf32> to vector<16x4xf32>
    %165 = vector.extract_strided_slice %26 {offsets = [0, 2], sizes = [1, 1], strides = [1, 1]} : vector<1x4xf32> to vector<1x1xf32>
    %166 = vector.broadcast %165 : vector<1x1xf32> to vector<16x4xf32>
    %167 = arith.mulf %164, %166 : vector<16x4xf32>
    %168 = arith.addf %163, %167 : vector<16x4xf32>
    %169 = vector.extract_strided_slice %154 {offsets = [0, 12], sizes = [16, 4], strides = [1, 1]} : vector<16x16xf32> to vector<16x4xf32>
    %170 = vector.extract_strided_slice %26 {offsets = [0, 3], sizes = [1, 1], strides = [1, 1]} : vector<1x4xf32> to vector<1x1xf32>
    %171 = vector.broadcast %170 : vector<1x1xf32> to vector<16x4xf32>
    %172 = arith.mulf %169, %171 : vector<16x4xf32>
    %173 = arith.addf %168, %172 : vector<16x4xf32>
    %c0_120 = arith.constant 0 : index
    %c0_121 = arith.constant 0 : index
    %c0_122 = arith.constant 0 : index
    %174 = vector.load %arg21[%c0_120, %c0_121, %c0_122] : memref<1x256x4xf32, #tpu.memory_space<vmem>>, vector<1x16x4xf32>
    %175 = vector.shape_cast %174 : vector<1x16x4xf32> to vector<16x4xf32>
    %176 = vector.shape_cast %173 : vector<16x4xf32> to vector<1x16x4xf32>
    tpu.vector_store %arg21[%c0_120, %c0_121, %c0_122], %176 {strides = array<i32>} : memref<1x256x4xf32, #tpu.memory_space<vmem>>, vector<1x16x4xf32>,
    %177 = vector.extract_strided_slice %154 {offsets = [0, 0], sizes = [16, 4], strides = [1, 1]} : vector<16x16xf32> to vector<16x4xf32>
    %178 = vector.extract_strided_slice %49 {offsets = [0, 0], sizes = [1, 1], strides = [1, 1]} : vector<1x4xf32> to vector<1x1xf32>
    %179 = vector.broadcast %178 : vector<1x1xf32> to vector<16x4xf32>
    %180 = arith.mulf %177, %179 : vector<16x4xf32>
    %181 = vector.extract_strided_slice %154 {offsets = [0, 4], sizes = [16, 4], strides = [1, 1]} : vector<16x16xf32> to vector<16x4xf32>
    %182 = vector.extract_strided_slice %49 {offsets = [0, 1], sizes = [1, 1], strides = [1, 1]} : vector<1x4xf32> to vector<1x1xf32>
    %183 = vector.broadcast %182 : vector<1x1xf32> to vector<16x4xf32>
    %184 = arith.mulf %181, %183 : vector<16x4xf32>
    %185 = arith.addf %180, %184 : vector<16x4xf32>
    %186 = vector.extract_strided_slice %154 {offsets = [0, 8], sizes = [16, 4], strides = [1, 1]} : vector<16x16xf32> to vector<16x4xf32>
    %187 = vector.extract_strided_slice %49 {offsets = [0, 2], sizes = [1, 1], strides = [1, 1]} : vector<1x4xf32> to vector<1x1xf32>
    %188 = vector.broadcast %187 : vector<1x1xf32> to vector<16x4xf32>
    %189 = arith.mulf %186, %188 : vector<16x4xf32>
    %190 = arith.addf %185, %189 : vector<16x4xf32>
    %191 = vector.extract_strided_slice %154 {offsets = [0, 12], sizes = [16, 4], strides = [1, 1]} : vector<16x16xf32> to vector<16x4xf32>
    %192 = vector.extract_strided_slice %49 {offsets = [0, 3], sizes = [1, 1], strides = [1, 1]} : vector<1x4xf32> to vector<1x1xf32>
    %193 = vector.broadcast %192 : vector<1x1xf32> to vector<16x4xf32>
    %194 = arith.mulf %191, %193 : vector<16x4xf32>
    %195 = arith.addf %190, %194 : vector<16x4xf32>
    %c0_123 = arith.constant 0 : index
    %c64 = arith.constant 64 : index
    %c0_124 = arith.constant 0 : index
    %196 = vector.load %arg21[%c0_123, %c64, %c0_124] : memref<1x256x4xf32, #tpu.memory_space<vmem>>, vector<1x16x4xf32>
    %197 = vector.shape_cast %196 : vector<1x16x4xf32> to vector<16x4xf32>
    %198 = vector.shape_cast %195 : vector<16x4xf32> to vector<1x16x4xf32>
    tpu.vector_store %arg21[%c0_123, %c64, %c0_124], %198 {strides = array<i32>} : memref<1x256x4xf32, #tpu.memory_space<vmem>>, vector<1x16x4xf32>,
    %199 = vector.extract_strided_slice %154 {offsets = [0, 0], sizes = [16, 4], strides = [1, 1]} : vector<16x16xf32> to vector<16x4xf32>
    %200 = vector.extract_strided_slice %72 {offsets = [0, 0], sizes = [1, 1], strides = [1, 1]} : vector<1x4xf32> to vector<1x1xf32>
    %201 = vector.broadcast %200 : vector<1x1xf32> to vector<16x4xf32>
    %202 = arith.mulf %199, %201 : vector<16x4xf32>
    %203 = vector.extract_strided_slice %154 {offsets = [0, 4], sizes = [16, 4], strides = [1, 1]} : vector<16x16xf32> to vector<16x4xf32>
    %204 = vector.extract_strided_slice %72 {offsets = [0, 1], sizes = [1, 1], strides = [1, 1]} : vector<1x4xf32> to vector<1x1xf32>
    %205 = vector.broadcast %204 : vector<1x1xf32> to vector<16x4xf32>
    %206 = arith.mulf %203, %205 : vector<16x4xf32>
    %207 = arith.addf %202, %206 : vector<16x4xf32>
    %208 = vector.extract_strided_slice %154 {offsets = [0, 8], sizes = [16, 4], strides = [1, 1]} : vector<16x16xf32> to vector<16x4xf32>
    %209 = vector.extract_strided_slice %72 {offsets = [0, 2], sizes = [1, 1], strides = [1, 1]} : vector<1x4xf32> to vector<1x1xf32>
    %210 = vector.broadcast %209 : vector<1x1xf32> to vector<16x4xf32>
    %211 = arith.mulf %208, %210 : vector<16x4xf32>
    %212 = arith.addf %207, %211 : vector<16x4xf32>
    %213 = vector.extract_strided_slice %154 {offsets = [0, 12], sizes = [16, 4], strides = [1, 1]} : vector<16x16xf32> to vector<16x4xf32>
    %214 = vector.extract_strided_slice %72 {offsets = [0, 3], sizes = [1, 1], strides = [1, 1]} : vector<1x4xf32> to vector<1x1xf32>
    %215 = vector.broadcast %214 : vector<1x1xf32> to vector<16x4xf32>
    %216 = arith.mulf %213, %215 : vector<16x4xf32>
    %217 = arith.addf %212, %216 : vector<16x4xf32>
    %c0_125 = arith.constant 0 : index
    %c128 = arith.constant 128 : index
    %c0_126 = arith.constant 0 : index
    %218 = vector.load %arg21[%c0_125, %c128, %c0_126] : memref<1x256x4xf32, #tpu.memory_space<vmem>>, vector<1x16x4xf32>
    %219 = vector.shape_cast %218 : vector<1x16x4xf32> to vector<16x4xf32>
    %220 = vector.shape_cast %217 : vector<16x4xf32> to vector<1x16x4xf32>
    tpu.vector_store %arg21[%c0_125, %c128, %c0_126], %220 {strides = array<i32>} : memref<1x256x4xf32, #tpu.memory_space<vmem>>, vector<1x16x4xf32>,
    %221 = vector.extract_strided_slice %154 {offsets = [0, 0], sizes = [16, 4], strides = [1, 1]} : vector<16x16xf32> to vector<16x4xf32>
    %222 = vector.extract_strided_slice %95 {offsets = [0, 0], sizes = [1, 1], strides = [1, 1]} : vector<1x4xf32> to vector<1x1xf32>
    %223 = vector.broadcast %222 : vector<1x1xf32> to vector<16x4xf32>
    %224 = arith.mulf %221, %223 : vector<16x4xf32>
    %225 = vector.extract_strided_slice %154 {offsets = [0, 4], sizes = [16, 4], strides = [1, 1]} : vector<16x16xf32> to vector<16x4xf32>
    %226 = vector.extract_strided_slice %95 {offsets = [0, 1], sizes = [1, 1], strides = [1, 1]} : vector<1x4xf32> to vector<1x1xf32>
    %227 = vector.broadcast %226 : vector<1x1xf32> to vector<16x4xf32>
    %228 = arith.mulf %225, %227 : vector<16x4xf32>
    %229 = arith.addf %224, %228 : vector<16x4xf32>
    %230 = vector.extract_strided_slice %154 {offsets = [0, 8], sizes = [16, 4], strides = [1, 1]} : vector<16x16xf32> to vector<16x4xf32>
    %231 = vector.extract_strided_slice %95 {offsets = [0, 2], sizes = [1, 1], strides = [1, 1]} : vector<1x4xf32> to vector<1x1xf32>
    %232 = vector.broadcast %231 : vector<1x1xf32> to vector<16x4xf32>
    %233 = arith.mulf %230, %232 : vector<16x4xf32>
    %234 = arith.addf %229, %233 : vector<16x4xf32>
    %235 = vector.extract_strided_slice %154 {offsets = [0, 12], sizes = [16, 4], strides = [1, 1]} : vector<16x16xf32> to vector<16x4xf32>
    %236 = vector.extract_strided_slice %95 {offsets = [0, 3], sizes = [1, 1], strides = [1, 1]} : vector<1x4xf32> to vector<1x1xf32>
    %237 = vector.broadcast %236 : vector<1x1xf32> to vector<16x4xf32>
    %238 = arith.mulf %235, %237 : vector<16x4xf32>
    %239 = arith.addf %234, %238 : vector<16x4xf32>
    %c0_127 = arith.constant 0 : index
    %c192 = arith.constant 192 : index
    %c0_128 = arith.constant 0 : index
    %240 = vector.load %arg21[%c0_127, %c192, %c0_128] : memref<1x256x4xf32, #tpu.memory_space<vmem>>, vector<1x16x4xf32>
    %241 = vector.shape_cast %240 : vector<1x16x4xf32> to vector<16x4xf32>
    %242 = vector.shape_cast %239 : vector<16x4xf32> to vector<1x16x4xf32>
    tpu.vector_store %arg21[%c0_127, %c192, %c0_128], %242 {strides = array<i32>} : memref<1x256x4xf32, #tpu.memory_space<vmem>>, vector<1x16x4xf32>,
    %243 = vector.extract_strided_slice %100 {offsets = [0, 8], sizes = [16, 8], strides = [1, 1]} : vector<16x32xf32> to vector<16x8xf32>
    %cst_129 = arith.constant dense<0.000000e+00> : vector<16xf32>
    %244 = vector.multi_reduction <add>, %243, %cst_129 [1] : vector<16x8xf32> to vector<16xf32>
    %245 = vector.shape_cast %244 : vector<16xf32> to vector<16x1xf32>
    %cst_130 = arith.constant 8.000000e+00 : f32
    %246 = vector.broadcast %cst_130 : f32 to vector<16x1xf32>
    %247 = arith.divf %245, %246 : vector<16x1xf32>
    %248 = vector.broadcast %247 : vector<16x1xf32> to vector<16x8xf32>
    %249 = arith.subf %243, %248 : vector<16x8xf32>
    %250 = arith.mulf %249, %249 : vector<16x8xf32>
    %cst_131 = arith.constant dense<0.000000e+00> : vector<16xf32>
    %251 = vector.multi_reduction <add>, %250, %cst_131 [1] : vector<16x8xf32> to vector<16xf32>
    %252 = vector.shape_cast %251 : vector<16xf32> to vector<16x1xf32>
    %cst_132 = arith.constant 8.000000e+00 : f32
    %253 = vector.broadcast %cst_132 : f32 to vector<16x1xf32>
    %254 = arith.divf %252, %253 : vector<16x1xf32>
    %cst_133 = arith.constant 9.99999997E-7 : f32
    %255 = vector.broadcast %cst_133 : f32 to vector<16x1xf32>
    %256 = arith.addf %254, %255 : vector<16x1xf32>
    %257 = math.rsqrt %256 : vector<16x1xf32>
    %258 = vector.broadcast %257 : vector<16x1xf32> to vector<16x8xf32>
    %259 = arith.mulf %249, %258 : vector<16x8xf32>
    %260 = vector.broadcast %103 : vector<1x8xf32> to vector<16x8xf32>
    %261 = arith.mulf %259, %260 : vector<16x8xf32>
    %262 = vector.broadcast %104 : vector<1x8xf32> to vector<16x8xf32>
    %263 = arith.addf %261, %262 : vector<16x8xf32>
    %cst_134 = arith.constant 5.000000e-01 : f32
    %264 = vector.broadcast %cst_134 : f32 to vector<16x8xf32>
    %265 = arith.mulf %264, %263 : vector<16x8xf32>
    %cst_135 = arith.constant 4.471500e-02 : f32
    %266 = vector.broadcast %cst_135 : f32 to vector<16x8xf32>
    %267 = arith.mulf %266, %263 : vector<16x8xf32>
    %268 = arith.mulf %267, %263 : vector<16x8xf32>
    %269 = arith.mulf %268, %263 : vector<16x8xf32>
    %270 = arith.addf %263, %269 : vector<16x8xf32>
    %cst_136 = arith.constant 0.797884583 : f32
    %271 = vector.broadcast %cst_136 : f32 to vector<16x8xf32>
    %272 = arith.mulf %271, %270 : vector<16x8xf32>
    %273 = math.tanh %272 : vector<16x8xf32>
    %cst_137 = arith.constant 1.000000e+00 : f32
    %274 = vector.broadcast %cst_137 : f32 to vector<16x8xf32>
    %275 = arith.addf %274, %273 : vector<16x8xf32>
    %276 = arith.mulf %265, %275 : vector<16x8xf32>
    %cst_138 = arith.constant dense<0.000000e+00> : vector<16x16xf32>
    %277 = tpu.matmul %276, %101, %cst_138 {dimension_numbers = #tpu.dot_dimension_numbers<[1], [0], [0], [1], [0, 0, 1, 1], [], []>} : vector<16x8xf32>, vector<8x16xf32>, vector<16x16xf32> -> vector<16x16xf32>
    %278 = vector.broadcast %102 : vector<1x16xf32> to vector<16x16xf32>
    %279 = arith.addf %277, %278 : vector<16x16xf32>
    %cst_139 = arith.constant 5.000000e-01 : f32
    %280 = vector.broadcast %cst_139 : f32 to vector<16x16xf32>
    %281 = arith.mulf %280, %279 : vector<16x16xf32>
    %cst_140 = arith.constant 4.471500e-02 : f32
    %282 = vector.broadcast %cst_140 : f32 to vector<16x16xf32>
    %283 = arith.mulf %282, %279 : vector<16x16xf32>
    %284 = arith.mulf %283, %279 : vector<16x16xf32>
    %285 = arith.mulf %284, %279 : vector<16x16xf32>
    %286 = arith.addf %279, %285 : vector<16x16xf32>
    %cst_141 = arith.constant 0.797884583 : f32
    %287 = vector.broadcast %cst_141 : f32 to vector<16x16xf32>
    %288 = arith.mulf %287, %286 : vector<16x16xf32>
    %289 = math.tanh %288 : vector<16x16xf32>
    %cst_142 = arith.constant 1.000000e+00 : f32
    %290 = vector.broadcast %cst_142 : f32 to vector<16x16xf32>
    %291 = arith.addf %290, %289 : vector<16x16xf32>
    %292 = arith.mulf %281, %291 : vector<16x16xf32>
    %293 = vector.extract_strided_slice %292 {offsets = [0, 0], sizes = [16, 4], strides = [1, 1]} : vector<16x16xf32> to vector<16x4xf32>
    %294 = vector.extract_strided_slice %26 {offsets = [0, 0], sizes = [1, 1], strides = [1, 1]} : vector<1x4xf32> to vector<1x1xf32>
    %295 = vector.broadcast %294 : vector<1x1xf32> to vector<16x4xf32>
    %296 = arith.mulf %293, %295 : vector<16x4xf32>
    %297 = vector.extract_strided_slice %292 {offsets = [0, 4], sizes = [16, 4], strides = [1, 1]} : vector<16x16xf32> to vector<16x4xf32>
    %298 = vector.extract_strided_slice %26 {offsets = [0, 1], sizes = [1, 1], strides = [1, 1]} : vector<1x4xf32> to vector<1x1xf32>
    %299 = vector.broadcast %298 : vector<1x1xf32> to vector<16x4xf32>
    %300 = arith.mulf %297, %299 : vector<16x4xf32>
    %301 = arith.addf %296, %300 : vector<16x4xf32>
    %302 = vector.extract_strided_slice %292 {offsets = [0, 8], sizes = [16, 4], strides = [1, 1]} : vector<16x16xf32> to vector<16x4xf32>
    %303 = vector.extract_strided_slice %26 {offsets = [0, 2], sizes = [1, 1], strides = [1, 1]} : vector<1x4xf32> to vector<1x1xf32>
    %304 = vector.broadcast %303 : vector<1x1xf32> to vector<16x4xf32>
    %305 = arith.mulf %302, %304 : vector<16x4xf32>
    %306 = arith.addf %301, %305 : vector<16x4xf32>
    %307 = vector.extract_strided_slice %292 {offsets = [0, 12], sizes = [16, 4], strides = [1, 1]} : vector<16x16xf32> to vector<16x4xf32>
    %308 = vector.extract_strided_slice %26 {offsets = [0, 3], sizes = [1, 1], strides = [1, 1]} : vector<1x4xf32> to vector<1x1xf32>
    %309 = vector.broadcast %308 : vector<1x1xf32> to vector<16x4xf32>
    %310 = arith.mulf %307, %309 : vector<16x4xf32>
    %311 = arith.addf %306, %310 : vector<16x4xf32>
    %c0_143 = arith.constant 0 : index
    %c16 = arith.constant 16 : index
    %c0_144 = arith.constant 0 : index
    %312 = vector.load %arg21[%c0_143, %c16, %c0_144] : memref<1x256x4xf32, #tpu.memory_space<vmem>>, vector<1x16x4xf32>
    %313 = vector.shape_cast %312 : vector<1x16x4xf32> to vector<16x4xf32>
    %314 = vector.shape_cast %311 : vector<16x4xf32> to vector<1x16x4xf32>
    tpu.vector_store %arg21[%c0_143, %c16, %c0_144], %314 {strides = array<i32>} : memref<1x256x4xf32, #tpu.memory_space<vmem>>, vector<1x16x4xf32>,
    %315 = vector.extract_strided_slice %292 {offsets = [0, 0], sizes = [16, 4], strides = [1, 1]} : vector<16x16xf32> to vector<16x4xf32>
    %316 = vector.extract_strided_slice %49 {offsets = [0, 0], sizes = [1, 1], strides = [1, 1]} : vector<1x4xf32> to vector<1x1xf32>
    %317 = vector.broadcast %316 : vector<1x1xf32> to vector<16x4xf32>
    %318 = arith.mulf %315, %317 : vector<16x4xf32>
    %319 = vector.extract_strided_slice %292 {offsets = [0, 4], sizes = [16, 4], strides = [1, 1]} : vector<16x16xf32> to vector<16x4xf32>
    %320 = vector.extract_strided_slice %49 {offsets = [0, 1], sizes = [1, 1], strides = [1, 1]} : vector<1x4xf32> to vector<1x1xf32>
    %321 = vector.broadcast %320 : vector<1x1xf32> to vector<16x4xf32>
    %322 = arith.mulf %319, %321 : vector<16x4xf32>
    %323 = arith.addf %318, %322 : vector<16x4xf32>
    %324 = vector.extract_strided_slice %292 {offsets = [0, 8], sizes = [16, 4], strides = [1, 1]} : vector<16x16xf32> to vector<16x4xf32>
    %325 = vector.extract_strided_slice %49 {offsets = [0, 2], sizes = [1, 1], strides = [1, 1]} : vector<1x4xf32> to vector<1x1xf32>
    %326 = vector.broadcast %325 : vector<1x1xf32> to vector<16x4xf32>
    %327 = arith.mulf %324, %326 : vector<16x4xf32>
    %328 = arith.addf %323, %327 : vector<16x4xf32>
    %329 = vector.extract_strided_slice %292 {offsets = [0, 12], sizes = [16, 4], strides = [1, 1]} : vector<16x16xf32> to vector<16x4xf32>
    %330 = vector.extract_strided_slice %49 {offsets = [0, 3], sizes = [1, 1], strides = [1, 1]} : vector<1x4xf32> to vector<1x1xf32>
    %331 = vector.broadcast %330 : vector<1x1xf32> to vector<16x4xf32>
    %332 = arith.mulf %329, %331 : vector<16x4xf32>
    %333 = arith.addf %328, %332 : vector<16x4xf32>
    %c0_145 = arith.constant 0 : index
    %c80 = arith.constant 80 : index
    %c0_146 = arith.constant 0 : index
    %334 = vector.load %arg21[%c0_145, %c80, %c0_146] : memref<1x256x4xf32, #tpu.memory_space<vmem>>, vector<1x16x4xf32>
    %335 = vector.shape_cast %334 : vector<1x16x4xf32> to vector<16x4xf32>
    %336 = vector.shape_cast %333 : vector<16x4xf32> to vector<1x16x4xf32>
    tpu.vector_store %arg21[%c0_145, %c80, %c0_146], %336 {strides = array<i32>} : memref<1x256x4xf32, #tpu.memory_space<vmem>>, vector<1x16x4xf32>,
    %337 = vector.extract_strided_slice %292 {offsets = [0, 0], sizes = [16, 4], strides = [1, 1]} : vector<16x16xf32> to vector<16x4xf32>
    %338 = vector.extract_strided_slice %72 {offsets = [0, 0], sizes = [1, 1], strides = [1, 1]} : vector<1x4xf32> to vector<1x1xf32>
    %339 = vector.broadcast %338 : vector<1x1xf32> to vector<16x4xf32>
    %340 = arith.mulf %337, %339 : vector<16x4xf32>
    %341 = vector.extract_strided_slice %292 {offsets = [0, 4], sizes = [16, 4], strides = [1, 1]} : vector<16x16xf32> to vector<16x4xf32>
    %342 = vector.extract_strided_slice %72 {offsets = [0, 1], sizes = [1, 1], strides = [1, 1]} : vector<1x4xf32> to vector<1x1xf32>
    %343 = vector.broadcast %342 : vector<1x1xf32> to vector<16x4xf32>
    %344 = arith.mulf %341, %343 : vector<16x4xf32>
    %345 = arith.addf %340, %344 : vector<16x4xf32>
    %346 = vector.extract_strided_slice %292 {offsets = [0, 8], sizes = [16, 4], strides = [1, 1]} : vector<16x16xf32> to vector<16x4xf32>
    %347 = vector.extract_strided_slice %72 {offsets = [0, 2], sizes = [1, 1], strides = [1, 1]} : vector<1x4xf32> to vector<1x1xf32>
    %348 = vector.broadcast %347 : vector<1x1xf32> to vector<16x4xf32>
    %349 = arith.mulf %346, %348 : vector<16x4xf32>
    %350 = arith.addf %345, %349 : vector<16x4xf32>
    %351 = vector.extract_strided_slice %292 {offsets = [0, 12], sizes = [16, 4], strides = [1, 1]} : vector<16x16xf32> to vector<16x4xf32>
    %352 = vector.extract_strided_slice %72 {offsets = [0, 3], sizes = [1, 1], strides = [1, 1]} : vector<1x4xf32> to vector<1x1xf32>
    %353 = vector.broadcast %352 : vector<1x1xf32> to vector<16x4xf32>
    %354 = arith.mulf %351, %353 : vector<16x4xf32>
    %355 = arith.addf %350, %354 : vector<16x4xf32>
    %c0_147 = arith.constant 0 : index
    %c144 = arith.constant 144 : index
    %c0_148 = arith.constant 0 : index
    %356 = vector.load %arg21[%c0_147, %c144, %c0_148] : memref<1x256x4xf32, #tpu.memory_space<vmem>>, vector<1x16x4xf32>
    %357 = vector.shape_cast %356 : vector<1x16x4xf32> to vector<16x4xf32>
    %358 = vector.shape_cast %355 : vector<16x4xf32> to vector<1x16x4xf32>
    tpu.vector_store %arg21[%c0_147, %c144, %c0_148], %358 {strides = array<i32>} : memref<1x256x4xf32, #tpu.memory_space<vmem>>, vector<1x16x4xf32>,
    %359 = vector.extract_strided_slice %292 {offsets = [0, 0], sizes = [16, 4], strides = [1, 1]} : vector<16x16xf32> to vector<16x4xf32>
    %360 = vector.extract_strided_slice %95 {offsets = [0, 0], sizes = [1, 1], strides = [1, 1]} : vector<1x4xf32> to vector<1x1xf32>
    %361 = vector.broadcast %360 : vector<1x1xf32> to vector<16x4xf32>
    %362 = arith.mulf %359, %361 : vector<16x4xf32>
    %363 = vector.extract_strided_slice %292 {offsets = [0, 4], sizes = [16, 4], strides = [1, 1]} : vector<16x16xf32> to vector<16x4xf32>
    %364 = vector.extract_strided_slice %95 {offsets = [0, 1], sizes = [1, 1], strides = [1, 1]} : vector<1x4xf32> to vector<1x1xf32>
    %365 = vector.broadcast %364 : vector<1x1xf32> to vector<16x4xf32>
    %366 = arith.mulf %363, %365 : vector<16x4xf32>
    %367 = arith.addf %362, %366 : vector<16x4xf32>
    %368 = vector.extract_strided_slice %292 {offsets = [0, 8], sizes = [16, 4], strides = [1, 1]} : vector<16x16xf32> to vector<16x4xf32>
    %369 = vector.extract_strided_slice %95 {offsets = [0, 2], sizes = [1, 1], strides = [1, 1]} : vector<1x4xf32> to vector<1x1xf32>
    %370 = vector.broadcast %369 : vector<1x1xf32> to vector<16x4xf32>
    %371 = arith.mulf %368, %370 : vector<16x4xf32>
    %372 = arith.addf %367, %371 : vector<16x4xf32>
    %373 = vector.extract_strided_slice %292 {offsets = [0, 12], sizes = [16, 4], strides = [1, 1]} : vector<16x16xf32> to vector<16x4xf32>
    %374 = vector.extract_strided_slice %95 {offsets = [0, 3], sizes = [1, 1], strides = [1, 1]} : vector<1x4xf32> to vector<1x1xf32>
    %375 = vector.broadcast %374 : vector<1x1xf32> to vector<16x4xf32>
    %376 = arith.mulf %373, %375 : vector<16x4xf32>
    %377 = arith.addf %372, %376 : vector<16x4xf32>
    %c0_149 = arith.constant 0 : index
    %c208 = arith.constant 208 : index
    %c0_150 = arith.constant 0 : index
    %378 = vector.load %arg21[%c0_149, %c208, %c0_150] : memref<1x256x4xf32, #tpu.memory_space<vmem>>, vector<1x16x4xf32>
    %379 = vector.shape_cast %378 : vector<1x16x4xf32> to vector<16x4xf32>
    %380 = vector.shape_cast %377 : vector<16x4xf32> to vector<1x16x4xf32>
    tpu.vector_store %arg21[%c0_149, %c208, %c0_150], %380 {strides = array<i32>} : memref<1x256x4xf32, #tpu.memory_space<vmem>>, vector<1x16x4xf32>,
    %381 = vector.extract_strided_slice %100 {offsets = [0, 16], sizes = [16, 8], strides = [1, 1]} : vector<16x32xf32> to vector<16x8xf32>
    %cst_151 = arith.constant dense<0.000000e+00> : vector<16xf32>
    %382 = vector.multi_reduction <add>, %381, %cst_151 [1] : vector<16x8xf32> to vector<16xf32>
    %383 = vector.shape_cast %382 : vector<16xf32> to vector<16x1xf32>
    %cst_152 = arith.constant 8.000000e+00 : f32
    %384 = vector.broadcast %cst_152 : f32 to vector<16x1xf32>
    %385 = arith.divf %383, %384 : vector<16x1xf32>
    %386 = vector.broadcast %385 : vector<16x1xf32> to vector<16x8xf32>
    %387 = arith.subf %381, %386 : vector<16x8xf32>
    %388 = arith.mulf %387, %387 : vector<16x8xf32>
    %cst_153 = arith.constant dense<0.000000e+00> : vector<16xf32>
    %389 = vector.multi_reduction <add>, %388, %cst_153 [1] : vector<16x8xf32> to vector<16xf32>
    %390 = vector.shape_cast %389 : vector<16xf32> to vector<16x1xf32>
    %cst_154 = arith.constant 8.000000e+00 : f32
    %391 = vector.broadcast %cst_154 : f32 to vector<16x1xf32>
    %392 = arith.divf %390, %391 : vector<16x1xf32>
    %cst_155 = arith.constant 9.99999997E-7 : f32
    %393 = vector.broadcast %cst_155 : f32 to vector<16x1xf32>
    %394 = arith.addf %392, %393 : vector<16x1xf32>
    %395 = math.rsqrt %394 : vector<16x1xf32>
    %396 = vector.broadcast %395 : vector<16x1xf32> to vector<16x8xf32>
    %397 = arith.mulf %387, %396 : vector<16x8xf32>
    %398 = vector.broadcast %103 : vector<1x8xf32> to vector<16x8xf32>
    %399 = arith.mulf %397, %398 : vector<16x8xf32>
    %400 = vector.broadcast %104 : vector<1x8xf32> to vector<16x8xf32>
    %401 = arith.addf %399, %400 : vector<16x8xf32>
    %cst_156 = arith.constant 5.000000e-01 : f32
    %402 = vector.broadcast %cst_156 : f32 to vector<16x8xf32>
    %403 = arith.mulf %402, %401 : vector<16x8xf32>
    %cst_157 = arith.constant 4.471500e-02 : f32
    %404 = vector.broadcast %cst_157 : f32 to vector<16x8xf32>
    %405 = arith.mulf %404, %401 : vector<16x8xf32>
    %406 = arith.mulf %405, %401 : vector<16x8xf32>
    %407 = arith.mulf %406, %401 : vector<16x8xf32>
    %408 = arith.addf %401, %407 : vector<16x8xf32>
    %cst_158 = arith.constant 0.797884583 : f32
    %409 = vector.broadcast %cst_158 : f32 to vector<16x8xf32>
    %410 = arith.mulf %409, %408 : vector<16x8xf32>
    %411 = math.tanh %410 : vector<16x8xf32>
    %cst_159 = arith.constant 1.000000e+00 : f32
    %412 = vector.broadcast %cst_159 : f32 to vector<16x8xf32>
    %413 = arith.addf %412, %411 : vector<16x8xf32>
    %414 = arith.mulf %403, %413 : vector<16x8xf32>
    %cst_160 = arith.constant dense<0.000000e+00> : vector<16x16xf32>
    %415 = tpu.matmul %414, %101, %cst_160 {dimension_numbers = #tpu.dot_dimension_numbers<[1], [0], [0], [1], [0, 0, 1, 1], [], []>} : vector<16x8xf32>, vector<8x16xf32>, vector<16x16xf32> -> vector<16x16xf32>
    %416 = vector.broadcast %102 : vector<1x16xf32> to vector<16x16xf32>
    %417 = arith.addf %415, %416 : vector<16x16xf32>
    %cst_161 = arith.constant 5.000000e-01 : f32
    %418 = vector.broadcast %cst_161 : f32 to vector<16x16xf32>
    %419 = arith.mulf %418, %417 : vector<16x16xf32>
    %cst_162 = arith.constant 4.471500e-02 : f32
    %420 = vector.broadcast %cst_162 : f32 to vector<16x16xf32>
    %421 = arith.mulf %420, %417 : vector<16x16xf32>
    %422 = arith.mulf %421, %417 : vector<16x16xf32>
    %423 = arith.mulf %422, %417 : vector<16x16xf32>
    %424 = arith.addf %417, %423 : vector<16x16xf32>
    %cst_163 = arith.constant 0.797884583 : f32
    %425 = vector.broadcast %cst_163 : f32 to vector<16x16xf32>
    %426 = arith.mulf %425, %424 : vector<16x16xf32>
    %427 = math.tanh %426 : vector<16x16xf32>
    %cst_164 = arith.constant 1.000000e+00 : f32
    %428 = vector.broadcast %cst_164 : f32 to vector<16x16xf32>
    %429 = arith.addf %428, %427 : vector<16x16xf32>
    %430 = arith.mulf %419, %429 : vector<16x16xf32>
    %431 = vector.extract_strided_slice %430 {offsets = [0, 0], sizes = [16, 4], strides = [1, 1]} : vector<16x16xf32> to vector<16x4xf32>
    %432 = vector.extract_strided_slice %26 {offsets = [0, 0], sizes = [1, 1], strides = [1, 1]} : vector<1x4xf32> to vector<1x1xf32>
    %433 = vector.broadcast %432 : vector<1x1xf32> to vector<16x4xf32>
    %434 = arith.mulf %431, %433 : vector<16x4xf32>
    %435 = vector.extract_strided_slice %430 {offsets = [0, 4], sizes = [16, 4], strides = [1, 1]} : vector<16x16xf32> to vector<16x4xf32>
    %436 = vector.extract_strided_slice %26 {offsets = [0, 1], sizes = [1, 1], strides = [1, 1]} : vector<1x4xf32> to vector<1x1xf32>
    %437 = vector.broadcast %436 : vector<1x1xf32> to vector<16x4xf32>
    %438 = arith.mulf %435, %437 : vector<16x4xf32>
    %439 = arith.addf %434, %438 : vector<16x4xf32>
    %440 = vector.extract_strided_slice %430 {offsets = [0, 8], sizes = [16, 4], strides = [1, 1]} : vector<16x16xf32> to vector<16x4xf32>
    %441 = vector.extract_strided_slice %26 {offsets = [0, 2], sizes = [1, 1], strides = [1, 1]} : vector<1x4xf32> to vector<1x1xf32>
    %442 = vector.broadcast %441 : vector<1x1xf32> to vector<16x4xf32>
    %443 = arith.mulf %440, %442 : vector<16x4xf32>
    %444 = arith.addf %439, %443 : vector<16x4xf32>
    %445 = vector.extract_strided_slice %430 {offsets = [0, 12], sizes = [16, 4], strides = [1, 1]} : vector<16x16xf32> to vector<16x4xf32>
    %446 = vector.extract_strided_slice %26 {offsets = [0, 3], sizes = [1, 1], strides = [1, 1]} : vector<1x4xf32> to vector<1x1xf32>
    %447 = vector.broadcast %446 : vector<1x1xf32> to vector<16x4xf32>
    %448 = arith.mulf %445, %447 : vector<16x4xf32>
    %449 = arith.addf %444, %448 : vector<16x4xf32>
    %c0_165 = arith.constant 0 : index
    %c32 = arith.constant 32 : index
    %c0_166 = arith.constant 0 : index
    %450 = vector.load %arg21[%c0_165, %c32, %c0_166] : memref<1x256x4xf32, #tpu.memory_space<vmem>>, vector<1x16x4xf32>
    %451 = vector.shape_cast %450 : vector<1x16x4xf32> to vector<16x4xf32>
    %452 = vector.shape_cast %449 : vector<16x4xf32> to vector<1x16x4xf32>
    tpu.vector_store %arg21[%c0_165, %c32, %c0_166], %452 {strides = array<i32>} : memref<1x256x4xf32, #tpu.memory_space<vmem>>, vector<1x16x4xf32>,
    %453 = vector.extract_strided_slice %430 {offsets = [0, 0], sizes = [16, 4], strides = [1, 1]} : vector<16x16xf32> to vector<16x4xf32>
    %454 = vector.extract_strided_slice %49 {offsets = [0, 0], sizes = [1, 1], strides = [1, 1]} : vector<1x4xf32> to vector<1x1xf32>
    %455 = vector.broadcast %454 : vector<1x1xf32> to vector<16x4xf32>
    %456 = arith.mulf %453, %455 : vector<16x4xf32>
    %457 = vector.extract_strided_slice %430 {offsets = [0, 4], sizes = [16, 4], strides = [1, 1]} : vector<16x16xf32> to vector<16x4xf32>
    %458 = vector.extract_strided_slice %49 {offsets = [0, 1], sizes = [1, 1], strides = [1, 1]} : vector<1x4xf32> to vector<1x1xf32>
    %459 = vector.broadcast %458 : vector<1x1xf32> to vector<16x4xf32>
    %460 = arith.mulf %457, %459 : vector<16x4xf32>
    %461 = arith.addf %456, %460 : vector<16x4xf32>
    %462 = vector.extract_strided_slice %430 {offsets = [0, 8], sizes = [16, 4], strides = [1, 1]} : vector<16x16xf32> to vector<16x4xf32>
    %463 = vector.extract_strided_slice %49 {offsets = [0, 2], sizes = [1, 1], strides = [1, 1]} : vector<1x4xf32> to vector<1x1xf32>
    %464 = vector.broadcast %463 : vector<1x1xf32> to vector<16x4xf32>
    %465 = arith.mulf %462, %464 : vector<16x4xf32>
    %466 = arith.addf %461, %465 : vector<16x4xf32>
    %467 = vector.extract_strided_slice %430 {offsets = [0, 12], sizes = [16, 4], strides = [1, 1]} : vector<16x16xf32> to vector<16x4xf32>
    %468 = vector.extract_strided_slice %49 {offsets = [0, 3], sizes = [1, 1], strides = [1, 1]} : vector<1x4xf32> to vector<1x1xf32>
    %469 = vector.broadcast %468 : vector<1x1xf32> to vector<16x4xf32>
    %470 = arith.mulf %467, %469 : vector<16x4xf32>
    %471 = arith.addf %466, %470 : vector<16x4xf32>
    %c0_167 = arith.constant 0 : index
    %c96 = arith.constant 96 : index
    %c0_168 = arith.constant 0 : index
    %472 = vector.load %arg21[%c0_167, %c96, %c0_168] : memref<1x256x4xf32, #tpu.memory_space<vmem>>, vector<1x16x4xf32>
    %473 = vector.shape_cast %472 : vector<1x16x4xf32> to vector<16x4xf32>
    %474 = vector.shape_cast %471 : vector<16x4xf32> to vector<1x16x4xf32>
    tpu.vector_store %arg21[%c0_167, %c96, %c0_168], %474 {strides = array<i32>} : memref<1x256x4xf32, #tpu.memory_space<vmem>>, vector<1x16x4xf32>,
    %475 = vector.extract_strided_slice %430 {offsets = [0, 0], sizes = [16, 4], strides = [1, 1]} : vector<16x16xf32> to vector<16x4xf32>
    %476 = vector.extract_strided_slice %72 {offsets = [0, 0], sizes = [1, 1], strides = [1, 1]} : vector<1x4xf32> to vector<1x1xf32>
    %477 = vector.broadcast %476 : vector<1x1xf32> to vector<16x4xf32>
    %478 = arith.mulf %475, %477 : vector<16x4xf32>
    %479 = vector.extract_strided_slice %430 {offsets = [0, 4], sizes = [16, 4], strides = [1, 1]} : vector<16x16xf32> to vector<16x4xf32>
    %480 = vector.extract_strided_slice %72 {offsets = [0, 1], sizes = [1, 1], strides = [1, 1]} : vector<1x4xf32> to vector<1x1xf32>
    %481 = vector.broadcast %480 : vector<1x1xf32> to vector<16x4xf32>
    %482 = arith.mulf %479, %481 : vector<16x4xf32>
    %483 = arith.addf %478, %482 : vector<16x4xf32>
    %484 = vector.extract_strided_slice %430 {offsets = [0, 8], sizes = [16, 4], strides = [1, 1]} : vector<16x16xf32> to vector<16x4xf32>
    %485 = vector.extract_strided_slice %72 {offsets = [0, 2], sizes = [1, 1], strides = [1, 1]} : vector<1x4xf32> to vector<1x1xf32>
    %486 = vector.broadcast %485 : vector<1x1xf32> to vector<16x4xf32>
    %487 = arith.mulf %484, %486 : vector<16x4xf32>
    %488 = arith.addf %483, %487 : vector<16x4xf32>
    %489 = vector.extract_strided_slice %430 {offsets = [0, 12], sizes = [16, 4], strides = [1, 1]} : vector<16x16xf32> to vector<16x4xf32>
    %490 = vector.extract_strided_slice %72 {offsets = [0, 3], sizes = [1, 1], strides = [1, 1]} : vector<1x4xf32> to vector<1x1xf32>
    %491 = vector.broadcast %490 : vector<1x1xf32> to vector<16x4xf32>
    %492 = arith.mulf %489, %491 : vector<16x4xf32>
    %493 = arith.addf %488, %492 : vector<16x4xf32>
    %c0_169 = arith.constant 0 : index
    %c160 = arith.constant 160 : index
    %c0_170 = arith.constant 0 : index
    %494 = vector.load %arg21[%c0_169, %c160, %c0_170] : memref<1x256x4xf32, #tpu.memory_space<vmem>>, vector<1x16x4xf32>
    %495 = vector.shape_cast %494 : vector<1x16x4xf32> to vector<16x4xf32>
    %496 = vector.shape_cast %493 : vector<16x4xf32> to vector<1x16x4xf32>
    tpu.vector_store %arg21[%c0_169, %c160, %c0_170], %496 {strides = array<i32>} : memref<1x256x4xf32, #tpu.memory_space<vmem>>, vector<1x16x4xf32>,
    %497 = vector.extract_strided_slice %430 {offsets = [0, 0], sizes = [16, 4], strides = [1, 1]} : vector<16x16xf32> to vector<16x4xf32>
    %498 = vector.extract_strided_slice %95 {offsets = [0, 0], sizes = [1, 1], strides = [1, 1]} : vector<1x4xf32> to vector<1x1xf32>
    %499 = vector.broadcast %498 : vector<1x1xf32> to vector<16x4xf32>
    %500 = arith.mulf %497, %499 : vector<16x4xf32>
    %501 = vector.extract_strided_slice %430 {offsets = [0, 4], sizes = [16, 4], strides = [1, 1]} : vector<16x16xf32> to vector<16x4xf32>
    %502 = vector.extract_strided_slice %95 {offsets = [0, 1], sizes = [1, 1], strides = [1, 1]} : vector<1x4xf32> to vector<1x1xf32>
    %503 = vector.broadcast %502 : vector<1x1xf32> to vector<16x4xf32>
    %504 = arith.mulf %501, %503 : vector<16x4xf32>
    %505 = arith.addf %500, %504 : vector<16x4xf32>
    %506 = vector.extract_strided_slice %430 {offsets = [0, 8], sizes = [16, 4], strides = [1, 1]} : vector<16x16xf32> to vector<16x4xf32>
    %507 = vector.extract_strided_slice %95 {offsets = [0, 2], sizes = [1, 1], strides = [1, 1]} : vector<1x4xf32> to vector<1x1xf32>
    %508 = vector.broadcast %507 : vector<1x1xf32> to vector<16x4xf32>
    %509 = arith.mulf %506, %508 : vector<16x4xf32>
    %510 = arith.addf %505, %509 : vector<16x4xf32>
    %511 = vector.extract_strided_slice %430 {offsets = [0, 12], sizes = [16, 4], strides = [1, 1]} : vector<16x16xf32> to vector<16x4xf32>
    %512 = vector.extract_strided_slice %95 {offsets = [0, 3], sizes = [1, 1], strides = [1, 1]} : vector<1x4xf32> to vector<1x1xf32>
    %513 = vector.broadcast %512 : vector<1x1xf32> to vector<16x4xf32>
    %514 = arith.mulf %511, %513 : vector<16x4xf32>
    %515 = arith.addf %510, %514 : vector<16x4xf32>
    %c0_171 = arith.constant 0 : index
    %c224 = arith.constant 224 : index
    %c0_172 = arith.constant 0 : index
    %516 = vector.load %arg21[%c0_171, %c224, %c0_172] : memref<1x256x4xf32, #tpu.memory_space<vmem>>, vector<1x16x4xf32>
    %517 = vector.shape_cast %516 : vector<1x16x4xf32> to vector<16x4xf32>
    %518 = vector.shape_cast %515 : vector<16x4xf32> to vector<1x16x4xf32>
    tpu.vector_store %arg21[%c0_171, %c224, %c0_172], %518 {strides = array<i32>} : memref<1x256x4xf32, #tpu.memory_space<vmem>>, vector<1x16x4xf32>,
    %519 = vector.extract_strided_slice %100 {offsets = [0, 24], sizes = [16, 8], strides = [1, 1]} : vector<16x32xf32> to vector<16x8xf32>
    %cst_173 = arith.constant dense<0.000000e+00> : vector<16xf32>
    %520 = vector.multi_reduction <add>, %519, %cst_173 [1] : vector<16x8xf32> to vector<16xf32>
    %521 = vector.shape_cast %520 : vector<16xf32> to vector<16x1xf32>
    %cst_174 = arith.constant 8.000000e+00 : f32
    %522 = vector.broadcast %cst_174 : f32 to vector<16x1xf32>
    %523 = arith.divf %521, %522 : vector<16x1xf32>
    %524 = vector.broadcast %523 : vector<16x1xf32> to vector<16x8xf32>
    %525 = arith.subf %519, %524 : vector<16x8xf32>
    %526 = arith.mulf %525, %525 : vector<16x8xf32>
    %cst_175 = arith.constant dense<0.000000e+00> : vector<16xf32>
    %527 = vector.multi_reduction <add>, %526, %cst_175 [1] : vector<16x8xf32> to vector<16xf32>
    %528 = vector.shape_cast %527 : vector<16xf32> to vector<16x1xf32>
    %cst_176 = arith.constant 8.000000e+00 : f32
    %529 = vector.broadcast %cst_176 : f32 to vector<16x1xf32>
    %530 = arith.divf %528, %529 : vector<16x1xf32>
    %cst_177 = arith.constant 9.99999997E-7 : f32
    %531 = vector.broadcast %cst_177 : f32 to vector<16x1xf32>
    %532 = arith.addf %530, %531 : vector<16x1xf32>
    %533 = math.rsqrt %532 : vector<16x1xf32>
    %534 = vector.broadcast %533 : vector<16x1xf32> to vector<16x8xf32>
    %535 = arith.mulf %525, %534 : vector<16x8xf32>
    %536 = vector.broadcast %103 : vector<1x8xf32> to vector<16x8xf32>
    %537 = arith.mulf %535, %536 : vector<16x8xf32>
    %538 = vector.broadcast %104 : vector<1x8xf32> to vector<16x8xf32>
    %539 = arith.addf %537, %538 : vector<16x8xf32>
    %cst_178 = arith.constant 5.000000e-01 : f32
    %540 = vector.broadcast %cst_178 : f32 to vector<16x8xf32>
    %541 = arith.mulf %540, %539 : vector<16x8xf32>
    %cst_179 = arith.constant 4.471500e-02 : f32
    %542 = vector.broadcast %cst_179 : f32 to vector<16x8xf32>
    %543 = arith.mulf %542, %539 : vector<16x8xf32>
    %544 = arith.mulf %543, %539 : vector<16x8xf32>
    %545 = arith.mulf %544, %539 : vector<16x8xf32>
    %546 = arith.addf %539, %545 : vector<16x8xf32>
    %cst_180 = arith.constant 0.797884583 : f32
    %547 = vector.broadcast %cst_180 : f32 to vector<16x8xf32>
    %548 = arith.mulf %547, %546 : vector<16x8xf32>
    %549 = math.tanh %548 : vector<16x8xf32>
    %cst_181 = arith.constant 1.000000e+00 : f32
    %550 = vector.broadcast %cst_181 : f32 to vector<16x8xf32>
    %551 = arith.addf %550, %549 : vector<16x8xf32>
    %552 = arith.mulf %541, %551 : vector<16x8xf32>
    %cst_182 = arith.constant dense<0.000000e+00> : vector<16x16xf32>
    %553 = tpu.matmul %552, %101, %cst_182 {dimension_numbers = #tpu.dot_dimension_numbers<[1], [0], [0], [1], [0, 0, 1, 1], [], []>} : vector<16x8xf32>, vector<8x16xf32>, vector<16x16xf32> -> vector<16x16xf32>
    %554 = vector.broadcast %102 : vector<1x16xf32> to vector<16x16xf32>
    %555 = arith.addf %553, %554 : vector<16x16xf32>
    %cst_183 = arith.constant 5.000000e-01 : f32
    %556 = vector.broadcast %cst_183 : f32 to vector<16x16xf32>
    %557 = arith.mulf %556, %555 : vector<16x16xf32>
    %cst_184 = arith.constant 4.471500e-02 : f32
    %558 = vector.broadcast %cst_184 : f32 to vector<16x16xf32>
    %559 = arith.mulf %558, %555 : vector<16x16xf32>
    %560 = arith.mulf %559, %555 : vector<16x16xf32>
    %561 = arith.mulf %560, %555 : vector<16x16xf32>
    %562 = arith.addf %555, %561 : vector<16x16xf32>
    %cst_185 = arith.constant 0.797884583 : f32
    %563 = vector.broadcast %cst_185 : f32 to vector<16x16xf32>
    %564 = arith.mulf %563, %562 : vector<16x16xf32>
    %565 = math.tanh %564 : vector<16x16xf32>
    %cst_186 = arith.constant 1.000000e+00 : f32
    %566 = vector.broadcast %cst_186 : f32 to vector<16x16xf32>
    %567 = arith.addf %566, %565 : vector<16x16xf32>
    %568 = arith.mulf %557, %567 : vector<16x16xf32>
    %569 = vector.extract_strided_slice %568 {offsets = [0, 0], sizes = [16, 4], strides = [1, 1]} : vector<16x16xf32> to vector<16x4xf32>
    %570 = vector.extract_strided_slice %26 {offsets = [0, 0], sizes = [1, 1], strides = [1, 1]} : vector<1x4xf32> to vector<1x1xf32>
    %571 = vector.broadcast %570 : vector<1x1xf32> to vector<16x4xf32>
    %572 = arith.mulf %569, %571 : vector<16x4xf32>
    %573 = vector.extract_strided_slice %568 {offsets = [0, 4], sizes = [16, 4], strides = [1, 1]} : vector<16x16xf32> to vector<16x4xf32>
    %574 = vector.extract_strided_slice %26 {offsets = [0, 1], sizes = [1, 1], strides = [1, 1]} : vector<1x4xf32> to vector<1x1xf32>
    %575 = vector.broadcast %574 : vector<1x1xf32> to vector<16x4xf32>
    %576 = arith.mulf %573, %575 : vector<16x4xf32>
    %577 = arith.addf %572, %576 : vector<16x4xf32>
    %578 = vector.extract_strided_slice %568 {offsets = [0, 8], sizes = [16, 4], strides = [1, 1]} : vector<16x16xf32> to vector<16x4xf32>
    %579 = vector.extract_strided_slice %26 {offsets = [0, 2], sizes = [1, 1], strides = [1, 1]} : vector<1x4xf32> to vector<1x1xf32>
    %580 = vector.broadcast %579 : vector<1x1xf32> to vector<16x4xf32>
    %581 = arith.mulf %578, %580 : vector<16x4xf32>
    %582 = arith.addf %577, %581 : vector<16x4xf32>
    %583 = vector.extract_strided_slice %568 {offsets = [0, 12], sizes = [16, 4], strides = [1, 1]} : vector<16x16xf32> to vector<16x4xf32>
    %584 = vector.extract_strided_slice %26 {offsets = [0, 3], sizes = [1, 1], strides = [1, 1]} : vector<1x4xf32> to vector<1x1xf32>
    %585 = vector.broadcast %584 : vector<1x1xf32> to vector<16x4xf32>
    %586 = arith.mulf %583, %585 : vector<16x4xf32>
    %587 = arith.addf %582, %586 : vector<16x4xf32>
    %c0_187 = arith.constant 0 : index
    %c48 = arith.constant 48 : index
    %c0_188 = arith.constant 0 : index
    %588 = vector.load %arg21[%c0_187, %c48, %c0_188] : memref<1x256x4xf32, #tpu.memory_space<vmem>>, vector<1x16x4xf32>
    %589 = vector.shape_cast %588 : vector<1x16x4xf32> to vector<16x4xf32>
    %590 = vector.shape_cast %587 : vector<16x4xf32> to vector<1x16x4xf32>
    tpu.vector_store %arg21[%c0_187, %c48, %c0_188], %590 {strides = array<i32>} : memref<1x256x4xf32, #tpu.memory_space<vmem>>, vector<1x16x4xf32>,
    %591 = vector.extract_strided_slice %568 {offsets = [0, 0], sizes = [16, 4], strides = [1, 1]} : vector<16x16xf32> to vector<16x4xf32>
    %592 = vector.extract_strided_slice %49 {offsets = [0, 0], sizes = [1, 1], strides = [1, 1]} : vector<1x4xf32> to vector<1x1xf32>
    %593 = vector.broadcast %592 : vector<1x1xf32> to vector<16x4xf32>
    %594 = arith.mulf %591, %593 : vector<16x4xf32>
    %595 = vector.extract_strided_slice %568 {offsets = [0, 4], sizes = [16, 4], strides = [1, 1]} : vector<16x16xf32> to vector<16x4xf32>
    %596 = vector.extract_strided_slice %49 {offsets = [0, 1], sizes = [1, 1], strides = [1, 1]} : vector<1x4xf32> to vector<1x1xf32>
    %597 = vector.broadcast %596 : vector<1x1xf32> to vector<16x4xf32>
    %598 = arith.mulf %595, %597 : vector<16x4xf32>
    %599 = arith.addf %594, %598 : vector<16x4xf32>
    %600 = vector.extract_strided_slice %568 {offsets = [0, 8], sizes = [16, 4], strides = [1, 1]} : vector<16x16xf32> to vector<16x4xf32>
    %601 = vector.extract_strided_slice %49 {offsets = [0, 2], sizes = [1, 1], strides = [1, 1]} : vector<1x4xf32> to vector<1x1xf32>
    %602 = vector.broadcast %601 : vector<1x1xf32> to vector<16x4xf32>
    %603 = arith.mulf %600, %602 : vector<16x4xf32>
    %604 = arith.addf %599, %603 : vector<16x4xf32>
    %605 = vector.extract_strided_slice %568 {offsets = [0, 12], sizes = [16, 4], strides = [1, 1]} : vector<16x16xf32> to vector<16x4xf32>
    %606 = vector.extract_strided_slice %49 {offsets = [0, 3], sizes = [1, 1], strides = [1, 1]} : vector<1x4xf32> to vector<1x1xf32>
    %607 = vector.broadcast %606 : vector<1x1xf32> to vector<16x4xf32>
    %608 = arith.mulf %605, %607 : vector<16x4xf32>
    %609 = arith.addf %604, %608 : vector<16x4xf32>
    %c0_189 = arith.constant 0 : index
    %c112 = arith.constant 112 : index
    %c0_190 = arith.constant 0 : index
    %610 = vector.load %arg21[%c0_189, %c112, %c0_190] : memref<1x256x4xf32, #tpu.memory_space<vmem>>, vector<1x16x4xf32>
    %611 = vector.shape_cast %610 : vector<1x16x4xf32> to vector<16x4xf32>
    %612 = vector.shape_cast %609 : vector<16x4xf32> to vector<1x16x4xf32>
    tpu.vector_store %arg21[%c0_189, %c112, %c0_190], %612 {strides = array<i32>} : memref<1x256x4xf32, #tpu.memory_space<vmem>>, vector<1x16x4xf32>,
    %613 = vector.extract_strided_slice %568 {offsets = [0, 0], sizes = [16, 4], strides = [1, 1]} : vector<16x16xf32> to vector<16x4xf32>
    %614 = vector.extract_strided_slice %72 {offsets = [0, 0], sizes = [1, 1], strides = [1, 1]} : vector<1x4xf32> to vector<1x1xf32>
    %615 = vector.broadcast %614 : vector<1x1xf32> to vector<16x4xf32>
    %616 = arith.mulf %613, %615 : vector<16x4xf32>
    %617 = vector.extract_strided_slice %568 {offsets = [0, 4], sizes = [16, 4], strides = [1, 1]} : vector<16x16xf32> to vector<16x4xf32>
    %618 = vector.extract_strided_slice %72 {offsets = [0, 1], sizes = [1, 1], strides = [1, 1]} : vector<1x4xf32> to vector<1x1xf32>
    %619 = vector.broadcast %618 : vector<1x1xf32> to vector<16x4xf32>
    %620 = arith.mulf %617, %619 : vector<16x4xf32>
    %621 = arith.addf %616, %620 : vector<16x4xf32>
    %622 = vector.extract_strided_slice %568 {offsets = [0, 8], sizes = [16, 4], strides = [1, 1]} : vector<16x16xf32> to vector<16x4xf32>
    %623 = vector.extract_strided_slice %72 {offsets = [0, 2], sizes = [1, 1], strides = [1, 1]} : vector<1x4xf32> to vector<1x1xf32>
    %624 = vector.broadcast %623 : vector<1x1xf32> to vector<16x4xf32>
    %625 = arith.mulf %622, %624 : vector<16x4xf32>
    %626 = arith.addf %621, %625 : vector<16x4xf32>
    %627 = vector.extract_strided_slice %568 {offsets = [0, 12], sizes = [16, 4], strides = [1, 1]} : vector<16x16xf32> to vector<16x4xf32>
    %628 = vector.extract_strided_slice %72 {offsets = [0, 3], sizes = [1, 1], strides = [1, 1]} : vector<1x4xf32> to vector<1x1xf32>
    %629 = vector.broadcast %628 : vector<1x1xf32> to vector<16x4xf32>
    %630 = arith.mulf %627, %629 : vector<16x4xf32>
    %631 = arith.addf %626, %630 : vector<16x4xf32>
    %c0_191 = arith.constant 0 : index
    %c176 = arith.constant 176 : index
    %c0_192 = arith.constant 0 : index
    %632 = vector.load %arg21[%c0_191, %c176, %c0_192] : memref<1x256x4xf32, #tpu.memory_space<vmem>>, vector<1x16x4xf32>
    %633 = vector.shape_cast %632 : vector<1x16x4xf32> to vector<16x4xf32>
    %634 = vector.shape_cast %631 : vector<16x4xf32> to vector<1x16x4xf32>
    tpu.vector_store %arg21[%c0_191, %c176, %c0_192], %634 {strides = array<i32>} : memref<1x256x4xf32, #tpu.memory_space<vmem>>, vector<1x16x4xf32>,
    %635 = vector.extract_strided_slice %568 {offsets = [0, 0], sizes = [16, 4], strides = [1, 1]} : vector<16x16xf32> to vector<16x4xf32>
    %636 = vector.extract_strided_slice %95 {offsets = [0, 0], sizes = [1, 1], strides = [1, 1]} : vector<1x4xf32> to vector<1x1xf32>
    %637 = vector.broadcast %636 : vector<1x1xf32> to vector<16x4xf32>
    %638 = arith.mulf %635, %637 : vector<16x4xf32>
    %639 = vector.extract_strided_slice %568 {offsets = [0, 4], sizes = [16, 4], strides = [1, 1]} : vector<16x16xf32> to vector<16x4xf32>
    %640 = vector.extract_strided_slice %95 {offsets = [0, 1], sizes = [1, 1], strides = [1, 1]} : vector<1x4xf32> to vector<1x1xf32>
    %641 = vector.broadcast %640 : vector<1x1xf32> to vector<16x4xf32>
    %642 = arith.mulf %639, %641 : vector<16x4xf32>
    %643 = arith.addf %638, %642 : vector<16x4xf32>
    %644 = vector.extract_strided_slice %568 {offsets = [0, 8], sizes = [16, 4], strides = [1, 1]} : vector<16x16xf32> to vector<16x4xf32>
    %645 = vector.extract_strided_slice %95 {offsets = [0, 2], sizes = [1, 1], strides = [1, 1]} : vector<1x4xf32> to vector<1x1xf32>
    %646 = vector.broadcast %645 : vector<1x1xf32> to vector<16x4xf32>
    %647 = arith.mulf %644, %646 : vector<16x4xf32>
    %648 = arith.addf %643, %647 : vector<16x4xf32>
    %649 = vector.extract_strided_slice %568 {offsets = [0, 12], sizes = [16, 4], strides = [1, 1]} : vector<16x16xf32> to vector<16x4xf32>
    %650 = vector.extract_strided_slice %95 {offsets = [0, 3], sizes = [1, 1], strides = [1, 1]} : vector<1x4xf32> to vector<1x1xf32>
    %651 = vector.broadcast %650 : vector<1x1xf32> to vector<16x4xf32>
    %652 = arith.mulf %649, %651 : vector<16x4xf32>
    %653 = arith.addf %648, %652 : vector<16x4xf32>
    %c0_193 = arith.constant 0 : index
    %c240 = arith.constant 240 : index
    %c0_194 = arith.constant 0 : index
    %654 = vector.load %arg21[%c0_193, %c240, %c0_194] : memref<1x256x4xf32, #tpu.memory_space<vmem>>, vector<1x16x4xf32>
    %655 = vector.shape_cast %654 : vector<1x16x4xf32> to vector<16x4xf32>
    %656 = vector.shape_cast %653 : vector<16x4xf32> to vector<1x16x4xf32>
    tpu.vector_store %arg21[%c0_193, %c240, %c0_194], %656 {strides = array<i32>} : memref<1x256x4xf32, #tpu.memory_space<vmem>>, vector<1x16x4xf32>,
    %657 = vector.extract_strided_slice %1 {offsets = [0, 0], sizes = [1, 32], strides = [1, 1]} : vector<7x32xf32> to vector<1x32xf32>
    %c0_195 = arith.constant 0 : index
    %c0_196 = arith.constant 0 : index
    %658 = vector.load %arg15[%c0_195, %c0_196] : memref<32x64xf32, #tpu.memory_space<vmem>>, vector<32x64xf32>
    %cst_197 = arith.constant dense<0.000000e+00> : vector<1x64xf32>
    %659 = tpu.matmul %657, %658, %cst_197 {dimension_numbers = #tpu.dot_dimension_numbers<[1], [0], [0], [1], [0, 0, 1, 1], [], []>} : vector<1x32xf32>, vector<32x64xf32>, vector<1x64xf32> -> vector<1x64xf32>
    %c0_198 = arith.constant 0 : index
    %c0_199 = arith.constant 0 : index
    %660 = vector.load %arg16[%c0_198, %c0_199] : memref<1x64xf32, #tpu.memory_space<vmem>>, vector<1x64xf32>
    %661 = arith.addf %659, %660 : vector<1x64xf32>
    %cst_200 = arith.constant 0.000000e+00 : f32
    %662 = vector.broadcast %cst_200 : f32 to vector<1x64xf32>
    %663 = arith.maximumf %661, %662 : vector<1x64xf32>
    %c0_201 = arith.constant 0 : index
    %c0_202 = arith.constant 0 : index
    %664 = vector.load %arg17[%c0_201, %c0_202] : memref<64x64xf32, #tpu.memory_space<vmem>>, vector<64x64xf32>
    %cst_203 = arith.constant dense<0.000000e+00> : vector<1x64xf32>
    %665 = tpu.matmul %663, %664, %cst_203 {dimension_numbers = #tpu.dot_dimension_numbers<[1], [0], [0], [1], [0, 0, 1, 1], [], []>} : vector<1x64xf32>, vector<64x64xf32>, vector<1x64xf32> -> vector<1x64xf32>
    %c0_204 = arith.constant 0 : index
    %c0_205 = arith.constant 0 : index
    %666 = vector.load %arg18[%c0_204, %c0_205] : memref<1x64xf32, #tpu.memory_space<vmem>>, vector<1x64xf32>
    %667 = arith.addf %665, %666 : vector<1x64xf32>
    %cst_206 = arith.constant 0.000000e+00 : f32
    %668 = vector.broadcast %cst_206 : f32 to vector<1x64xf32>
    %669 = arith.maximumf %667, %668 : vector<1x64xf32>
    %c0_207 = arith.constant 0 : index
    %c0_208 = arith.constant 0 : index
    %670 = vector.load %arg19[%c0_207, %c0_208] : memref<64x4xf32, #tpu.memory_space<vmem>>, vector<64x4xf32>
    %cst_209 = arith.constant dense<0.000000e+00> : vector<1x4xf32>
    %671 = tpu.matmul %669, %670, %cst_209 {dimension_numbers = #tpu.dot_dimension_numbers<[1], [0], [0], [1], [0, 0, 1, 1], [], []>} : vector<1x64xf32>, vector<64x4xf32>, vector<1x4xf32> -> vector<1x4xf32>
    %c0_210 = arith.constant 0 : index
    %c0_211 = arith.constant 0 : index
    %672 = vector.load %arg20[%c0_210, %c0_211] : memref<1x4xf32, #tpu.memory_space<vmem>>, vector<1x4xf32>
    %673 = arith.addf %671, %672 : vector<1x4xf32>
    %c0_212 = arith.constant 0 : index
    %c0_213 = arith.constant 0 : index
    %c0_214 = arith.constant 0 : index
    %674 = vector.load %arg22[%c0_212, %c0_213, %c0_214] : memref<1x1x4xf32, #tpu.memory_space<vmem>>, vector<1x1x4xf32>
    %675 = vector.shape_cast %674 : vector<1x1x4xf32> to vector<1x4xf32>
    %676 = vector.shape_cast %673 : vector<1x4xf32> to vector<1x1x4xf32>
    tpu.vector_store %arg22[%c0_212, %c0_213, %c0_214], %676 {strides = array<i32>} : memref<1x1x4xf32, #tpu.memory_space<vmem>>, vector<1x1x4xf32>,
    return
  }
  func.func @transform_0(%arg0: i32) -> (i32, i32, i32) {
    %c0_i32 = arith.constant 0 : i32
    %c0_i32_0 = arith.constant 0 : i32
    %c0_i32_1 = arith.constant 0 : i32
    return %arg0, %c0_i32, %c0_i32_0 : i32, i32, i32
  }
  func.func @transform_1(%arg0: i32) -> (i32, i32, i32) {
    %c0_i32 = arith.constant 0 : i32
    %c0_i32_0 = arith.constant 0 : i32
    %c0_i32_1 = arith.constant 0 : i32
    return %arg0, %c0_i32, %c0_i32_0 : i32, i32, i32
  }
  func.func @transform_2(%arg0: i32) -> (i32, i32) {
    %c0_i32 = arith.constant 0 : i32
    %c0_i32_0 = arith.constant 0 : i32
    %c0_i32_1 = arith.constant 0 : i32
    return %c0_i32, %c0_i32_0 : i32, i32
  }
  func.func @transform_3(%arg0: i32) -> (i32, i32) {
    %c0_i32 = arith.constant 0 : i32
    %c0_i32_0 = arith.constant 0 : i32
    %c0_i32_1 = arith.constant 0 : i32
    return %c0_i32, %c0_i32_0 : i32, i32
  }
  func.func @transform_4(%arg0: i32) -> (i32, i32) {
    %c0_i32 = arith.constant 0 : i32
    %c0_i32_0 = arith.constant 0 : i32
    %c0_i32_1 = arith.constant 0 : i32
    return %c0_i32, %c0_i32_0 : i32, i32
  }
  func.func @transform_5(%arg0: i32) -> (i32, i32) {
    %c0_i32 = arith.constant 0 : i32
    %c0_i32_0 = arith.constant 0 : i32
    %c0_i32_1 = arith.constant 0 : i32
    return %c0_i32, %c0_i32_0 : i32, i32
  }
  func.func @transform_6(%arg0: i32) -> (i32, i32) {
    %c0_i32 = arith.constant 0 : i32
    %c0_i32_0 = arith.constant 0 : i32
    %c0_i32_1 = arith.constant 0 : i32
    return %c0_i32, %c0_i32_0 : i32, i32
  }
  func.func @transform_7(%arg0: i32) -> (i32, i32) {
    %c0_i32 = arith.constant 0 : i32
    %c0_i32_0 = arith.constant 0 : i32
    %c0_i32_1 = arith.constant 0 : i32
    return %c0_i32, %c0_i32_0 : i32, i32
  }
  func.func @transform_8(%arg0: i32) -> (i32, i32, i32) {
    %c0_i32 = arith.constant 0 : i32
    %c0_i32_0 = arith.constant 0 : i32
    %c0_i32_1 = arith.constant 0 : i32
    %c0_i32_2 = arith.constant 0 : i32
    return %c0_i32, %c0_i32_0, %c0_i32_1 : i32, i32, i32
  }
  func.func @transform_9(%arg0: i32) -> (i32, i32, i32) {
    %c0_i32 = arith.constant 0 : i32
    %c0_i32_0 = arith.constant 0 : i32
    %c0_i32_1 = arith.constant 0 : i32
    %c0_i32_2 = arith.constant 0 : i32
    return %c0_i32, %c0_i32_0, %c0_i32_1 : i32, i32, i32
  }
  func.func @transform_10(%arg0: i32) -> (i32, i32, i32) {
    %c0_i32 = arith.constant 0 : i32
    %c0_i32_0 = arith.constant 0 : i32
    %c0_i32_1 = arith.constant 0 : i32
    %c0_i32_2 = arith.constant 0 : i32
    return %c0_i32, %c0_i32_0, %c0_i32_1 : i32, i32, i32
  }
  func.func @transform_11(%arg0: i32) -> (i32, i32, i32) {
    %c0_i32 = arith.constant 0 : i32
    %c0_i32_0 = arith.constant 0 : i32
    %c0_i32_1 = arith.constant 0 : i32
    %c0_i32_2 = arith.constant 0 : i32
    return %c0_i32, %c0_i32_0, %c0_i32_1 : i32, i32, i32
  }
  func.func @transform_12(%arg0: i32) -> (i32, i32, i32) {
    %c0_i32 = arith.constant 0 : i32
    %c0_i32_0 = arith.constant 0 : i32
    %c0_i32_1 = arith.constant 0 : i32
    %c0_i32_2 = arith.constant 0 : i32
    return %c0_i32, %c0_i32_0, %c0_i32_1 : i32, i32, i32
  }
  func.func @transform_13(%arg0: i32) -> (i32, i32, i32) {
    %c0_i32 = arith.constant 0 : i32
    %c0_i32_0 = arith.constant 0 : i32
    %c0_i32_1 = arith.constant 0 : i32
    %c0_i32_2 = arith.constant 0 : i32
    return %c0_i32, %c0_i32_0, %c0_i32_1 : i32, i32, i32
  }
  func.func @transform_14(%arg0: i32) -> (i32, i32) {
    %c0_i32 = arith.constant 0 : i32
    %c0_i32_0 = arith.constant 0 : i32
    %c0_i32_1 = arith.constant 0 : i32
    return %c0_i32, %c0_i32_0 : i32, i32
  }
  func.func @transform_15(%arg0: i32) -> (i32, i32) {
    %c0_i32 = arith.constant 0 : i32
    %c0_i32_0 = arith.constant 0 : i32
    %c0_i32_1 = arith.constant 0 : i32
    return %c0_i32, %c0_i32_0 : i32, i32
  }
  func.func @transform_16(%arg0: i32) -> (i32, i32) {
    %c0_i32 = arith.constant 0 : i32
    %c0_i32_0 = arith.constant 0 : i32
    %c0_i32_1 = arith.constant 0 : i32
    return %c0_i32, %c0_i32_0 : i32, i32
  }
  func.func @transform_17(%arg0: i32) -> (i32, i32) {
    %c0_i32 = arith.constant 0 : i32
    %c0_i32_0 = arith.constant 0 : i32
    %c0_i32_1 = arith.constant 0 : i32
    return %c0_i32, %c0_i32_0 : i32, i32
  }
  func.func @transform_18(%arg0: i32) -> (i32, i32) {
    %c0_i32 = arith.constant 0 : i32
    %c0_i32_0 = arith.constant 0 : i32
    %c0_i32_1 = arith.constant 0 : i32
    return %c0_i32, %c0_i32_0 : i32, i32
  }
  func.func @transform_19(%arg0: i32) -> (i32, i32) {
    %c0_i32 = arith.constant 0 : i32
    %c0_i32_0 = arith.constant 0 : i32
    %c0_i32_1 = arith.constant 0 : i32
    return %c0_i32, %c0_i32_0 : i32, i32
  }
  func.func @transform_20(%arg0: i32) -> (i32, i32, i32) {
    %c0_i32 = arith.constant 0 : i32
    %c0_i32_0 = arith.constant 0 : i32
    %c0_i32_1 = arith.constant 0 : i32
    return %arg0, %c0_i32, %c0_i32_0 : i32, i32, i32
  }
  func.func @transform_21(%arg0: i32) -> (i32, i32, i32) {
    %c0_i32 = arith.constant 0 : i32
    %c0_i32_0 = arith.constant 0 : i32
    %c0_i32_1 = arith.constant 0 : i32
    return %arg0, %c0_i32, %c0_i32_0 : i32, i32, i32
  }
}

</mosaic_0001>

<bundles_post_ra>
// kernel: sam_with_bbox_forward.3
= control target key start
LH: loop header
LB: loop body
LE: loop exit
PB: predicated region body
PF: predicated region fallthrough
CT: control target
= control target key end

     0   :  { %s2292_s29 = smov 0   ;;  %s2623_s0 = inlined_call_operand.vmem [shape: f32[2,16,192], index: 0, kind: input, shape index: {}]   ;;  %s2624_s1 = inlined_call_operand.vmem [shape: f32[192,32], index: 1, kind: input, shape index: {}]   ;;  %s2625_s2 = inlined_call_operand.vmem [shape: f32[1,32], index: 2, kind: input, shape index: {}]   ;;  %s2626_s3 = inlined_call_operand.vmem [shape: f32[3,1,32], index: 3, kind: input, shape index: {}]   ;;  %s2627_s4 = inlined_call_operand.vmem [shape: f32[3,1,32], index: 4, kind: input, shape index: {}]   ;;  %s2628_s5 = inlined_call_operand.vmem [shape: f32[32,96], index: 5, kind: input, shape index: {}]   ;;  %s2629_s6 = inlined_call_operand.vmem [shape: f32[1,96], index: 6, kind: input, shape index: {}]   ;;  %s2630_s7 = inlined_call_operand.vmem [shape: f32[32,32], index: 7, kind: input, shape index: {}]   ;;  %s2631_s8 = inlined_call_operand.vmem [shape: f32[1,32], index: 8, kind: input, shape index: {}]   ;;  %s2632_s9 = inlined_call_operand.vmem [shape: f32[32,64], index: 9, kind: input, shape index: {}]   ;;  %s2633_s10 = inlined_call_operand.vmem [shape: f32[1,64], index: 10, kind: input, shape index: {}]   ;;  %s2634_s11 = inlined_call_operand.vmem [shape: f32[64,32], index: 11, kind: input, shape index: {}]   ;;  %s2635_s12 = inlined_call_operand.vmem [shape: f32[1,32], index: 12, kind: input, shape index: {}]   ;;  %s2636_s13 = inlined_call_operand.vmem [shape: f32[32,32], index: 13, kind: input, shape index: {}]   ;;  %s2637_s14 = inlined_call_operand.vmem [shape: f32[2,16,32], index: 14, kind: output, shape index: {}]  }
   0x1 LB: > { %s1923_s30 = sadd.s32 4294967295, %s2211_s29   ;;  %p1927_p0 = scmp.ge.s32.totalorder %s2211_s29, 1  ;;  %s2211_s29 = sphi %s2292_s29, %s24_s29  }
   0x2   : > { %p412_p1 = scmp.lt.s32.totalorder %s2211_s29, 3 }
   0x4   : > { %p413_p2 = pnand %p1927_p0, %p412_p1 }
   0x5   : > { %p458_p3 = scmp.lt.s32.totalorder (!%p413_p2), %s1923_s30, 1  ;;  %s2214_s17 = smov (!%p413_p2), 96  }
   0x6   : > { %416 = sbr.rel (%p413_p2) target bundleno = 3446 (0xd76), region = 76  ;;  %s2215_s22 = smov (!%p413_p2), 64  }
   0xb   : > { %v487_v0 = vld [vmem:[%s2624_s1 + $0x78] sm:$0xff]  ;;  %v2213_v1 = vmov 0.0   ;;  %v486_v2 = vld [vmem:[%s2624_s1 + $0x70] sm:$0xff]  ;;  %s2639_s30 = smov (!%p458_p3, %s1923_s30), 1  ;;  %v485_v3 = vld [vmem:[%s2624_s1 + $0x68] sm:$0xff]  ;;  %vm503_vm0 = vcmask 523264  }
   0xc   : > { %510 = vmatprep.subr.mxu0 %v2213_v1  ;;  %s1979_s21 = sshll.u32 %s2639_s30, 5  ;;  %v484_v4 = vld [vmem:[%s2624_s1 + $0x60] sm:$0xff]  ;;  %v483_v5 = vld [vmem:[%s2624_s1 + $0x58] sm:$0xff]  ;;  %v482_v7 = vld [vmem:[%s2624_s1 + $0x50] sm:$0xff]  ;;  %vm587_vm1 = vcmask 261120   ;;  %vm912_vm2 = vcmask 130048  }
   0xd   : > { %511 = vmatpush1.msra.mxu0 %v487_v0  ;;  %s2321_s26 = scalar_lea.vmem %s2623_s0, %s1979_s21  ;;  %v481_v8 = vld [vmem:[%s2624_s1 + $0x48] sm:$0xff]  ;;  %v480_v9 = vld [vmem:[%s2624_s1 + $0x40] sm:$0xff]  ;;  %v479_v10 = vld [vmem:[%s2624_s1 + $0x38] sm:$0xff]  ;;  %s1980_s15 = sshll.u32 %s2639_s30, 4 }
   0xe   : > { %512 = vmatprep.subr.mxu0 %v2213_v1  ;;  %v469_v6 = vld [vmem:[%s2321_s26 + $0x8] sm:$0xff]  ;;  %v478_v11 = vld [vmem:[%s2624_s1 + $0x30] sm:$0xff]  ;;  %v476_v13 = vld [vmem:[%s2624_s1 + $0x20] sm:$0xff]  ;;  %s467_s19 = scalar_lea.vmem %s2637_s14, %s1980_s15 }
   0xf   : > { %513 = vmatpush1.msra.mxu0 %v486_v2  ;;  %1933 = vmatprep.mubr.msk.f32.mxu0 %vm503_vm0, %v469_v6  ;;  %v477_v12 = vld [vmem:[%s2624_s1 + $0x28] sm:$0xff]  ;;  %v475_v14 = vld [vmem:[%s2624_s1 + $0x18] sm:$0xff]  ;;  %v474_v15 = vld [vmem:[%s2624_s1 + $0x10] sm:$0xff] }
  0x10   : > { %514 = vmatprep.subr.mxu0 %v2213_v1  ;;  %v473_v16 = vld [vmem:[%s2624_s1 + $0x8] sm:$0xff]  ;;  %v472_v17 = vld [vmem:[%s2624_s1] sm:$0xff]  ;;  %v495_v18 = vld [vmem:[%s2624_s1 + $0xb8] sm:$0xff] }
  0x11   : > { %515 = vmatpush1.msra.mxu0 %v485_v3  ;;  %v494_v19 = vld [vmem:[%s2624_s1 + $0xb0] sm:$0xff]  ;;  %v493_v20 = vld [vmem:[%s2624_s1 + $0xa8] sm:$0xff]  ;;  %v492_v21 = vld [vmem:[%s2624_s1 + $0xa0] sm:$0xff] }
  0x12   : > { %516 = vmatprep.subr.mxu0 %v2213_v1  ;;  %v491_v22 = vld [vmem:[%s2624_s1 + $0x98] sm:$0xff]  ;;  %v490_v23 = vld [vmem:[%s2624_s1 + $0x90] sm:$0xff]  ;;  %v489_v24 = vld [vmem:[%s2624_s1 + $0x88] sm:$0xff] }
  0x13   : > { %517 = vmatpush1.msra.mxu0 %v484_v4  ;;  %v488_v25 = vld [vmem:[%s2624_s1 + $0x80] sm:$0xff]  ;;  %v471_v27 = vld [vmem:[%s2321_s26 + $0x18] sm:$0xff]  ;;  %v470_v28 = vld [vmem:[%s2321_s26 + $0x10] sm:$0xff] }
  0x14   : > { %518 = vmatprep.subr.mxu0 %v2213_v1  ;;  %v468_v26 = vld [vmem:[%s2321_s26] sm:$0xff]  ;;  %v634_v38 = vld [vmem:[%s2628_s5 + $0x18] sm:$0xff]  ;;  %v633_v39 = vld [vmem:[%s2628_s5 + $0x10] sm:$0xff] }
  0x15   : > { %519 = vmatpush1.msra.mxu0 %v483_v5  ;;  %v1932_v29 = vld [vmem:[%s2625_s2] ss:$0 sm:$0xff]  ;;  %2045 = vmatprep.subr.mxu1 %v634_v38  ;;  %v632_v40 = vld [vmem:[%s2628_s5 + $0x8] sm:$0xff] }
  0x16   : > { %520 = vmatprep.subr.mxu0 %v2213_v1  ;;  %2046 = vmatpush3.msra.mxu1 %v634_v38  ;;  %v631_v41 = vld [vmem:[%s2628_s5] sm:$0xff] }
  0x17   : > { %521 = vmatpush1.msra.mxu0 %v482_v7  ;;  %2047 = vmatprep.subr.mxu1 %v633_v39  ;;  %v2448_v53 = vld [vmem:[%s2629_s6] ss:$0 sm:$0xff] }
  0x18   : > { %522 = vmatprep.subr.mxu0 %v2213_v1  ;;  %2048 = vmatpush3.msra.mxu1 %v633_v39  ;;  %v1935_v61 = vld [vmem:[%s2626_s3] ss:$0 sm:$0xff] }
  0x19   : > { %523 = vmatpush1.msra.mxu0 %v481_v8  ;;  %2049 = vmatprep.subr.mxu1 %v632_v40  ;;  %v1936_v0 = vld [vmem:[%s2627_s4] ss:$0 sm:$0xff] }
  0x1a   : > { %524 = vmatprep.subr.mxu0 %v2213_v1  ;;  %2050 = vmatpush3.msra.mxu1 %v632_v40 }
  0x1b   : > { %525 = vmatpush1.msra.mxu0 %v480_v9  ;;  %2051 = vmatprep.subr.mxu1 %v631_v41 }
  0x1c   : > { %526 = vmatprep.subr.mxu0 %v2213_v1  ;;  %2052 = vmatpush3.msra.mxu1 %v631_v41 }
  0x1d   : > { %527 = vmatpush1.msra.mxu0 %v479_v10 }
  0x1e   : > { %528 = vmatprep.subr.mxu0 %v2213_v1 }
  0x1f   : > { %529 = vmatpush1.msra.mxu0 %v478_v11 }
  0x20   : > { %530 = vmatprep.subr.mxu0 %v2213_v1 }
  0x21   : > { %531 = vmatpush1.msra.mxu0 %v477_v12 }
  0x22   : > { %532 = vmatprep.subr.mxu0 %v2213_v1 }
  0x23   : > { %533 = vmatpush1.msra.mxu0 %v476_v13 }
  0x24   : > { %534 = vmatprep.subr.mxu0 %v2213_v1 }
  0x25   : > { %535 = vmatpush1.msra.mxu0 %v475_v14 }
  0x26   : > { %536 = vmatprep.subr.mxu0 %v2213_v1 }
  0x27   : > { %537 = vmatpush1.msra.mxu0 %v474_v15 }
  0x28   : > { %538 = vmatprep.subr.mxu0 %v2213_v1 }
  0x29   : > { %539 = vmatpush1.msra.mxu0 %v473_v16 }
  0x2a   : > { %540 = vmatprep.subr.mxu0 %v2213_v1 }
  0x2b   : > { %541 = vmatpush1.msra.mxu0 %v472_v17 }
  0x2c   : > { %558 = vmatprep.subr.mxu0 %v2213_v1 }
  0x2d   : > { %559 = vmatpush2.msra.mxu0 %v495_v18 }
  0x2e   : > { %560 = vmatprep.subr.mxu0 %v2213_v1 }
  0x2f   : > { %561 = vmatpush2.msra.mxu0 %v494_v19 }
  0x30   : > { %562 = vmatprep.subr.mxu0 %v2213_v1 }
  0x31   : > { %563 = vmatpush2.msra.mxu0 %v493_v20 }
  0x32   : > { %564 = vmatprep.subr.mxu0 %v2213_v1 }
  0x33   : > { %565 = vmatpush2.msra.mxu0 %v492_v21 }
  0x34   : > { %566 = vmatprep.subr.mxu0 %v2213_v1 }
  0x35   : > { %567 = vmatpush2.msra.mxu0 %v491_v22 }
  0x36   : > { %568 = vmatprep.subr.mxu0 %v2213_v1 }
  0x37   : > { %569 = vmatpush2.msra.mxu0 %v490_v23 }
  0x38   : > { %570 = vmatprep.subr.mxu0 %v2213_v1 }
  0x39   : > { %571 = vmatpush2.msra.mxu0 %v489_v24 }
  0x3a   : > { %572 = vmatprep.subr.mxu0 %v2213_v1 }
  0x3b   : > { %573 = vmatpush2.msra.mxu0 %v488_v25 }
  0x3c   : > { %575 = vmatmul.mubr.f32.vlgmr.msra.gmra.mxu0 %v468_v26 }
  0x3d   : > { %1934 = vmatprep.mubr.msk.f32.mxu0 %vm503_vm0, %v471_v27 }
  0x40   : > { %580 = vmatmul.mubr.f32.gmra.mxu0 %v470_v28 }
  0xfc   : > { %v576_v30 = vpop.f32.mrf.mxu0 }
  0xfd   : > { %v2413_v31 = vadd.f32 %v1932_v29, %v576_v30 }
  0xfe   : > { %v578_v32 = vpop.f32.mrf.mxu0 }
  0xff   : > { %v588_v33 = vsel %vm587_vm1, %v2413_v31, 0.0 }
 0x100   : > { %v581_v34 = vpop.f32.mrf.mxu0  ;;  %589 = vadd.xlane.f32.xlu0 %v588_v33 }
 0x101   : > { %v2417_v35 = vadd.f32 %v1932_v29, %v581_v34 }
 0x102   : > { %v583_v36 = vpop.f32.mrf.mxu0 }
 0x103   : > { %v591_v37 = vsel %vm587_vm1, %v2417_v35, 0.0 }
 0x104   : > { %592 = vadd.xlane.f32.xlu0 %v591_v37 }
 0x11a   : > { %738 = vrot.lane.b32.xlu0 %v634_v38, %s2214_s17 }
 0x11e   : > { %828 = vrot.lane.b32.xlu0 %v634_v38, %s2215_s22 }
 0x122   : > { %824 = vrot.lane.b32.xlu0 %v632_v40, %s2215_s22 }
 0x126   : > { %822 = vrot.lane.b32.xlu0 %v631_v41, %s2215_s22 }
 0x189   : > { %v590_v42 = vpop.xlane.xlu0 %589 }
 0x18a   : > { %v595_v43 = vmul.f32 0.03125, %v590_v42 }
 0x18c   : > { %v597_v44 = vsub.f32 %v2413_v31, %v595_v43 }
 0x18d   : > { %v593_v45 = vpop.xlane.xlu0 %592 }
 0x18e   : > { %v596_v46 = vmul.f32 0.03125, %v593_v45  ;;  %v599_v47 = vmul.f32 %v597_v44, %v597_v44 }
 0x190   : > { %v598_v48 = vsub.f32 %v2417_v35, %v596_v46  ;;  %v601_v49 = vsel %vm587_vm1, %v599_v47, 0.0 }
 0x191   : > { %602 = vadd.xlane.f32.xlu1 %v601_v49  ;;  %v739_v52 = vpop.permute.xlu0 %738 }
 0x192   : > { %v600_v50 = vmul.f32 %v598_v48, %v598_v48  ;;  %2056 = vmatprep.subr.mxu1 %v739_v52 }
 0x194   : > { %v604_v51 = vsel %vm587_vm1, %v600_v50, 0.0 }
 0x195   : > { %605 = vadd.xlane.f32.xlu1 %v604_v51  ;;  %v829_v8 = vpop.permute.xlu0 %828 }
 0x199   : > { %v825_v10 = vpop.permute.xlu0 %824 }
 0x19d   : > { %v823_v12 = vpop.permute.xlu0 %822 }
 0x1a6   : > { %736 = vrot.lane.b32.xlu1 %v633_v39, %s2214_s17 }
 0x1aa   : > { %734 = vrot.lane.b32.xlu1 %v632_v40, %s2214_s17 }
 0x1ae   : > { %732 = vrot.lane.b32.xlu1 %v631_v41, %s2214_s17 }
 0x1b2   : > { %826 = vrot.lane.b32.xlu1 %v633_v39, %s2215_s22 }
 0x1b6   : > { %744 = vrot.lane.b32.xlu1 %v2448_v53, %s2214_s17  ;;  %s2216_s17 = smov 112  }
 0x21a   : > { %v603_v54 = vpop.xlane.xlu1 %602 }
 0x21b   : > { %v607_v55 = vmul.f32 0.03125, %v603_v54 }
 0x21d   : > { %v609_v56 = vadd.f32 1e-05, %v607_v55  ;;  %v637_v55 = vld [vmem:[%s2630_s7 + $0x8] sm:$0xff] }
 0x21e   : > { %v606_v57 = vpop.xlane.xlu1 %605  ;;  %2113 = vmatprep.subr.mxu0 %v637_v55 }
 0x21f   : > { %2173 = vrsqrt.f32 %v609_v56  ;;  %v608_v58 = vmul.f32 0.03125, %v606_v57  ;;  %2114 = vmatpush3.msra.mxu0 %v637_v55  ;;  %v636_v56 = vld [vmem:[%s2630_s7] sm:$0xff] }
 0x220   : > { %2115 = vmatprep.subr.mxu0 %v636_v56 }
 0x221   : > { %v610_v59 = vadd.f32 1e-05, %v608_v58  ;;  %2116 = vmatpush3.msra.mxu0 %v636_v56 }
 0x222   : > { %v737_v62 = vpop.permute.xlu1 %736 }
 0x223   : > { %2175 = vrsqrt.f32 %v610_v59 }
 0x226   : > { %v735_v5 = vpop.permute.xlu1 %734 }
 0x22a   : > { %v733_v9 = vpop.permute.xlu1 %732 }
 0x22c   : > { %v2174_v60 = vpop.eup %2173 }
 0x22d   : > { %v613_v63 = vmul.f32 %v2174_v60, %v597_v44 }
 0x22e   : > { %v827_v11 = vpop.permute.xlu1 %826 }
 0x22f   : > { %v621_v1 = vmul.f32 %v1935_v61, %v613_v63 }
 0x230   : > { %v2176_v2 = vpop.eup %2175 }
 0x231   : > { %v614_v3 = vmul.f32 %v2176_v2, %v598_v48  ;;  %v629_v4 = vadd.f32 %v1936_v0, %v621_v1 }
 0x232   : > { %v745_v16 = vpop.permute.xlu1 %744 }
 0x233   : > { %v622_v6 = vmul.f32 %v1935_v61, %v614_v3  ;;  %2053 = vmatprep.mubr.msk.f32.mxu1 %vm587_vm1, %v629_v4 }
 0x235   : > { %v630_v7 = vadd.f32 %v1936_v0, %v622_v6 }
 0x237   : > { %2054 = vmatmul.mubr.msk.f32.vlgmr.msra.gmra.mxu1 %vm587_vm1, %v630_v7 }
 0x238   : > { %2057 = vmatpush3.msra.mxu1 %v739_v52  ;;  %2064 = vmatprep.mubr.msk.f32.mxu1 %vm587_vm1, %v629_v4 }
 0x239   : > { %2058 = vmatprep.subr.mxu1 %v737_v62 }
 0x23a   : > { %2059 = vmatpush3.msra.mxu1 %v737_v62 }
 0x23b   : > { %2060 = vmatprep.subr.mxu1 %v735_v5 }
 0x23c   : > { %2061 = vmatpush3.msra.mxu1 %v735_v5 }
 0x23d   : > { %2062 = vmatprep.subr.mxu1 %v733_v9 }
 0x23e   : > { %2063 = vmatpush3.msra.mxu1 %v733_v9 }
 0x23f   : > { %2065 = vmatmul.mubr.msk.f32.vlgmr.msra.gmra.mxu1 %vm587_vm1, %v630_v7  ;;  %2067 = vmatprep.subr.mxu1 %v829_v8 }
 0x240   : > { %2068 = vmatpush3.msra.mxu1 %v829_v8  ;;  %2075 = vmatprep.mubr.msk.f32.mxu1 %vm587_vm1, %v629_v4 }
 0x241   : > { %2069 = vmatprep.subr.mxu1 %v827_v11 }
 0x242   : > { %2070 = vmatpush3.msra.mxu1 %v827_v11 }
 0x243   : > { %2071 = vmatprep.subr.mxu1 %v825_v10 }
 0x244   : > { %2072 = vmatpush3.msra.mxu1 %v825_v10 }
 0x245   : > { %2073 = vmatprep.subr.mxu1 %v823_v12 }
 0x246   : > { %2074 = vmatpush3.msra.mxu1 %v823_v12 }
 0x247   : > { %2076 = vmatmul.mubr.msk.f32.vlgmr.msra.gmra.mxu1 %vm587_vm1, %v630_v7 }
 0x2f7   : > { %v2055_v13 = vpop.f32.mrf.mxu1 }
 0x2f8   : > { %v725_v21 = vadd.f32 %v2055_v13, %v2448_v53 }
 0x2f9   : > { %v719_v14 = vpop.f32.mrf.mxu1 }
 0x2fa   : > { %v720_v15 = vadd.f32 %v2448_v53, %v719_v14 }
 0x2fc   : > { %2082 = vmatprep.mubr.msk.f32.mxu1 %vm912_vm2, %v720_v15 }
 0x2ff   : > { %v2066_v17 = vpop.f32.mrf.mxu1 }
 0x300   : > { %v819_v18 = vadd.f32 %v2066_v17, %v745_v16 }
 0x301   : > { %v813_v19 = vpop.f32.mrf.mxu1 }
 0x302   : > { %v814_v20 = vadd.f32 %v813_v19, %v745_v16  ;;  %2078 = vmatprep.subr.msk.mxu1 %vm912_vm2, %v819_v18 }
 0x303   : > { %2079 = vmatpush3.xpose.msk.msra.mxu1 %vm912_vm2, %v819_v18 }
 0x304   : > { %2080 = vmatprep.subr.msk.mxu1 %vm912_vm2, %v814_v20 }
 0x307   : > { %2081 = vmatpush3.xpose.msk.msra.mxu1 %vm912_vm2, %v814_v20  ;;  %v2077_v22 = vpop.f32.mrf.mxu1 }
 0x309   : > { %v903_v23 = vpop.f32.mrf.mxu1 }
 0x30a   : > { %2083 = vmatmul.mubr.msk.f32.vlgmr.msra.gmra.mxu1 %vm912_vm2, %v725_v21 }
 0x3ca   : > { %v2084_v24 = vpop.f32.mrf.mxu1 }
 0x3cb   : > { %v1001_v25 = vmul.f32 0.25, %v2084_v24  ;;  %v1960_v24 = vld [vmem:[%s2631_s8] ss:$0 sm:$0xff] }
 0x3cc   : > { %v991_v26 = vpop.f32.mrf.mxu1 }
 0x3cd   : > { %v1000_v27 = vmul.f32 0.25, %v991_v26  ;;  %v1005_v28 = vsel %vm912_vm2, %v1001_v25, -inf }
 0x3ce   : > { %1006 = vmax.xlane.f32.xlu0 %v1005_v28 }
 0x3cf   : > { %v1002_v29 = vsel %vm912_vm2, %v1000_v27, -inf }
 0x3d0   : > { %1003 = vmax.xlane.f32.xlu1 %v1002_v29 }
 0x3e1   : > { %834 = vrot.lane.b32.xlu1 %v2448_v53, %s2215_s22 }
 0x3e5   : > { %1109 = vrot.lane.b32.xlu1 %v814_v20, %s2216_s17  ;;  %v638_v20 = vld [vmem:[%s2630_s7 + $0x10] sm:$0xff] }
 0x3e9   : > { %1105 = vrot.lane.b32.xlu1 %v720_v15, %s2216_s17  ;;  %v639_v15 = vld [vmem:[%s2630_s7 + $0x18] sm:$0xff] }
 0x3ed   : > { %1107 = vrot.lane.b32.xlu1 %v725_v21, %s2216_s17 }
 0x457   : > { %v1007_v30 = vpop.xlane.xlu0 %1006 }
 0x458   : > { %v1009_v32 = vsub.f32 %v1001_v25, %v1007_v30 }
 0x459   : > { %v1004_v33 = vpop.xlane.xlu1 %1003 }
 0x45a   : > { %v1012_v34 = vmul.f32 1.442695, %v1009_v32  ;;  %v1008_v36 = vsub.f32 %v1000_v27, %v1004_v33 }
 0x45c   : > { %2177 = vpow2.f32 %v1012_v34  ;;  %v1010_v37 = vmul.f32 1.442695, %v1008_v36 }
 0x45d   : > { %v835_v38 = vpop.permute.xlu1 %834 }
 0x45e   : > { %2179 = vpow2.f32 %v1010_v37  ;;  %v2479_v39 = vadd.f32 %v2077_v22, %v835_v38  ;;  %v904_v40 = vadd.f32 %v903_v23, %v835_v38 }
 0x460   : > { %2085 = vmatprep.subr.mxu1 %v2479_v39 }
 0x461   : > { %2086 = vmatpush3.msra.mxu1 %v2479_v39  ;;  %v1110_v48 = vpop.permute.xlu1 %1109 }
 0x462   : > { %2087 = vmatprep.subr.mxu1 %v904_v40 }
 0x463   : > { %2088 = vmatpush3.msra.mxu1 %v904_v40 }
 0x465   : > { %v1106_v53 = vpop.permute.xlu1 %1105 }
 0x469   : > { %v2178_v41 = vpop.eup %2177  ;;  %v1108_v54 = vpop.permute.xlu1 %1107 }
 0x46a   : > { %v1017_v42 = vsel %vm912_vm2, %v2178_v41, 0.0 }
 0x46b   : > { %v2180_v43 = vpop.eup %2179  ;;  %1018 = vadd.xlane.f32.xlu0 %v1017_v42 }
 0x46c   : > { %v1014_v44 = vsel %vm912_vm2, %v2180_v43, 0.0 }
 0x46f   : > { %1015 = vadd.xlane.f32.xlu0 %v1014_v44 }
 0x485   : > { %1111 = vrot.lane.b32.xlu0 %v819_v18, %s2216_s17 }
 0x4f4   : > { %v1019_v45 = vpop.xlane.xlu0 %1018 }
 0x4f5   : > { %2181 = vrcp.f32 %v1019_v45 }
 0x4f8   : > { %v1016_v46 = vpop.xlane.xlu0 %1015 }
 0x4f9   : > { %2183 = vrcp.f32 %v1016_v46  ;;  %v1530_v46 = vld [vmem:[%s2632_s9 + $0x18] sm:$0xff] }
 0x4fc   : > { %v1112_v47 = vpop.permute.xlu0 %1111 }
 0x4fd   : > { %2092 = vmatprep.subr.msk.mxu1 %vm912_vm2, %v1112_v47 }
 0x502   : > { %v2182_v49 = vpop.eup %2181 }
 0x503   : > { %v1023_v52 = vmul.f32 %v2182_v49, %v2178_v41  ;;  %v1527_v49 = vld [vmem:[%s2632_s9] sm:$0xff] }
 0x506   : > { %v2184_v50 = vpop.eup %2183 }
 0x507   : > { %v1022_v51 = vmul.f32 %v2184_v50, %v2180_v43 }
 0x509   : > { %2089 = vmatprep.mubr.msk.f32.mxu1 %vm912_vm2, %v1022_v51 }
 0x50a   : > { %2090 = vmatmul.mubr.msk.f32.vlgmr.msra.gmra.mxu1 %vm912_vm2, %v1023_v52 }
 0x50b   : > { %2093 = vmatpush3.xpose.msk.msra.mxu1 %vm912_vm2, %v1112_v47  ;;  %2096 = vmatprep.mubr.msk.f32.mxu1 %vm912_vm2, %v1106_v53  ;;  %v1529_v47 = vld [vmem:[%s2632_s9 + $0x10] sm:$0xff] }
 0x50c   : > { %2094 = vmatprep.subr.msk.mxu1 %vm912_vm2, %v1110_v48 }
 0x50f   : > { %2095 = vmatpush3.xpose.msk.msra.mxu1 %vm912_vm2, %v1110_v48  ;;  %v1528_v48 = vld [vmem:[%s2632_s9 + $0x8] sm:$0xff] }
 0x512   : > { %2097 = vmatmul.mubr.msk.f32.vlgmr.msra.gmra.mxu1 %vm912_vm2, %v1108_v54 }
 0x5ca   : > { %v2091_v57 = vpop.f32.mrf.mxu1 }
 0x5cc   : > { %v1096_v58 = vpop.f32.mrf.mxu1 }
 0x5cd   : > { %2117 = vmatprep.mubr.msk.f32.mxu0 %vm912_vm2, %v1096_v58 }
 0x5ce   : > { %2118 = vmatmul.mubr.msk.f32.vlgmr.msra.gmra.mxu0 %vm912_vm2, %v2091_v57  ;;  %v1963_v57 = vld [vmem:[%s2626_s3 + $0x1] ss:$0 sm:$0xff] }
 0x5d2   : > { %v2098_v59 = vpop.f32.mrf.mxu1 }
 0x5d3   : > { %v1197_v60 = vmul.f32 0.25, %v2098_v59 }
 0x5d4   : > { %v1187_v61 = vpop.f32.mrf.mxu1 }
 0x5d5   : > { %v1196_v62 = vmul.f32 0.25, %v1187_v61  ;;  %v1201_v63 = vsel %vm912_vm2, %v1197_v60, -inf }
 0x5d6   : > { %1202 = vmax.xlane.f32.xlu1 %v1201_v63 }
 0x5d7   : > { %v1198_v0 = vsel %vm912_vm2, %v1196_v62, -inf }
 0x5d8   : > { %1199 = vmax.xlane.f32.xlu0 %v1198_v0 }
 0x5e7   : > { %1222 = vrot.lane.b32.xlu1 %v904_v40, %s2216_s17 }
 0x65f   : > { %v1203_v1 = vpop.xlane.xlu1 %1202 }
 0x660   : > { %v1205_v2 = vsub.f32 %v1197_v60, %v1203_v1 }
 0x661   : > { %v1200_v3 = vpop.xlane.xlu0 %1199 }
 0x662   : > { %v1208_v4 = vmul.f32 1.442695, %v1205_v2  ;;  %v1204_v5 = vsub.f32 %v1196_v62, %v1200_v3  ;;  %v1964_v62 = vld [vmem:[%s2627_s4 + $0x1] ss:$0 sm:$0xff]  ;;  %v1644_v2 = vld [vmem:[%s2634_s11 + $0x38] sm:$0xff]  ;;  %v1643_v3 = vld [vmem:[%s2634_s11 + $0x30] sm:$0xff] }
 0x663   : > { %v1223_v14 = vpop.permute.xlu1 %1222  ;;  %2131 = vmatprep.subr.mxu0 %v1644_v2 }
 0x664   : > { %2185 = vpow2.f32 %v1208_v4  ;;  %v1206_v6 = vmul.f32 1.442695, %v1204_v5  ;;  %2132 = vmatpush3.msra.mxu0 %v1644_v2  ;;  %v1642_v4 = vld [vmem:[%s2634_s11 + $0x28] sm:$0xff]  ;;  %v1641_v5 = vld [vmem:[%s2634_s11 + $0x20] sm:$0xff] }
 0x665   : > { %2133 = vmatprep.subr.mxu0 %v1643_v3 }
 0x666   : > { %2187 = vpow2.f32 %v1206_v6  ;;  %2134 = vmatpush3.msra.mxu0 %v1643_v3  ;;  %v1640_v6 = vld [vmem:[%s2634_s11 + $0x18] sm:$0xff] }
 0x667   : > { %2135 = vmatprep.subr.mxu0 %v1642_v4 }
 0x668   : > { %2136 = vmatpush3.msra.mxu0 %v1642_v4  ;;  %v1976_v4 = vld [vmem:[%s2627_s4 + $0x2] ss:$0 sm:$0xff] }
 0x669   : > { %2137 = vmatprep.subr.mxu0 %v1641_v5 }
 0x66a   : > { %2138 = vmatpush3.msra.mxu0 %v1641_v5 }
 0x66b   : > { %2139 = vmatprep.subr.mxu0 %v1640_v6 }
 0x66c   : > { %2140 = vmatpush3.msra.mxu0 %v1640_v6 }
 0x671   : > { %v2186_v7 = vpop.eup %2185 }
 0x672   : > { %v1213_v8 = vsel %vm912_vm2, %v2186_v7, 0.0 }
 0x673   : > { %v2188_v9 = vpop.eup %2187  ;;  %1214 = vadd.xlane.f32.xlu0 %v1213_v8  ;;  %v1638_v8 = vld [vmem:[%s2634_s11 + $0x8] sm:$0xff] }
 0x674   : > { %v1210_v10 = vsel %vm912_vm2, %v2188_v9, 0.0 }
 0x677   : > { %1211 = vadd.xlane.f32.xlu0 %v1210_v10  ;;  %v1965_v10 = vld [vmem:[%s2633_s10] ss:$0 sm:$0xff] }
 0x68d   : > { %1224 = vrot.lane.b32.xlu0 %v2479_v39, %s2216_s17 }
 0x68e   : > { %v2119_v23 = vpop.f32.mrf.mxu0 }
 0x690   : > { %v1462_v27 = vpop.f32.mrf.mxu0 }
 0x6fc   : > { %v1215_v11 = vpop.xlane.xlu0 %1214 }
 0x6fd   : > { %2189 = vrcp.f32 %v1215_v11 }
 0x700   : > { %v1212_v12 = vpop.xlane.xlu0 %1211 }
 0x701   : > { %2191 = vrcp.f32 %v1212_v12 }
 0x704   : > { %v1225_v13 = vpop.permute.xlu0 %1224 }
 0x705   : > { %2099 = vmatprep.subr.mxu1 %v1225_v13 }
 0x706   : > { %2100 = vmatpush3.msra.mxu1 %v1225_v13 }
 0x707   : > { %2101 = vmatprep.subr.mxu1 %v1223_v14 }
 0x708   : > { %2102 = vmatpush3.msra.mxu1 %v1223_v14 }
 0x709   : > { %2106 = vmatprep.subr.mxu1 %v639_v15 }
 0x70a   : > { %v2190_v16 = vpop.eup %2189 }
 0x70b   : > { %v1219_v19 = vmul.f32 %v2190_v16, %v2186_v7  ;;  %v1639_v7 = vld [vmem:[%s2634_s11 + $0x10] sm:$0xff] }
 0x70c   : > { %2141 = vmatprep.subr.mxu0 %v1639_v7 }
 0x70d   : > { %2142 = vmatpush3.msra.mxu0 %v1639_v7 }
 0x70e   : > { %v2192_v17 = vpop.eup %2191  ;;  %2143 = vmatprep.subr.mxu0 %v1638_v8 }
 0x70f   : > { %v1218_v18 = vmul.f32 %v2192_v17, %v2188_v9  ;;  %v1637_v9 = vld [vmem:[%s2634_s11] sm:$0xff]  ;;  %2144 = vmatpush3.msra.mxu0 %v1638_v8 }
 0x710   : > { %2145 = vmatprep.subr.mxu0 %v1637_v9 }
 0x711   : > { %2103 = vmatprep.mubr.msk.f32.mxu1 %vm912_vm2, %v1218_v18  ;;  %2146 = vmatpush3.msra.mxu0 %v1637_v9 }
 0x712   : > { %2104 = vmatmul.mubr.msk.f32.vlgmr.msra.gmra.mxu1 %vm912_vm2, %v1219_v19 }
 0x713   : > { %2107 = vmatpush3.msra.mxu1 %v639_v15 }
 0x714   : > { %2108 = vmatprep.subr.mxu1 %v638_v20 }
 0x715   : > { %2109 = vmatpush3.msra.mxu1 %v638_v20 }
 0x716   : > { %2120 = vmatprep.subr.mxu1 %v1530_v46 }
 0x7d2   : > { %v2105_v21 = vpop.f32.mrf.mxu1 }
 0x7d4   : > { %v1300_v22 = vpop.f32.mrf.mxu1 }
 0x7d5   : > { %2110 = vmatprep.mubr.msk.f32.mxu1 %vm912_vm2, %v1300_v22 }
 0x7d6   : > { %2111 = vmatmul.mubr.msk.f32.vlgmr.msra.gmra.mxu1 %vm912_vm2, %v2105_v21 }
 0x7d7   : > { %2121 = vmatpush3.msra.mxu1 %v1530_v46 }
 0x7d8   : > { %2122 = vmatprep.subr.mxu1 %v1529_v47 }
 0x7d9   : > { %2123 = vmatpush3.msra.mxu1 %v1529_v47 }
 0x7da   : > { %2124 = vmatprep.subr.mxu1 %v1528_v48 }
 0x7db   : > { %2125 = vmatpush3.msra.mxu1 %v1528_v48 }
 0x7dc   : > { %2126 = vmatprep.subr.mxu1 %v1527_v49 }
 0x7dd   : > { %2127 = vmatpush3.msra.mxu1 %v1527_v49 }
 0x896   : > { %v2112_v25 = vpop.f32.mrf.mxu1 }
 0x897   : > { %v1468_v26 = vadd.f32 %v2119_v23, %v2112_v25 }
 0x898   : > { %v1381_v28 = vpop.f32.mrf.mxu1 }
 0x899   : > { %v1478_v29 = vadd.f32 %v1960_v24, %v1468_v26  ;;  %v1463_v30 = vadd.f32 %v1462_v27, %v1381_v28 }
 0x89b   : > { %v2523_v32 = vadd.f32 %v1478_v29, %v2417_v35  ;;  %v1477_v33 = vadd.f32 %v1960_v24, %v1463_v30 }
 0x89d   : > { %v2526_v34 = vadd.f32 %v1477_v33, %v2413_v31  ;;  %v1488_v36 = vsel %vm587_vm1, %v2523_v32, 0.0 }
 0x89e   : > { %1489 = vadd.xlane.f32.xlu0 %v1488_v36 }
 0x89f   : > { %v1485_v37 = vsel %vm587_vm1, %v2526_v34, 0.0 }
 0x8a0   : > { %1486 = vadd.xlane.f32.xlu1 %v1485_v37  ;;  %v1738_v37 = vld [vmem:[%s2636_s13 + $0x18] sm:$0xff] }
 0x8a1   : > { %2150 = vmatprep.subr.mxu1 %v1738_v37 }
 0x927   : > { %v1490_v38 = vpop.xlane.xlu0 %1489 }
 0x928   : > { %v1492_v39 = vmul.f32 0.03125, %v1490_v38  ;;  %v1737_v38 = vld [vmem:[%s2636_s13 + $0x10] sm:$0xff] }
 0x929   : > { %v1487_v40 = vpop.xlane.xlu1 %1486 }
 0x92a   : > { %v1494_v41 = vsub.f32 %v2523_v32, %v1492_v39  ;;  %v1491_v42 = vmul.f32 0.03125, %v1487_v40  ;;  %v1736_v39 = vld [vmem:[%s2636_s13 + $0x8] sm:$0xff]  ;;  %v1735_v40 = vld [vmem:[%s2636_s13] sm:$0xff] }
 0x92c   : > { %v1493_v35 = vsub.f32 %v2526_v34, %v1491_v42  ;;  %v1496_v43 = vmul.f32 %v1494_v41, %v1494_v41 }
 0x92e   : > { %v1500_v31 = vsel %vm587_vm1, %v1496_v43, 0.0  ;;  %v1495_v44 = vmul.f32 %v1493_v35, %v1493_v35 }
 0x92f   : > { %1501 = vadd.xlane.f32.xlu1 %v1500_v31 }
 0x930   : > { %v1497_v45 = vsel %vm587_vm1, %v1495_v44, 0.0 }
 0x931   : > { %1498 = vadd.xlane.f32.xlu0 %v1497_v45 }
 0x9b8   : > { %v1502_v50 = vpop.xlane.xlu1 %1501 }
 0x9b9   : > { %v1504_v51 = vmul.f32 0.03125, %v1502_v50 }
 0x9ba   : > { %v1499_v52 = vpop.xlane.xlu0 %1498 }
 0x9bb   : > { %v1506_v53 = vadd.f32 1e-05, %v1504_v51  ;;  %v1503_v54 = vmul.f32 0.03125, %v1499_v52 }
 0x9bd   : > { %2193 = vrsqrt.f32 %v1506_v53  ;;  %v1505_v55 = vadd.f32 1e-05, %v1503_v54 }
 0x9bf   : > { %2195 = vrsqrt.f32 %v1505_v55 }
 0x9ca   : > { %v2194_v56 = vpop.eup %2193 }
 0x9cb   : > { %v1510_v58 = vmul.f32 %v2194_v56, %v1494_v41  ;;  %v1968_v41 = vld [vmem:[%s2635_s12] ss:$0 sm:$0xff] }
 0x9cc   : > { %v2196_v59 = vpop.eup %2195 }
 0x9cd   : > { %v1509_v60 = vmul.f32 %v2196_v59, %v1493_v35  ;;  %v1518_v61 = vmul.f32 %v1963_v57, %v1510_v58 }
 0x9cf   : > { %v1517_v63 = vmul.f32 %v1963_v57, %v1509_v60  ;;  %v1526_v1 = vadd.f32 %v1964_v62, %v1518_v61 }
 0x9d1   : > { %v1525_v0 = vadd.f32 %v1964_v62, %v1517_v63 }
 0x9d3   : > { %2128 = vmatprep.mubr.msk.f32.mxu1 %vm587_vm1, %v1525_v0 }
 0x9d4   : > { %2129 = vmatmul.mubr.msk.f32.vlgmr.msra.gmra.mxu1 %vm587_vm1, %v1526_v1  ;;  %v1975_v1 = vld [vmem:[%s2626_s3 + $0x2] ss:$0 sm:$0xff] }
 0x9d5   : > { %2151 = vmatpush3.msra.mxu1 %v1738_v37 }
 0x9d6   : > { %2152 = vmatprep.subr.mxu1 %v1737_v38 }
 0x9d7   : > { %2153 = vmatpush3.msra.mxu1 %v1737_v38 }
 0x9d8   : > { %2154 = vmatprep.subr.mxu1 %v1736_v39 }
 0x9d9   : > { %2155 = vmatpush3.msra.mxu1 %v1736_v39 }
 0x9da   : > { %2156 = vmatprep.subr.mxu1 %v1735_v40 }
 0x9db   : > { %2157 = vmatpush3.msra.mxu1 %v1735_v40 }
 0xa94   : > { %v2130_v11 = vpop.f32.mrf.mxu1 }
 0xa95   : > { %v1616_v12 = vadd.f32 %v2130_v11, %v1965_v10 }
 0xa96   : > { %v1610_v13 = vpop.f32.mrf.mxu1 }
 0xa97   : > { %v1622_v14 = vmul.f32 0.044715, %v1616_v12  ;;  %v1611_v15 = vadd.f32 %v1965_v10, %v1610_v13  ;;  %v1620_v30 = vmul.f32 0.5, %v1616_v12 }
 0xa99   : > { %v1624_v16 = vmul.f32 %v1622_v14, %v1616_v12  ;;  %v1621_v17 = vmul.f32 0.044715, %v1611_v15  ;;  %v1619_v28 = vmul.f32 0.5, %v1611_v15 }
 0xa9b   : > { %v1626_v18 = vmul.f32 %v1624_v16, %v1616_v12  ;;  %v1623_v19 = vmul.f32 %v1621_v17, %v1611_v15 }
 0xa9d   : > { %v1628_v20 = vadd.f32 %v1626_v18, %v1616_v12  ;;  %v1625_v21 = vmul.f32 %v1623_v19, %v1611_v15 }
 0xa9f   : > { %v1630_v22 = vmul.f32 0.7978846, %v1628_v20  ;;  %v1627_v23 = vadd.f32 %v1625_v21, %v1611_v15 }
 0xaa1   : > { %2197 = vtanh.f32 %v1630_v22  ;;  %v1629_v24 = vmul.f32 0.7978846, %v1627_v23 }
 0xaa3   : > { %2199 = vtanh.f32 %v1629_v24 }
 0xaae   : > { %v2198_v25 = vpop.eup %2197 }
 0xaaf   : > { %v1634_v27 = vadd.f32 1.0, %v2198_v25 }
 0xab0   : > { %v2200_v26 = vpop.eup %2199 }
 0xab1   : > { %v1633_v29 = vadd.f32 1.0, %v2200_v26  ;;  %v1636_v36 = vmul.f32 %v1634_v27, %v1620_v30 }
 0xab3   : > { %v1635_v33 = vmul.f32 %v1633_v29, %v1619_v28 }
 0xab5   : > { %2147 = vmatprep.mubr.msk.f32.mxu0 %vm503_vm0, %v1635_v33 }
 0xab6   : > { %2148 = vmatmul.mubr.msk.f32.vlgmr.msra.gmra.mxu0 %vm503_vm0, %v1636_v36 }
 0xb76   : > { %v2149_v42 = vpop.f32.mrf.mxu0 }
 0xb77   : > { %v1730_v35 = vadd.f32 %v2149_v42, %v1968_v41 }
 0xb78   : > { %v1724_v43 = vpop.f32.mrf.mxu0 }
 0xb79   : > { %v1725_v31 = vadd.f32 %v1968_v41, %v1724_v43  ;;  %v1734_v45 = vadd.f32 %v1730_v35, %v2523_v32 }
 0xb7b   : > { %v1733_v44 = vadd.f32 %v1725_v31, %v2526_v34 }
 0xb7d   : > { %2158 = vmatprep.mubr.msk.f32.mxu1 %vm587_vm1, %v1733_v44 }
 0xb7e   : > { %2159 = vmatmul.mubr.msk.f32.vlgmr.msra.gmra.mxu1 %vm587_vm1, %v1734_v45 }
 0xc3e   : > { %v2160_v46 = vpop.f32.mrf.mxu1 }
 0xc3f   : > { %v1827_v47 = vsel %vm587_vm1, %v2160_v46, 0.0 }
 0xc40   : > { %1828 = vadd.xlane.f32.xlu1 %v1827_v47  ;;  %v1811_v48 = vpop.f32.mrf.mxu1 }
 0xc41   : > { %v1824_v49 = vsel %vm587_vm1, %v1811_v48, 0.0 }
 0xc42   : > { %1825 = vadd.xlane.f32.xlu0 %v1824_v49 }
 0xcc9   : > { %v1829_v50 = vpop.xlane.xlu1 %1828 }
 0xcca   : > { %v1831_v51 = vmul.f32 0.03125, %v1829_v50 }
 0xccb   : > { %v1826_v52 = vpop.xlane.xlu0 %1825 }
 0xccc   : > { %v1833_v53 = vsub.f32 %v2160_v46, %v1831_v51  ;;  %v1830_v54 = vmul.f32 0.03125, %v1826_v52 }
 0xcce   : > { %v1832_v34 = vsub.f32 %v1811_v48, %v1830_v54  ;;  %v1835_v55 = vmul.f32 %v1833_v53, %v1833_v53 }
 0xcd0   : > { %v1839_v32 = vsel %vm587_vm1, %v1835_v55, 0.0  ;;  %v1834_v56 = vmul.f32 %v1832_v34, %v1832_v34 }
 0xcd1   : > { %1840 = vadd.xlane.f32.xlu1 %v1839_v32 }
 0xcd2   : > { %v1836_v57 = vsel %vm587_vm1, %v1834_v56, 0.0 }
 0xcd3   : > { %1837 = vadd.xlane.f32.xlu0 %v1836_v57 }
 0xd5a   : > { %v1841_v58 = vpop.xlane.xlu1 %1840 }
 0xd5b   : > { %v1843_v59 = vmul.f32 0.03125, %v1841_v58 }
 0xd5c   : > { %v1838_v60 = vpop.xlane.xlu0 %1837 }
 0xd5d   : > { %v1845_v61 = vadd.f32 1e-06, %v1843_v59  ;;  %v1842_v62 = vmul.f32 0.03125, %v1838_v60 }
 0xd5f   : > { %2201 = vrsqrt.f32 %v1845_v61  ;;  %v1844_v63 = vadd.f32 1e-06, %v1842_v62 }
 0xd61   : > { %2203 = vrsqrt.f32 %v1844_v63 }
 0xd6c   : > { %v2202_v0 = vpop.eup %2201 }
 0xd6d   : > { %v1849_v2 = vmul.f32 %v2202_v0, %v1833_v53 }
 0xd6e   : > { %v2204_v3 = vpop.eup %2203 }
 0xd6f   : > { %v1857_v5 = vmul.f32 %v1975_v1, %v1849_v2  ;;  %v1848_v6 = vmul.f32 %v2204_v3, %v1832_v34 }
 0xd71   : > { %v1865_v7 = vadd.f32 %v1976_v4, %v1857_v5  ;;  %v1856_v8 = vmul.f32 %v1975_v1, %v1848_v6 }
 0xd73   : > { %1867 = vst.msk [vmem:[%s467_s19 + $0x8] sm:$0xff] %vm587_vm1, %v1865_v7  ;;  %v1864_v9 = vadd.f32 %v1976_v4, %v1856_v8 }
 0xd75   : > { %1866 = vst.msk [vmem:[%s467_s19] sm:$0xff] %vm587_vm1, %v1864_v9 }
 0xd76 PF: > { %s24_s29 = sadd.s32 1, %s2211_s29  }
 0xd77   : > { %p21_p4 = scmp.ge.s32.totalorder %s24_s29, 4  }
 0xd79   :  { %23 = sbr.rel (!%p21_p4) target bundleno = 1 (0x1), region = 110 }

// kernel: sam_with_bbox_forward.5
= control target key start
LH: loop header
LB: loop body
LE: loop exit
PB: predicated region body
PF: predicated region fallthrough
CT: control target
= control target key end

     0   :  { %s5393_s0 = inlined_call_operand.vmem [shape: f32[2,7,32], index: 0, kind: input, shape index: {}]   ;;  %s5394_s1 = inlined_call_operand.vmem [shape: f32[2,16,32], index: 1, kind: input, shape index: {}]   ;;  %s5395_s2 = inlined_call_operand.vmem [shape: f32[32,32], index: 2, kind: input, shape index: {}]   ;;  %s5396_s3 = inlined_call_operand.vmem [shape: f32[1,32], index: 3, kind: input, shape index: {}]   ;;  %s5397_s4 = inlined_call_operand.vmem [shape: f32[1,8], index: 4, kind: input, shape index: {}]   ;;  %s5398_s5 = inlined_call_operand.vmem [shape: f32[1,8], index: 5, kind: input, shape index: {}]   ;;  %s5399_s6 = inlined_call_operand.vmem [shape: f32[8,16], index: 6, kind: input, shape index: {}]   ;;  %s5400_s7 = inlined_call_operand.vmem [shape: f32[1,16], index: 7, kind: input, shape index: {}]   ;;  %s5401_s8 = inlined_call_operand.vmem [shape: f32[4,32,32], index: 8, kind: input, shape index: {}]   ;;  %s5402_s9 = inlined_call_operand.vmem [shape: f32[4,1,32], index: 9, kind: input, shape index: {}]   ;;  %s5403_s10 = inlined_call_operand.vmem [shape: f32[4,32,32], index: 10, kind: input, shape index: {}]   ;;  %s5404_s11 = inlined_call_operand.vmem [shape: f32[4,1,32], index: 11, kind: input, shape index: {}]   ;;  %s5405_s12 = inlined_call_operand.vmem [shape: f32[4,32,4], index: 12, kind: input, shape index: {}]   ;;  %s5406_s13 = inlined_call_operand.vmem [shape: f32[4,1,4], index: 13, kind: input, shape index: {}]   ;;  %s5407_s14 = inlined_call_operand.vmem [shape: f32[32,64], index: 14, kind: input, shape index: {}]   ;;  %s5408_s15 = inlined_call_operand.vmem [shape: f32[1,64], index: 15, kind: input, shape index: {}]   ;;  %s5409_s16 = inlined_call_operand.vmem [shape: f32[64,64], index: 16, kind: input, shape index: {}]   ;;  %s5410_s17 = inlined_call_operand.vmem [shape: f32[1,64], index: 17, kind: input, shape index: {}]   ;;  %s5411_s18 = inlined_call_operand.vmem [shape: f32[64,4], index: 18, kind: input, shape index: {}]   ;;  %s5412_s19 = inlined_call_operand.vmem [shape: f32[1,4], index: 19, kind: input, shape index: {}]   ;;  %s5413_s20 = inlined_call_operand.vmem [shape: f32[2,256,4], index: 20, kind: output, shape index: {0}]   ;;  %s5414_s21 = inlined_call_operand.hbm [shape: f32[2,1,4], index: 21, kind: output, shape index: {1}]  }
   0x1   :  { %5427 = sst [smem:[#allocation11_spill]] %s5393_s0 }
   0x2   :  { %5428 = sst [smem:[#allocation12_spill]] %s5394_s1 }
   0x3   :  { %5429 = sst [smem:[#allocation13_spill]] %s5395_s2 }
   0x4   :  { %5430 = sst [smem:[#allocation14_spill]] %s5396_s3 }
   0x5   :  { %5431 = sst [smem:[#allocation15_spill]] %s5397_s4 }
   0x6   :  { %5432 = sst [smem:[#allocation16_spill]] %s5398_s5 }
   0x7   :  { %5433 = sst [smem:[#allocation17_spill]] %s5399_s6 }
   0x8   :  { %5434 = sst [smem:[#allocation18_spill]] %s5401_s8 }
   0x9   :  { %5435 = sst [smem:[#allocation19_spill]] %s5402_s9 }
   0xa   :  { %5436 = sst [smem:[#allocation20_spill]] %s5414_s21 }
   0xb   :  { %27 = vsyncpa [#allocation3], 0 }
   0xc   :  { %29 = vsyncpa [#allocation3 + $0x1], 0  ;;  %s4225_s2 = smov 0   ;;  %s4227_s25 = smov 0  }
   0xd   :  { %s4229_s26 = smov 0   ;;  %s4231_s27 = smov 0  }
   0xe LB: > { %5437 = sst [smem:[#allocation5_spill]] %s4087_s2  ;;  %s4246_s3 = sadd.s32 4294967295, %s4099_s27   ;;  %s4099_s27 = sphi %s4231_s27, %s5462_s27   ;;  %s4095_s26 = sphi %s4229_s26, %s5464_s26   ;;  %s4091_s25 = sphi %s4227_s25, %s5466_s25   ;;  %s4087_s2 = sphi %s4225_s2, %s5465_s2  }
   0xf   : > { %5438 = sst [smem:[#allocation6_spill]] %s4095_s26  ;;  %s3505_s28 = sadd.s32 4294967294, %s4099_s27  }
  0x10   : > { %5439 = sst [smem:[#allocation7_spill]] %s4099_s27  ;;  %s4250_s29 = sadd.s32 1, %s4099_s27  }
  0x11   : > { %5440 = sst [smem:[#allocation8_spill]] %s4250_s29  ;;  %s498_s0 = sadd.s32 1, %s4095_s26 }
  0x12   : > { %s495_s4 = ssub.s32 %s4099_s27, %s4250_s29  ;;  %p508_p0 = scmp.ne.s32.totalorder %s4095_s26, %s4091_s25 }
  0x13   : > { %p496_p1 = scmp.eq.s32.totalorder %s495_s4, 0  ;;  %p509_p2 = scmp.eq.s32.totalorder %s4246_s3, 1 }
  0x14   : > { %p514_p3 = scmp.ne.s32.totalorder %s4091_s25, %s4087_s2  ;;  %p515_p4 = scmp.eq.s32.totalorder %s3505_s28, 1 }
  0x15   : > { %s4261_s30 = scalar_select %p496_p1, %s4095_s26, %s498_s0  }
  0x16   : > { %p4263_p5 = por %p509_p2, %p508_p0  ;;  %p4267_p6 = por %p515_p4, %p514_p3 }
  0x17   : > { %5441 = sst [smem:[#allocation9_spill]] %s4261_s30  ;;  %p3508_p7 = scmp.ge.s32.totalorder %s4099_s27, 1 }
  0x18   : > { %s5443_s22 = scalar_select %p4267_p6, 1, 0 }
  0x19   : > { %p602_p8 = scmp.lt.s32.totalorder %s4099_s27, 3 }
  0x1a   : > { %5444 = sst [smem:[#allocation10_spill]] %s5443_s22 }
  0x1b   : > { %p603_p9 = pnand %p3508_p7, %p602_p8 }
  0x1c   : > { %s5445_s8 = sld [smem:[#allocation18_spill]] (!%p603_p9)  ;;  %p670_p10 = scmp.lt.s32.totalorder (!%p603_p9), %s4246_s3, 1 }
  0x1d   : > { %606 = sbr.rel (%p603_p9) target bundleno = 4102 (0x1006), region = 100  ;;  %s5446_s1 = sld [smem:[#allocation11_spill]] (!%p603_p9) }
  0x1e   : > { %s5447_s9 = sld [smem:[#allocation19_spill]] (!%p603_p9)  ;;  %s4103_s28 = smov (!%p603_p9), 112  }
  0x1f   : > { %s5449_s27 = sld [smem:[#allocation13_spill]] (!%p603_p9)  ;;  %s4107_s29 = smov (!%p603_p9), 16  }
  0x20   : > { %s5452_s26 = sld [smem:[#allocation15_spill]] (!%p603_p9)  ;;  %s4110_s24 = smov (!%p603_p9), 124  }
  0x21   : > { %s5453_s2 = sld [smem:[#allocation16_spill]] (!%p603_p9) }
  0x22   : > { %v690_v0 = vld [vmem:[%s5445_s8 + $0x18] sm:$0xff]  ;;  %v4101_v1 = vmov 0.0   ;;  %v689_v2 = vld [vmem:[%s5445_s8 + $0x10] sm:$0xff]  ;;  %vm4102_vm0 = vmmov 0   ;;  %s4287_s23 = scalar_select %p670_p10, %s4246_s3, 1  ;;  %v688_v5 = vld [vmem:[%s5445_s8 + $0x8] sm:$0xff] }
  0x23   : > { %3694 = vmatprep.subr.mxu0 %v4101_v1  ;;  %3702 = vmatprep.mubr.msk.f32.mxu0 %vm4102_vm0, %v4101_v1  ;;  %v771_v3 = vld [vmem:[%s5403_s10 + $0x18] sm:$0xff]  ;;  %v770_v4 = vld [vmem:[%s5403_s10 + $0x10] sm:$0xff]  ;;  %v687_v6 = vld [vmem:[%s5445_s8] sm:$0xff]  ;;  %vm694_vm1 = vcmask 261120   ;;  %vm1747_vm2 = vcmask 64512   ;;  %s5454_s6 = sld [smem:[#allocation17_spill]] }
  0x24   : > { %3695 = vmatpush3.msra.mxu0 %v690_v0  ;;  %3705 = vmatprep.subr.mxu1 %v4101_v1  ;;  %s3509_s0 = sshll.u32 %s4287_s23, 3  ;;  %v769_v9 = vld [vmem:[%s5403_s10 + $0x8] sm:$0xff]  ;;  %v768_v10 = vld [vmem:[%s5403_s10] sm:$0xff]  ;;  %v850_v11 = vld [vmem:[%s5405_s12 + $0x18] sm:$0xff]  ;;  %s3591_s30 = sshll.u32 %s4287_s23, 4  ;;  %vm1971_vm3 = vcmask 31744  }
  0x25   : > { %3696 = vmatprep.subr.mxu0 %v4101_v1  ;;  %3706 = vmatpush3.msra.mxu1 %v771_v3  ;;  %s4306_s22 = scalar_lea.vmem %s5446_s1, %s3509_s0  ;;  %v849_v12 = vld [vmem:[%s5405_s12 + $0x10] sm:$0xff]  ;;  %v691_v13 = vld [vmem:[%s5447_s9] sm:$0x1]  ;;  %v3520_v18 = vld [vmem:[%s5445_s8 + $0x38] sm:$0xff]  ;;  %s5448_s0 = sld [smem:[#allocation12_spill]]  ;;  %vm3233_vm4 = vcmask 523264  }
  0x26   : > { %3697 = vmatpush3.msra.mxu0 %v689_v2  ;;  %3707 = vmatprep.subr.mxu1 %v4101_v1  ;;  %v4309_v7 = vld [vmem:[%s4306_s22] sm:$0x7f]  ;;  %v3519_v19 = vld [vmem:[%s5445_s8 + $0x30] sm:$0xff]  ;;  %v3518_v20 = vld [vmem:[%s5445_s8 + $0x28] sm:$0xff]  ;;  %s5450_s21 = smov %s5449_s27  ;;  %vm3390_vm5 = vcmask 24576  }
  0x27   : > { %3698 = vmatprep.subr.mxu0 %v4101_v1  ;;  %3708 = vmatpush3.msra.mxu1 %v770_v4  ;;  %v693_v8 = vrot.slane %v4309_v7, 1  ;;  %v3517_v21 = vld [vmem:[%s5445_s8 + $0x20] sm:$0xff]  ;;  %v932_v22 = vrot.slane %v4309_v7, 2  ;;  %v848_v23 = vld [vmem:[%s5405_s12 + $0x8] sm:$0xff]  ;;  %v3526_v30 = vld [vmem:[%s5403_s10 + $0x38] sm:$0xff]  ;;  %v1174_v43 = vrot.slane %v4309_v7, 3 }
  0x28   : > { %3699 = vmatpush3.msra.mxu0 %v688_v5  ;;  %3709 = vmatprep.subr.mxu1 %v4101_v1  ;;  %v847_v24 = vld [vmem:[%s5405_s12] sm:$0xff]  ;;  %v3525_v31 = vld [vmem:[%s5403_s10 + $0x30] sm:$0xff]  ;;  %v3524_v33 = vld [vmem:[%s5403_s10 + $0x28] sm:$0xff] }
  0x29   : > { %3700 = vmatprep.subr.mxu0 %v4101_v1  ;;  %3713 = vmatprep.mubr.msk.f32.mxu1 %vm4102_vm0, %v4101_v1  ;;  %v772_v25 = vld [vmem:[%s5404_s11] sm:$0x1]  ;;  %v3521_v32 = vld [vmem:[%s5447_s9 + $0x1] sm:$0x1]  ;;  %v3538_v39 = vld [vmem:[%s5445_s8 + $0x58] sm:$0xff] }
  0x2a   : > { %3701 = vmatpush3.msra.mxu0 %v687_v6  ;;  %3710 = vmatpush3.msra.mxu1 %v769_v9  ;;  %v3523_v36 = vld [vmem:[%s5403_s10 + $0x20] sm:$0xff]  ;;  %v3537_v40 = vld [vmem:[%s5445_s8 + $0x50] sm:$0xff]  ;;  %v3536_v41 = vld [vmem:[%s5445_s8 + $0x48] sm:$0xff] }
  0x2b   : > { %3703 = vmatmul.mubr.msk.f32.vlgmr.msra.gmra.mxu0 %vm694_vm1, %v693_v8  ;;  %3716 = vmatprep.subr.mxu0 %v4101_v1  ;;  %v3535_v42 = vld [vmem:[%s5445_s8 + $0x40] sm:$0xff]  ;;  %v3532_v44 = vld [vmem:[%s5405_s12 + $0x38] sm:$0xff]  ;;  %v3531_v45 = vld [vmem:[%s5405_s12 + $0x30] sm:$0xff]  ;;  %v1416_v8 = vrot.slane %v4309_v7, 4  ;;  %s678_s4 = scalar_lea.vmem %s5448_s0, %s3591_s30  ;;  %s5425_s0 = smov 120  }
  0x2c   : > { %3724 = vmatprep.mubr.msk.f32.mxu0 %vm4102_vm0, %v4101_v1  ;;  %3711 = vmatprep.subr.mxu1 %v4101_v1  ;;  %v3530_v46 = vld [vmem:[%s5405_s12 + $0x28] sm:$0xff]  ;;  %v3529_v47 = vld [vmem:[%s5405_s12 + $0x20] sm:$0xff]  ;;  %v3544_v57 = vld [vmem:[%s5403_s10 + $0x58] sm:$0xff]  ;;  %s4106_s30 = smov 8  }
  0x2d   : > { %3712 = vmatpush3.msra.mxu1 %v768_v10  ;;  %3717 = vmatpush3.msra.mxu0 %v850_v11  ;;  %v851_v48 = vld [vmem:[%s5406_s13] sm:$0x1]  ;;  %v3527_v52 = vld [vmem:[%s5404_s11 + $0x1] sm:$0x1]  ;;  %v3543_v58 = vld [vmem:[%s5403_s10 + $0x50] sm:$0xff] }
  0x2e   : > { %3727 = vmatprep.subr.mxu1 %v4101_v1  ;;  %3718 = vmatprep.subr.mxu0 %v4101_v1  ;;  %v3539_v59 = vld [vmem:[%s5447_s9 + $0x2] sm:$0x1]  ;;  %v3542_v60 = vld [vmem:[%s5403_s10 + $0x48] sm:$0xff]  ;;  %v3556_v3 = vld [vmem:[%s5445_s8 + $0x78] sm:$0xff] }
  0x2f   : > { %3719 = vmatpush3.msra.mxu0 %v849_v12  ;;  %v3541_v63 = vld [vmem:[%s5403_s10 + $0x40] sm:$0xff]  ;;  %v3555_v4 = vld [vmem:[%s5445_s8 + $0x70] sm:$0xff]  ;;  %v3554_v5 = vld [vmem:[%s5445_s8 + $0x68] sm:$0xff] }
  0x30   : > { %3720 = vmatprep.subr.mxu0 %v4101_v1  ;;  %v3553_v6 = vld [vmem:[%s5445_s8 + $0x60] sm:$0xff]  ;;  %v3550_v9 = vld [vmem:[%s5405_s12 + $0x58] sm:$0xff]  ;;  %v3549_v10 = vld [vmem:[%s5405_s12 + $0x50] sm:$0xff]  ;;  %s4105_s8 = smov 104  }
  0x31   : > { %3721 = vmatpush3.msra.mxu0 %v848_v23  ;;  %v3548_v7 = vld [vmem:[%s5405_s12 + $0x48] sm:$0xff]  ;;  %v3547_v11 = vld [vmem:[%s5405_s12 + $0x40] sm:$0xff] }
  0x32   : > { %3722 = vmatprep.subr.mxu0 %v4101_v1 }
  0x33   : > { %3723 = vmatpush3.msra.mxu0 %v847_v24 }
  0x34   : > { %3738 = vmatprep.subr.mxu0 %v4101_v1 }
  0xeb   : > { %v763_v14 = vpop.f32.mrf.mxu0 }
  0xec   : > { %v764_v15 = vadd.f32 %v763_v14, %v691_v13  ;;  %v3545_v14 = vld [vmem:[%s5404_s11 + $0x2] sm:$0x1] }
  0xed   : > { %v3704_v16 = vpop.f32.mrf.mxu0 }
  0xee   : > { %v767_v17 = vmax.f32 %v764_v15, 0.0 }
  0xf0   : > { %3714 = vmatmul.mubr.msk.f32.vlgmr.msra.gmra.mxu1 %vm694_vm1, %v767_v17 }
  0xf1   : > { %3728 = vmatpush3.msra.mxu1 %v3520_v18  ;;  %3735 = vmatprep.mubr.msk.f32.mxu1 %vm4102_vm0, %v4101_v1 }
  0xf2   : > { %3729 = vmatprep.subr.mxu1 %v4101_v1 }
  0xf3   : > { %3730 = vmatpush3.msra.mxu1 %v3519_v19  ;;  %v3562_v19 = vld [vmem:[%s5403_s10 + $0x78] sm:$0xff] }
  0xf4   : > { %3731 = vmatprep.subr.mxu1 %v4101_v1 }
  0xf5   : > { %3732 = vmatpush3.msra.mxu1 %v3518_v20  ;;  %v3561_v20 = vld [vmem:[%s5403_s10 + $0x70] sm:$0xff] }
  0xf6   : > { %3733 = vmatprep.subr.mxu1 %v4101_v1 }
  0xf7   : > { %3734 = vmatpush3.msra.mxu1 %v3517_v21  ;;  %v3557_v21 = vld [vmem:[%s5447_s9 + $0x3] sm:$0x1]  ;;  %s4111_s9 = smov 126  }
  0xf8   : > { %3736 = vmatmul.mubr.msk.f32.vlgmr.msra.gmra.mxu1 %vm694_vm1, %v932_v22  ;;  %3749 = vmatprep.subr.mxu1 %v4101_v1  ;;  %v3560_v22 = vld [vmem:[%s5403_s10 + $0x68] sm:$0xff] }
  0xf9   : > { %3757 = vmatprep.mubr.msk.f32.mxu1 %vm4102_vm0, %v4101_v1  ;;  %3750 = vmatpush3.msra.mxu1 %v3532_v44 }
  0xfa   : > { %3751 = vmatprep.subr.mxu1 %v4101_v1 }
  0xfb   : > { %3752 = vmatpush3.msra.mxu1 %v3531_v45 }
  0xfc   : > { %3753 = vmatprep.subr.mxu1 %v4101_v1 }
  0xfd   : > { %3754 = vmatpush3.msra.mxu1 %v3530_v46 }
  0xfe   : > { %3755 = vmatprep.subr.mxu1 %v4101_v1 }
  0xff   : > { %3756 = vmatpush3.msra.mxu1 %v3529_v47 }
 0x100   : > { %3771 = vmatprep.subr.mxu1 %v4101_v1 }
 0x1b0   : > { %v842_v26 = vpop.f32.mrf.mxu1 }
 0x1b1   : > { %v843_v27 = vadd.f32 %v842_v26, %v772_v25  ;;  %v3559_v25 = vld [vmem:[%s5403_s10 + $0x60] sm:$0xff] }
 0x1b2   : > { %v3715_v28 = vpop.f32.mrf.mxu1 }
 0x1b3   : > { %v846_v29 = vmax.f32 %v843_v27, 0.0  ;;  %v1654_v27 = vld [vmem:[%s5449_s27 + $0x18] sm:$0xff]  ;;  %s5451_s27 = sld [smem:[#allocation14_spill]] }
 0x1b5   : > { %3725 = vmatmul.mubr.msk.f32.vlgmr.msra.gmra.mxu0 %vm694_vm1, %v846_v29  ;;  %v685_v29 = vld [vmem:[%s678_s4] sm:$0xff] }
 0x1b6   : > { %3739 = vmatpush3.msra.mxu0 %v3526_v30  ;;  %3746 = vmatprep.mubr.msk.f32.mxu0 %vm4102_vm0, %v4101_v1  ;;  %v1653_v30 = vld [vmem:[%s5450_s21 + $0x10] sm:$0xff] }
 0x1b7   : > { %3740 = vmatprep.subr.mxu0 %v4101_v1 }
 0x1b8   : > { %v1001_v34 = vpop.f32.mrf.mxu1  ;;  %3741 = vmatpush3.msra.mxu0 %v3525_v31  ;;  %v1652_v31 = vld [vmem:[%s5450_s21 + $0x8] sm:$0xff] }
 0x1b9   : > { %v1002_v35 = vadd.f32 %v3521_v32, %v1001_v34  ;;  %3742 = vmatprep.subr.mxu0 %v4101_v1  ;;  %v1651_v32 = vld [vmem:[%s5450_s21] sm:$0xff]  ;;  %v3568_v34 = vld [vmem:[%s5405_s12 + $0x78] sm:$0xff] }
 0x1ba   : > { %v3737_v37 = vpop.f32.mrf.mxu1  ;;  %3743 = vmatpush3.msra.mxu0 %v3524_v33  ;;  %v686_v33 = vld [vmem:[%s678_s4 + $0x8] sm:$0xff]  ;;  %v3571_v46 = vld [vmem:[%s5451_s27] ss:$0 sm:$0xff]  ;;  %s4108_s27 = smov 24  }
 0x1bb   : > { %v1005_v38 = vmax.f32 %v1002_v35, 0.0  ;;  %3744 = vmatprep.subr.mxu0 %v4101_v1  ;;  %v3567_v35 = vld [vmem:[%s5405_s12 + $0x70] sm:$0xff]  ;;  %v3565_v37 = vld [vmem:[%s5405_s12 + $0x60] sm:$0xff] }
 0x1bc   : > { %3745 = vmatpush3.msra.mxu0 %v3523_v36  ;;  %v3566_v36 = vld [vmem:[%s5405_s12 + $0x68] sm:$0xff] }
 0x1bd   : > { %3747 = vmatmul.mubr.msk.f32.vlgmr.msra.gmra.mxu0 %vm694_vm1, %v1005_v38  ;;  %3760 = vmatprep.subr.mxu0 %v4101_v1 }
 0x1be   : > { %3761 = vmatpush3.msra.mxu0 %v3538_v39  ;;  %3768 = vmatprep.mubr.msk.f32.mxu0 %vm4102_vm0, %v4101_v1 }
 0x1bf   : > { %3762 = vmatprep.subr.mxu0 %v4101_v1 }
 0x1c0   : > { %3763 = vmatpush3.msra.mxu0 %v3537_v40  ;;  %v3563_v40 = vld [vmem:[%s5404_s11 + $0x3] sm:$0x1] }
 0x1c1   : > { %3764 = vmatprep.subr.mxu0 %v4101_v1 }
 0x1c2   : > { %3765 = vmatpush3.msra.mxu0 %v3536_v41 }
 0x1c3   : > { %3766 = vmatprep.subr.mxu0 %v4101_v1 }
 0x1c4   : > { %3767 = vmatpush3.msra.mxu0 %v3535_v42 }
 0x1c5   : > { %3769 = vmatmul.mubr.msk.f32.vlgmr.msra.gmra.mxu0 %vm694_vm1, %v1174_v43  ;;  %3782 = vmatprep.subr.mxu0 %v4101_v1 }
 0x1c6   : > { %3790 = vmatprep.mubr.msk.f32.mxu0 %vm4102_vm0, %v4101_v1  ;;  %3783 = vmatpush3.msra.mxu0 %v3550_v9 }
 0x1c7   : > { %3784 = vmatprep.subr.mxu0 %v4101_v1 }
 0x1c8   : > { %3785 = vmatpush3.msra.mxu0 %v3549_v10 }
 0x1c9   : > { %3786 = vmatprep.subr.mxu0 %v4101_v1 }
 0x1ca   : > { %3787 = vmatpush3.msra.mxu0 %v3548_v7 }
 0x1cb   : > { %3788 = vmatprep.subr.mxu0 %v4101_v1 }
 0x1cc   : > { %3789 = vmatpush3.msra.mxu0 %v3547_v11 }
 0x1cd   : > { %3804 = vmatprep.subr.mxu0 %v4101_v1 }
 0x275   : > { %v921_v49 = vpop.f32.mrf.mxu0 }
 0x276   : > { %v4437_v50 = vadd.f32 %v921_v49, %v851_v48 }
 0x277   : > { %v3726_v51 = vpop.f32.mrf.mxu0 }
 0x278   : > { %3906 = vpush %v4437_v50 }
 0x27d   : > { %v1082_v53 = vpop.f32.mrf.mxu0 }
 0x27e   : > { %v1083_v54 = vadd.f32 %v3527_v52, %v1082_v53 }
 0x27f   : > { %v3748_v55 = vpop.f32.mrf.mxu0 }
 0x280   : > { %v1086_v56 = vmax.f32 %v1083_v54, 0.0 }
 0x282   : > { %3758 = vmatmul.mubr.msk.f32.vlgmr.msra.gmra.mxu1 %vm694_vm1, %v1086_v56 }
 0x283   : > { %3772 = vmatpush3.msra.mxu1 %v3544_v57  ;;  %3779 = vmatprep.mubr.msk.f32.mxu1 %vm4102_vm0, %v4101_v1 }
 0x284   : > { %3773 = vmatprep.subr.mxu1 %v4101_v1 }
 0x285   : > { %3774 = vmatpush3.msra.mxu1 %v3543_v58  ;;  %v1243_v61 = vpop.f32.mrf.mxu0 }
 0x286   : > { %v1244_v62 = vadd.f32 %v3539_v59, %v1243_v61  ;;  %3775 = vmatprep.subr.mxu1 %v4101_v1 }
 0x287   : > { %3776 = vmatpush3.msra.mxu1 %v3542_v60  ;;  %v3770_v0 = vpop.f32.mrf.mxu0 }
 0x288   : > { %v1247_v2 = vmax.f32 %v1244_v62, 0.0  ;;  %3777 = vmatprep.subr.mxu1 %v4101_v1 }
 0x289   : > { %3778 = vmatpush3.msra.mxu1 %v3541_v63 }
 0x28a   : > { %3793 = vmatprep.subr.mxu1 %v4101_v1  ;;  %3780 = vmatmul.mubr.msk.f32.vlgmr.msra.gmra.mxu1 %vm694_vm1, %v1247_v2 }
 0x28b   : > { %3794 = vmatpush3.msra.mxu1 %v3556_v3  ;;  %3801 = vmatprep.mubr.msk.f32.mxu1 %vm4102_vm0, %v4101_v1 }
 0x28c   : > { %3795 = vmatprep.subr.mxu1 %v4101_v1 }
 0x28d   : > { %3796 = vmatpush3.msra.mxu1 %v3555_v4 }
 0x28e   : > { %3797 = vmatprep.subr.mxu1 %v4101_v1 }
 0x28f   : > { %3798 = vmatpush3.msra.mxu1 %v3554_v5 }
 0x290   : > { %3799 = vmatprep.subr.mxu1 %v4101_v1 }
 0x291   : > { %3800 = vmatpush3.msra.mxu1 %v3553_v6 }
 0x292   : > { %3802 = vmatmul.mubr.msk.f32.vlgmr.msra.gmra.mxu1 %vm694_vm1, %v1416_v8  ;;  %3815 = vmatprep.subr.mxu1 %v4101_v1 }
 0x293   : > { %3823 = vmatprep.mubr.msk.f32.mxu1 %vm4102_vm0, %v4101_v1  ;;  %3816 = vmatpush3.msra.mxu1 %v3568_v34 }
 0x294   : > { %3817 = vmatprep.subr.mxu1 %v4101_v1 }
 0x295   : > { %3818 = vmatpush3.msra.mxu1 %v3567_v35 }
 0x296   : > { %3819 = vmatprep.subr.mxu1 %v4101_v1 }
 0x297   : > { %3820 = vmatpush3.msra.mxu1 %v3566_v36 }
 0x298   : > { %3821 = vmatprep.subr.mxu1 %v4101_v1 }
 0x299   : > { %3822 = vmatpush3.msra.mxu1 %v3565_v37 }
 0x342   : > { %v4504_v12 = vpop.f32.mrf.mxu1 }
 0x344   : > { %v3759_v13 = vpop.f32.mrf.mxu1 }
 0x34a   : > { %v1324_v15 = vpop.f32.mrf.mxu1 }
 0x34b   : > { %v1325_v16 = vadd.f32 %v3545_v14, %v1324_v15 }
 0x34c   : > { %v3781_v17 = vpop.f32.mrf.mxu1 }
 0x34d   : > { %v1328_v18 = vmax.f32 %v1325_v16, 0.0 }
 0x34f   : > { %3791 = vmatmul.mubr.msk.f32.vlgmr.msra.gmra.mxu0 %vm694_vm1, %v1328_v18 }
 0x350   : > { %3805 = vmatpush3.msra.mxu0 %v3562_v19  ;;  %3812 = vmatprep.mubr.msk.f32.mxu0 %vm4102_vm0, %v4101_v1 }
 0x351   : > { %3806 = vmatprep.subr.mxu0 %v4101_v1 }
 0x352   : > { %v1485_v23 = vpop.f32.mrf.mxu1  ;;  %3807 = vmatpush3.msra.mxu0 %v3561_v20 }
 0x353   : > { %v1486_v24 = vadd.f32 %v3557_v21, %v1485_v23  ;;  %3808 = vmatprep.subr.mxu0 %v4101_v1 }
 0x354   : > { %v3803_v26 = vpop.f32.mrf.mxu1  ;;  %3809 = vmatpush3.msra.mxu0 %v3560_v22 }
 0x355   : > { %v1489_v28 = vmax.f32 %v1486_v24, 0.0  ;;  %3810 = vmatprep.subr.mxu0 %v4101_v1 }
 0x356   : > { %3811 = vmatpush3.msra.mxu0 %v3559_v25 }
 0x357   : > { %3813 = vmatmul.mubr.msk.f32.vlgmr.msra.gmra.mxu0 %vm694_vm1, %v1489_v28  ;;  %3826 = vmatprep.subr.mxu0 %v1654_v27 }
 0x358   : > { %3827 = vmatpush3.msra.mxu0 %v1654_v27  ;;  %3834 = vmatprep.mubr.msk.f32.mxu0 %vm694_vm1, %v685_v29  ;;  %v4643_v29 = vld [vmem:[%s5452_s26] ss:$0 sm:$0xff]  ;;  %s4109_s26 = smov 127  }
 0x359   : > { %3828 = vmatprep.subr.mxu0 %v1653_v30 }
 0x35a   : > { %3829 = vmatpush3.msra.mxu0 %v1653_v30  ;;  %v4650_v30 = vld [vmem:[%s5453_s2] ss:$0 sm:$0xff] }
 0x35b   : > { %3830 = vmatprep.subr.mxu0 %v1652_v31 }
 0x35c   : > { %3831 = vmatpush3.msra.mxu0 %v1652_v31 }
 0x35d   : > { %3832 = vmatprep.subr.mxu0 %v1651_v32 }
 0x35e   : > { %3833 = vmatpush3.msra.mxu0 %v1651_v32 }
 0x35f   : > { %3835 = vmatmul.mubr.msk.f32.vlgmr.msra.gmra.mxu0 %vm694_vm1, %v686_v33  ;;  %3857 = vmatprep.subr.mxu0 %v4101_v1 }
 0x360   : > { %3865 = vmatprep.mubr.msk.f32.mxu0 %vm4102_vm0, %v4101_v1 }
 0x40f   : > { %v4567_v38 = vpop.f32.mrf.mxu0 }
 0x411   : > { %v3792_v39 = vpop.f32.mrf.mxu0 }
 0x417   : > { %v1566_v41 = vpop.f32.mrf.mxu0 }
 0x418   : > { %v1567_v42 = vadd.f32 %v3563_v40, %v1566_v41 }
 0x419   : > { %v3814_v43 = vpop.f32.mrf.mxu0 }
 0x41a   : > { %v1570_v44 = vmax.f32 %v1567_v42, 0.0 }
 0x41c   : > { %3824 = vmatmul.mubr.msk.f32.vlgmr.msra.gmra.mxu1 %vm694_vm1, %v1570_v44 }
 0x41f   : > { %v3836_v45 = vpop.f32.mrf.mxu0 }
 0x420   : > { %v4582_v49 = vadd.f32 %v3836_v45, %v3571_v46 }
 0x421   : > { %v1734_v47 = vpop.f32.mrf.mxu0 }
 0x422   : > { %v4576_v48 = vadd.f32 %v3571_v46, %v1734_v47  ;;  %v1751_v28 = vsel %vm1747_vm2, %v4582_v49, 0.0 }
 0x424   : > { %2484 = vrot.lane.b32.xlu1 %v4576_v48, %s4103_s28  ;;  %2153 = vrot.lane.b32.xlu0 %v4576_v48, %s5425_s0  ;;  %v1748_v27 = vsel %vm1747_vm2, %v4576_v48, 0.0 }
 0x428   : > { %2486 = vrot.lane.b32.xlu1 %v4582_v49, %s4103_s28  ;;  %2155 = vrot.lane.b32.xlu0 %v4582_v49, %s5425_s0 }
 0x42c   : > { %2817 = vrot.lane.b32.xlu1 %v4582_v49, %s4105_s8  ;;  %2815 = vrot.lane.b32.xlu0 %v4576_v48, %s4105_s8 }
 0x496   : > { %v2485_v51 = vpop.permute.xlu1 %2484  ;;  %v2154_v52 = vpop.permute.xlu0 %2153 }
 0x497   : > { %v2159_v53 = vsel %vm1747_vm2, %v2154_v52, 0.0  ;;  %v2490_v56 = vsel %vm1747_vm2, %v2485_v51, 0.0 }
 0x498   : > { %2160 = vadd.xlane.f32.xlu0 %v2159_v53 }
 0x49a   : > { %v2487_v54 = vpop.permute.xlu1 %2486  ;;  %v2156_v55 = vpop.permute.xlu0 %2155 }
 0x49b   : > { %v2162_v57 = vsel %vm1747_vm2, %v2156_v55, 0.0  ;;  %v2493_v59 = vsel %vm1747_vm2, %v2487_v54, 0.0 }
 0x49c   : > { %2491 = vadd.xlane.f32.xlu0 %v2490_v56  ;;  %2163 = vadd.xlane.f32.xlu1 %v2162_v57 }
 0x49e   : > { %v2816_v58 = vpop.permute.xlu0 %2815  ;;  %v2818_v61 = vpop.permute.xlu1 %2817 }
 0x49f   : > { %v2821_v60 = vsel %vm1747_vm2, %v2816_v58, 0.0  ;;  %v2824_v62 = vsel %vm1747_vm2, %v2818_v61, 0.0 }
 0x4a0   : > { %2494 = vadd.xlane.f32.xlu0 %v2493_v59  ;;  %2822 = vadd.xlane.f32.xlu1 %v2821_v60 }
 0x4a4   : > { %2825 = vadd.xlane.f32.xlu0 %v2824_v62 }
 0x4dc   : > { %v4598_v63 = vpop.f32.mrf.mxu1 }
 0x4de   : > { %v3825_v0 = vpop.f32.mrf.mxu1 }
 0x521   : > { %v2161_v2 = vpop.xlane.xlu0 %2160 }
 0x522   : > { %v2165_v10 = vmul.f32 0.125, %v2161_v2 }
 0x524   : > { %v4613_v16 = vsub.f32 %v4576_v48, %v2165_v10 }
 0x525   : > { %v2164_v3 = vpop.xlane.xlu1 %2163  ;;  %v2492_v4 = vpop.xlane.xlu0 %2491 }
 0x526   : > { %v2166_v5 = vmul.f32 0.125, %v2164_v3  ;;  %v2496_v17 = vmul.f32 0.125, %v2492_v4  ;;  %v2169_v23 = vmul.f32 %v4613_v16, %v4613_v16 }
 0x528   : > { %v4601_v6 = vsub.f32 %v4582_v49, %v2166_v5  ;;  %v4622_v21 = vsub.f32 %v4576_v48, %v2496_v17 }
 0x529   : > { %v2823_v8 = vpop.xlane.xlu1 %2822  ;;  %v2495_v9 = vpop.xlane.xlu0 %2494 }
 0x52a   : > { %v2827_v7 = vmul.f32 0.125, %v2823_v8  ;;  %v2497_v11 = vmul.f32 0.125, %v2495_v9  ;;  %v2170_v13 = vmul.f32 %v4601_v6, %v4601_v6  ;;  %v2500_v25 = vmul.f32 %v4622_v21, %v4622_v21 }
 0x52c   : > { %v4606_v14 = vsub.f32 %v4576_v48, %v2827_v7  ;;  %v4609_v15 = vsub.f32 %v4582_v49, %v2497_v11  ;;  %2175 = vrot.lane.b32.xlu0 %v2170_v13, %s5425_s0 }
 0x52d   : > { %v2826_v20 = vpop.xlane.xlu0 %2825 }
 0x52e   : > { %v2831_v18 = vmul.f32 %v4606_v14, %v4606_v14  ;;  %v2501_v19 = vmul.f32 %v4609_v15, %v4609_v15  ;;  %v2828_v22 = vmul.f32 0.125, %v2826_v20 }
 0x530   : > { %2835 = vrot.lane.b32.xlu0 %v2831_v18, %s4105_s8  ;;  %2506 = vrot.lane.b32.xlu1 %v2501_v19, %s4103_s28  ;;  %v4628_v24 = vsub.f32 %v4582_v49, %v2828_v22 }
 0x532   : > { %v2832_v26 = vmul.f32 %v4628_v24, %v4628_v24 }
 0x534   : > { %2173 = vrot.lane.b32.xlu1 %v2169_v23, %s5425_s0 }
 0x538   : > { %2504 = vrot.lane.b32.xlu1 %v2500_v25, %s4103_s28 }
 0x53c   : > { %2837 = vrot.lane.b32.xlu1 %v2832_v26, %s4105_s8 }
 0x54f   : > { %1749 = vadd.xlane.f32.xlu0 %v1748_v27 }
 0x560   : > { %1752 = vadd.xlane.f32.xlu1 %v1751_v28 }
 0x571   : > { %2193 = vrot.lane.b32.xlu1 %v4643_v29, %s4106_s30 }
 0x575   : > { %2524 = vrot.lane.b32.xlu1 %v4643_v29, %s4107_s29 }
 0x579   : > { %2529 = vrot.lane.b32.xlu1 %v4650_v30, %s4107_s29 }
 0x59e   : > { %v2176_v31 = vpop.permute.xlu0 %2175 }
 0x59f   : > { %v2182_v32 = vsel %vm1747_vm2, %v2176_v31, 0.0 }
 0x5a0   : > { %2183 = vadd.xlane.f32.xlu0 %v2182_v32 }
 0x5a2   : > { %v2507_v33 = vpop.permute.xlu1 %2506  ;;  %v2836_v39 = vpop.permute.xlu0 %2835 }
 0x5a3   : > { %v2513_v34 = vsel %vm1747_vm2, %v2507_v33, 0.0  ;;  %v2841_v41 = vsel %vm1747_vm2, %v2836_v39, 0.0 }
 0x5a4   : > { %2514 = vadd.xlane.f32.xlu0 %v2513_v34 }
 0x5a6   : > { %v2174_v35 = vpop.permute.xlu1 %2173 }
 0x5a7   : > { %v2179_v43 = vsel %vm1747_vm2, %v2174_v35, 0.0 }
 0x5aa   : > { %v2505_v36 = vpop.permute.xlu1 %2504 }
 0x5ab   : > { %v2510_v37 = vsel %vm1747_vm2, %v2505_v36, 0.0 }
 0x5ac   : > { %2511 = vadd.xlane.f32.xlu1 %v2510_v37 }
 0x5ae   : > { %v2838_v40 = vpop.permute.xlu1 %2837 }
 0x5af   : > { %v2844_v42 = vsel %vm1747_vm2, %v2838_v40, 0.0 }
 0x5b0   : > { %2842 = vadd.xlane.f32.xlu1 %v2841_v41  ;;  %2845 = vadd.xlane.f32.xlu0 %v2844_v42 }
 0x5b4   : > { %2180 = vadd.xlane.f32.xlu0 %v2179_v43 }
 0x5c1   : > { %2860 = vrot.lane.b32.xlu1 %v4650_v30, %s4108_s27 }
 0x5ca   : > { %2198 = vrot.lane.b32.xlu0 %v4650_v30, %s4106_s30  ;;  %s4729_s30 = spop %3906 }
 0x5ce   : > { %2855 = vrot.lane.b32.xlu0 %v4643_v29, %s4108_s27  ;;  %s4112_s27 = smov 125  }
 0x5d8   : > { %v1750_v44 = vpop.xlane.xlu0 %1749 }
 0x5d9   : > { %v1755_v45 = vmul.f32 0.125, %v1750_v44 }
 0x5db   : > { %v4663_v46 = vsub.f32 %v4576_v48, %v1755_v45  ;;  %v4677_v48 = vld [vmem:[%s5454_s6] sm:$0xff] }
 0x5dc   : > { %3837 = vmatprep.subr.mxu1 %v4677_v48 }
 0x5dd   : > { %v1759_v47 = vmul.f32 %v4663_v46, %v4663_v46  ;;  %3838 = vmatpush3.msra.mxu1 %v4677_v48 }
 0x5de   : > { %3842 = vmatprep.subr.mxu1 %v4677_v48 }
 0x5df   : > { %v1761_v54 = vsel %vm1747_vm2, %v1759_v47, 0.0 }
 0x5e9   : > { %v1753_v51 = vpop.xlane.xlu1 %1752 }
 0x5ea   : > { %v1756_v52 = vmul.f32 0.125, %v1753_v51 }
 0x5ec   : > { %v4668_v53 = vsub.f32 %v4582_v49, %v1756_v52 }
 0x5ed   : > { %1762 = vadd.xlane.f32.xlu0 %v1761_v54  ;;  %v4682_v49 = vpop.permute.xlu1 %2193 }
 0x5ee   : > { %v1760_v55 = vmul.f32 %v4668_v53, %v4668_v53 }
 0x5f0   : > { %v1764_v56 = vsel %vm1747_vm2, %v1760_v55, 0.0 }
 0x5f1   : > { %1765 = vadd.xlane.f32.xlu1 %v1764_v56  ;;  %v2525_v59 = vpop.permute.xlu1 %2524 }
 0x5f5   : > { %v2530_v2 = vpop.permute.xlu1 %2529 }
 0x629   : > { %v2184_v57 = vpop.xlane.xlu0 %2183 }
 0x62a   : > { %v2186_v58 = vmul.f32 0.125, %v2184_v57 }
 0x62c   : > { %v2188_v60 = vadd.f32 1e-06, %v2186_v58 }
 0x62d   : > { %v2515_v61 = vpop.xlane.xlu0 %2514 }
 0x62e   : > { %3990 = vrsqrt.f32 %v2188_v60  ;;  %v2517_v62 = vmul.f32 0.125, %v2515_v61 }
 0x630   : > { %v2519_v0 = vadd.f32 1e-06, %v2517_v62 }
 0x632   : > { %3992 = vrsqrt.f32 %v2519_v0 }
 0x635   : > { %v2512_v3 = vpop.xlane.xlu1 %2511 }
 0x636   : > { %v2516_v4 = vmul.f32 0.125, %v2512_v3 }
 0x638   : > { %v2518_v5 = vadd.f32 1e-06, %v2516_v4 }
 0x639   : > { %v2843_v8 = vpop.xlane.xlu1 %2842  ;;  %v2846_v9 = vpop.xlane.xlu0 %2845 }
 0x63a   : > { %3994 = vrsqrt.f32 %v2518_v5  ;;  %v2847_v10 = vmul.f32 0.125, %v2843_v8  ;;  %v2848_v7 = vmul.f32 0.125, %v2846_v9 }
 0x63b   : > { %v3991_v11 = vpop.eup %3990 }
 0x63c   : > { %v2849_v13 = vadd.f32 1e-06, %v2847_v10  ;;  %v2850_v17 = vadd.f32 1e-06, %v2848_v7  ;;  %v2192_v18 = vmul.f32 %v3991_v11, %v4601_v6 }
 0x63d   : > { %v2181_v19 = vpop.xlane.xlu0 %2180 }
 0x63e   : > { %3996 = vrsqrt.f32 %v2849_v13  ;;  %v2185_v20 = vmul.f32 0.125, %v2181_v19  ;;  %v2197_v26 = vmul.f32 %v4682_v49, %v2192_v18 }
 0x63f   : > { %v3993_v22 = vpop.eup %3992  ;;  %3998 = vrsqrt.f32 %v2850_v17 }
 0x640   : > { %v2523_v23 = vmul.f32 %v3993_v22, %v4609_v15  ;;  %v2187_v25 = vadd.f32 1e-06, %v2185_v20 }
 0x641   : > { %v2199_v27 = vpop.permute.xlu0 %2198 }
 0x642   : > { %v2528_v28 = vmul.f32 %v2525_v59, %v2523_v23  ;;  %4000 = vrsqrt.f32 %v2187_v25  ;;  %v2202_v31 = vadd.f32 %v2199_v27, %v2197_v26 }
 0x644   : > { %v2206_v32 = vmul.f32 0.044715, %v2202_v31  ;;  %v2533_v33 = vadd.f32 %v2530_v2, %v2528_v28  ;;  %v2204_v22 = vmul.f32 0.5, %v2202_v31 }
 0x645   : > { %v2856_v54 = vpop.permute.xlu0 %2855 }
 0x646   : > { %v2208_v34 = vmul.f32 %v2206_v32, %v2202_v31  ;;  %v2537_v35 = vmul.f32 0.044715, %v2533_v33 }
 0x647   : > { %v3995_v36 = vpop.eup %3994 }
 0x648   : > { %v2522_v6 = vmul.f32 %v3995_v36, %v4622_v21  ;;  %v2210_v37 = vmul.f32 %v2208_v34, %v2202_v31  ;;  %v2539_v39 = vmul.f32 %v2537_v35, %v2533_v33  ;;  %v2861_v21 = vpop.permute.xlu1 %2860  ;;  %v2535_v34 = vmul.f32 0.5, %v2533_v33 }
 0x64a   : > { %v2527_v40 = vmul.f32 %v2525_v59, %v2522_v6  ;;  %v2212_v41 = vadd.f32 %v2210_v37, %v2202_v31  ;;  %v2541_v42 = vmul.f32 %v2539_v39, %v2533_v33 }
 0x64b   : > { %v3997_v15 = vpop.eup %3996 }
 0x64c   : > { %v3999_v43 = vpop.eup %3998  ;;  %v2853_v44 = vmul.f32 %v3997_v15, %v4606_v14  ;;  %v2214_v45 = vmul.f32 0.7978846, %v2212_v41  ;;  %v2543_v47 = vadd.f32 %v2541_v42, %v2533_v33  ;;  %v2532_v51 = vadd.f32 %v2530_v2, %v2527_v40 }
 0x64d   : > { %v2854_v52 = vmul.f32 %v3999_v43, %v4628_v24 }
 0x64e   : > { %v2858_v55 = vmul.f32 %v2856_v54, %v2853_v44  ;;  %4002 = vtanh.f32 %v2214_v45  ;;  %v2545_v56 = vmul.f32 0.7978846, %v2543_v47  ;;  %v2536_v60 = vmul.f32 0.044715, %v2532_v51 }
 0x64f   : > { %v4001_v57 = vpop.eup %4000  ;;  %v2859_v58 = vmul.f32 %v2856_v54, %v2854_v52  ;;  %v2534_v33 = vmul.f32 0.5, %v2532_v51 }
 0x650   : > { %v2191_v59 = vmul.f32 %v4001_v57, %v4613_v16  ;;  %v2863_v61 = vadd.f32 %v2861_v21, %v2858_v55  ;;  %4004 = vtanh.f32 %v2545_v56  ;;  %v2538_v0 = vmul.f32 %v2536_v60, %v2532_v51 }
 0x651   : > { %v2864_v62 = vadd.f32 %v2861_v21, %v2859_v58 }
 0x652   : > { %v2196_v14 = vmul.f32 %v4682_v49, %v2191_v59  ;;  %v2867_v3 = vmul.f32 0.044715, %v2863_v61  ;;  %v2540_v4 = vmul.f32 %v2538_v0, %v2532_v51  ;;  %v2865_v55 = vmul.f32 0.5, %v2863_v61 }
 0x653   : > { %v2868_v2 = vmul.f32 0.044715, %v2864_v62  ;;  %v2866_v31 = vmul.f32 0.5, %v2864_v62 }
 0x654   : > { %v2201_v24 = vadd.f32 %v2199_v27, %v2196_v14  ;;  %v2869_v5 = vmul.f32 %v2867_v3, %v2863_v61  ;;  %v2542_v7 = vadd.f32 %v2540_v4, %v2532_v51 }
 0x655   : > { %v2870_v8 = vmul.f32 %v2868_v2, %v2864_v62 }
 0x656   : > { %v2205_v9 = vmul.f32 0.044715, %v2201_v24  ;;  %v2871_v13 = vmul.f32 %v2869_v5, %v2863_v61  ;;  %v2544_v20 = vmul.f32 0.7978846, %v2542_v7  ;;  %v2203_v42 = vmul.f32 0.5, %v2201_v24 }
 0x657   : > { %v2872_v10 = vmul.f32 %v2870_v8, %v2864_v62 }
 0x658   : > { %v2207_v11 = vmul.f32 %v2205_v9, %v2201_v24  ;;  %v2873_v49 = vadd.f32 %v2871_v13, %v2863_v61 }
 0x659   : > { %v2874_v17 = vadd.f32 %v2872_v10, %v2864_v62 }
 0x65a   : > { %v2209_v18 = vmul.f32 %v2207_v11, %v2201_v24  ;;  %v2875_v35 = vmul.f32 0.7978846, %v2873_v49 }
 0x65b   : > { %v4003_v16 = vpop.eup %4002  ;;  %v2876_v19 = vmul.f32 0.7978846, %v2874_v17 }
 0x65c   : > { %v2218_v23 = vadd.f32 1.0, %v4003_v16  ;;  %v2211_v25 = vadd.f32 %v2209_v18, %v2201_v24 }
 0x65d   : > { %v4005_v26 = vpop.eup %4004  ;;  %4006 = vtanh.f32 %v2876_v19 }
 0x65e   : > { %v2220_v28 = vmul.f32 %v2218_v23, %v2204_v22  ;;  %v2549_v27 = vadd.f32 1.0, %v4005_v26  ;;  %v2213_v32 = vmul.f32 0.7978846, %v2211_v25  ;;  %4008 = vtanh.f32 %v2544_v20 }
 0x660   : > { %2225 = vrot.lane.b32.xlu1 %v2220_v28, %s5425_s0  ;;  %4010 = vtanh.f32 %v2213_v32  ;;  %v2551_v36 = vmul.f32 %v2549_v27, %v2535_v34  ;;  %v4725_v34 = vld [vmem:[%s5400_s7] ss:$0 sm:$0xff] }
 0x661   : > { %4012 = vtanh.f32 %v2875_v35 }
 0x664   : > { %2556 = vrot.lane.b32.xlu1 %v2551_v36, %s4103_s28 }
 0x66a   : > { %v4007_v6 = vpop.eup %4006 }
 0x66b   : > { %v2880_v37 = vadd.f32 1.0, %v4007_v6  ;;  %v4009_v39 = vpop.eup %4008 }
 0x66c   : > { %v2548_v44 = vadd.f32 1.0, %v4009_v39 }
 0x66d   : > { %v4011_v40 = vpop.eup %4010  ;;  %v2882_v41 = vmul.f32 %v2880_v37, %v2866_v31 }
 0x66e   : > { %v2217_v15 = vadd.f32 1.0, %v4011_v40  ;;  %v4013_v45 = vpop.eup %4012  ;;  %v2550_v47 = vmul.f32 %v2548_v44, %v2534_v33 }
 0x66f   : > { %2887 = vrot.lane.b32.xlu1 %v2882_v41, %s4105_s8  ;;  %v2879_v52 = vadd.f32 1.0, %v4013_v45 }
 0x670   : > { %v2219_v43 = vmul.f32 %v2217_v15, %v2203_v42 }
 0x671   : > { %v2881_v57 = vmul.f32 %v2879_v52, %v2865_v55 }
 0x672   : > { %2223 = vrot.lane.b32.xlu0 %v2219_v43, %s5425_s0 }
 0x676   : > { %2554 = vrot.lane.b32.xlu0 %v2550_v47, %s4103_s28  ;;  %v1763_v54 = vpop.xlane.xlu0 %1762 }
 0x677   : > { %v1767_v56 = vmul.f32 0.125, %v1763_v54 }
 0x679   : > { %v1769_v21 = vadd.f32 1e-06, %v1767_v56 }
 0x67a   : > { %v1766_v58 = vpop.xlane.xlu1 %1765  ;;  %2885 = vrot.lane.b32.xlu0 %v2881_v57, %s4105_s8  ;;  %s5423_s8 = smov 116  }
 0x67b   : > { %4014 = vrsqrt.f32 %v1769_v21  ;;  %v1768_v60 = vmul.f32 0.125, %v1766_v58 }
 0x67d   : > { %v1770_v59 = vadd.f32 1e-06, %v1768_v60 }
 0x67e   : > { %1920 = vrot.lane.b32.xlu0 %v4437_v50, %s4109_s26 }
 0x67f   : > { %4016 = vrsqrt.f32 %v1770_v59 }
 0x688   : > { %v4015_v51 = vpop.eup %4014 }
 0x689   : > { %v1773_v62 = vmul.f32 %v4015_v51, %v4663_v46 }
 0x68b   : > { %v1781_v0 = vmul.f32 %v4643_v29, %v1773_v62 }
 0x68c   : > { %v4017_v61 = vpop.eup %4016 }
 0x68d   : > { %v1789_v14 = vadd.f32 %v4650_v30, %v1781_v0  ;;  %v1774_v3 = vmul.f32 %v4017_v61, %v4668_v53 }
 0x68f   : > { %v1782_v2 = vmul.f32 %v4643_v29, %v1774_v3  ;;  %v1793_v4 = vmul.f32 0.044715, %v1789_v14  ;;  %v1791_v16 = vmul.f32 0.5, %v1789_v14 }
 0x691   : > { %v1790_v24 = vadd.f32 %v4650_v30, %v1782_v2  ;;  %v1795_v5 = vmul.f32 %v1793_v4, %v1789_v14  ;;  %v3533_v4 = vld [vmem:[%s5406_s13 + $0x1] sm:$0x1] }
 0x693   : > { %v1797_v8 = vmul.f32 %v1795_v5, %v1789_v14  ;;  %v1794_v9 = vmul.f32 0.044715, %v1790_v24  ;;  %v1792_v29 = vmul.f32 0.5, %v1790_v24 }
 0x695   : > { %v1799_v10 = vadd.f32 %v1797_v8, %v1789_v14  ;;  %v1796_v7 = vmul.f32 %v1794_v9, %v1790_v24 }
 0x697   : > { %v1801_v11 = vmul.f32 0.7978846, %v1799_v10  ;;  %v1798_v13 = vmul.f32 %v1796_v7, %v1790_v24 }
 0x699   : > { %4018 = vtanh.f32 %v1801_v11  ;;  %v1800_v46 = vadd.f32 %v1798_v13, %v1790_v24  ;;  %v1164_v24 = vadd.f32 %v3533_v4, %v4504_v12  ;;  %v4769_v12 = vstv %s4729_s30 }
 0x69b   : > { %v1802_v17 = vmul.f32 0.7978846, %v1800_v46 }
 0x69d   : > { %4020 = vtanh.f32 %v1802_v17 }
 0x6a6   : > { %v4019_v18 = vpop.eup %4018 }
 0x6a7   : > { %v1805_v19 = vadd.f32 1.0, %v4019_v18 }
 0x6a9   : > { %v1807_v53 = vmul.f32 %v1805_v19, %v1791_v16 }
 0x6aa   : > { %v4021_v20 = vpop.eup %4020 }
 0x6ab   : > { %3839 = vmatprep.mubr.msk.f32.mxu1 %vm1747_vm2, %v1807_v53  ;;  %v1806_v30 = vadd.f32 1.0, %v4021_v20 }
 0x6ad   : > { %v1808_v22 = vmul.f32 %v1806_v30, %v1792_v29 }
 0x6af   : > { %3840 = vmatmul.mubr.msk.f32.vlgmr.msra.gmra.mxu1 %vm1747_vm2, %v1808_v22 }
 0x6b0   : > { %3843 = vmatpush3.msra.mxu1 %v4677_v48 }
 0x6b1   : > { %3847 = vmatprep.subr.mxu1 %v4677_v48 }
 0x6d2   : > { %v2226_v23 = vpop.permute.xlu1 %2225 }
 0x6d6   : > { %v2557_v26 = vpop.permute.xlu1 %2556 }
 0x6e1   : > { %v2888_v27 = vpop.permute.xlu1 %2887 }
 0x6e4   : > { %v2224_v25 = vpop.permute.xlu0 %2223 }
 0x6e5   : > { %3844 = vmatprep.mubr.msk.f32.mxu1 %vm1747_vm2, %v2224_v25 }
 0x6e6   : > { %3845 = vmatmul.mubr.msk.f32.vlgmr.msra.gmra.mxu1 %vm1747_vm2, %v2226_v23 }
 0x6e7   : > { %3848 = vmatpush3.msra.mxu1 %v4677_v48 }
 0x6e8   : > { %v2555_v49 = vpop.permute.xlu0 %2554  ;;  %3852 = vmatprep.subr.mxu1 %v4677_v48 }
 0x6e9   : > { %3849 = vmatprep.mubr.msk.f32.mxu1 %vm1747_vm2, %v2555_v49 }
 0x6ea   : > { %3850 = vmatmul.mubr.msk.f32.vlgmr.msra.gmra.mxu1 %vm1747_vm2, %v2557_v26 }
 0x6eb   : > { %3853 = vmatpush3.msra.mxu1 %v4677_v48 }
 0x6ec   : > { %v2886_v28 = vpop.permute.xlu0 %2885  ;;  %3868 = vmatprep.subr.mxu1 %v4101_v1 }
 0x6ed   : > { %3854 = vmatprep.mubr.msk.f32.mxu1 %vm1747_vm2, %v2886_v28 }
 0x6ee   : > { %3855 = vmatmul.mubr.msk.f32.vlgmr.msra.gmra.mxu1 %vm1747_vm2, %v2888_v27 }
 0x6ef   : > { %3884 = vmatprep.mubr.msk.f32.mxu1 %vm4102_vm0, %v4101_v1 }
 0x6f0   : > { %v1921_v32 = vpop.permute.xlu0 %1920 }
 0x6f1   : > { %3908 = vpush %v1921_v32 }
 0x722   : > { %s3909_s29 = spop %3908 }
 0x723   : > { %v4733_v21 = vstv %s3909_s29  ;;  %s3592_s29 = sshll.u32 %s4287_s23, 8 }
 0x724   : > { %s4779_s1 = scalar_lea.vmem %s5413_s20, %s3592_s29  ;;  %s3588_s29 = sshll.u32 %s4246_s3, 4 }
 0x76f   : > { %v3841_v35 = vpop.f32.mrf.mxu1 }
 0x770   : > { %v1893_v48 = vadd.f32 %v3841_v35, %v4725_v34 }
 0x771   : > { %v1887_v36 = vpop.f32.mrf.mxu1 }
 0x772   : > { %v1899_v6 = vmul.f32 0.044715, %v1893_v48  ;;  %v1888_v31 = vadd.f32 %v4725_v34, %v1887_v36  ;;  %v1897_v47 = vmul.f32 0.5, %v1893_v48 }
 0x774   : > { %v1901_v37 = vmul.f32 %v1899_v6, %v1893_v48  ;;  %v1898_v39 = vmul.f32 0.044715, %v1888_v31  ;;  %v1896_v56 = vmul.f32 0.5, %v1888_v31 }
 0x776   : > { %v1903_v40 = vmul.f32 %v1901_v37, %v1893_v48  ;;  %v1900_v41 = vmul.f32 %v1898_v39, %v1888_v31 }
 0x778   : > { %v1905_v42 = vadd.f32 %v1903_v40, %v1893_v48  ;;  %v1902_v15 = vmul.f32 %v1900_v41, %v1888_v31 }
 0x77a   : > { %v1907_v43 = vmul.f32 0.7978846, %v1905_v42  ;;  %v1904_v44 = vadd.f32 %v1902_v15, %v1888_v31  ;;  %v3551_v31 = vld [vmem:[%s5406_s13 + $0x2] sm:$0x1] }
 0x77b   : > { %v1406_v39 = vadd.f32 %v3551_v31, %v4567_v38  ;;  %v3231_v31 = vld [vmem:[%s5409_s16 + $0x38] sm:$0xff] }
 0x77c   : > { %4022 = vtanh.f32 %v1907_v43  ;;  %v1906_v45 = vmul.f32 0.7978846, %v1904_v44  ;;  %3869 = vmatpush3.msra.mxu1 %v3231_v31 }
 0x77d   : > { %3870 = vmatprep.subr.mxu1 %v4101_v1 }
 0x77e   : > { %4024 = vtanh.f32 %v1906_v45 }
 0x789   : > { %v4023_v33 = vpop.eup %4022 }
 0x78a   : > { %v1911_v52 = vadd.f32 1.0, %v4023_v33 }
 0x78b   : > { %v4025_v54 = vpop.eup %4024 }
 0x78c   : > { %v4731_v55 = vmul.f32 %v1911_v52, %v1897_v47  ;;  %v1910_v57 = vadd.f32 1.0, %v4025_v54 }
 0x78e   : > { %v4735_v58 = vmul.f32 %v1910_v57, %v1896_v56  ;;  %v1926_v60 = vmul.f32 %v4733_v21, %v4731_v55  ;;  %v1919_v10 = vmul.f32 %v4769_v12, %v4731_v55 }
 0x790   : > { %1931 = vrot.lane.b32.xlu0 %v1926_v60, %s4110_s24  ;;  %v1925_v59 = vmul.f32 %v4733_v21, %v4735_v58  ;;  %v1918_v7 = vmul.f32 %v4769_v12, %v4735_v58 }
 0x792   : > { %1929 = vrot.lane.b32.xlu1 %v1925_v59, %s4110_s24 }
 0x796   : > { %1937 = vrot.lane.b32.xlu1 %v4437_v50, %s4111_s9 }
 0x802   : > { %v1932_v3 = vpop.permute.xlu0 %1931 }
 0x803   : > { %v1936_v13 = vadd.f32 %v1932_v3, %v1919_v10 }
 0x804   : > { %v1930_v51 = vpop.permute.xlu1 %1929 }
 0x805   : > { %v1935_v46 = vadd.f32 %v1930_v51, %v1918_v7 }
 0x808   : > { %v1938_v62 = vpop.permute.xlu1 %1937 }
 0x809   : > { %3910 = vpush %v1938_v62 }
 0x83a   : > { %s3911_s2 = spop %3910 }
 0x83b   : > { %v4745_v0 = vstv %s3911_s2 }
 0x83c   : > { %v1943_v61 = vmul.f32 %v4745_v0, %v4731_v55  ;;  %v1942_v14 = vmul.f32 %v4745_v0, %v4735_v58 }
 0x83e   : > { %1948 = vrot.lane.b32.xlu1 %v1943_v61, %s5425_s0  ;;  %1946 = vrot.lane.b32.xlu0 %v1942_v14, %s5425_s0 }
 0x842   : > { %1954 = vrot.lane.b32.xlu0 %v4437_v50, %s4112_s27 }
 0x8b0   : > { %v1947_v2 = vpop.permute.xlu0 %1946  ;;  %v1949_v11 = vpop.permute.xlu1 %1948 }
 0x8b1   : > { %v1953_v17 = vadd.f32 %v1949_v11, %v1936_v13  ;;  %v1952_v18 = vadd.f32 %v1947_v2, %v1935_v46 }
 0x8b4   : > { %v1955_v5 = vpop.permute.xlu0 %1954 }
 0x8b5   : > { %3912 = vpush %v1955_v5 }
 0x8b6   : > { %3914 = vpush %v1164_v24 }
 0x8e6   : > { %s3913_s28 = spop %3912 }
 0x8e7   : > { %v4759_v8 = vstv %s3913_s28  ;;  %s3915_s23 = spop %3914 }
 0x8e8   : > { %v1960_v9 = vmul.f32 %v4759_v8, %v4731_v55  ;;  %v1959_v50 = vmul.f32 %v4759_v8, %v4735_v58  ;;  %v4803_v32 = vstv %s3915_s23 }
 0x8e9   : > { %v1978_v48 = vmul.f32 %v4803_v32, %v4735_v58  ;;  %v1979_v38 = vmul.f32 %v4803_v32, %v4731_v55 }
 0x8ea   : > { %1965 = vrot.lane.b32.xlu0 %v1960_v9, %s5423_s8  ;;  %1963 = vrot.lane.b32.xlu1 %v1959_v50, %s5423_s8  ;;  %v3569_v50 = vld [vmem:[%s5406_s13 + $0x3] sm:$0x1] }
 0x8eb   : > { %v4852_v7 = vadd.f32 %v3569_v50, %v4598_v63  ;;  %v3149_v63 = vld [vmem:[%s5407_s14 + $0x18] sm:$0xff] }
 0x8ec   : > { %3858 = vmatpush3.msra.mxu0 %v3149_v63  ;;  %v3309_v63 = vld [vmem:[%s5411_s18 + $0x8] sm:$0xff] }
 0x8ed   : > { %3859 = vmatprep.subr.mxu0 %v4101_v1 }
 0x8ee   : > { %1980 = vrot.lane.b32.xlu1 %v1164_v24, %s4109_s26 }
 0x95c   : > { %v1966_v16 = vpop.permute.xlu0 %1965  ;;  %v1964_v19 = vpop.permute.xlu1 %1963 }
 0x95d   : > { %v1970_v53 = vadd.f32 %v1966_v16, %v1953_v17  ;;  %v1969_v20 = vadd.f32 %v1964_v19, %v1952_v18  ;;  %v3148_v18 = vld [vmem:[%s5407_s14 + $0x10] sm:$0xff]  ;;  %v3147_v16 = vld [vmem:[%s5407_s14 + $0x8] sm:$0xff]  ;;  %v3146_v19 = vld [vmem:[%s5407_s14] sm:$0xff] }
 0x95e   : > { %3860 = vmatpush3.msra.mxu0 %v3148_v18 }
 0x95f   : > { %1973 = vst.msk [vmem:[%s4779_s1 + $0x8] sm:$0xff] %vm1971_vm3, %v1970_v53  ;;  %1972 = vst.msk [vmem:[%s4779_s1] sm:$0xff] %vm1971_vm3, %v1969_v20  ;;  %3861 = vmatprep.subr.mxu0 %v4101_v1  ;;  %v4038_v53 = vld [vmem:[%s4306_s22] sm:$0x7f] }
 0x960   : > { %v1981_v29 = vpop.permute.xlu1 %1980  ;;  %3862 = vmatpush3.msra.mxu0 %v3147_v16 }
 0x961   : > { %3916 = vpush %v1981_v29  ;;  %3863 = vmatprep.subr.mxu0 %v4101_v1 }
 0x962   : > { %3864 = vmatpush3.msra.mxu0 %v3146_v19 }
 0x963   : > { %3866 = vmatmul.mubr.msk.f32.vlgmr.msra.gmra.mxu0 %vm694_vm1, %v4038_v53  ;;  %3887 = vmatprep.subr.mxu0 %v4101_v1 }
 0x964   : > { %3903 = vmatprep.mubr.msk.f32.mxu0 %vm4102_vm0, %v4101_v1 }
 0x992   : > { %s3917_s30 = spop %3916 }
 0x993   : > { %v4785_v30 = vstv %s3917_s30 }
 0x994   : > { %v1986_v22 = vmul.f32 %v4785_v30, %v4731_v55  ;;  %v1985_v23 = vmul.f32 %v4785_v30, %v4735_v58 }
 0x996   : > { %1991 = vrot.lane.b32.xlu1 %v1986_v22, %s4110_s24  ;;  %1989 = vrot.lane.b32.xlu0 %v1985_v23, %s4110_s24 }
 0x99a   : > { %1997 = vrot.lane.b32.xlu0 %v1164_v24, %s4111_s9 }
 0xa08   : > { %v1990_v25 = vpop.permute.xlu0 %1989  ;;  %v1992_v35 = vpop.permute.xlu1 %1991 }
 0xa09   : > { %v1995_v36 = vadd.f32 %v1990_v25, %v1978_v48  ;;  %v1996_v44 = vadd.f32 %v1992_v35, %v1979_v38  ;;  %v3225_v38 = vld [vmem:[%s5409_s16 + $0x8] sm:$0xff] }
 0xa0c   : > { %v1998_v49 = vpop.permute.xlu0 %1997 }
 0xa0d   : > { %3918 = vpush %v1998_v49 }
 0xa3e   : > { %s3919_s28 = spop %3918 }
 0xa3f   : > { %v4794_v26 = vstv %s3919_s28 }
 0xa40   : > { %v2003_v28 = vmul.f32 %v4794_v26, %v4731_v55  ;;  %v2002_v27 = vmul.f32 %v4794_v26, %v4735_v58 }
 0xa42   : > { %2008 = vrot.lane.b32.xlu0 %v2003_v28, %s5425_s0  ;;  %2006 = vrot.lane.b32.xlu1 %v2002_v27, %s5425_s0 }
 0xa46   : > { %2014 = vrot.lane.b32.xlu1 %v1164_v24, %s4112_s27 }
 0xab4   : > { %v2007_v6 = vpop.permute.xlu1 %2006  ;;  %v2009_v43 = vpop.permute.xlu0 %2008 }
 0xab5   : > { %v2012_v37 = vadd.f32 %v2007_v6, %v1995_v36  ;;  %v2013_v45 = vadd.f32 %v2009_v43, %v1996_v44  ;;  %v3224_v43 = vld [vmem:[%s5409_s16] sm:$0xff] }
 0xab6   : > { %v3150_v44 = vld [vmem:[%s5408_s15] sm:$0x1] }
 0xab8   : > { %v2015_v40 = vpop.permute.xlu1 %2014 }
 0xab9   : > { %3920 = vpush %v2015_v40  ;;  %v3228_v40 = vld [vmem:[%s5409_s16 + $0x20] sm:$0xff] }
 0xaba   : > { %3922 = vpush %v1406_v39 }
 0xaea   : > { %s3921_s4 = spop %3920 }
 0xaeb   : > { %v4811_v41 = vstv %s3921_s4  ;;  %s3923_s23 = spop %3922 }
 0xaec   : > { %v2020_v42 = vmul.f32 %v4811_v41, %v4731_v55  ;;  %v2019_v15 = vmul.f32 %v4811_v41, %v4735_v58  ;;  %v4844_v2 = vstv %s3923_s23 }
 0xaed   : > { %v2037_v24 = vmul.f32 %v4844_v2, %v4735_v58  ;;  %v2038_v20 = vmul.f32 %v4844_v2, %v4731_v55 }
 0xaee   : > { %2025 = vrot.lane.b32.xlu1 %v2020_v42, %s5423_s8  ;;  %2023 = vrot.lane.b32.xlu0 %v2019_v15, %s5423_s8  ;;  %v3227_v42 = vld [vmem:[%s5409_s16 + $0x18] sm:$0xff]  ;;  %v3226_v15 = vld [vmem:[%s5409_s16 + $0x10] sm:$0xff] }
 0xaf2   : > { %2039 = vrot.lane.b32.xlu0 %v1406_v39, %s4109_s26 }
 0xb60   : > { %v2026_v33 = vpop.permute.xlu1 %2025  ;;  %v2024_v47 = vpop.permute.xlu0 %2023 }
 0xb61   : > { %v2030_v52 = vadd.f32 %v2026_v33, %v2013_v45  ;;  %v2029_v54 = vadd.f32 %v2024_v47, %v2012_v37  ;;  %v3230_v37 = vld [vmem:[%s5409_s16 + $0x30] sm:$0xff]  ;;  %v3219_v45 = vpop.f32.mrf.mxu0 }
 0xb62   : > { %3871 = vmatpush3.msra.mxu1 %v3230_v37  ;;  %v3220_v33 = vadd.f32 %v3219_v45, %v3150_v44 }
 0xb63   : > { %2032 = vst.msk [vmem:[%s4779_s1 + $0x48] sm:$0xff] %vm1971_vm3, %v2030_v52  ;;  %2031 = vst.msk [vmem:[%s4779_s1 + $0x40] sm:$0xff] %vm1971_vm3, %v2029_v54  ;;  %3872 = vmatprep.subr.mxu1 %v4101_v1  ;;  %v3867_v47 = vpop.f32.mrf.mxu0 }
 0xb64   : > { %v2040_v56 = vpop.permute.xlu0 %2039  ;;  %v3223_v52 = vmax.f32 %v3220_v33, 0.0 }
 0xb65   : > { %3924 = vpush %v2040_v56 }
 0xb96   : > { %s3925_s30 = spop %3924 }
 0xb97   : > { %v4826_v57 = vstv %s3925_s30 }
 0xb98   : > { %v2045_v60 = vmul.f32 %v4826_v57, %v4731_v55  ;;  %v2044_v59 = vmul.f32 %v4826_v57, %v4735_v58 }
 0xb9a   : > { %2050 = vrot.lane.b32.xlu0 %v2045_v60, %s4110_s24  ;;  %2048 = vrot.lane.b32.xlu1 %v2044_v59, %s4110_s24 }
 0xb9e   : > { %2056 = vrot.lane.b32.xlu1 %v1406_v39, %s4111_s9 }
 0xc0c   : > { %v2049_v51 = vpop.permute.xlu1 %2048  ;;  %v2051_v4 = vpop.permute.xlu0 %2050 }
 0xc0d   : > { %v2054_v5 = vadd.f32 %v2049_v51, %v2037_v24  ;;  %v2055_v22 = vadd.f32 %v2051_v4, %v2038_v20  ;;  %v3315_v4 = vld [vmem:[%s5411_s18 + $0x38] sm:$0xff]  ;;  %v3308_v20 = vld [vmem:[%s5411_s18] sm:$0xff] }
 0xc0e   : > { %3888 = vmatpush3.msra.mxu0 %v3315_v4 }
 0xc0f   : > { %3889 = vmatprep.subr.mxu0 %v4101_v1 }
 0xc10   : > { %v2057_v62 = vpop.permute.xlu1 %2056 }
 0xc11   : > { %3926 = vpush %v2057_v62  ;;  %v3846_v62 = vpop.f32.mrf.mxu1 }
 0xc42   : > { %s3927_s28 = spop %3926 }
 0xc43   : > { %v4835_v61 = vstv %s3927_s28  ;;  %s668_s28 = sand.u32 1, %s4091_s25  }
 0xc44   : > { %v2062_v14 = vmul.f32 %v4835_v61, %v4731_v55  ;;  %v2061_v3 = vmul.f32 %v4835_v61, %v4735_v58  ;;  %s669_s2 = scalar_lea.vmem [#allocation2], %s668_s28  ;;  %s3398_s3 = scalar_lea.sflag [#allocation3], %s668_s28 }
 0xc46   : > { %2067 = vrot.lane.b32.xlu1 %v2062_v14, %s5425_s0  ;;  %2065 = vrot.lane.b32.xlu0 %v2061_v3, %s5425_s0  ;;  %v2297_v14 = vpop.f32.mrf.mxu1 }
 0xc48   : > { %v4948_v3 = vpop.f32.mrf.mxu1 }
 0xc49   : > { %v2634_v4 = vadd.f32 %v4948_v3, %v4725_v34 }
 0xc4a   : > { %2073 = vrot.lane.b32.xlu0 %v1406_v39, %s4112_s27  ;;  %v3229_v39 = vld [vmem:[%s5409_s16 + $0x28] sm:$0xff]  ;;  %v4954_v24 = vpop.f32.mrf.mxu1 }
 0xc4b   : > { %3873 = vmatpush3.msra.mxu1 %v3229_v39 }
 0xc4c   : > { %3874 = vmatprep.subr.mxu1 %v4101_v1  ;;  %v4963_v50 = vpop.f32.mrf.mxu1 }
 0xc4d   : > { %3875 = vmatpush3.msra.mxu1 %v3228_v40 }
 0xc4e   : > { %3876 = vmatprep.subr.mxu1 %v4101_v1 }
 0xc4f   : > { %3877 = vmatpush3.msra.mxu1 %v3227_v42 }
 0xc50   : > { %3878 = vmatprep.subr.mxu1 %v4101_v1 }
 0xc51   : > { %3879 = vmatpush3.msra.mxu1 %v3226_v15 }
 0xc52   : > { %3880 = vmatprep.subr.mxu1 %v4101_v1 }
 0xc53   : > { %3881 = vmatpush3.msra.mxu1 %v3225_v38 }
 0xc54   : > { %3882 = vmatprep.subr.mxu1 %v4101_v1 }
 0xc55   : > { %3883 = vmatpush3.msra.mxu1 %v3224_v43 }
 0xc56   : > { %3885 = vmatmul.mubr.msk.f32.vlgmr.msra.gmra.mxu1 %vm3233_vm4, %v3223_v52 }
 0xcb8   : > { %v2066_v9 = vpop.permute.xlu0 %2065  ;;  %v2068_v29 = vpop.permute.xlu1 %2067 }
 0xcb9   : > { %v2071_v10 = vadd.f32 %v2066_v9, %v2054_v5  ;;  %v2072_v23 = vadd.f32 %v2068_v29, %v2055_v22  ;;  %v3314_v5 = vld [vmem:[%s5411_s18 + $0x30] sm:$0xff]  ;;  %v3313_v9 = vld [vmem:[%s5411_s18 + $0x28] sm:$0xff] }
 0xcba   : > { %3890 = vmatpush3.msra.mxu0 %v3314_v5  ;;  %v2629_v5 = vadd.f32 %v4725_v34, %v4954_v24 }
 0xcbb   : > { %3891 = vmatprep.subr.mxu0 %v4101_v1 }
 0xcbc   : > { %v2074_v11 = vpop.permute.xlu0 %2073  ;;  %3892 = vmatpush3.msra.mxu0 %v3313_v9 }
 0xcbd   : > { %3928 = vpush %v2074_v11  ;;  %3893 = vmatprep.subr.mxu0 %v4101_v1  ;;  %v4973_v11 = vpop.f32.mrf.mxu1 }
 0xcbe   : > { %3930 = vpush %v4852_v7 }
 0xcee   : > { %s3929_s4 = spop %3928 }
 0xcef   : > { %v4855_v13 = vstv %s3929_s4  ;;  %s4891_s22 = spop %3930 }
 0xcf0   : > { %v2079_v46 = vmul.f32 %v4855_v13, %v4731_v55  ;;  %v2078_v17 = vmul.f32 %v4855_v13, %v4735_v58  ;;  %v4992_v29 = vstv %s4891_s22 }
 0xcf2   : > { %2084 = vrot.lane.b32.xlu0 %v2079_v46, %s5423_s8  ;;  %2082 = vrot.lane.b32.xlu1 %v2078_v17, %s5423_s8  ;;  %v3232_v46 = vld [vmem:[%s5410_s17] sm:$0x1]  ;;  %v3310_v17 = vld [vmem:[%s5411_s18 + $0x10] sm:$0xff] }
 0xcf6   : > { %2098 = vrot.lane.b32.xlu1 %v4852_v7, %s4109_s26 }
 0xd16   : > { %v3303_v18 = vpop.f32.mrf.mxu1 }
 0xd17   : > { %v3304_v16 = vadd.f32 %v3303_v18, %v3232_v46 }
 0xd18   : > { %v3886_v19 = vpop.f32.mrf.mxu1 }
 0xd19   : > { %v3307_v53 = vmax.f32 %v3304_v16, 0.0 }
 0xd64   : > { %v2085_v25 = vpop.permute.xlu0 %2084  ;;  %v2083_v49 = vpop.permute.xlu1 %2082 }
 0xd65   : > { %v2089_v28 = vadd.f32 %v2085_v25, %v2072_v23  ;;  %v2088_v27 = vadd.f32 %v2083_v49, %v2071_v10  ;;  %v3312_v10 = vld [vmem:[%s5411_s18 + $0x20] sm:$0xff]  ;;  %v2096_v23 = vmul.f32 %v4992_v29, %v4735_v58 }
 0xd66   : > { %3894 = vmatpush3.msra.mxu0 %v3312_v10 }
 0xd67   : > { %2091 = vst.msk [vmem:[%s4779_s1 + $0x88] sm:$0xff] %vm1971_vm3, %v2089_v28  ;;  %2090 = vst.msk [vmem:[%s4779_s1 + $0x80] sm:$0xff] %vm1971_vm3, %v2088_v27  ;;  %3895 = vmatprep.subr.mxu0 %v4101_v1 }
 0xd68   : > { %v2099_v35 = vpop.permute.xlu1 %2098 }
 0xd69   : > { %3932 = vpush %v2099_v35  ;;  %v2298_v35 = vadd.f32 %v4725_v34, %v2297_v14 }
 0xd9a   : > { %s3933_s8 = spop %3932 }
 0xd9b   : > { %v4893_v48 = vstv %s3933_s8  ;;  %s5455_s8 = smov 116  }
 0xd9c   : > { %v2104_v36 = vmul.f32 %v4893_v48, %v4731_v55  ;;  %v2103_v6 = vmul.f32 %v4893_v48, %v4735_v58 }
 0xd9e   : > { %2109 = vrot.lane.b32.xlu1 %v2104_v36, %s4110_s24  ;;  %2107 = vrot.lane.b32.xlu0 %v2103_v6, %s4110_s24  ;;  %v2308_v6 = vmul.f32 0.044715, %v2298_v35 }
 0xda0   : > { %v2310_v37 = vmul.f32 %v2308_v6, %v2298_v35 }
 0xda2   : > { %2115 = vrot.lane.b32.xlu0 %v4852_v7, %s4111_s9  ;;  %v2312_v40 = vmul.f32 %v2310_v37, %v2298_v35 }
 0xda4   : > { %v2314_v15 = vadd.f32 %v2312_v40, %v2298_v35 }
 0xda6   : > { %v2316_v43 = vmul.f32 0.7978846, %v2314_v15 }
 0xe10   : > { %v2108_v54 = vpop.permute.xlu0 %2107  ;;  %v4994_v22 = vpop.permute.xlu1 %2109 }
 0xe11   : > { %v2113_v25 = vadd.f32 %v2108_v54, %v2096_v23  ;;  %v2306_v54 = vmul.f32 0.5, %v2298_v35 }
 0xe14   : > { %v2116_v56 = vpop.permute.xlu0 %2115 }
 0xe15   : > { %3934 = vpush %v2116_v56 }
 0xe46   : > { %s3935_s23 = spop %3934 }
 0xe47   : > { %v4938_v60 = vstv %s3935_s23  ;;  %s3413_s23 = sshll.u32 %s669_s2, 4  ;;  %s3414_s23 = int_to_ptr.vmem [resolvable:$true] %s3413_s23 }
 0xe48   : > { %v2121_v59 = vmul.f32 %v4938_v60, %v4731_v55  ;;  %v2120_v51 = vmul.f32 %v4938_v60, %v4735_v58  ;;  %s4039_s30 = scalar_lea.vmem %s3414_s23, 16 }
 0xe49   : > { %p4040_p11 = scmp.ne.s32.totalorder %s3414_s23, %s4039_s30 }
 0xe4a   : > { %2126 = vrot.lane.b32.xlu0 %v2121_v59, %s5425_s0  ;;  %2124 = vrot.lane.b32.xlu1 %v2120_v51, %s5425_s0 }
 0xe4b   : > { %p4041_p12 = pnand %p4040_p11, %p4263_p5 }
 0xe4d   : > { %p4042_p13 = pneg %p4041_p12 }
 0xe4e   : > { %2132 = vrot.lane.b32.xlu1 %v4852_v7, %s4112_s27  ;;  %v3311_v7 = vld [vmem:[%s5411_s18 + $0x18] sm:$0xff]  ;;  %s5456_s27 = sld [smem:[#allocation20_spill]] }
 0xe4f   : > { %3896 = vmatpush3.msra.mxu0 %v3311_v7  ;;  %v2639_v7 = vmul.f32 0.044715, %v2629_v5 }
 0xe50   : > { %3897 = vmatprep.subr.mxu0 %v4101_v1 }
 0xe51   : > { %3898 = vmatpush3.msra.mxu0 %v3310_v17  ;;  %v2641_v17 = vmul.f32 %v2639_v7, %v2629_v5 }
 0xe52   : > { %3899 = vmatprep.subr.mxu0 %v4101_v1 }
 0xe53   : > { %3900 = vmatpush3.msra.mxu0 %v3309_v63  ;;  %v2643_v19 = vmul.f32 %v2641_v17, %v2629_v5 }
 0xe54   : > { %3901 = vmatprep.subr.mxu0 %v4101_v1  ;;  %v2303_v1 = vadd.f32 %v3846_v62, %v4725_v34  ;;  %s5457_s9 = smov %s5456_s27 }
 0xe55   : > { %3902 = vmatpush3.msra.mxu0 %v3308_v20 }
 0xe56   : > { %3904 = vmatmul.mubr.msk.f32.vlgmr.msra.gmra.mxu0 %vm3233_vm4, %v3307_v53  ;;  %v2309_v36 = vmul.f32 0.044715, %v2303_v1  ;;  %v2307_v52 = vmul.f32 0.5, %v2303_v1 }
 0xe58   : > { %v2311_v31 = vmul.f32 %v2309_v36, %v2303_v1 }
 0xe5a   : > { %v2313_v39 = vmul.f32 %v2311_v31, %v2303_v1 }
 0xe5c   : > { %v2315_v42 = vadd.f32 %v2313_v39, %v2303_v1 }
 0xe5e   : > { %v2317_v38 = vmul.f32 0.7978846, %v2315_v42 }
 0xe60   : > { %4026 = vtanh.f32 %v2317_v38 }
 0xe61   : > { %4028 = vtanh.f32 %v2316_v43 }
 0xe6d   : > { %v4027_v44 = vpop.eup %4026 }
 0xe6e   : > { %v4029_v45 = vpop.eup %4028  ;;  %v2321_v33 = vadd.f32 1.0, %v4027_v44 }
 0xe6f   : > { %v2320_v47 = vadd.f32 1.0, %v4029_v45 }
 0xe70   : > { %v5004_v59 = vmul.f32 %v2321_v33, %v2307_v52 }
 0xe71   : > { %v5006_v51 = vmul.f32 %v2320_v47, %v2306_v54 }
 0xe72   : > { %v2327_v9 = vmul.f32 %v5004_v59, %v4733_v21  ;;  %v2339_v46 = vmul.f32 %v5004_v59, %v4745_v0  ;;  %v2351_v63 = vmul.f32 %v5004_v59, %v4759_v8  ;;  %v2367_v53 = vmul.f32 %v5004_v59, %v4785_v30 }
 0xe73   : > { %v2326_v10 = vmul.f32 %v5006_v51, %v4733_v21  ;;  %v2338_v3 = vmul.f32 %v5006_v51, %v4745_v0  ;;  %v2350_v18 = vmul.f32 %v5006_v51, %v4759_v8  ;;  %v2366_v20 = vmul.f32 %v5006_v51, %v4785_v30 }
 0xe74   : > { %v2391_v36 = vmul.f32 %v5004_v59, %v4811_v41  ;;  %v2390_v6 = vmul.f32 %v5006_v51, %v4811_v41  ;;  %v2407_v31 = vmul.f32 %v5004_v59, %v4826_v57  ;;  %v2406_v37 = vmul.f32 %v5006_v51, %v4826_v57 }
 0xe75   : > { %v2419_v39 = vmul.f32 %v5004_v59, %v4835_v61  ;;  %v2418_v40 = vmul.f32 %v5006_v51, %v4835_v61  ;;  %v2431_v42 = vmul.f32 %v5004_v59, %v4855_v13  ;;  %v2430_v15 = vmul.f32 %v5006_v51, %v4855_v13 }
 0xe76   : > { %v2447_v43 = vmul.f32 %v5004_v59, %v4893_v48  ;;  %v2446_v44 = vmul.f32 %v5006_v51, %v4893_v48  ;;  %v2459_v52 = vmul.f32 %v5004_v59, %v4938_v60  ;;  %v2458_v54 = vmul.f32 %v5006_v51, %v4938_v60 }
 0xebc   : > { %v2125_v49 = vpop.permute.xlu1 %2124 }
 0xebd   : > { %v4998_v28 = vadd.f32 %v2125_v49, %v2113_v25  ;;  %v2645_v25 = vadd.f32 %v2643_v19, %v2629_v5  ;;  %v2379_v49 = vmul.f32 %v5004_v59, %v4794_v26 }
 0xebf   : > { %v2647_v35 = vmul.f32 0.7978846, %v2645_v25 }
 0xec0   : > { %v2133_v27 = vpop.permute.xlu1 %2132 }
 0xec1   : > { %3936 = vpush %v2133_v27  ;;  %v2378_v27 = vmul.f32 %v5006_v51, %v4794_v26 }
 0xef2   : > { %s3937_s22 = spop %3936 }
 0xef3   : > { %v5002_v56 = vstv %s3937_s22  ;;  %s5260_s22 = scalar_lea.hbm %s5456_s27, %s3588_s29 }
 0xef4   : > { %v2138_v62 = vmul.f32 %v5002_v56, %v4731_v55  ;;  %v2137_v14 = vmul.f32 %v5002_v56, %v4735_v58  ;;  %v2640_v58 = vmul.f32 0.044715, %v2634_v4  ;;  %v2470_v7 = vmul.f32 %v5006_v51, %v5002_v56 }
 0xef6   : > { %2143 = vrot.lane.b32.xlu1 %v2138_v62, %s5455_s8  ;;  %2141 = vrot.lane.b32.xlu0 %v2137_v14, %s5455_s8  ;;  %v2642_v24 = vmul.f32 %v2640_v58, %v2634_v4  ;;  %v2638_v62 = vmul.f32 0.5, %v2634_v4  ;;  %v2637_v14 = vmul.f32 0.5, %v2629_v5  ;;  %v2471_v58 = vmul.f32 %v5004_v59, %v5002_v56 }
 0xef7   : > { %v2960_v5 = vadd.f32 %v4725_v34, %v4973_v11 }
 0xef8   : > { %v2644_v16 = vmul.f32 %v2642_v24, %v2634_v4 }
 0xef9   : > { %v2970_v17 = vmul.f32 0.044715, %v2960_v5 }
 0xefa   : > { %2332 = vrot.lane.b32.xlu1 %v2327_v9, %s4110_s24  ;;  %2330 = vrot.lane.b32.xlu0 %v2326_v10, %s4110_s24  ;;  %v2646_v23 = vadd.f32 %v2644_v16, %v2634_v4  ;;  %v2965_v4 = vadd.f32 %v4963_v50, %v4725_v34 }
 0xefb   : > { %v2972_v11 = vmul.f32 %v2970_v17, %v2960_v5 }
 0xefc   : > { %v2648_v1 = vmul.f32 0.7978846, %v2646_v23  ;;  %v2971_v24 = vmul.f32 0.044715, %v2965_v4 }
 0xefe   : > { %2344 = vrot.lane.b32.xlu1 %v2339_v46, %s5425_s0  ;;  %2342 = vrot.lane.b32.xlu0 %v2338_v3, %s5425_s0  ;;  %4030 = vtanh.f32 %v2648_v1  ;;  %v2973_v34 = vmul.f32 %v2971_v24, %v2965_v4 }
 0xeff   : > { %4032 = vtanh.f32 %v2647_v35 }
 0xf00   : > { %v2975_v19 = vmul.f32 %v2973_v34, %v2965_v4  ;;  %v2097_v34 = vmul.f32 %v4992_v29, %v4731_v55 }
 0xf02   : > { %2356 = vrot.lane.b32.xlu1 %v2351_v63, %s5455_s8  ;;  %2354 = vrot.lane.b32.xlu0 %v2350_v18, %s5455_s8  ;;  %v2977_v25 = vadd.f32 %v2975_v19, %v2965_v4 }
 0xf04   : > { %v2979_v35 = vmul.f32 0.7978846, %v2977_v25 }
 0xf06   : > { %2372 = vrot.lane.b32.xlu1 %v2367_v53, %s4110_s24  ;;  %2370 = vrot.lane.b32.xlu0 %v2366_v20, %s4110_s24  ;;  %v2974_v53 = vmul.f32 %v2972_v11, %v2960_v5  ;;  %4034 = vtanh.f32 %v2979_v35  ;;  %v2127_v11 = vpop.permute.xlu0 %2126 }
 0xf0a   : > { %2384 = vrot.lane.b32.xlu1 %v2379_v49, %s5425_s0  ;;  %2382 = vrot.lane.b32.xlu0 %v2378_v27, %s5425_s0  ;;  %v2976_v49 = vadd.f32 %v2974_v53, %v2960_v5 }
 0xf0b   : > { %v4031_v38 = vpop.eup %4030 }
 0xf0c   : > { %v4033_v45 = vpop.eup %4032  ;;  %v2652_v33 = vadd.f32 1.0, %v4031_v38 }
 0xf0d   : > { %v2651_v47 = vadd.f32 1.0, %v4033_v45 }
 0xf0e   : > { %2396 = vrot.lane.b32.xlu1 %v2391_v36, %s5455_s8  ;;  %2394 = vrot.lane.b32.xlu0 %v2390_v6, %s5455_s8  ;;  %v5084_v9 = vmul.f32 %v2652_v33, %v2638_v62  ;;  %v2978_v36 = vmul.f32 0.7978846, %v2976_v49 }
 0xf0f   : > { %v5086_v10 = vmul.f32 %v2651_v47, %v2637_v14  ;;  %v2969_v14 = vmul.f32 0.5, %v2965_v4 }
 0xf10   : > { %v2658_v46 = vmul.f32 %v5084_v9, %v4733_v21  ;;  %v2670_v63 = vmul.f32 %v5084_v9, %v4745_v0  ;;  %v2682_v18 = vmul.f32 %v5084_v9, %v4759_v8  ;;  %v2698_v20 = vmul.f32 %v5084_v9, %v4785_v30 }
 0xf11   : > { %v2657_v3 = vmul.f32 %v5086_v10, %v4733_v21  ;;  %v2669_v50 = vmul.f32 %v5086_v10, %v4745_v0  ;;  %v2681_v16 = vmul.f32 %v5086_v10, %v4759_v8  ;;  %v2697_v23 = vmul.f32 %v5086_v10, %v4785_v30 }
 0xf12   : > { %2412 = vrot.lane.b32.xlu1 %v2407_v31, %s4110_s24  ;;  %2410 = vrot.lane.b32.xlu0 %v2406_v37, %s4110_s24  ;;  %v2710_v27 = vmul.f32 %v5084_v9, %v4794_v26  ;;  %v2709_v1 = vmul.f32 %v5086_v10, %v4794_v26  ;;  %v2722_v6 = vmul.f32 %v5084_v9, %v4811_v41  ;;  %4036 = vtanh.f32 %v2978_v36 }
 0xf13   : > { %v2721_v31 = vmul.f32 %v5086_v10, %v4811_v41  ;;  %v2738_v37 = vmul.f32 %v5084_v9, %v4826_v57  ;;  %v2761_v38 = vmul.f32 %v5086_v10, %v4855_v13  ;;  %v2777_v45 = vmul.f32 %v5086_v10, %v4893_v48 }
 0xf14   : > { %v2789_v62 = vmul.f32 %v5086_v10, %v4938_v60  ;;  %v2801_v24 = vmul.f32 %v5086_v10, %v5002_v56 }
 0xf16   : > { %2424 = vrot.lane.b32.xlu1 %v2419_v39, %s5425_s0  ;;  %2422 = vrot.lane.b32.xlu0 %v2418_v40, %s5425_s0  ;;  %v2737_v39 = vmul.f32 %v5086_v10, %v4826_v57  ;;  %v2750_v40 = vmul.f32 %v5084_v9, %v4835_v61 }
 0xf1a   : > { %2436 = vrot.lane.b32.xlu1 %v2431_v42, %s5455_s8  ;;  %2434 = vrot.lane.b32.xlu0 %v2430_v15, %s5455_s8  ;;  %v2749_v42 = vmul.f32 %v5086_v10, %v4835_v61  ;;  %v2762_v15 = vmul.f32 %v5084_v9, %v4855_v13 }
 0xf1e   : > { %2452 = vrot.lane.b32.xlu1 %v2447_v43, %s4110_s24  ;;  %2450 = vrot.lane.b32.xlu0 %v2446_v44, %s4110_s24  ;;  %v4035_v43 = vpop.eup %4034  ;;  %v2778_v44 = vmul.f32 %v5084_v9, %v4893_v48 }
 0xf1f   : > { %v4037_v33 = vpop.eup %4036  ;;  %v2983_v47 = vadd.f32 1.0, %v4035_v43 }
 0xf22   : > { %2464 = vrot.lane.b32.xlu1 %v2459_v52, %s5425_s0  ;;  %2462 = vrot.lane.b32.xlu0 %v2458_v54, %s5425_s0  ;;  %v2982_v52 = vadd.f32 1.0, %v4037_v33  ;;  %v2790_v54 = vmul.f32 %v5084_v9, %v4938_v60 }
 0xf26   : > { %2476 = vrot.lane.b32.xlu1 %v2471_v58, %s5455_s8  ;;  %2474 = vrot.lane.b32.xlu0 %v2470_v7, %s5455_s8  ;;  %v2968_v58 = vmul.f32 0.5, %v2960_v5  ;;  %v5164_v7 = vmul.f32 %v2983_v47, %v2969_v14  ;;  %v2365_v14 = vmul.f32 %v5004_v59, %v4803_v32 }
 0xf28   : > { %v2989_v4 = vmul.f32 %v5164_v7, %v4733_v21  ;;  %v3001_v17 = vmul.f32 %v5164_v7, %v4745_v0  ;;  %v3041_v55 = vmul.f32 %v5164_v7, %v4794_v26  ;;  %v3053_v49 = vmul.f32 %v5164_v7, %v4811_v41 }
 0xf29   : > { %v3069_v36 = vmul.f32 %v5164_v7, %v4826_v57 }
 0xf2a   : > { %2663 = vrot.lane.b32.xlu1 %v2658_v46, %s4110_s24  ;;  %2661 = vrot.lane.b32.xlu0 %v2657_v3, %s4110_s24  ;;  %v5166_v46 = vmul.f32 %v2982_v52, %v2968_v58  ;;  %v2802_v3 = vmul.f32 %v5084_v9, %v5002_v56  ;;  %v3093_v52 = vmul.f32 %v5164_v7, %v4855_v13 }
 0xf2b   : > { %v2364_v58 = vmul.f32 %v5006_v51, %v4803_v32 }
 0xf2c   : > { %v2988_v5 = vmul.f32 %v5166_v46, %v4733_v21  ;;  %v3012_v21 = vmul.f32 %v5166_v46, %v4759_v8 }
 0xf2e   : > { %2675 = vrot.lane.b32.xlu1 %v2670_v63, %s5425_s0  ;;  %2673 = vrot.lane.b32.xlu0 %v2669_v50, %s5425_s0  ;;  %v3000_v63 = vmul.f32 %v5166_v46, %v4745_v0  ;;  %v3013_v50 = vmul.f32 %v5164_v7, %v4759_v8  ;;  %v3029_v0 = vmul.f32 %v5164_v7, %v4785_v30 }
 0xf32   : > { %2687 = vrot.lane.b32.xlu1 %v2682_v18, %s5455_s8  ;;  %2685 = vrot.lane.b32.xlu0 %v2681_v16, %s5455_s8  ;;  %v3028_v18 = vmul.f32 %v5166_v46, %v4785_v30  ;;  %v2114_v16 = vadd.f32 %v4994_v22, %v2097_v34 }
 0xf34   : > { %v2131_v8 = vadd.f32 %v2127_v11, %v2114_v16 }
 0xf36   : > { %2703 = vrot.lane.b32.xlu1 %v2698_v20, %s4110_s24  ;;  %2701 = vrot.lane.b32.xlu0 %v2697_v23, %s4110_s24  ;;  %v3040_v20 = vmul.f32 %v5166_v46, %v4794_v26  ;;  %v2325_v26 = vmul.f32 %v5004_v59, %v4769_v12 }
 0xf3a   : > { %2715 = vrot.lane.b32.xlu1 %v2710_v27, %s5425_s0  ;;  %2713 = vrot.lane.b32.xlu0 %v2709_v1, %s5425_s0  ;;  %v3052_v27 = vmul.f32 %v5166_v46, %v4811_v41 }
 0xf3e   : > { %2727 = vrot.lane.b32.xlu1 %v2722_v6, %s5455_s8  ;;  %2725 = vrot.lane.b32.xlu0 %v2721_v31, %s5455_s8  ;;  %v3068_v6 = vmul.f32 %v5166_v46, %v4826_v57 }
 0xf42   : > { %2743 = vrot.lane.b32.xlu1 %v2738_v37, %s4110_s24  ;;  %2741 = vrot.lane.b32.xlu0 %v2737_v39, %s4110_s24 }
 0xf46   : > { %2755 = vrot.lane.b32.xlu1 %v2750_v40, %s5425_s0  ;;  %2753 = vrot.lane.b32.xlu0 %v2749_v42, %s5425_s0 }
 0xf4a   : > { %2767 = vrot.lane.b32.xlu1 %v2762_v15, %s5455_s8  ;;  %2765 = vrot.lane.b32.xlu0 %v2761_v38, %s5455_s8  ;;  %v3081_v15 = vmul.f32 %v5164_v7, %v4835_v61  ;;  %v3080_v38 = vmul.f32 %v5166_v46, %v4835_v61 }
 0xf4e   : > { %2783 = vrot.lane.b32.xlu1 %v2778_v44, %s4110_s24  ;;  %2781 = vrot.lane.b32.xlu0 %v2777_v45, %s4110_s24  ;;  %v3386_v44 = vpop.f32.mrf.mxu0  ;;  %v3316_v45 = vld [vmem:[%s5412_s19] sm:$0x1] }
 0xf50   : > { %v3905_v33 = vpop.f32.mrf.mxu0 }
 0xf52   : > { %2795 = vrot.lane.b32.xlu1 %v2790_v54, %s5425_s0  ;;  %2793 = vrot.lane.b32.xlu0 %v2789_v62, %s5425_s0  ;;  %v3092_v54 = vmul.f32 %v5166_v46, %v4855_v13  ;;  %v3387_v62 = vadd.f32 %v3386_v44, %v3316_v45  ;;  %v3108_v13 = vmul.f32 %v5166_v46, %v4893_v48 }
 0xf54   : > { %3391 = vst.msk [vmem:[%s669_s2] sm:$0x1] %vm3390_vm5, %v3387_v62 }
 0xf56   : > { %2807 = vrot.lane.b32.xlu1 %v2802_v3, %s5455_s8  ;;  %2805 = vrot.lane.b32.xlu0 %v2801_v24, %s5455_s8 }
 0xf5a   : > { %2994 = vrot.lane.b32.xlu1 %v2989_v4, %s4110_s24  ;;  %2992 = vrot.lane.b32.xlu0 %v2988_v5, %s4110_s24  ;;  %v3109_v4 = vmul.f32 %v5164_v7, %v4893_v48 }
 0xf5e   : > { %3006 = vrot.lane.b32.xlu1 %v3001_v17, %s5425_s0  ;;  %3004 = vrot.lane.b32.xlu0 %v3000_v63, %s5425_s0 }
 0xf62   : > { %3018 = vrot.lane.b32.xlu1 %v3013_v50, %s5455_s8  ;;  %3016 = vrot.lane.b32.xlu0 %v3012_v21, %s5455_s8 }
 0xf66   : > { %3034 = vrot.lane.b32.xlu1 %v3029_v0, %s4110_s24  ;;  %3032 = vrot.lane.b32.xlu0 %v3028_v18, %s4110_s24 }
 0xf68   : > { %v2144_v19 = vpop.permute.xlu1 %2143  ;;  %v2142_v53 = vpop.permute.xlu0 %2141 }
 0xf69   : > { %v2148_v23 = vadd.f32 %v2144_v19, %v2131_v8  ;;  %v2147_v25 = vadd.f32 %v2142_v53, %v4998_v28  ;;  %v2324_v28 = vmul.f32 %v5006_v51, %v4769_v12 }
 0xf6a   : > { %3046 = vrot.lane.b32.xlu1 %v3041_v55, %s5425_s0  ;;  %3044 = vrot.lane.b32.xlu0 %v3040_v20, %s5425_s0 }
 0xf6b   : > { %2150 = vst.msk [vmem:[%s4779_s1 + $0xc8] sm:$0xff] %vm1971_vm3, %v2148_v23  ;;  %2149 = vst.msk [vmem:[%s4779_s1 + $0xc0] sm:$0xff] %vm1971_vm3, %v2147_v25 }
 0xf6c   : > { %v2333_v30 = vpop.permute.xlu1 %2332  ;;  %v2331_v22 = vpop.permute.xlu0 %2330 }
 0xf6d   : > { %v2337_v31 = vadd.f32 %v2333_v30, %v2325_v26  ;;  %v2336_v41 = vadd.f32 %v2331_v22, %v2324_v28 }
 0xf6e   : > { %3058 = vrot.lane.b32.xlu1 %v3053_v49, %s5455_s8  ;;  %3056 = vrot.lane.b32.xlu0 %v3052_v27, %s5455_s8 }
 0xf70   : > { %v2345_v1 = vpop.permute.xlu1 %2344  ;;  %v2343_v35 = vpop.permute.xlu0 %2342 }
 0xf71   : > { %v2349_v37 = vadd.f32 %v2345_v1, %v2337_v31  ;;  %v2348_v39 = vadd.f32 %v2343_v35, %v2336_v41 }
 0xf72   : > { %3074 = vrot.lane.b32.xlu1 %v3069_v36, %s4110_s24  ;;  %3072 = vrot.lane.b32.xlu0 %v3068_v6, %s4110_s24 }
 0xf74   : > { %v2357_v40 = vpop.permute.xlu1 %2356  ;;  %v2355_v42 = vpop.permute.xlu0 %2354 }
 0xf75   : > { %v2361_v43 = vadd.f32 %v2357_v40, %v2349_v37  ;;  %v2360_v57 = vadd.f32 %v2355_v42, %v2348_v39 }
 0xf76   : > { %3086 = vrot.lane.b32.xlu1 %v3081_v15, %s5425_s0  ;;  %3084 = vrot.lane.b32.xlu0 %v3080_v38, %s5425_s0  ;;  %s4114_s0 = smov [#allocation2]  }
 0xf77   : > { %2363 = vst.msk [vmem:[%s4779_s1 + $0x18] sm:$0xff] %vm1971_vm3, %v2361_v43  ;;  %2362 = vst.msk [vmem:[%s4779_s1 + $0x10] sm:$0xff] %vm1971_vm3, %v2360_v57  ;;  %s4043_s6 = sshll.u32 %s4114_s0, 4  ;;  %s4044_s6 = int_to_ptr.vmem [resolvable:$false] %s4043_s6 }
 0xf78   : > { %v2373_v47 = vpop.permute.xlu1 %2372  ;;  %v2371_v61 = vpop.permute.xlu0 %2370  ;;  %s4045_s4 = scalar_lea.vmem %s4044_s6, 32  ;;  %p4046_p0 = scmp.lt.s32.totalorder %s3414_s23, %s4044_s6 }
 0xf79   : > { %v2377_v5 = vadd.f32 %v2373_v47, %v2365_v14  ;;  %v2376_v17 = vadd.f32 %v2371_v61, %v2364_v58  ;;  %p4047_p1 = scmp.lt.s32.totalorder %s4045_s4, %s4039_s30 }
 0xf7a   : > { %3098 = vrot.lane.b32.xlu1 %v3093_v52, %s5455_s8  ;;  %3096 = vrot.lane.b32.xlu0 %v3092_v54, %s5455_s8 }
 0xf7b   : > { %p4048_p2 = por %p4047_p1, %p4046_p0 }
 0xf7c   : > { %v2385_v3 = vpop.permute.xlu1 %2384  ;;  %v2383_v24 = vpop.permute.xlu0 %2382 }
 0xf7d   : > { %v2389_v63 = vadd.f32 %v2385_v3, %v2377_v5  ;;  %v2388_v50 = vadd.f32 %v2383_v24, %v2376_v17  ;;  %p4049_p3 = pnand %p4048_p2, %p4042_p13 }
 0xf7e   : > { %3114 = vrot.lane.b32.xlu1 %v3109_v4, %s4110_s24  ;;  %3112 = vrot.lane.b32.xlu0 %v3108_v13, %s4110_s24 }
 0xf7f   : > { %4052 = shalt.err (!%p4049_p3)
}
 0xf80   : > { %s4053_s24 = scalar_lea.hbm %s5260_s22, 16  ;;  %s4057_s0 = scalar_lea.hbm %s5457_s9, 32 }
 0xf81   : > { %p4054_p4 = scmp.ne.s32.totalorder %s5260_s22, %s4053_s24  ;;  %p4058_p9 = scmp.lt.s32.totalorder %s5260_s22, %s5457_s9 }
 0xf82   : > { %p4059_p10 = scmp.lt.s32.totalorder %s4057_s0, %s4053_s24 }
 0xf83   : > { %p4055_p7 = pnand %p4054_p4, %p4263_p5 }
 0xf84   : > { %p4060_p11 = por %p4059_p10, %p4058_p9 }
 0xf85   : > { %p4056_p8 = pneg %p4055_p7 }
 0xf87   : > { %p4061_p12 = pnand %p4060_p11, %p4056_p8 }
 0xf89   : > { %4064 = shalt.err (!%p4061_p12)
}
 0xf8a   : > { %3938 = dma.vmem_to_hbm [thread:$0]  (%p4263_p5), %s3414_s23, 16, %s5260_s22, %s3398_s3   ;;  %v2397_v48 = vpop.permute.xlu1 %2396  ;;  %v2395_v21 = vpop.permute.xlu0 %2394  ;;  %v3121_v34 = vmul.f32 %v5164_v7, %v4938_v60  ;;  %v3120_v11 = vmul.f32 %v5166_v46, %v4938_v60  ;;  %v3133_v19 = vmul.f32 %v5164_v7, %v5002_v56  ;;  %v3132_v53 = vmul.f32 %v5166_v46, %v5002_v56 }
 0xf8b   : > { %v2401_v0 = vadd.f32 %v2397_v48, %v2389_v63  ;;  %v2400_v18 = vadd.f32 %v2395_v21, %v2388_v50  ;;  %s5458_s6 = smov 120   ;;  %v2405_v60 = vmul.f32 %v5004_v59, %v4844_v2  ;;  %v2404_v55 = vmul.f32 %v5006_v51, %v4844_v2 }
 0xf8c   : > { %3126 = vrot.lane.b32.xlu1 %v3121_v34, %s5458_s6  ;;  %3124 = vrot.lane.b32.xlu0 %v3120_v11, %s5458_s6  ;;  %v2445_v36 = vmul.f32 %v5004_v59, %v4992_v29  ;;  %v2444_v6 = vmul.f32 %v5006_v51, %v4992_v29  ;;  %v2656_v51 = vmul.f32 %v5084_v9, %v4769_v12 }
 0xf8d   : > { %2403 = vst.msk [vmem:[%s4779_s1 + $0x58] sm:$0xff] %vm1971_vm3, %v2401_v0  ;;  %2402 = vst.msk [vmem:[%s4779_s1 + $0x50] sm:$0xff] %vm1971_vm3, %v2400_v18  ;;  %v2655_v45 = vmul.f32 %v5086_v10, %v4769_v12  ;;  %v2696_v5 = vmul.f32 %v5084_v9, %v4803_v32  ;;  %v2695_v17 = vmul.f32 %v5086_v10, %v4803_v32 }
 0xf8e   : > { %v2413_v16 = vpop.permute.xlu1 %2412  ;;  %v2411_v8 = vpop.permute.xlu0 %2410 }
 0xf8f   : > { %v2417_v25 = vadd.f32 %v2413_v16, %v2405_v60  ;;  %v2416_v30 = vadd.f32 %v2411_v8, %v2404_v55  ;;  %v2736_v60 = vmul.f32 %v5084_v9, %v4844_v2  ;;  %v2735_v55 = vmul.f32 %v5086_v10, %v4844_v2 }
 0xf90   : > { %3138 = vrot.lane.b32.xlu1 %v3133_v19, %s5455_s8  ;;  %3136 = vrot.lane.b32.xlu0 %v3132_v53, %s5455_s8 }
 0xf92   : > { %v2425_v20 = vpop.permute.xlu1 %2424  ;;  %v2423_v23 = vpop.permute.xlu0 %2422 }
 0xf93   : > { %v2429_v22 = vadd.f32 %v2425_v20, %v2417_v25  ;;  %v2428_v49 = vadd.f32 %v2423_v23, %v2416_v30 }
 0xf96   : > { %v2437_v27 = vpop.permute.xlu1 %2436  ;;  %v2435_v26 = vpop.permute.xlu0 %2434 }
 0xf97   : > { %v2441_v56 = vadd.f32 %v2437_v27, %v2429_v22  ;;  %v2440_v28 = vadd.f32 %v2435_v26, %v2428_v49 }
 0xf99   : > { %2443 = vst.msk [vmem:[%s4779_s1 + $0x98] sm:$0xff] %vm1971_vm3, %v2441_v56  ;;  %2442 = vst.msk [vmem:[%s4779_s1 + $0x90] sm:$0xff] %vm1971_vm3, %v2440_v28 }
 0xf9a   : > { %v2453_v1 = vpop.permute.xlu1 %2452  ;;  %v2451_v35 = vpop.permute.xlu0 %2450 }
 0xf9b   : > { %v2457_v37 = vadd.f32 %v2453_v1, %v2445_v36  ;;  %v2456_v39 = vadd.f32 %v2451_v35, %v2444_v6  ;;  %v2776_v36 = vmul.f32 %v5084_v9, %v4992_v29  ;;  %v2775_v6 = vmul.f32 %v5086_v10, %v4992_v29 }
 0xf9c   : > { %v2987_v10 = vmul.f32 %v5164_v7, %v4769_v12 }
 0xf9e   : > { %v2465_v31 = vpop.permute.xlu1 %2464  ;;  %v2463_v41 = vpop.permute.xlu0 %2462 }
 0xf9f   : > { %v2469_v40 = vadd.f32 %v2465_v31, %v2457_v37  ;;  %v2468_v42 = vadd.f32 %v2463_v41, %v2456_v39 }
 0xfa2   : > { %v2477_v15 = vpop.permute.xlu1 %2476  ;;  %v2475_v38 = vpop.permute.xlu0 %2474 }
 0xfa3   : > { %v2481_v43 = vadd.f32 %v2477_v15, %v2469_v40  ;;  %v2480_v57 = vadd.f32 %v2475_v38, %v2468_v42 }
 0xfa5   : > { %2483 = vst.msk [vmem:[%s4779_s1 + $0xd8] sm:$0xff] %vm1971_vm3, %v2481_v43  ;;  %2482 = vst.msk [vmem:[%s4779_s1 + $0xd0] sm:$0xff] %vm1971_vm3, %v2480_v57 }
 0xfa6   : > { %v2664_v59 = vpop.permute.xlu1 %2663  ;;  %v2662_v44 = vpop.permute.xlu0 %2661 }
 0xfa7   : > { %v2668_v61 = vadd.f32 %v2664_v59, %v2656_v51  ;;  %v2667_v52 = vadd.f32 %v2662_v44, %v2655_v45  ;;  %v2986_v44 = vmul.f32 %v5166_v46, %v4769_v12  ;;  %v3027_v12 = vmul.f32 %v5164_v7, %v4803_v32 }
 0xfaa   : > { %v2676_v33 = vpop.permute.xlu1 %2675  ;;  %v2674_v47 = vpop.permute.xlu0 %2673 }
 0xfab   : > { %v2680_v54 = vadd.f32 %v2676_v33, %v2668_v61  ;;  %v2679_v62 = vadd.f32 %v2674_v47, %v2667_v52 }
 0xfae   : > { %v2688_v14 = vpop.permute.xlu1 %2687  ;;  %v2686_v58 = vpop.permute.xlu0 %2685 }
 0xfaf   : > { %v2692_v3 = vadd.f32 %v2688_v14, %v2680_v54  ;;  %v2691_v24 = vadd.f32 %v2686_v58, %v2679_v62 }
 0xfb1   : > { %2694 = vst.msk [vmem:[%s4779_s1 + $0x28] sm:$0xff] %vm1971_vm3, %v2692_v3  ;;  %2693 = vst.msk [vmem:[%s4779_s1 + $0x20] sm:$0xff] %vm1971_vm3, %v2691_v24 }
 0xfb2   : > { %v2704_v4 = vpop.permute.xlu1 %2703  ;;  %v2702_v13 = vpop.permute.xlu0 %2701 }
 0xfb3   : > { %v2708_v48 = vadd.f32 %v2704_v4, %v2696_v5  ;;  %v2707_v21 = vadd.f32 %v2702_v13, %v2695_v17  ;;  %v3026_v4 = vmul.f32 %v5166_v46, %v4803_v32  ;;  %v3067_v32 = vmul.f32 %v5164_v7, %v4844_v2 }
 0xfb6   : > { %v2716_v63 = vpop.permute.xlu1 %2715  ;;  %v2714_v50 = vpop.permute.xlu0 %2713 }
 0xfb7   : > { %v2720_v34 = vadd.f32 %v2716_v63, %v2708_v48  ;;  %v2719_v11 = vadd.f32 %v2714_v50, %v2707_v21 }
 0xfba   : > { %v2728_v0 = vpop.permute.xlu1 %2727  ;;  %v2726_v18 = vpop.permute.xlu0 %2725 }
 0xfbb   : > { %v2732_v16 = vadd.f32 %v2728_v0, %v2720_v34  ;;  %v2731_v8 = vadd.f32 %v2726_v18, %v2719_v11 }
 0xfbd   : > { %2734 = vst.msk [vmem:[%s4779_s1 + $0x68] sm:$0xff] %vm1971_vm3, %v2732_v16  ;;  %2733 = vst.msk [vmem:[%s4779_s1 + $0x60] sm:$0xff] %vm1971_vm3, %v2731_v8  ;;  %v3066_v8 = vmul.f32 %v5166_v46, %v4844_v2  ;;  %v3107_v2 = vmul.f32 %v5164_v7, %v4992_v29 }
 0xfbe   : > { %v2744_v19 = vpop.permute.xlu1 %2743  ;;  %v2742_v53 = vpop.permute.xlu0 %2741 }
 0xfbf   : > { %v2748_v25 = vadd.f32 %v2744_v19, %v2736_v60  ;;  %v2747_v30 = vadd.f32 %v2742_v53, %v2735_v55 }
 0xfc2   : > { %v2756_v20 = vpop.permute.xlu1 %2755  ;;  %v2754_v23 = vpop.permute.xlu0 %2753 }
 0xfc3   : > { %v2760_v22 = vadd.f32 %v2756_v20, %v2748_v25  ;;  %v2759_v49 = vadd.f32 %v2754_v23, %v2747_v30 }
 0xfc6   : > { %v2768_v27 = vpop.permute.xlu1 %2767  ;;  %v2766_v26 = vpop.permute.xlu0 %2765 }
 0xfc7   : > { %v2772_v56 = vadd.f32 %v2768_v27, %v2760_v22  ;;  %v2771_v28 = vadd.f32 %v2766_v26, %v2759_v49 }
 0xfc9   : > { %2774 = vst.msk [vmem:[%s4779_s1 + $0xa8] sm:$0xff] %vm1971_vm3, %v2772_v56  ;;  %2773 = vst.msk [vmem:[%s4779_s1 + $0xa0] sm:$0xff] %vm1971_vm3, %v2771_v28  ;;  %v3106_v56 = vmul.f32 %v5166_v46, %v4992_v29 }
 0xfca   : > { %v2784_v1 = vpop.permute.xlu1 %2783  ;;  %v2782_v35 = vpop.permute.xlu0 %2781 }
 0xfcb   : > { %v2788_v37 = vadd.f32 %v2784_v1, %v2776_v36  ;;  %v2787_v39 = vadd.f32 %v2782_v35, %v2775_v6 }
 0xfce   : > { %v2796_v31 = vpop.permute.xlu1 %2795  ;;  %v2794_v41 = vpop.permute.xlu0 %2793 }
 0xfcf   : > { %v2800_v40 = vadd.f32 %v2796_v31, %v2788_v37  ;;  %v2799_v42 = vadd.f32 %v2794_v41, %v2787_v39 }
 0xfd2   : > { %v2808_v15 = vpop.permute.xlu1 %2807  ;;  %v2806_v38 = vpop.permute.xlu0 %2805 }
 0xfd3   : > { %v2812_v43 = vadd.f32 %v2808_v15, %v2800_v40  ;;  %v2811_v57 = vadd.f32 %v2806_v38, %v2799_v42 }
 0xfd5   : > { %2814 = vst.msk [vmem:[%s4779_s1 + $0xe8] sm:$0xff] %vm1971_vm3, %v2812_v43  ;;  %2813 = vst.msk [vmem:[%s4779_s1 + $0xe0] sm:$0xff] %vm1971_vm3, %v2811_v57 }
 0xfd6   : > { %v2995_v9 = vpop.permute.xlu1 %2994  ;;  %v2993_v59 = vpop.permute.xlu0 %2992 }
 0xfd7   : > { %v2999_v33 = vadd.f32 %v2995_v9, %v2987_v10  ;;  %v2998_v47 = vadd.f32 %v2993_v59, %v2986_v44 }
 0xfda   : > { %v3007_v51 = vpop.permute.xlu1 %3006  ;;  %v3005_v45 = vpop.permute.xlu0 %3004 }
 0xfdb   : > { %v3011_v61 = vadd.f32 %v3007_v51, %v2999_v33  ;;  %v3010_v52 = vadd.f32 %v3005_v45, %v2998_v47 }
 0xfde   : > { %v3019_v54 = vpop.permute.xlu1 %3018  ;;  %v3017_v62 = vpop.permute.xlu0 %3016 }
 0xfdf   : > { %v3023_v14 = vadd.f32 %v3019_v54, %v3011_v61  ;;  %v3022_v58 = vadd.f32 %v3017_v62, %v3010_v52 }
 0xfe1   : > { %3025 = vst.msk [vmem:[%s4779_s1 + $0x38] sm:$0xff] %vm1971_vm3, %v3023_v14  ;;  %3024 = vst.msk [vmem:[%s4779_s1 + $0x30] sm:$0xff] %vm1971_vm3, %v3022_v58 }
 0xfe2   : > { %v3035_v3 = vpop.permute.xlu1 %3034  ;;  %v3033_v24 = vpop.permute.xlu0 %3032 }
 0xfe3   : > { %v3039_v17 = vadd.f32 %v3035_v3, %v3027_v12  ;;  %v3038_v63 = vadd.f32 %v3033_v24, %v3026_v4 }
 0xfe6   : > { %v3047_v13 = vpop.permute.xlu1 %3046  ;;  %v3045_v5 = vpop.permute.xlu0 %3044 }
 0xfe7   : > { %v3051_v50 = vadd.f32 %v3047_v13, %v3039_v17  ;;  %v3050_v48 = vadd.f32 %v3045_v5, %v3038_v63 }
 0xfea   : > { %v3059_v21 = vpop.permute.xlu1 %3058  ;;  %v3057_v34 = vpop.permute.xlu0 %3056 }
 0xfeb   : > { %v3063_v11 = vadd.f32 %v3059_v21, %v3051_v50  ;;  %v3062_v0 = vadd.f32 %v3057_v34, %v3050_v48 }
 0xfed   : > { %3065 = vst.msk [vmem:[%s4779_s1 + $0x78] sm:$0xff] %vm1971_vm3, %v3063_v11  ;;  %3064 = vst.msk [vmem:[%s4779_s1 + $0x70] sm:$0xff] %vm1971_vm3, %v3062_v0 }
 0xfee   : > { %v3075_v18 = vpop.permute.xlu1 %3074  ;;  %v3073_v16 = vpop.permute.xlu0 %3072 }
 0xfef   : > { %v3079_v60 = vadd.f32 %v3075_v18, %v3067_v32  ;;  %v3078_v55 = vadd.f32 %v3073_v16, %v3066_v8 }
 0xff2   : > { %v3087_v19 = vpop.permute.xlu1 %3086  ;;  %v3085_v53 = vpop.permute.xlu0 %3084 }
 0xff3   : > { %v3091_v20 = vadd.f32 %v3087_v19, %v3079_v60  ;;  %v3090_v23 = vadd.f32 %v3085_v53, %v3078_v55 }
 0xff6   : > { %v3099_v25 = vpop.permute.xlu1 %3098  ;;  %v3097_v30 = vpop.permute.xlu0 %3096 }
 0xff7   : > { %v3103_v22 = vadd.f32 %v3099_v25, %v3091_v20  ;;  %v3102_v49 = vadd.f32 %v3097_v30, %v3090_v23 }
 0xff9   : > { %3105 = vst.msk [vmem:[%s4779_s1 + $0xb8] sm:$0xff] %vm1971_vm3, %v3103_v22  ;;  %3104 = vst.msk [vmem:[%s4779_s1 + $0xb0] sm:$0xff] %vm1971_vm3, %v3102_v49 }
 0xffa   : > { %v3115_v27 = vpop.permute.xlu1 %3114  ;;  %v3113_v26 = vpop.permute.xlu0 %3112 }
 0xffb   : > { %v3119_v35 = vadd.f32 %v3115_v27, %v3107_v2  ;;  %v3118_v36 = vadd.f32 %v3113_v26, %v3106_v56 }
 0xffe   : > { %v3127_v28 = vpop.permute.xlu1 %3126  ;;  %v3125_v1 = vpop.permute.xlu0 %3124 }
 0xfff   : > { %v3131_v6 = vadd.f32 %v3127_v28, %v3119_v35  ;;  %v3130_v31 = vadd.f32 %v3125_v1, %v3118_v36 }
0x1002   : > { %v3139_v41 = vpop.permute.xlu1 %3138  ;;  %v3137_v37 = vpop.permute.xlu0 %3136 }
0x1003   : > { %v3143_v39 = vadd.f32 %v3139_v41, %v3131_v6  ;;  %v3142_v40 = vadd.f32 %v3137_v37, %v3130_v31 }
0x1005   : > { %3145 = vst.msk [vmem:[%s4779_s1 + $0xf8] sm:$0xff] %vm1971_vm3, %v3143_v39  ;;  %3144 = vst.msk [vmem:[%s4779_s1 + $0xf0] sm:$0xff] %vm1971_vm3, %v3142_v40 }
0x1006 PF: > { %s5459_s5 = sld [smem:[#allocation7_spill]] }
0x1007   : > { %s5460_s8 = sld [smem:[#allocation5_spill]] }
0x100c   : > { %p3944_p5 = scmp.ge.s32.totalorder %s5459_s5, 2 }
0x100d   : > { %s3433_s22 = sand.u32 1, %s5460_s8  }
0x100e   : > { %p3941_p13 = pnand %p3944_p5, %p4267_p6  ;;  %s3434_s23 = scalar_lea.sflag [#allocation3], %s3433_s22 }
0x1010   : > { %p3942_p0 = pneg %p3941_p13 }
0x1012   : > { %4082 = dma.done.wait (%p3942_p0), %s3434_s23, 16  }
0x1013   : > { %4084 = vsyncadd (%p3942_p0), %s3434_s23, 4294967280  ;;  %s5462_s27 = sld [smem:[#allocation8_spill]]  ;;  %s5465_s2 = smov %s4091_s25 }
0x1014   : > { %s5463_s3 = sld [smem:[#allocation6_spill]] }
0x1015   : > { %s5464_s26 = sld [smem:[#allocation9_spill]] }
0x1019   : > { %p32_p1 = scmp.ge.s32.totalorder %s5462_s27, 4  }
0x101a   : > { %s5466_s25 = smov %s5463_s3 }
0x101b   :  { %34 = sbr.rel (!%p32_p1) target bundleno = 14 (0xe), region = 168 }
0x1020   :  { %3438 = vsyncpa [#allocation3], 1 }
0x1021   :  { %3440 = vsyncpa [#allocation3 + $0x1], 1 }

// kernel: sam_with_bbox_forward.4
= control target key start
LH: loop header
LB: loop body
LE: loop exit
PB: predicated region body
PF: predicated region fallthrough
CT: control target
= control target key end

     0   :  { %s4898_s18 = smov 0   ;;  %s5526_s0 = inlined_call_operand.vmem [shape: f32[2,16,32], index: 0, kind: input, shape index: {}]   ;;  %s5527_s1 = inlined_call_operand.vmem [shape: f32[2,7,32], index: 1, kind: input, shape index: {}]   ;;  %s5528_s2 = inlined_call_operand.vmem [shape: f32[16,32], index: 2, kind: input, shape index: {}]   ;;  %s5529_s3 = inlined_call_operand.vmem [shape: f32[1,32], index: 3, kind: input, shape index: {}]   ;;  %s5530_s4 = inlined_call_operand.vmem [shape: f32[4,32,96], index: 4, kind: input, shape index: {}]   ;;  %s5531_s5 = inlined_call_operand.vmem [shape: f32[4,1,96], index: 5, kind: input, shape index: {}]   ;;  %s5532_s6 = inlined_call_operand.vmem [shape: f32[4,32,32], index: 6, kind: input, shape index: {}]   ;;  %s5533_s7 = inlined_call_operand.vmem [shape: f32[4,1,32], index: 7, kind: input, shape index: {}]   ;;  %s5534_s8 = inlined_call_operand.vmem [shape: f32[5,1,32], index: 8, kind: input, shape index: {}]   ;;  %s5535_s9 = inlined_call_operand.vmem [shape: f32[5,1,32], index: 9, kind: input, shape index: {}]   ;;  %s5536_s10 = inlined_call_operand.vmem [shape: f32[32,64], index: 10, kind: input, shape index: {}]   ;;  %s5537_s11 = inlined_call_operand.vmem [shape: f32[1,64], index: 11, kind: input, shape index: {}]   ;;  %s5538_s12 = inlined_call_operand.vmem [shape: f32[64,32], index: 12, kind: input, shape index: {}]   ;;  %s5539_s13 = inlined_call_operand.vmem [shape: f32[1,32], index: 13, kind: input, shape index: {}]   ;;  %s5540_s14 = inlined_call_operand.vmem [shape: f32[2,7,32], index: 14, kind: output, shape index: {0}]   ;;  %s5541_s15 = inlined_call_operand.vmem [shape: f32[2,16,32], index: 15, kind: output, shape index: {1}]  }
   0x1 LB: > { %s4138_s19 = sadd.s32 4294967295, %s4811_s18   ;;  %p4142_p0 = scmp.ge.s32.totalorder %s4811_s18, 1  ;;  %s4811_s18 = sphi %s4898_s18, %s26_s18  }
   0x2   : > { %p449_p1 = scmp.lt.s32.totalorder %s4811_s18, 3 }
   0x4   : > { %p450_p2 = pnand %p4142_p0, %p449_p1 }
   0x5   : > { %s4813_s24 = smov (!%p450_p2), 96   ;;  %p505_p3 = scmp.lt.s32.totalorder (!%p450_p2), %s4138_s19, 1 }
   0x6   : > { %453 = sbr.rel (%p450_p2) target bundleno = 6940 (0x1b1c), region = 76  ;;  %s4816_s22 = smov (!%p450_p2), 64  }
   0x7   : > { %s4817_s23 = smov (!%p450_p2), 112  }
   0xb   : > { %v540_v0 = vld [vmem:[%s5530_s4 + $0x18] sm:$0xff]  ;;  %v538_v1 = vld [vmem:[%s5530_s4 + $0x8] sm:$0xff]  ;;  %v539_v2 = vld [vmem:[%s5530_s4 + $0x10] sm:$0xff]  ;;  %v4814_v4 = vmov 0.0   ;;  %vm4815_vm0 = vmmov 0   ;;  %s5543_s19 = smov (!%p505_p3, %s4138_s19), 1 }
   0xc   : > { %637 = vrot.lane.b32.xlu0 %v540_v0, %s4813_s24  ;;  %633 = vrot.lane.b32.xlu1 %v538_v1, %s4813_s24  ;;  %v537_v3 = vld [vmem:[%s5530_s4] sm:$0xff]  ;;  %s4145_s29 = sshll.u32 %s5543_s19, 3  ;;  %vm553_vm1 = vcmask 261120   ;;  %vm801_vm2 = vcmask 130048   ;;  %vm879_vm3 = vcmask 55296   ;;  %vm895_vm4 = vcmask 1046528  }
   0xd   : > { %4437 = vmatprep.subr.mxu1 %v4814_v4  ;;  %4426 = vmatprep.subr.mxu0 %v4814_v4  ;;  %s513_s17 = scalar_lea.vmem %s5527_s1, %s4145_s29  ;;  %v4940_v5 = vld [vmem:[%s5531_s5] ss:$0 sm:$0xff]  ;;  %vm891_vm5 = vcmask 56320   ;;  %v545_v49 = vld [vmem:[%s5532_s6 + $0x18] sm:$0xff]  ;;  %v543_v54 = vld [vmem:[%s5532_s6 + $0x8] sm:$0xff]  ;;  %vm1291_vm6 = vcmask 260096  }
   0xe   : > { %4427 = vmatpush3.msra.mxu0 %v540_v0  ;;  %4445 = vmatprep.mubr.msk.f32.mxu1 %vm4815_vm0, %v4814_v4  ;;  %v4943_v6 = vld [vmem:[%s513_s17] sm:$0x7f]  ;;  %v544_v56 = vld [vmem:[%s5532_s6 + $0x10] sm:$0xff]  ;;  %s4275_s25 = sshll.u32 %s5543_s19, 4  ;;  %vm1692_vm7 = vcmask 129024   ;;  %vm2237_vm8 = vcmask 523264  }
   0xf   : > { %4428 = vmatprep.subr.mxu0 %v4814_v4  ;;  %4434 = vmatprep.mubr.msk.f32.mxu0 %vm4815_vm0, %v4814_v4  ;;  %v542_v55 = vld [vmem:[%s5532_s6] sm:$0xff]  ;;  %s509_s28 = scalar_lea.vmem %s5526_s0, %s4275_s25  ;;  %s522_s26 = scalar_lea.vmem %s5541_s15, %s4275_s25 }
  0x10   : > { %635 = vrot.lane.b32.xlu0 %v539_v2, %s4813_s24  ;;  %631 = vrot.lane.b32.xlu1 %v537_v3, %s4813_s24 }
  0x11   : > { %4429 = vmatpush3.msra.mxu0 %v539_v2 }
  0x12   : > { %4430 = vmatprep.subr.mxu0 %v4814_v4 }
  0x13   : > { %4431 = vmatpush3.msra.mxu0 %v538_v1 }
  0x14   : > { %4432 = vmatprep.subr.mxu0 %v4814_v4  ;;  %643 = vrot.lane.b32.xlu0 %v4940_v5, %s4813_s24 }
  0x15   : > { %4433 = vmatpush3.msra.mxu0 %v537_v3  ;;  %722 = vrot.lane.b32.xlu1 %v540_v0, %s4816_s22  ;;  %v4164_v0 = vld [vmem:[%s5533_s7] ss:$0 sm:$0xff] }
  0x16   : > { %4435 = vmatmul.mubr.msk.f32.vlgmr.msra.gmra.mxu0 %vm553_vm1, %v4943_v6  ;;  %4448 = vmatprep.subr.mxu0 %v4814_v4 }
  0x17   : > { %4456 = vmatprep.mubr.msk.f32.mxu0 %vm4815_vm0, %v4814_v4 }
  0x18   : > { %720 = vrot.lane.b32.xlu0 %v539_v2, %s4816_s22 }
  0x19   : > { %718 = vrot.lane.b32.xlu1 %v538_v1, %s4816_s22 }
  0x1c   : > { %716 = vrot.lane.b32.xlu0 %v537_v3, %s4816_s22 }
  0x7e   : > { %v638_v7 = vpop.permute.xlu0 %637  ;;  %v634_v8 = vpop.permute.xlu1 %633 }
  0x7f   : > { %4438 = vmatpush3.msra.mxu1 %v638_v7  ;;  %v5029_v7 = vld [vmem:[%s5530_s4 + $0x38] sm:$0xff] }
  0x80   : > { %4439 = vmatprep.subr.mxu1 %v4814_v4 }
  0x82   : > { %v636_v9 = vpop.permute.xlu0 %635  ;;  %v632_v10 = vpop.permute.xlu1 %631 }
  0x83   : > { %4440 = vmatpush3.msra.mxu1 %v636_v9  ;;  %v5042_v9 = vld [vmem:[%s5530_s4 + $0x28] sm:$0xff] }
  0x84   : > { %4441 = vmatprep.subr.mxu1 %v4814_v4 }
  0x85   : > { %4442 = vmatpush3.msra.mxu1 %v634_v8  ;;  %v5035_v8 = vld [vmem:[%s5530_s4 + $0x30] sm:$0xff] }
  0x86   : > { %4443 = vmatprep.subr.mxu1 %v4814_v4  ;;  %v644_v11 = vpop.permute.xlu0 %643 }
  0x87   : > { %4444 = vmatpush3.msra.mxu1 %v632_v10  ;;  %v723_v12 = vpop.permute.xlu1 %722  ;;  %v5054_v10 = vld [vmem:[%s5530_s4 + $0x20] sm:$0xff] }
  0x88   : > { %4446 = vmatmul.mubr.msk.f32.vlgmr.msra.gmra.mxu1 %vm553_vm1, %v4943_v6  ;;  %4459 = vmatprep.subr.mxu1 %v4814_v4 }
  0x89   : > { %4461 = vmatprep.mubr.msk.f32.mxu1 %vm4815_vm0, %v4814_v4  ;;  %4449 = vmatpush3.msra.mxu0 %v723_v12 }
  0x8a   : > { %v721_v13 = vpop.permute.xlu0 %720  ;;  %4450 = vmatprep.subr.mxu0 %v4814_v4 }
  0x8b   : > { %4451 = vmatpush3.msra.mxu0 %v721_v13  ;;  %v719_v14 = vpop.permute.xlu1 %718 }
  0x8c   : > { %4452 = vmatprep.subr.mxu0 %v4814_v4 }
  0x8d   : > { %4453 = vmatpush3.msra.mxu0 %v719_v14 }
  0x8e   : > { %v717_v15 = vpop.permute.xlu0 %716  ;;  %4454 = vmatprep.subr.mxu0 %v4814_v4 }
  0x8f   : > { %4455 = vmatpush3.msra.mxu0 %v717_v15 }
  0x90   : > { %4457 = vmatmul.mubr.msk.f32.vlgmr.msra.gmra.mxu0 %vm553_vm1, %v4943_v6  ;;  %4469 = vmatprep.subr.mxu0 %v4814_v4 }
  0x91   : > { %4471 = vmatprep.mubr.msk.f32.mxu0 %vm4815_vm0, %v4814_v4 }
  0xd6   : > { %v623_v16 = vpop.f32.mrf.mxu0 }
  0xd7   : > { %v624_v17 = vadd.f32 %v4940_v5, %v623_v16 }
  0xd8   : > { %v4436_v18 = vpop.f32.mrf.mxu0 }
  0xd9   : > { %969 = vrot.lane.b32.xlu0 %v624_v17, %s4817_s23  ;;  %v4149_v18 = vld [vmem:[%s5529_s3] ss:$0 sm:$0xff] }
 0x148   : > { %v712_v19 = vpop.f32.mrf.mxu1 }
 0x149   : > { %v713_v20 = vadd.f32 %v712_v19, %v644_v11 }
 0x14a   : > { %v4447_v21 = vpop.f32.mrf.mxu1 }
 0x14b   : > { %971 = vrot.lane.b32.xlu1 %v713_v20, %s4817_s23  ;;  %4460 = vmatpush3.xpose.msk.msra.mxu1 %vm801_vm2, %v713_v20  ;;  %v970_v25 = vpop.permute.xlu0 %969  ;;  %v5076_v20 = vld [vmem:[%s5528_s2] sm:$0xff] }
 0x14c   : > { %4464 = vmatprep.subr.mxu1 %v4814_v4 }
 0x14e   : > { %4462 = vmatmul.mubr.msk.f32.vlgmr.msra.gmra.mxu1 %vm801_vm2, %v624_v17  ;;  %v526_v17 = vld [vmem:[%s509_s28] sm:$0xff] }
 0x14f   : > { %4466 = vmatprep.mubr.msk.f32.mxu1 %vm4815_vm0, %v4814_v4  ;;  %v5071_v19 = vadd.f32 %v4149_v18, %v526_v17  ;;  %v4173_v17 = vld [vmem:[%s5532_s6 + $0x28] sm:$0xff] }
 0x150   : > { %v797_v22 = vpop.f32.mrf.mxu0 }
 0x151   : > { %v5080_v21 = vadd.f32 %v5071_v19, %v5076_v20 }
 0x152   : > { %v4458_v23 = vpop.f32.mrf.mxu0 }
 0x153   : > { %v527_v23 = vld [vmem:[%s509_s28 + $0x8] sm:$0xff] }
 0x1bd   : > { %v972_v24 = vpop.permute.xlu1 %971 }
 0x1be   : > { %4470 = vmatpush3.xpose.msk.msra.mxu0 %vm801_vm2, %v972_v24 }
 0x1bf   : > { %4479 = vmatprep.subr.mxu0 %v4814_v4 }
 0x1c1   : > { %4472 = vmatmul.mubr.msk.f32.vlgmr.msra.gmra.mxu0 %vm801_vm2, %v970_v25 }
 0x1c2   : > { %4483 = vmatprep.mubr.msk.f32.mxu0 %vm4815_vm0, %v4814_v4  ;;  %4480 = vmatpush3.msra.mxu0 %v545_v49 }
 0x1c3   : > { %4481 = vmatprep.subr.mxu0 %v4814_v4 }
 0x1c4   : > { %4482 = vmatpush3.msra.mxu0 %v544_v56 }
 0x1c5   : > { %4493 = vmatprep.subr.mxu0 %v4814_v4 }
 0x20e   : > { %v874_v26 = vpop.f32.mrf.mxu1 }
 0x20f   : > { %v878_v27 = vmul.f32 0.25, %v874_v26 }
 0x210   : > { %v4463_v28 = vpop.f32.mrf.mxu1 }
 0x211   : > { %v880_v29 = vsel %vm879_vm3, %v878_v27, -inf  ;;  %v5091_v28 = vadd.f32 %v4149_v18, %v527_v23  ;;  %v4172_v23 = vld [vmem:[%s5532_s6 + $0x20] sm:$0xff] }
 0x212   : > { %881 = vmax.xlane.f32.xlu1 %v880_v29 }
 0x281   : > { %v1043_v30 = vpop.f32.mrf.mxu0 }
 0x282   : > { %v1047_v31 = vmul.f32 0.25, %v1043_v30  ;;  %v5096_v30 = vld [vmem:[%s5528_s2 + $0x8] sm:$0xff] }
 0x283   : > { %v4473_v32 = vpop.f32.mrf.mxu0 }
 0x284   : > { %v1048_v33 = vsel %vm879_vm3, %v1047_v31, -inf  ;;  %v5100_v32 = vadd.f32 %v5091_v28, %v5096_v30 }
 0x285   : > { %1049 = vmax.xlane.f32.xlu0 %v1048_v33 }
 0x29b   : > { %v882_v34 = vpop.xlane.xlu1 %881  ;;  %728 = vrot.lane.b32.xlu0 %v4940_v5, %s4816_s22 }
 0x29c   : > { %v883_v35 = vsub.f32 %v878_v27, %v882_v34  ;;  %v4165_v34 = vld [vmem:[%s5534_s8] ss:$0 sm:$0xff] }
 0x29e   : > { %v884_v36 = vmul.f32 1.442695, %v883_v35 }
 0x2a0   : > { %4753 = vpow2.f32 %v884_v36  ;;  %v4166_v36 = vld [vmem:[%s5535_s9] ss:$0 sm:$0xff] }
 0x2ad   : > { %v4754_v37 = vpop.eup %4753 }
 0x2ae   : > { %v886_v38 = vsel %vm879_vm3, %v4754_v37, 0.0 }
 0x2af   : > { %887 = vadd.xlane.f32.xlu1 %v886_v38 }
 0x30e   : > { %v1050_v39 = vpop.xlane.xlu0 %1049 }
 0x30f   : > { %v1051_v40 = vsub.f32 %v1047_v31, %v1050_v39 }
 0x311   : > { %v1052_v41 = vmul.f32 1.442695, %v1051_v40 }
 0x312   : > { %v729_v42 = vpop.permute.xlu0 %728 }
 0x313   : > { %4755 = vpow2.f32 %v1052_v41  ;;  %v798_v43 = vadd.f32 %v797_v22, %v729_v42  ;;  %v5087_v22 = vld [vmem:[%s5531_s5 + $0x1] ss:$0 sm:$0xff] }
 0x315   : > { %4465 = vmatpush3.msk.msra.mxu1 %vm895_vm4, %v798_v43 }
 0x316   : > { %4474 = vmatprep.subr.mxu1 %v4814_v4 }
 0x320   : > { %v4756_v44 = vpop.eup %4755 }
 0x321   : > { %v1054_v45 = vsel %vm879_vm3, %v4756_v44, 0.0 }
 0x322   : > { %1055 = vadd.xlane.f32.xlu1 %v1054_v45 }
 0x333   : > { %1059 = vrot.lane.b32.xlu1 %v798_v43, %s4817_s23 }
 0x338   : > { %v888_v46 = vpop.xlane.xlu1 %887 }
 0x339   : > { %4757 = vrcp.f32 %v888_v46 }
 0x346   : > { %v4758_v47 = vpop.eup %4757 }
 0x347   : > { %v890_v48 = vmul.f32 %v4758_v47, %v4754_v37 }
 0x349   : > { %4467 = vmatmul.mubr.msk.f32.vlgmr.msra.gmra.mxu1 %vm891_vm5, %v890_v48 }
 0x34a   : > { %4476 = vmatprep.mubr.msk.f32.mxu1 %vm4815_vm0, %v4814_v4 }
 0x3ab   : > { %v1056_v50 = vpop.xlane.xlu1 %1055 }
 0x3ac   : > { %4759 = vrcp.f32 %v1056_v50 }
 0x3af   : > { %v1060_v51 = vpop.permute.xlu1 %1059 }
 0x3b0   : > { %4475 = vmatpush3.msk.msra.mxu1 %vm895_vm4, %v1060_v51 }
 0x3b1   : > { %4486 = vmatprep.subr.mxu1 %v4814_v4 }
 0x3b9   : > { %v4760_v52 = vpop.eup %4759 }
 0x3ba   : > { %v1058_v53 = vmul.f32 %v4760_v52, %v4756_v44 }
 0x3bc   : > { %4477 = vmatmul.mubr.msk.f32.vlgmr.msra.gmra.mxu1 %vm891_vm5, %v1058_v53 }
 0x3bd   : > { %4487 = vmatpush3.msra.mxu1 %v543_v54  ;;  %4490 = vmatprep.mubr.msk.f32.mxu1 %vm4815_vm0, %v4814_v4 }
 0x3be   : > { %4488 = vmatprep.subr.mxu1 %v4814_v4 }
 0x3bf   : > { %4489 = vmatpush3.msra.mxu1 %v542_v55 }
 0x409   : > { %v965_v57 = vpop.f32.mrf.mxu1 }
 0x40a   : > { %4491 = vmatmul.mubr.msk.f32.vlgmr.msra.gmra.mxu1 %vm801_vm2, %v965_v57 }
 0x40b   : > { %v4468_v58 = vpop.f32.mrf.mxu1  ;;  %4512 = vmatprep.mubr.msk.f32.mxu1 %vm553_vm1, %v5080_v21 }
 0x47c   : > { %v1132_v59 = vpop.f32.mrf.mxu1 }
 0x47d   : > { %4484 = vmatmul.mubr.msk.f32.vlgmr.msra.gmra.mxu0 %vm801_vm2, %v1132_v59 }
 0x47e   : > { %v4478_v60 = vpop.f32.mrf.mxu1  ;;  %4501 = vmatprep.mubr.msk.f32.mxu0 %vm4815_vm0, %v4814_v4  ;;  %4494 = vmatpush3.msra.mxu0 %v5029_v7 }
 0x47f   : > { %4495 = vmatprep.subr.mxu0 %v4814_v4 }
 0x480   : > { %4496 = vmatpush3.msra.mxu0 %v5035_v8 }
 0x481   : > { %4497 = vmatprep.subr.mxu0 %v4814_v4 }
 0x482   : > { %4498 = vmatpush3.msra.mxu0 %v5042_v9 }
 0x483   : > { %4499 = vmatprep.subr.mxu0 %v4814_v4 }
 0x484   : > { %4500 = vmatpush3.msra.mxu0 %v5054_v10 }
 0x4ca   : > { %v1278_v61 = vpop.f32.mrf.mxu1 }
 0x4cc   : > { %v4492_v62 = vpop.f32.mrf.mxu1 }
 0x53d   : > { %v1205_v63 = vpop.f32.mrf.mxu0 }
 0x53e   : > { %v1279_v1 = vadd.f32 %v1278_v61, %v1205_v63 }
 0x53f   : > { %v4485_v2 = vpop.f32.mrf.mxu0 }
 0x540   : > { %v1288_v3 = vadd.f32 %v4164_v0, %v1279_v1 }
 0x542   : > { %v1292_v5 = vsel %vm1291_vm6, %v1288_v3, 0.0 }
 0x543   : > { %1293 = vadd.xlane.f32.xlu0 %v1292_v5 }
 0x559   : > { %1426 = vrot.lane.b32.xlu0 %v5029_v7, %s4813_s24 }
 0x55d   : > { %1422 = vrot.lane.b32.xlu0 %v5042_v9, %s4813_s24 }
 0x561   : > { %1420 = vrot.lane.b32.xlu0 %v5054_v10, %s4813_s24 }
 0x5cc   : > { %v1294_v11 = vpop.xlane.xlu0 %1293 }
 0x5cd   : > { %v1296_v12 = vmul.f32 0.03125, %v1294_v11 }
 0x5cf   : > { %v1297_v13 = vsub.f32 %v1288_v3, %v1296_v12 }
 0x5d0   : > { %v1427_v16 = vpop.permute.xlu0 %1426 }
 0x5d1   : > { %v1298_v14 = vmul.f32 %v1297_v13, %v1297_v13  ;;  %4504 = vmatprep.subr.mxu1 %v1427_v16 }
 0x5d2   : > { %4505 = vmatpush3.msra.mxu1 %v1427_v16 }
 0x5d3   : > { %v1299_v15 = vsel %vm1291_vm6, %v1298_v14, 0.0 }
 0x5d4   : > { %1300 = vadd.xlane.f32.xlu1 %v1299_v15  ;;  %v1423_v25 = vpop.permute.xlu0 %1422 }
 0x5d8   : > { %v1421_v31 = vpop.permute.xlu0 %1420 }
 0x5e5   : > { %1424 = vrot.lane.b32.xlu1 %v5035_v8, %s4813_s24 }
 0x5e9   : > { %1432 = vrot.lane.b32.xlu1 %v5087_v22, %s4813_s24 }
 0x65d   : > { %v1301_v24 = vpop.xlane.xlu1 %1300 }
 0x65e   : > { %v1302_v26 = vmul.f32 0.03125, %v1301_v24 }
 0x660   : > { %v1303_v27 = vadd.f32 1e-05, %v1302_v26 }
 0x661   : > { %v1425_v29 = vpop.permute.xlu1 %1424 }
 0x662   : > { %4761 = vrsqrt.f32 %v1303_v27  ;;  %4506 = vmatprep.subr.mxu1 %v1425_v29 }
 0x663   : > { %4507 = vmatpush3.msra.mxu1 %v1425_v29 }
 0x664   : > { %4508 = vmatprep.subr.mxu1 %v1423_v25 }
 0x665   : > { %4509 = vmatpush3.msra.mxu1 %v1423_v25  ;;  %v1433_v40 = vpop.permute.xlu1 %1432 }
 0x666   : > { %4510 = vmatprep.subr.mxu1 %v1421_v31 }
 0x667   : > { %4511 = vmatpush3.msra.mxu1 %v1421_v31  ;;  %v4175_v31 = vld [vmem:[%s5532_s6 + $0x38] sm:$0xff] }
 0x668   : > { %4513 = vmatmul.mubr.msk.f32.vlgmr.msra.gmra.mxu1 %vm553_vm1, %v5100_v32  ;;  %4526 = vmatprep.subr.mxu1 %v4814_v4 }
 0x669   : > { %4530 = vmatprep.mubr.msk.f32.mxu1 %vm4815_vm0, %v4814_v4 }
 0x66f   : > { %v4762_v33 = vpop.eup %4761 }
 0x670   : > { %v1305_v35 = vmul.f32 %v4762_v33, %v1297_v13  ;;  %v4174_v33 = vld [vmem:[%s5532_s6 + $0x30] sm:$0xff] }
 0x672   : > { %v1312_v37 = vmul.f32 %v4165_v34, %v1305_v35 }
 0x674   : > { %v5113_v38 = vadd.f32 %v4166_v36, %v1312_v37 }
 0x676   : > { %v1320_v39 = vadd.f32 %v5113_v38, %v4943_v6 }
 0x678   : > { %4502 = vmatmul.mubr.msk.f32.vlgmr.msra.gmra.mxu0 %vm553_vm1, %v1320_v39 }
 0x679   : > { %4523 = vmatprep.mubr.msk.f32.mxu0 %vm553_vm1, %v5071_v19 }
 0x728   : > { %v4514_v41 = vpop.f32.mrf.mxu1 }
 0x729   : > { %v1513_v42 = vadd.f32 %v4514_v41, %v1433_v40  ;;  %v4193_v41 = vld [vmem:[%s5533_s7 + $0x1] ss:$0 sm:$0xff] }
 0x72a   : > { %v1507_v43 = vpop.f32.mrf.mxu1 }
 0x72b   : > { %1781 = vrot.lane.b32.xlu0 %v1513_v42, %s4817_s23  ;;  %4527 = vmatpush3.xpose.msk.msra.mxu1 %vm801_vm2, %v1513_v42  ;;  %v1508_v44 = vadd.f32 %v1507_v43, %v1433_v40 }
 0x72c   : > { %4528 = vmatprep.subr.mxu1 %v4814_v4 }
 0x72d   : > { %1779 = vrot.lane.b32.xlu1 %v1508_v44, %s4817_s23 }
 0x72f   : > { %4529 = vmatpush3.xpose.msk.msra.mxu1 %vm801_vm2, %v1508_v44 }
 0x730   : > { %4540 = vmatprep.subr.mxu1 %v4814_v4 }
 0x731   : > { %1522 = vrot.lane.b32.xlu1 %v5029_v7, %s4816_s22 }
 0x735   : > { %1518 = vrot.lane.b32.xlu1 %v5042_v9, %s4816_s22 }
 0x738   : > { %v1412_v45 = vpop.f32.mrf.mxu0 }
 0x739   : > { %v1413_v46 = vadd.f32 %v5087_v22, %v1412_v45 }
 0x73a   : > { %v4503_v47 = vpop.f32.mrf.mxu0 }
 0x73b   : > { %1777 = vrot.lane.b32.xlu0 %v1413_v46, %s4817_s23  ;;  %4531 = vmatmul.mubr.msk.f32.vlgmr.msra.gmra.mxu1 %vm801_vm2, %v1413_v46 }
 0x73c   : > { %4544 = vmatprep.mubr.msk.f32.mxu1 %vm4815_vm0, %v4814_v4 }
 0x73f   : > { %1520 = vrot.lane.b32.xlu0 %v5035_v8, %s4816_s22 }
 0x743   : > { %1516 = vrot.lane.b32.xlu0 %v5054_v10, %s4816_s22 }
 0x79d   : > { %v1782_v48 = vpop.permute.xlu0 %1781 }
 0x79e   : > { %4541 = vmatpush3.xpose.msk.msra.mxu1 %vm801_vm2, %v1782_v48 }
 0x79f   : > { %v1780_v49 = vpop.permute.xlu1 %1779  ;;  %4542 = vmatprep.subr.mxu1 %v4814_v4 }
 0x7a2   : > { %4543 = vmatpush3.xpose.msk.msra.mxu1 %vm801_vm2, %v1780_v49 }
 0x7a3   : > { %v1523_v50 = vpop.permute.xlu1 %1522  ;;  %4561 = vmatprep.subr.mxu1 %v4814_v4 }
 0x7a4   : > { %4515 = vmatprep.subr.mxu0 %v1523_v50 }
 0x7a5   : > { %4516 = vmatpush3.msra.mxu0 %v1523_v50 }
 0x7a7   : > { %v1519_v53 = vpop.permute.xlu1 %1518 }
 0x7ad   : > { %v1778_v51 = vpop.permute.xlu0 %1777 }
 0x7ae   : > { %4545 = vmatmul.mubr.msk.f32.vlgmr.msra.gmra.mxu1 %vm801_vm2, %v1778_v51 }
 0x7af   : > { %4565 = vmatprep.mubr.msk.f32.mxu1 %vm4815_vm0, %v4814_v4  ;;  %4562 = vmatpush3.msra.mxu1 %v4173_v17 }
 0x7b0   : > { %4563 = vmatprep.subr.mxu1 %v4814_v4 }
 0x7b1   : > { %v1521_v52 = vpop.permute.xlu0 %1520  ;;  %4564 = vmatpush3.msra.mxu1 %v4172_v23 }
 0x7b2   : > { %4517 = vmatprep.subr.mxu0 %v1521_v52  ;;  %4579 = vmatprep.subr.mxu1 %v4814_v4 }
 0x7b3   : > { %4518 = vmatpush3.msra.mxu0 %v1521_v52 }
 0x7b4   : > { %4519 = vmatprep.subr.mxu0 %v1519_v53 }
 0x7b5   : > { %v1517_v54 = vpop.permute.xlu0 %1516  ;;  %4520 = vmatpush3.msra.mxu0 %v1519_v53  ;;  %v2140_v53 = vld [vmem:[%s5536_s10 + $0x18] sm:$0xff] }
 0x7b6   : > { %4521 = vmatprep.subr.mxu0 %v1517_v54 }
 0x7b7   : > { %4522 = vmatpush3.msra.mxu0 %v1517_v54  ;;  %v2138_v54 = vld [vmem:[%s5536_s10 + $0x8] sm:$0xff] }
 0x7b8   : > { %4524 = vmatmul.mubr.msk.f32.vlgmr.msra.gmra.mxu0 %vm553_vm1, %v5091_v28  ;;  %4533 = vmatprep.subr.mxu0 %v4814_v4 }
 0x7b9   : > { %4537 = vmatprep.mubr.msk.f32.mxu0 %vm4815_vm0, %v4814_v4 }
 0x7fb   : > { %v1687_v55 = vpop.f32.mrf.mxu1 }
 0x7fc   : > { %v1691_v56 = vmul.f32 0.25, %v1687_v55  ;;  %v2137_v55 = vld [vmem:[%s5536_s10] sm:$0xff] }
 0x7fd   : > { %v4532_v57 = vpop.f32.mrf.mxu1 }
 0x7fe   : > { %v1693_v58 = vsel %vm1692_vm7, %v1691_v56, -inf  ;;  %v2228_v57 = vld [vmem:[%s5538_s12 + $0x30] sm:$0xff] }
 0x7ff   : > { %1694 = vmax.xlane.f32.xlu1 %v1693_v58  ;;  %v2227_v58 = vld [vmem:[%s5538_s12 + $0x28] sm:$0xff] }
 0x86e   : > { %v1855_v59 = vpop.f32.mrf.mxu1 }
 0x86f   : > { %v1859_v60 = vmul.f32 0.25, %v1855_v59  ;;  %v2226_v59 = vld [vmem:[%s5538_s12 + $0x20] sm:$0xff] }
 0x870   : > { %v4546_v61 = vpop.f32.mrf.mxu1 }
 0x871   : > { %v1860_v62 = vsel %vm1692_vm7, %v1859_v60, -inf }
 0x872   : > { %1861 = vmax.xlane.f32.xlu0 %v1860_v62 }
 0x878   : > { %v4525_v5 = vpop.f32.mrf.mxu0 }
 0x87a   : > { %v1603_v9 = vpop.f32.mrf.mxu0 }
 0x888   : > { %v1695_v63 = vpop.xlane.xlu1 %1694  ;;  %1528 = vrot.lane.b32.xlu0 %v5087_v22, %s4816_s22 }
 0x889   : > { %v1696_v0 = vsub.f32 %v1691_v56, %v1695_v63  ;;  %v2229_v56 = vld [vmem:[%s5538_s12 + $0x38] sm:$0xff] }
 0x88b   : > { %v1697_v1 = vmul.f32 1.442695, %v1696_v0 }
 0x88d   : > { %4763 = vpow2.f32 %v1697_v1  ;;  %v4196_v1 = vld [vmem:[%s5534_s8 + $0x1] ss:$0 sm:$0xff] }
 0x89a   : > { %v4764_v2 = vpop.eup %4763 }
 0x89b   : > { %v1699_v3 = vsel %vm1692_vm7, %v4764_v2, 0.0 }
 0x89c   : > { %1700 = vadd.xlane.f32.xlu1 %v1699_v3  ;;  %v4197_v3 = vld [vmem:[%s5535_s9 + $0x1] ss:$0 sm:$0xff] }
 0x8fb   : > { %v1862_v7 = vpop.xlane.xlu0 %1861 }
 0x8fc   : > { %v1863_v8 = vsub.f32 %v1859_v60, %v1862_v7  ;;  %v2225_v60 = vld [vmem:[%s5538_s12 + $0x18] sm:$0xff] }
 0x8fe   : > { %v1864_v10 = vmul.f32 1.442695, %v1863_v8  ;;  %v2224_v8 = vld [vmem:[%s5538_s12 + $0x10] sm:$0xff] }
 0x8ff   : > { %v1529_v11 = vpop.permute.xlu0 %1528 }
 0x900   : > { %4765 = vpow2.f32 %v1864_v10  ;;  %v1609_v12 = vadd.f32 %v4525_v5, %v1529_v11  ;;  %v1604_v13 = vadd.f32 %v1603_v9, %v1529_v11  ;;  %v2223_v9 = vld [vmem:[%s5538_s12 + $0x8] sm:$0xff]  ;;  %v2222_v10 = vld [vmem:[%s5538_s12] sm:$0xff] }
 0x902   : > { %4534 = vmatpush3.msra.mxu0 %v1609_v12  ;;  %1873 = vrot.lane.b32.xlu0 %v1604_v13, %s4817_s23 }
 0x903   : > { %4535 = vmatprep.subr.mxu0 %v4814_v4 }
 0x904   : > { %4536 = vmatpush3.msra.mxu0 %v1604_v13 }
 0x905   : > { %4547 = vmatprep.subr.mxu0 %v4814_v4 }
 0x90d   : > { %v4766_v14 = vpop.eup %4765 }
 0x90e   : > { %v1866_v15 = vsel %vm1692_vm7, %v4766_v14, 0.0 }
 0x90f   : > { %1867 = vadd.xlane.f32.xlu1 %v1866_v15  ;;  %v4200_v15 = vld [vmem:[%s5539_s13] ss:$0 sm:$0xff] }
 0x920   : > { %1875 = vrot.lane.b32.xlu1 %v1609_v12, %s4817_s23 }
 0x925   : > { %v1701_v16 = vpop.xlane.xlu1 %1700 }
 0x926   : > { %4767 = vrcp.f32 %v1701_v16 }
 0x933   : > { %v4768_v18 = vpop.eup %4767 }
 0x934   : > { %v1703_v22 = vmul.f32 %v4768_v18, %v4764_v2 }
 0x936   : > { %4538 = vmatmul.mubr.msk.f32.vlgmr.msra.gmra.mxu0 %vm801_vm2, %v1703_v22 }
 0x937   : > { %4551 = vmatprep.mubr.msk.f32.mxu0 %vm4815_vm0, %v4814_v4 }
 0x974   : > { %v1874_v26 = vpop.permute.xlu0 %1873 }
 0x998   : > { %v1868_v24 = vpop.xlane.xlu1 %1867 }
 0x999   : > { %4769 = vrcp.f32 %v1868_v24  ;;  %v4209_v24 = vld [vmem:[%s5530_s4 + $0x58] sm:$0xff] }
 0x99c   : > { %v1876_v25 = vpop.permute.xlu1 %1875 }
 0x99d   : > { %4548 = vmatpush3.msra.mxu0 %v1876_v25  ;;  %v5269_v25 = vld [vmem:[%s5530_s4 + $0x50] sm:$0xff] }
 0x99e   : > { %4549 = vmatprep.subr.mxu0 %v4814_v4 }
 0x99f   : > { %4550 = vmatpush3.msra.mxu0 %v1874_v26  ;;  %v4207_v26 = vld [vmem:[%s5530_s4 + $0x48] sm:$0xff] }
 0x9a0   : > { %4554 = vmatprep.subr.mxu0 %v4814_v4 }
 0x9a6   : > { %v4770_v27 = vpop.eup %4769 }
 0x9a7   : > { %v1870_v29 = vmul.f32 %v4770_v27, %v4766_v14  ;;  %v4206_v27 = vld [vmem:[%s5530_s4 + $0x40] sm:$0xff] }
 0x9a9   : > { %4552 = vmatmul.mubr.msk.f32.vlgmr.msra.gmra.mxu0 %vm801_vm2, %v1870_v29 }
 0x9aa   : > { %4555 = vmatpush3.msra.mxu0 %v4175_v31  ;;  %4558 = vmatprep.mubr.msk.f32.mxu0 %vm4815_vm0, %v4814_v4 }
 0x9ab   : > { %4556 = vmatprep.subr.mxu0 %v4814_v4 }
 0x9ac   : > { %4557 = vmatpush3.msra.mxu0 %v4174_v33 }
 0x9ad   : > { %4568 = vmatprep.subr.mxu0 %v4814_v4 }
 0x9f6   : > { %v1773_v34 = vpop.f32.mrf.mxu0 }
 0x9f7   : > { %4566 = vmatmul.mubr.msk.f32.vlgmr.msra.gmra.mxu1 %vm801_vm2, %v1773_v34 }
 0x9f8   : > { %v4539_v35 = vpop.f32.mrf.mxu0  ;;  %4595 = vmatprep.mubr.msk.f32.mxu1 %vm4815_vm0, %v4814_v4  ;;  %4580 = vmatpush3.msra.mxu1 %v2229_v56 }
 0x9f9   : > { %4581 = vmatprep.subr.mxu1 %v4814_v4 }
 0x9fa   : > { %4582 = vmatpush3.msra.mxu1 %v2228_v57 }
 0x9fb   : > { %4583 = vmatprep.subr.mxu1 %v4814_v4 }
 0x9fc   : > { %4584 = vmatpush3.msra.mxu1 %v2227_v58 }
 0x9fd   : > { %4585 = vmatprep.subr.mxu1 %v4814_v4 }
 0x9fe   : > { %4586 = vmatpush3.msra.mxu1 %v2226_v59 }
 0x9ff   : > { %4587 = vmatprep.subr.mxu1 %v4814_v4 }
 0xa00   : > { %4588 = vmatpush3.msra.mxu1 %v2225_v60 }
 0xa01   : > { %4589 = vmatprep.subr.mxu1 %v4814_v4 }
 0xa02   : > { %4590 = vmatpush3.msra.mxu1 %v2224_v8 }
 0xa03   : > { %4591 = vmatprep.subr.mxu1 %v4814_v4 }
 0xa04   : > { %4592 = vmatpush3.msra.mxu1 %v2223_v9 }
 0xa05   : > { %4593 = vmatprep.subr.mxu1 %v4814_v4 }
 0xa06   : > { %4594 = vmatpush3.msra.mxu1 %v2222_v10 }
 0xa07   : > { %4620 = vmatprep.subr.mxu1 %v4814_v4 }
 0xa69   : > { %v1948_v36 = vpop.f32.mrf.mxu0 }
 0xa6a   : > { %4559 = vmatmul.mubr.msk.f32.vlgmr.msra.gmra.mxu0 %vm801_vm2, %v1948_v36 }
 0xa6b   : > { %v4553_v37 = vpop.f32.mrf.mxu0  ;;  %4576 = vmatprep.mubr.msk.f32.mxu0 %vm4815_vm0, %v4814_v4  ;;  %4569 = vmatpush3.msra.mxu0 %v2140_v53 }
 0xa6c   : > { %4570 = vmatprep.subr.mxu0 %v4814_v4 }
 0xab7   : > { %v2094_v39 = vpop.f32.mrf.mxu1 }
 0xab9   : > { %v4567_v40 = vpop.f32.mrf.mxu1 }
 0xb2a   : > { %v2021_v42 = vpop.f32.mrf.mxu0 }
 0xb2b   : > { %v2095_v43 = vadd.f32 %v2094_v39, %v2021_v42 }
 0xb2c   : > { %v4560_v44 = vpop.f32.mrf.mxu0 }
 0xb2d   : > { %v2104_v45 = vadd.f32 %v4193_v41, %v2095_v43 }
 0xb2f   : > { %v2105_v46 = vadd.f32 %v2104_v45, %v5113_v38  ;;  %v2139_v38 = vld [vmem:[%s5536_s10 + $0x10] sm:$0xff] }
 0xb30   : > { %4571 = vmatpush3.msra.mxu0 %v2139_v38 }
 0xb31   : > { %v2110_v47 = vsel %vm1291_vm6, %v2105_v46, 0.0  ;;  %4572 = vmatprep.subr.mxu0 %v4814_v4 }
 0xb32   : > { %2111 = vadd.xlane.f32.xlu0 %v2110_v47  ;;  %4573 = vmatpush3.msra.mxu0 %v2138_v54 }
 0xb33   : > { %4574 = vmatprep.subr.mxu0 %v4814_v4 }
 0xb34   : > { %4575 = vmatpush3.msra.mxu0 %v2137_v55 }
 0xb35   : > { %4598 = vmatprep.subr.mxu0 %v4209_v24 }
 0xbbb   : > { %v2112_v48 = vpop.xlane.xlu0 %2111 }
 0xbbc   : > { %v2113_v49 = vmul.f32 0.03125, %v2112_v48  ;;  %v4204_v48 = vld [vmem:[%s5534_s8 + $0x2] ss:$0 sm:$0xff] }
 0xbbe   : > { %v2114_v50 = vsub.f32 %v2105_v46, %v2113_v49 }
 0xbc0   : > { %v2115_v51 = vmul.f32 %v2114_v50, %v2114_v50 }
 0xbc2   : > { %v2116_v52 = vsel %vm1291_vm6, %v2115_v51, 0.0 }
 0xbc3   : > { %2117 = vadd.xlane.f32.xlu1 %v2116_v52 }
 0xbd4   : > { %2449 = vrot.lane.b32.xlu1 %v4209_v24, %s4813_s24 }
 0xbd8   : > { %2445 = vrot.lane.b32.xlu1 %v4207_v26, %s4813_s24 }
 0xbdc   : > { %2443 = vrot.lane.b32.xlu1 %v4206_v27, %s4813_s24 }
 0xc4c   : > { %v2118_v61 = vpop.xlane.xlu1 %2117 }
 0xc4d   : > { %v2119_v62 = vmul.f32 0.03125, %v2118_v61 }
 0xc4f   : > { %v2120_v63 = vadd.f32 1e-05, %v2119_v62 }
 0xc50   : > { %v2450_v36 = vpop.permute.xlu1 %2449 }
 0xc51   : > { %4771 = vrsqrt.f32 %v2120_v63 }
 0xc54   : > { %v2446_v42 = vpop.permute.xlu1 %2445 }
 0xc58   : > { %v2444_v46 = vpop.permute.xlu1 %2443 }
 0xc5e   : > { %v4772_v0 = vpop.eup %4771 }
 0xc5f   : > { %v2122_v2 = vmul.f32 %v4772_v0, %v2114_v50  ;;  %v4205_v50 = vld [vmem:[%s5535_s9 + $0x2] ss:$0 sm:$0xff] }
 0xc61   : > { %v2129_v5 = vmul.f32 %v4196_v1, %v2122_v2 }
 0xc63   : > { %v2136_v7 = vadd.f32 %v4197_v3, %v2129_v5 }
 0xc65   : > { %4577 = vmatmul.mubr.msk.f32.vlgmr.msra.gmra.mxu0 %vm553_vm1, %v2136_v7 }
 0xc66   : > { %4606 = vmatprep.mubr.msk.f32.mxu0 %vm553_vm1, %v5080_v21  ;;  %v4198_v21 = vld [vmem:[%s5537_s11] ss:$0 sm:$0xff]  ;;  %4599 = vmatpush3.msra.mxu0 %v4209_v24 }
 0xc67   : > { %4600 = vmatprep.subr.mxu0 %v5269_v25 }
 0xc68   : > { %4601 = vmatpush3.msra.mxu0 %v5269_v25 }
 0xc69   : > { %4602 = vmatprep.subr.mxu0 %v4207_v26 }
 0xc6a   : > { %4603 = vmatpush3.msra.mxu0 %v4207_v26 }
 0xc6b   : > { %4604 = vmatprep.subr.mxu0 %v4206_v27 }
 0xc6c   : > { %4605 = vmatpush3.msra.mxu0 %v4206_v27 }
 0xc6d   : > { %4609 = vmatprep.subr.mxu0 %v4814_v4  ;;  %4607 = vmatmul.mubr.msk.f32.vlgmr.msra.gmra.mxu0 %vm553_vm1, %v5100_v32  ;;  %v5293_v32 = vld [vmem:[%s5531_s5 + $0x2] ss:$0 sm:$0xff] }
 0xc6e   : > { %4617 = vmatprep.mubr.msk.f32.mxu0 %vm4815_vm0, %v4814_v4  ;;  %4610 = vmatpush3.msra.mxu0 %v2450_v36 }
 0xc6f   : > { %4611 = vmatprep.subr.mxu0 %v4814_v4 }
 0xd25   : > { %v2217_v11 = vpop.f32.mrf.mxu0 }
 0xd26   : > { %v2218_v12 = vadd.f32 %v4198_v21, %v2217_v11 }
 0xd27   : > { %v4578_v13 = vpop.f32.mrf.mxu0 }
 0xd28   : > { %v2221_v14 = vmax.f32 %v2218_v12, 0.0 }
 0xd2a   : > { %4596 = vmatmul.mubr.msk.f32.vlgmr.msra.gmra.mxu1 %vm2237_vm8, %v2221_v14 }
 0xd2b   : > { %4628 = vmatprep.mubr.msk.f32.mxu1 %vm4815_vm0, %v4814_v4 }
 0xd2d   : > { %v4608_v37 = vpop.f32.mrf.mxu0 }
 0xd2f   : > { %v2430_v39 = vpop.f32.mrf.mxu0 }
 0xd30   : > { %v2431_v40 = vadd.f32 %v5293_v32, %v2430_v39 }
 0xdea   : > { %v2307_v16 = vpop.f32.mrf.mxu1 }
 0xdeb   : > { %v2308_v17 = vadd.f32 %v4200_v15, %v2307_v16 }
 0xdec   : > { %v4597_v18 = vpop.f32.mrf.mxu1 }
 0xded   : > { %v2311_v22 = vadd.f32 %v2308_v17, %v2136_v7 }
 0xdef   : > { %v2316_v23 = vsel %vm1291_vm6, %v2311_v22, 0.0 }
 0xdf0   : > { %2317 = vadd.xlane.f32.xlu0 %v2316_v23 }
 0xe79   : > { %v2318_v29 = vpop.xlane.xlu0 %2317 }
 0xe7a   : > { %v2319_v31 = vmul.f32 0.03125, %v2318_v29 }
 0xe7c   : > { %v2320_v33 = vsub.f32 %v2311_v22, %v2319_v31 }
 0xe7e   : > { %v2321_v34 = vmul.f32 %v2320_v33, %v2320_v33 }
 0xe80   : > { %v2322_v35 = vsel %vm1291_vm6, %v2321_v34, 0.0 }
 0xe81   : > { %2323 = vadd.xlane.f32.xlu0 %v2322_v35 }
 0xe97   : > { %2447 = vrot.lane.b32.xlu0 %v5269_v25, %s4813_s24 }
 0xe9b   : > { %2455 = vrot.lane.b32.xlu0 %v5293_v32, %s4813_s24 }
 0xe9f   : > { %2811 = vrot.lane.b32.xlu0 %v2431_v40, %s4817_s23 }
 0xea3   : > { %2537 = vrot.lane.b32.xlu0 %v4209_v24, %s4816_s22 }
 0xea7   : > { %2533 = vrot.lane.b32.xlu0 %v4207_v26, %s4816_s22 }
 0xf0a   : > { %v2324_v41 = vpop.xlane.xlu0 %2323 }
 0xf0b   : > { %v2325_v43 = vmul.f32 0.03125, %v2324_v41 }
 0xf0d   : > { %v2326_v44 = vadd.f32 1e-05, %v2325_v43 }
 0xf0e   : > { %v2448_v45 = vpop.permute.xlu0 %2447 }
 0xf0f   : > { %4773 = vrsqrt.f32 %v2326_v44  ;;  %4612 = vmatpush3.msra.mxu0 %v2448_v45 }
 0xf10   : > { %4613 = vmatprep.subr.mxu0 %v4814_v4 }
 0xf11   : > { %4614 = vmatpush3.msra.mxu0 %v2446_v42 }
 0xf12   : > { %4615 = vmatprep.subr.mxu0 %v4814_v4  ;;  %v2456_v38 = vpop.permute.xlu0 %2455 }
 0xf13   : > { %4616 = vmatpush3.msra.mxu0 %v2444_v46 }
 0xf16   : > { %v2812_v54 = vpop.permute.xlu0 %2811 }
 0xf1a   : > { %v2538_v55 = vpop.permute.xlu0 %2537 }
 0xf1b   : > { %4621 = vmatpush3.msra.mxu1 %v2538_v55 }
 0xf1c   : > { %v4774_v47 = vpop.eup %4773  ;;  %4622 = vmatprep.subr.mxu1 %v4814_v4 }
 0xf1d   : > { %v2328_v49 = vmul.f32 %v4774_v47, %v2320_v33 }
 0xf1e   : > { %v2534_v62 = vpop.permute.xlu0 %2533 }
 0xf1f   : > { %v2335_v51 = vmul.f32 %v4204_v48, %v2328_v49 }
 0xf21   : > { %v5309_v52 = vadd.f32 %v4205_v50, %v2335_v51  ;;  %v4212_v50 = vld [vmem:[%s5532_s6 + $0x48] sm:$0xff]  ;;  %v4214_v51 = vld [vmem:[%s5532_s6 + $0x58] sm:$0xff] }
 0xf23   : > { %v5313_v53 = vadd.f32 %v5309_v52, %v4943_v6  ;;  %v2436_v6 = vadd.f32 %v4608_v37, %v5293_v32 }
 0xf25   : > { %4618 = vmatmul.mubr.msk.f32.vlgmr.msra.gmra.mxu0 %vm553_vm1, %v5313_v53 }
 0xf26   : > { %4633 = vmatprep.mubr.msk.f32.mxu0 %vm801_vm2, %v2431_v40 }
 0xfe5   : > { %v2527_v56 = vpop.f32.mrf.mxu0 }
 0xfe6   : > { %v2528_v57 = vadd.f32 %v2527_v56, %v2456_v38 }
 0xfe7   : > { %v4619_v58 = vpop.f32.mrf.mxu0 }
 0xfe8   : > { %2815 = vrot.lane.b32.xlu1 %v2528_v57, %s4817_s23  ;;  %4631 = vmatprep.subr.msk.mxu0 %vm801_vm2, %v2528_v57 }
 0xfe9   : > { %4632 = vmatpush3.xpose.msk.msra.mxu0 %vm801_vm2, %v2528_v57 }
 0xfec   : > { %2813 = vrot.lane.b32.xlu1 %v2436_v6, %s4817_s23  ;;  %4634 = vmatmul.mubr.msk.f32.vlgmr.msra.gmra.mxu0 %vm801_vm2, %v2436_v6  ;;  %v4211_v6 = vld [vmem:[%s5532_s6 + $0x40] sm:$0xff] }
 0xfed   : > { %4643 = vmatprep.mubr.msk.f32.mxu0 %vm801_vm2, %v2812_v54 }
 0xff0   : > { %2535 = vrot.lane.b32.xlu1 %v5269_v25, %s4816_s22 }
 0xff4   : > { %2531 = vrot.lane.b32.xlu1 %v4206_v27, %s4816_s22 }
0x105a   : > { %v2816_v59 = vpop.permute.xlu1 %2815 }
0x105b   : > { %4641 = vmatprep.subr.msk.mxu0 %vm801_vm2, %v2816_v59 }
0x105c   : > { %4642 = vmatpush3.xpose.msk.msra.mxu0 %vm801_vm2, %v2816_v59  ;;  %v4213_v59 = vld [vmem:[%s5532_s6 + $0x50] sm:$0xff] }
0x105d   : > { %4651 = vmatprep.subr.mxu0 %v4214_v51 }
0x105e   : > { %v2814_v60 = vpop.permute.xlu1 %2813 }
0x105f   : > { %4644 = vmatmul.mubr.msk.f32.vlgmr.msra.gmra.mxu0 %vm801_vm2, %v2814_v60 }
0x1060   : > { %4652 = vmatpush3.msra.mxu0 %v4214_v51 }
0x1061   : > { %4653 = vmatprep.subr.mxu0 %v4213_v59 }
0x1062   : > { %v2536_v61 = vpop.permute.xlu1 %2535  ;;  %4654 = vmatpush3.msra.mxu0 %v4213_v59 }
0x1063   : > { %4623 = vmatpush3.msra.mxu1 %v2536_v61  ;;  %4665 = vmatprep.subr.mxu0 %v4814_v4 }
0x1064   : > { %4624 = vmatprep.subr.mxu1 %v4814_v4 }
0x1065   : > { %4625 = vmatpush3.msra.mxu1 %v2534_v62 }
0x1066   : > { %v2532_v63 = vpop.permute.xlu1 %2531  ;;  %4626 = vmatprep.subr.mxu1 %v4814_v4 }
0x1067   : > { %4627 = vmatpush3.msra.mxu1 %v2532_v63 }
0x1068   : > { %4629 = vmatmul.mubr.msk.f32.vlgmr.msra.gmra.mxu1 %vm553_vm1, %v5309_v52 }
0x10ac   : > { %v4635_v0 = vpop.f32.mrf.mxu0 }
0x10ad   : > { %v2704_v1 = vmul.f32 0.25, %v4635_v0  ;;  %v4245_v0 = vld [vmem:[%s5530_s4 + $0x78] sm:$0xff] }
0x10ae   : > { %v2694_v2 = vpop.f32.mrf.mxu0 }
0x10af   : > { %v2703_v3 = vmul.f32 0.25, %v2694_v2  ;;  %v2708_v5 = vsel %vm891_vm5, %v2704_v1, -inf  ;;  %v4243_v2 = vld [vmem:[%s5530_s4 + $0x68] sm:$0xff] }
0x10b0   : > { %2709 = vmax.xlane.f32.xlu1 %v2708_v5 }
0x10b1   : > { %v2705_v7 = vsel %vm891_vm5, %v2703_v3, -inf }
0x10b2   : > { %2706 = vmax.xlane.f32.xlu0 %v2705_v7  ;;  %v4237_v7 = vld [vmem:[%s5533_s7 + $0x2] ss:$0 sm:$0xff] }
0x10c1   : > { %2543 = vrot.lane.b32.xlu1 %v5293_v32, %s4816_s22 }
0x111f   : > { %v4645_v8 = vpop.f32.mrf.mxu0 }
0x1120   : > { %v2899_v21 = vmul.f32 0.25, %v4645_v8 }
0x1121   : > { %v2889_v9 = vpop.f32.mrf.mxu0 }
0x1122   : > { %v2898_v10 = vmul.f32 0.25, %v2889_v9  ;;  %v2903_v13 = vsel %vm891_vm5, %v2899_v21, -inf }
0x1124   : > { %v2900_v11 = vsel %vm891_vm5, %v2898_v10, -inf }
0x1125   : > { %2901 = vmax.xlane.f32.xlu0 %v2900_v11 }
0x1128   : > { %v2615_v12 = vpop.f32.mrf.mxu1 }
0x1129   : > { %2904 = vmax.xlane.f32.xlu0 %v2903_v13 }
0x112a   : > { %v4630_v14 = vpop.f32.mrf.mxu1 }
0x1139   : > { %v2710_v15 = vpop.xlane.xlu1 %2709 }
0x113a   : > { %v2712_v16 = vsub.f32 %v2704_v1, %v2710_v15  ;;  %v5378_v1 = vld [vmem:[%s5530_s4 + $0x70] sm:$0xff] }
0x113b   : > { %v2707_v17 = vpop.xlane.xlu0 %2706 }
0x113c   : > { %v2715_v18 = vmul.f32 1.442695, %v2712_v16  ;;  %v2711_v22 = vsub.f32 %v2703_v3, %v2707_v17  ;;  %v5391_v3 = vld [vmem:[%s5530_s4 + $0x60] sm:$0xff] }
0x113d   : > { %v2544_v23 = vpop.permute.xlu1 %2543 }
0x113e   : > { %4775 = vpow2.f32 %v2715_v18  ;;  %v2713_v24 = vmul.f32 1.442695, %v2711_v22  ;;  %v2616_v25 = vadd.f32 %v2615_v12, %v2544_v23 }
0x1140   : > { %4777 = vpow2.f32 %v2713_v24  ;;  %2922 = vrot.lane.b32.xlu1 %v2616_v25, %s4817_s23  ;;  %4636 = vmatprep.subr.msk.mxu1 %vm895_vm4, %v2616_v25 }
0x1141   : > { %4637 = vmatpush3.msk.msra.mxu1 %vm895_vm4, %v2616_v25 }
0x114b   : > { %v4776_v26 = vpop.eup %4775 }
0x114c   : > { %v2720_v27 = vsel %vm891_vm5, %v4776_v26, 0.0 }
0x114d   : > { %v4778_v29 = vpop.eup %4777  ;;  %2721 = vadd.xlane.f32.xlu0 %v2720_v27 }
0x114e   : > { %v2717_v31 = vsel %vm891_vm5, %v4778_v29, 0.0 }
0x1151   : > { %2718 = vadd.xlane.f32.xlu0 %v2717_v31 }
0x11ae   : > { %v2902_v33 = vpop.xlane.xlu0 %2901 }
0x11af   : > { %v2906_v34 = vsub.f32 %v2898_v10, %v2902_v33 }
0x11b1   : > { %v2908_v35 = vmul.f32 1.442695, %v2906_v34  ;;  %v5419_v34 = vld [vmem:[%s5531_s5 + $0x3] ss:$0 sm:$0xff] }
0x11b2   : > { %v2905_v36 = vpop.xlane.xlu0 %2904  ;;  %v2923_v32 = vpop.permute.xlu1 %2922 }
0x11b3   : > { %4779 = vpow2.f32 %v2908_v35  ;;  %v2907_v37 = vsub.f32 %v2899_v21, %v2905_v36  ;;  %4646 = vmatprep.subr.msk.mxu1 %vm895_vm4, %v2923_v32 }
0x11b5   : > { %v2910_v39 = vmul.f32 1.442695, %v2907_v37 }
0x11b7   : > { %4781 = vpow2.f32 %v2910_v39 }
0x11c0   : > { %v4780_v40 = vpop.eup %4779 }
0x11c1   : > { %v2912_v41 = vsel %vm891_vm5, %v4780_v40, 0.0 }
0x11c2   : > { %2913 = vadd.xlane.f32.xlu0 %v2912_v41 }
0x11c4   : > { %v4782_v42 = vpop.eup %4781 }
0x11c5   : > { %v2915_v43 = vsel %vm891_vm5, %v4782_v42, 0.0 }
0x11c6   : > { %2916 = vadd.xlane.f32.xlu0 %v2915_v43 }
0x11d6   : > { %v2722_v44 = vpop.xlane.xlu0 %2721 }
0x11d7   : > { %4783 = vrcp.f32 %v2722_v44 }
0x11da   : > { %v2719_v45 = vpop.xlane.xlu0 %2718 }
0x11db   : > { %4785 = vrcp.f32 %v2719_v45  ;;  %v4240_v45 = vld [vmem:[%s5534_s8 + $0x3] ss:$0 sm:$0xff] }
0x11e4   : > { %v4784_v46 = vpop.eup %4783 }
0x11e5   : > { %v2726_v49 = vmul.f32 %v4784_v46, %v4776_v26 }
0x11e8   : > { %v4786_v47 = vpop.eup %4785 }
0x11e9   : > { %v2725_v48 = vmul.f32 %v4786_v47, %v4778_v29  ;;  %v4241_v47 = vld [vmem:[%s5535_s9 + $0x3] ss:$0 sm:$0xff] }
0x11eb   : > { %4638 = vmatprep.mubr.msk.f32.mxu1 %vm891_vm5, %v2725_v48 }
0x11ec   : > { %4639 = vmatmul.mubr.msk.f32.vlgmr.msra.gmra.mxu1 %vm891_vm5, %v2726_v49 }
0x11ed   : > { %4647 = vmatpush3.msk.msra.mxu1 %vm895_vm4, %v2923_v32 }
0x11ee   : > { %4658 = vmatprep.subr.mxu1 %v4212_v50 }
0x124b   : > { %v2914_v38 = vpop.xlane.xlu0 %2913 }
0x124c   : > { %4787 = vrcp.f32 %v2914_v38 }
0x124f   : > { %v2917_v54 = vpop.xlane.xlu0 %2916 }
0x1250   : > { %4789 = vrcp.f32 %v2917_v54 }
0x1259   : > { %v4788_v55 = vpop.eup %4787 }
0x125a   : > { %v2920_v56 = vmul.f32 %v4788_v55, %v4780_v40 }
0x125c   : > { %4648 = vmatprep.mubr.msk.f32.mxu1 %vm891_vm5, %v2920_v56 }
0x125d   : > { %v4790_v57 = vpop.eup %4789 }
0x125e   : > { %v2921_v58 = vmul.f32 %v4790_v57, %v4782_v42 }
0x1260   : > { %4649 = vmatmul.mubr.msk.f32.vlgmr.msra.gmra.mxu1 %vm891_vm5, %v2921_v58 }
0x1261   : > { %4659 = vmatpush3.msra.mxu1 %v4212_v50 }
0x1262   : > { %4660 = vmatprep.subr.mxu1 %v4211_v6 }
0x1263   : > { %4661 = vmatpush3.msra.mxu1 %v4211_v6 }
0x12ac   : > { %v4640_v60 = vpop.f32.mrf.mxu1 }
0x12ae   : > { %v2802_v61 = vpop.f32.mrf.mxu1 }
0x12af   : > { %4662 = vmatprep.mubr.msk.f32.mxu1 %vm801_vm2, %v2802_v61 }
0x12b0   : > { %4663 = vmatmul.mubr.msk.f32.vlgmr.msra.gmra.mxu1 %vm801_vm2, %v4640_v60 }
0x1320   : > { %v4650_v62 = vpop.f32.mrf.mxu1 }
0x1322   : > { %v2998_v63 = vpop.f32.mrf.mxu1 }
0x1323   : > { %4655 = vmatprep.mubr.msk.f32.mxu0 %vm801_vm2, %v2998_v63 }
0x1324   : > { %4656 = vmatmul.mubr.msk.f32.vlgmr.msra.gmra.mxu0 %vm801_vm2, %v4650_v62 }
0x1325   : > { %4666 = vmatpush3.msra.mxu0 %v4245_v0  ;;  %4673 = vmatprep.mubr.msk.f32.mxu0 %vm4815_vm0, %v4814_v4 }
0x1326   : > { %4667 = vmatprep.subr.mxu0 %v4814_v4 }
0x1327   : > { %4668 = vmatpush3.msra.mxu0 %v5378_v1 }
0x1328   : > { %4669 = vmatprep.subr.mxu0 %v4814_v4 }
0x1329   : > { %4670 = vmatpush3.msra.mxu0 %v4243_v2 }
0x132a   : > { %4671 = vmatprep.subr.mxu0 %v4814_v4 }
0x132b   : > { %4672 = vmatpush3.msra.mxu0 %v5391_v3 }
0x132c   : > { %4674 = vmatmul.mubr.msk.f32.vlgmr.msra.gmra.mxu0 %vm553_vm1, %v5313_v53 }
0x1370   : > { %v4664_v5 = vpop.f32.mrf.mxu1 }
0x1372   : > { %v3160_v10 = vpop.f32.mrf.mxu1 }
0x13e4   : > { %v4657_v8 = vpop.f32.mrf.mxu0 }
0x13e5   : > { %v3166_v9 = vadd.f32 %v4664_v5, %v4657_v8 }
0x13e6   : > { %v3079_v21 = vpop.f32.mrf.mxu0 }
0x13e7   : > { %v3176_v11 = vadd.f32 %v4237_v7, %v3166_v9  ;;  %v3161_v12 = vadd.f32 %v3160_v10, %v3079_v21 }
0x13e9   : > { %v3175_v13 = vadd.f32 %v4237_v7, %v3161_v12  ;;  %v3178_v14 = vadd.f32 %v3176_v11, %v5091_v28 }
0x13eb   : > { %v3186_v15 = vsel %vm553_vm1, %v3178_v14, 0.0  ;;  %v3177_v16 = vadd.f32 %v3175_v13, %v5071_v19 }
0x13ec   : > { %v5403_v17 = vpop.f32.mrf.mxu0  ;;  %3187 = vadd.xlane.f32.xlu1 %v3186_v15 }
0x13ed   : > { %v3183_v53 = vsel %vm553_vm1, %v3177_v16, 0.0 }
0x13ee   : > { %v4675_v18 = vpop.f32.mrf.mxu0  ;;  %3184 = vadd.xlane.f32.xlu0 %v3183_v53 }
0x13fd   : > { %3321 = vrot.lane.b32.xlu1 %v5391_v3, %s4813_s24 }
0x1401   : > { %3423 = vrot.lane.b32.xlu1 %v4245_v0, %s4816_s22 }
0x1404   : > { %3327 = vrot.lane.b32.xlu0 %v4245_v0, %s4813_s24 }
0x1405   : > { %3419 = vrot.lane.b32.xlu1 %v4243_v2, %s4816_s22 }
0x1475   : > { %v3188_v28 = vpop.xlane.xlu1 %3187 }
0x1476   : > { %v3190_v22 = vmul.f32 0.03125, %v3188_v28 }
0x1477   : > { %v3185_v23 = vpop.xlane.xlu0 %3184 }
0x1478   : > { %v3192_v19 = vsub.f32 %v3178_v14, %v3190_v22  ;;  %v3189_v24 = vmul.f32 0.03125, %v3185_v23 }
0x1479   : > { %v3322_v43 = vpop.permute.xlu1 %3321 }
0x147a   : > { %v3191_v25 = vsub.f32 %v3177_v16, %v3189_v24  ;;  %v3194_v26 = vmul.f32 %v3192_v19, %v3192_v19 }
0x147b   : > { %v3328_v27 = vpop.permute.xlu0 %3327 }
0x147c   : > { %v3198_v29 = vsel %vm553_vm1, %v3194_v26, 0.0  ;;  %v3193_v31 = vmul.f32 %v3191_v25, %v3191_v25  ;;  %4676 = vmatprep.subr.mxu1 %v3328_v27 }
0x147d   : > { %3199 = vadd.xlane.f32.xlu0 %v3198_v29  ;;  %4677 = vmatpush3.msra.mxu1 %v3328_v27  ;;  %v3424_v58 = vpop.permute.xlu1 %3423  ;;  %v4248_v29 = vld [vmem:[%s5532_s6 + $0x68] sm:$0xff] }
0x147e   : > { %v3195_v33 = vsel %vm553_vm1, %v3193_v31, 0.0  ;;  %4687 = vmatprep.subr.mxu0 %v3424_v58 }
0x147f   : > { %4688 = vmatpush3.msra.mxu0 %v3424_v58 }
0x1481   : > { %3196 = vadd.xlane.f32.xlu0 %v3195_v33 }
0x1497   : > { %3325 = vrot.lane.b32.xlu0 %v5378_v1, %s4813_s24 }
0x149b   : > { %3323 = vrot.lane.b32.xlu0 %v4243_v2, %s4813_s24 }
0x149f   : > { %3333 = vrot.lane.b32.xlu0 %v5419_v34, %s4813_s24 }
0x1506   : > { %v3200_v35 = vpop.xlane.xlu0 %3199 }
0x1507   : > { %v3202_v36 = vmul.f32 0.03125, %v3200_v35 }
0x1509   : > { %v3204_v32 = vadd.f32 1e-05, %v3202_v36 }
0x150a   : > { %v3197_v37 = vpop.xlane.xlu0 %3196 }
0x150b   : > { %4791 = vrsqrt.f32 %v3204_v32  ;;  %v3201_v39 = vmul.f32 0.03125, %v3197_v37 }
0x150d   : > { %v3203_v40 = vadd.f32 1e-05, %v3201_v39 }
0x150e   : > { %v3326_v41 = vpop.permute.xlu0 %3325 }
0x150f   : > { %4793 = vrsqrt.f32 %v3203_v40  ;;  %4678 = vmatprep.subr.mxu1 %v3326_v41  ;;  %v4250_v40 = vld [vmem:[%s5532_s6 + $0x78] sm:$0xff] }
0x1510   : > { %4679 = vmatpush3.msra.mxu1 %v3326_v41  ;;  %v4249_v41 = vld [vmem:[%s5532_s6 + $0x70] sm:$0xff] }
0x1512   : > { %v3324_v42 = vpop.permute.xlu0 %3323 }
0x1513   : > { %4680 = vmatprep.subr.mxu1 %v3324_v42 }
0x1514   : > { %4681 = vmatpush3.msra.mxu1 %v3324_v42 }
0x1515   : > { %4682 = vmatprep.subr.mxu1 %v3322_v43 }
0x1516   : > { %4683 = vmatpush3.msra.mxu1 %v3322_v43  ;;  %v3334_v57 = vpop.permute.xlu0 %3333 }
0x1517   : > { %4698 = vmatprep.subr.mxu1 %v4814_v4 }
0x1518   : > { %v4792_v44 = vpop.eup %4791 }
0x1519   : > { %v3208_v46 = vmul.f32 %v4792_v44, %v3192_v19 }
0x151b   : > { %v3216_v48 = vmul.f32 %v4240_v45, %v3208_v46 }
0x151c   : > { %v4794_v49 = vpop.eup %4793 }
0x151d   : > { %v3207_v50 = vmul.f32 %v4794_v49, %v3191_v25  ;;  %v3224_v51 = vadd.f32 %v4241_v47, %v3216_v48  ;;  %v4268_v48 = vld [vmem:[%s5533_s7 + $0x3] ss:$0 sm:$0xff] }
0x151f   : > { %v3215_v38 = vmul.f32 %v4240_v45, %v3207_v50  ;;  %4039 = vst.msk [vmem:[%s522_s26 + $0x8] sm:$0xff] %vm553_vm1, %v3224_v51  ;;  %v3226_v56 = vadd.f32 %v3224_v51, %v5096_v30  ;;  %v3314_v30 = vadd.f32 %v5419_v34, %v5403_v17 }
0x1521   : > { %v3223_v54 = vadd.f32 %v4241_v47, %v3215_v38 }
0x1523   : > { %4695 = vmatprep.mubr.msk.f32.mxu0 %vm553_vm1, %v3223_v54  ;;  %4038 = vst.msk [vmem:[%s522_s26] sm:$0xff] %vm553_vm1, %v3223_v54  ;;  %v3225_v55 = vadd.f32 %v3223_v54, %v5076_v20 }
0x1525   : > { %4684 = vmatprep.mubr.msk.f32.mxu1 %vm553_vm1, %v3225_v55 }
0x1526   : > { %4685 = vmatmul.mubr.msk.f32.vlgmr.msra.gmra.mxu1 %vm553_vm1, %v3226_v56 }
0x1527   : > { %4702 = vmatprep.mubr.msk.f32.mxu1 %vm4815_vm0, %v4814_v4 }
0x15e6   : > { %v4686_v6 = vpop.f32.mrf.mxu1 }
0x15e7   : > { %v3414_v59 = vadd.f32 %v4686_v6, %v3334_v57 }
0x15e8   : > { %v3408_v60 = vpop.f32.mrf.mxu1 }
0x15e9   : > { %3681 = vrot.lane.b32.xlu0 %v3414_v59, %s4817_s23  ;;  %4699 = vmatpush3.xpose.msk.msra.mxu1 %vm801_vm2, %v3414_v59  ;;  %v3409_v20 = vadd.f32 %v3408_v60, %v3334_v57 }
0x15ea   : > { %4700 = vmatprep.subr.mxu1 %v4814_v4 }
0x15ed   : > { %3679 = vrot.lane.b32.xlu0 %v3409_v20, %s4817_s23  ;;  %4701 = vmatpush3.xpose.msk.msra.mxu1 %vm801_vm2, %v3409_v20 }
0x15ee   : > { %4712 = vmatprep.subr.mxu1 %v4814_v4 }
0x15f0   : > { %4703 = vmatmul.mubr.msk.f32.vlgmr.msra.gmra.mxu1 %vm801_vm2, %v3314_v30 }
0x15f1   : > { %3677 = vrot.lane.b32.xlu0 %v3314_v30, %s4817_s23  ;;  %4716 = vmatprep.mubr.msk.f32.mxu1 %vm4815_vm0, %v4814_v4 }
0x15f5   : > { %3421 = vrot.lane.b32.xlu0 %v5378_v1, %s4816_s22  ;;  %v3420_v1 = vpop.permute.xlu1 %3419 }
0x15f9   : > { %3417 = vrot.lane.b32.xlu0 %v5391_v3, %s4816_s22 }
0x165b   : > { %v3682_v61 = vpop.permute.xlu0 %3681 }
0x165c   : > { %4713 = vmatpush3.xpose.msk.msra.mxu1 %vm801_vm2, %v3682_v61 }
0x165d   : > { %4714 = vmatprep.subr.mxu1 %v4814_v4 }
0x165f   : > { %v3680_v62 = vpop.permute.xlu0 %3679 }
0x1660   : > { %4715 = vmatpush3.xpose.msk.msra.mxu1 %vm801_vm2, %v3680_v62  ;;  %v4272_v62 = vld [vmem:[%s5535_s9 + $0x4] ss:$0 sm:$0xff] }
0x1661   : > { %4733 = vmatprep.subr.mxu1 %v4814_v4 }
0x1663   : > { %v3678_v63 = vpop.permute.xlu0 %3677 }
0x1664   : > { %4717 = vmatmul.mubr.msk.f32.vlgmr.msra.gmra.mxu1 %vm801_vm2, %v3678_v63 }
0x1665   : > { %4737 = vmatprep.mubr.msk.f32.mxu1 %vm4815_vm0, %v4814_v4  ;;  %4734 = vmatpush3.msra.mxu1 %v4248_v29 }
0x1666   : > { %4735 = vmatprep.subr.mxu1 %v4814_v4 }
0x1667   : > { %v3422_v0 = vpop.permute.xlu0 %3421 }
0x1668   : > { %4689 = vmatprep.subr.mxu0 %v3422_v0 }
0x1669   : > { %4690 = vmatpush3.msra.mxu0 %v3422_v0 }
0x166a   : > { %4691 = vmatprep.subr.mxu0 %v3420_v1 }
0x166b   : > { %4692 = vmatpush3.msra.mxu0 %v3420_v1  ;;  %v3418_v2 = vpop.permute.xlu0 %3417 }
0x166c   : > { %4693 = vmatprep.subr.mxu0 %v3418_v2 }
0x166d   : > { %4694 = vmatpush3.msra.mxu0 %v3418_v2 }
0x166e   : > { %4696 = vmatmul.mubr.msk.f32.vlgmr.msra.gmra.mxu0 %vm553_vm1, %v3224_v51  ;;  %4705 = vmatprep.subr.mxu0 %v4814_v4 }
0x166f   : > { %4709 = vmatprep.mubr.msk.f32.mxu0 %vm4815_vm0, %v4814_v4 }
0x16b0   : > { %v3588_v3 = vpop.f32.mrf.mxu1 }
0x16b1   : > { %v3592_v5 = vmul.f32 0.25, %v3588_v3 }
0x16b2   : > { %v4704_v7 = vpop.f32.mrf.mxu1 }
0x16b3   : > { %v3593_v8 = vsel %vm1692_vm7, %v3592_v5, -inf }
0x16b4   : > { %3594 = vmax.xlane.f32.xlu1 %v3593_v8 }
0x1724   : > { %v3755_v9 = vpop.f32.mrf.mxu1 }
0x1725   : > { %v3759_v10 = vmul.f32 0.25, %v3755_v9 }
0x1726   : > { %v4718_v21 = vpop.f32.mrf.mxu1 }
0x1727   : > { %v3760_v11 = vsel %vm1692_vm7, %v3759_v10, -inf }
0x1728   : > { %3761 = vmax.xlane.f32.xlu0 %v3760_v11 }
0x172e   : > { %v4697_v17 = vpop.f32.mrf.mxu0 }
0x1730   : > { %v3504_v22 = vpop.f32.mrf.mxu0 }
0x173d   : > { %v3595_v12 = vpop.xlane.xlu1 %3594 }
0x173e   : > { %v3596_v13 = vsub.f32 %v3592_v5, %v3595_v12  ;;  %3429 = vrot.lane.b32.xlu0 %v5419_v34, %s4816_s22  ;;  %v4247_v34 = vld [vmem:[%s5532_s6 + $0x60] sm:$0xff] }
0x173f   : > { %4736 = vmatpush3.msra.mxu1 %v4247_v34 }
0x1740   : > { %v3597_v14 = vmul.f32 1.442695, %v3596_v13 }
0x1742   : > { %4795 = vpow2.f32 %v3597_v14 }
0x174f   : > { %v4796_v15 = vpop.eup %4795 }
0x1750   : > { %v3599_v16 = vsel %vm1692_vm7, %v4796_v15, 0.0 }
0x1751   : > { %3600 = vadd.xlane.f32.xlu1 %v3599_v16 }
0x17b1   : > { %v3762_v53 = vpop.xlane.xlu0 %3761 }
0x17b2   : > { %v3763_v18 = vsub.f32 %v3759_v10, %v3762_v53 }
0x17b4   : > { %v3764_v28 = vmul.f32 1.442695, %v3763_v18 }
0x17b5   : > { %v3430_v23 = vpop.permute.xlu0 %3429 }
0x17b6   : > { %4797 = vpow2.f32 %v3764_v28  ;;  %v3505_v19 = vadd.f32 %v3504_v22, %v3430_v23  ;;  %v3510_v24 = vadd.f32 %v4697_v17, %v3430_v23 }
0x17b8   : > { %4706 = vmatpush3.msra.mxu0 %v3510_v24  ;;  %3773 = vrot.lane.b32.xlu0 %v3505_v19, %s4817_s23 }
0x17b9   : > { %4707 = vmatprep.subr.mxu0 %v4814_v4 }
0x17ba   : > { %4708 = vmatpush3.msra.mxu0 %v3505_v19 }
0x17bb   : > { %4719 = vmatprep.subr.mxu0 %v4814_v4 }
0x17c3   : > { %v4798_v25 = vpop.eup %4797 }
0x17c4   : > { %v3766_v26 = vsel %vm1692_vm7, %v4798_v25, 0.0 }
0x17c5   : > { %3767 = vadd.xlane.f32.xlu1 %v3766_v26 }
0x17d6   : > { %3775 = vrot.lane.b32.xlu1 %v3510_v24, %s4817_s23  ;;  %s517_s23 = scalar_lea.vmem %s5540_s14, %s4145_s29 }
0x17da   : > { %v3601_v27 = vpop.xlane.xlu1 %3600 }
0x17db   : > { %4799 = vrcp.f32 %v3601_v27 }
0x17e8   : > { %v4800_v31 = vpop.eup %4799 }
0x17e9   : > { %v3603_v33 = vmul.f32 %v4800_v31, %v4796_v15 }
0x17eb   : > { %4710 = vmatmul.mubr.msk.f32.vlgmr.msra.gmra.mxu0 %vm801_vm2, %v3603_v33 }
0x17ec   : > { %4723 = vmatprep.mubr.msk.f32.mxu0 %vm4815_vm0, %v4814_v4 }
0x182a   : > { %v3774_v32 = vpop.permute.xlu0 %3773 }
0x184e   : > { %v3768_v35 = vpop.xlane.xlu1 %3767 }
0x184f   : > { %4801 = vrcp.f32 %v3768_v35 }
0x1852   : > { %v3776_v36 = vpop.permute.xlu1 %3775 }
0x1853   : > { %4720 = vmatpush3.msra.mxu0 %v3776_v36 }
0x1854   : > { %4721 = vmatprep.subr.mxu0 %v4814_v4 }
0x1855   : > { %4722 = vmatpush3.msra.mxu0 %v3774_v32 }
0x1856   : > { %4726 = vmatprep.subr.mxu0 %v4814_v4 }
0x185c   : > { %v4802_v37 = vpop.eup %4801 }
0x185d   : > { %v3770_v39 = vmul.f32 %v4802_v37, %v4798_v25 }
0x185f   : > { %4724 = vmatmul.mubr.msk.f32.vlgmr.msra.gmra.mxu0 %vm801_vm2, %v3770_v39 }
0x1860   : > { %4727 = vmatpush3.msra.mxu0 %v4250_v40  ;;  %4730 = vmatprep.mubr.msk.f32.mxu0 %vm4815_vm0, %v4814_v4 }
0x1861   : > { %4728 = vmatprep.subr.mxu0 %v4814_v4 }
0x1862   : > { %4729 = vmatpush3.msra.mxu0 %v4249_v41 }
0x18ab   : > { %v3673_v42 = vpop.f32.mrf.mxu0 }
0x18ac   : > { %4738 = vmatmul.mubr.msk.f32.vlgmr.msra.gmra.mxu1 %vm801_vm2, %v3673_v42 }
0x18ad   : > { %v4711_v43 = vpop.f32.mrf.mxu0 }
0x191f   : > { %v3848_v44 = vpop.f32.mrf.mxu0 }
0x1920   : > { %4731 = vmatmul.mubr.msk.f32.vlgmr.msra.gmra.mxu0 %vm801_vm2, %v3848_v44 }
0x1921   : > { %v4725_v45 = vpop.f32.mrf.mxu0 }
0x196c   : > { %v3994_v46 = vpop.f32.mrf.mxu1 }
0x196e   : > { %v4739_v47 = vpop.f32.mrf.mxu1 }
0x19e0   : > { %v3921_v4 = vpop.f32.mrf.mxu0 }
0x19e1   : > { %v3995_v49 = vadd.f32 %v3994_v46, %v3921_v4 }
0x19e2   : > { %v4732_v50 = vpop.f32.mrf.mxu0 }
0x19e3   : > { %v4004_v51 = vadd.f32 %v4268_v48, %v3995_v49 }
0x19e5   : > { %v4005_v38 = vadd.f32 %v4004_v51, %v5309_v52  ;;  %v4271_v52 = vld [vmem:[%s5534_s8 + $0x4] ss:$0 sm:$0xff] }
0x19e7   : > { %v4010_v54 = vsel %vm1291_vm6, %v4005_v38, 0.0 }
0x19e8   : > { %4011 = vadd.xlane.f32.xlu0 %v4010_v54 }
0x1a71   : > { %v4012_v55 = vpop.xlane.xlu0 %4011 }
0x1a72   : > { %v4013_v56 = vmul.f32 0.03125, %v4012_v55 }
0x1a74   : > { %v4014_v57 = vsub.f32 %v4005_v38, %v4013_v56 }
0x1a76   : > { %v4015_v58 = vmul.f32 %v4014_v57, %v4014_v57 }
0x1a78   : > { %v4016_v6 = vsel %vm1291_vm6, %v4015_v58, 0.0 }
0x1a79   : > { %4017 = vadd.xlane.f32.xlu1 %v4016_v6 }
0x1b02   : > { %v4018_v59 = vpop.xlane.xlu1 %4017 }
0x1b03   : > { %v4019_v60 = vmul.f32 0.03125, %v4018_v59 }
0x1b05   : > { %v4020_v20 = vadd.f32 1e-05, %v4019_v60 }
0x1b07   : > { %4803 = vrsqrt.f32 %v4020_v20 }
0x1b14   : > { %v4804_v30 = vpop.eup %4803 }
0x1b15   : > { %v4022_v61 = vmul.f32 %v4804_v30, %v4014_v57 }
0x1b17   : > { %v4029_v63 = vmul.f32 %v4271_v52, %v4022_v61 }
0x1b19   : > { %v4036_v0 = vadd.f32 %v4272_v62, %v4029_v63 }
0x1b1b   : > { %4037 = vst.msk [vmem:[%s517_s23] sm:$0x7f] %vm1291_vm6, %v4036_v0 }
0x1b1c PF: > { %s26_s18 = sadd.s32 1, %s4811_s18  }
0x1b1d   : > { %p23_p4 = scmp.ge.s32.totalorder %s26_s18, 4  }
0x1b1f   :  { %25 = sbr.rel (!%p23_p4) target bundleno = 1 (0x1), region = 141 }

</bundles_post_ra>
